<compile_context>
chip_gen: v6e
topology: v6e:2x2x1
jax: 0.10.0
libtpu: 0.0.40
codegen_flags: <defaults>
</compile_context>

<pallas_src>
import functools

import numpy as np
import jax
import jax.numpy as jnp
from jax.experimental import pallas as pl
from jax.experimental.pallas import tpu as pltpu

NEG_SLOPE = 0.01  # nn.LeakyReLU(negative_slope=0.01)


def _leaky(x):
    return jnp.where(x > 0, x, NEG_SLOPE * x)


def _sigmoid_kernel(x):
    # 1 / (1 + exp(-x)) with the reciprocal on the EUP (approx vrcp).
    return pl.reciprocal(1.0 + jnp.exp(-x), approx=True)


# -----------------------------------------------------------------------------
# Static per-layer geometry for the head (conv 'same' -> pool(2,1) -> leaky).
# Activations are kept flat: rows = spatial positions on a stride-Sp grid,
# lanes = channels.  Only contiguous sublane slices are ever needed.
# -----------------------------------------------------------------------------
def _layer_dims(spatial, chan_chain, ksizes):
    dims = []
    S = spatial
    for l, K in enumerate(ksizes):
        P = K // 2
        Sp = S + 2 * P
        dims.append(dict(
            S=S, K=K, P=P, Sp=Sp,
            Npad=Sp * Sp,                 # flat length of the zero-padded image
            Lc=(S - 1) * Sp + S,          # flat length of the conv output we need
            Lp=(S - 2) * Sp + S - 1,      # flat length of the pooled output we need
            Cin=chan_chain[l], Cout=chan_chain[l + 1]))
        S -= 1                            # pool(2, stride=1) shrinks by 1
    return dims


# -----------------------------------------------------------------------------
# Fused kernel: 6x (conv -> pool -> leaky) -> fc -> leaky -> GRU gates.
# One grid step == one batch element (grid axis is "parallel" for megacore).
# -----------------------------------------------------------------------------
def _make_fused_kernel(dims, s_out):
    n_layers = len(dims)

    def kernel(*refs):
        x_ref, h_ref = refs[0], refs[1]
        conv_w = [refs[2 + 2 * l] for l in range(n_layers)]      # (K*K, Cin, Cout)
        conv_b = [refs[3 + 2 * l] for l in range(n_layers)]      # (1, Cout)
        base = 2 + 2 * n_layers
        fcw_ref, fcb_ref, wx_ref, wh_ref, gb_ref = refs[base:base + 5]
        hout_ref, gate_ref = refs[base + 5], refs[base + 6]
        pad_refs = refs[base + 7:base + 7 + n_layers]             # VMEM scratch

        def mm(a, b):
            return jnp.dot(a, b, preferred_element_type=jnp.float32)

        # ---- conv / pool / leaky stack (all VMEM-resident) -------------------
        act = x_ref[0]                       # (S0*S0, Cin0), valid rows at stride S0
        stride = dims[0]["S"]
        for l, d in enumerate(dims):
            S, K, P, Sp = d["S"], d["K"], d["P"], d["Sp"]
            Lc, Lp, Cin, Cout = d["Lc"], d["Lp"], d["Cin"], d["Cout"]

            # Zero-padded image, stored flat (Sp*Sp, Cin) in scratch.
            pref = pad_refs[l]
            pref[...] = jnp.zeros((d["Npad"], Cin), jnp.float32)
            for r in range(S):
                dst = (r + P) * Sp + P
                pref[dst:dst + S, :] = act[r * stride:r * stride + S, :]
            xpad = pref[...]                                       # (Sp*Sp, Cin)

            # Conv = sum over the K*K taps of a shifted (Lc,Cin)@(Cin,Cout) matmul.
            acc = None
            for dh in range(K):
                for dw in range(K):
                    start = dh * Sp + dw
                    t = mm(xpad[start:start + Lc, :], conv_w[l][dh * K + dw])
                    acc = t if acc is None else acc + t
            y = acc + conv_b[l][...]                               # (Lc, Cout)

            # MaxPool(2, stride=1) on the stride-Sp flat grid, then LeakyReLU.
            m = jnp.maximum(jnp.maximum(y[0:Lp], y[1:Lp + 1]),
                            jnp.maximum(y[Sp:Sp + Lp], y[Sp + 1:Sp + 1 + Lp]))
            act = _leaky(m)                   # valid rows at stride Sp, width S-1
            stride = Sp

        # ---- fc + LeakyReLU ---------------------------------------------------
        # header is channel-last in VMEM; the fc weight was pre-grouped per spatial
        # position in the wrapper so no data reordering is needed here.
        fc_acc = fcb_ref[...]                                      # (1, fc_dim)
        for hh in range(s_out):
            for ww in range(s_out):
                row = act[hh * stride + ww:hh * stride + ww + 1, :]   # (1, C_last)
                fc_acc = fc_acc + mm(row, fcw_ref[hh * s_out + ww])
        fcv = _leaky(fc_acc)                                       # (1, fc_dim)

        # ---- GRU-style gates (FullyCon3D assumed x@Wx + h@Wh + b) -------------
        h = h_ref[0]                                               # (1, hid)
        gi = _sigmoid_kernel(mm(fcv, wx_ref[0]) + mm(h, wh_ref[0]) + gb_ref[0])
        gf = _sigmoid_kernel(mm(fcv, wx_ref[1]) + mm(h, wh_ref[1]) + gb_ref[1])
        hn = jnp.tanh(mm(fcv, wx_ref[2]) + mm(gf * h, wh_ref[2]) + gb_ref[2])
        hout_ref[0] = gi * h + (1.0 - gi) * hn
        gate_ref[0] = gi

    return kernel


# -----------------------------------------------------------------------------
# Full forward (wrapper): pure layout glue + one pallas_call.
# -----------------------------------------------------------------------------
def gru_encoder_forward(x_nchw, hidden, params):
    x = jnp.transpose(x_nchw, (0, 2, 3, 1)).astype(jnp.float32)    # NCHW -> NHWC
    B, H, W, Cin = x.shape
    assert H == W, "square spatial input assumed"

    ksizes = [w.shape[0] for (w, _) in params["head"]]
    chain = [Cin] + [w.shape[-1] for (w, _) in params["head"]]
    dims = _layer_dims(H, chain, ksizes)
    s_out = dims[-1]["S"] - 1                 # final spatial size (2 for 8x8 input)
    c_out = chain[-1]
    hid = hidden.shape[-1]
    fc_dim = params["fc_w"].shape[-1]

    # ---- pre-pack operands (layout only, no compute) ----
    x_flat = x.reshape(B, H * W, Cin)
    hidden3 = hidden.astype(jnp.float32).reshape(B, 1, hid)

    conv_ops = []
    for (w, b) in params["head"]:
        K, _, ci, co = w.shape
        conv_ops += [w.reshape(K * K, ci, co).astype(jnp.float32),
                     b.reshape(1, co).astype(jnp.float32)]

    # fc weight rows are (c, h, w)-ordered (PyTorch flatten); regroup per (h, w).
    fcw_blk = jnp.transpose(
        params["fc_w"].reshape(c_out, s_out, s_out, fc_dim),
        (1, 2, 0, 3)).reshape(s_out * s_out, c_out, fc_dim).astype(jnp.float32)
    fc_b = params["fc_b"].reshape(1, fc_dim).astype(jnp.float32)
    wx_all = jnp.stack([params["wi_x"], params["wf_x"], params["wo_x"]]).astype(jnp.float32)
    wh_all = jnp.stack([params["wi_h"], params["wf_h"], params["wo_h"]]).astype(jnp.float32)
    gb_all = jnp.stack([params["wi_b"], params["wf_b"], params["wo_b"]]).astype(jnp.float32)

    operands = [x_flat, hidden3] + conv_ops + [fcw_blk, fc_b, wx_all, wh_all, gb_all]

    def _full_spec(a):
        nd = a.ndim
        return pl.BlockSpec(a.shape, lambda b, _nd=nd: (0,) * _nd)

    in_specs = [pl.BlockSpec((1, H * W, Cin), lambda b: (b, 0, 0)),
                pl.BlockSpec((1, 1, hid), lambda b: (b, 0, 0))]
    in_specs += [_full_spec(a) for a in operands[2:]]

    out_shape = (jax.ShapeDtypeStruct((B, 1, hid), jnp.float32),
                 jax.ShapeDtypeStruct((B, 1, hid), jnp.float32))
    out_specs = (pl.BlockSpec((1, 1, hid), lambda b: (b, 0, 0)),
                 pl.BlockSpec((1, 1, hid), lambda b: (b, 0, 0)))
    scratch = [pltpu.VMEM((d["Npad"], d["Cin"]), jnp.float32) for d in dims]

    kernel = _make_fused_kernel(dims, s_out)
    h_new, gate = pl.pallas_call(
        kernel,
        out_shape=out_shape,
        grid=(B,),
        in_specs=in_specs,
        out_specs=out_specs,
        scratch_shapes=scratch,
        compiler_params=pltpu.CompilerParams(
            dimension_semantics=("parallel",)),
    )(*operands)
    return h_new.reshape(B, hid), gate.reshape(B, hid)


# -----------------------------------------------------------------------------
# Pure-JAX reference (ground truth at HIGHEST precision)
# -----------------------------------------------------------------------------
def reference_forward(x_nchw, hidden, params):
    x = jnp.transpose(x_nchw, (0, 2, 3, 1))
    for w, b in params["head"]:
        K = w.shape[0]
        P = K // 2
        y = jax.lax.conv_general_dilated(
            x, w, window_strides=(1, 1), padding=[(P, P), (P, P)],
            dimension_numbers=("NHWC", "HWIO", "NHWC"),
            precision=jax.lax.Precision.HIGHEST)
        y = y + b.reshape(1, 1, 1, -1)
        y = jax.lax.reduce_window(y, -jnp.inf, jax.lax.max,
                                  (1, 2, 2, 1), (1, 1, 1, 1), "VALID")
        x = _leaky(y)
    B = x.shape[0]
    hdr = jnp.transpose(x, (0, 3, 1, 2)).reshape(B, -1)
    mm = lambda a, b: jnp.dot(a, b, precision=jax.lax.Precision.HIGHEST)
    fc = _leaky(mm(hdr, params["fc_w"]) + params["fc_b"])
    gi = jax.nn.sigmoid(mm(fc, params["wi_x"]) + mm(hidden, params["wi_h"]) + params["wi_b"])
    gf = jax.nn.sigmoid(mm(fc, params["wf_x"]) + mm(hidden, params["wf_h"]) + params["wf_b"])
    hn = jnp.tanh(mm(fc, params["wo_x"]) + mm(gf * hidden, params["wo_h"]) + params["wo_b"])
    return gi * hidden + (1.0 - gi) * hn, gi


# -----------------------------------------------------------------------------
# Deterministic synthetic parameter init (shapes follow the module __init__)
# -----------------------------------------------------------------------------
def init_params(key, in_ch, conv_shapes, fc_in, fc_dim, hid_dim):
    ks = list(jax.random.split(key, 32))
    nk = lambda: ks.pop(0)

    def conv_w(k, ksize, cin, cout):
        return (jax.random.normal(k, (ksize, ksize, cin, cout), jnp.float32)
                / np.sqrt(ksize * ksize * cin))

    def lin_w(k, din, dout):
        return jax.random.normal(k, (din, dout), jnp.float32) / np.sqrt(din)

    chain = [in_ch] + list(conv_shapes)
    ksizes = [7, 3, 3, 3, 3, 3]
    head = []
    for li in range(6):
        w = conv_w(nk(), ksizes[li], chain[li], chain[li + 1])
        b = 0.1 * jax.random.normal(nk(), (chain[li + 1],), jnp.float32)
        head.append((w, b))

    params = {
        "head": head,
        "fc_w": lin_w(nk(), fc_in, fc_dim),
        "fc_b": 0.1 * jax.random.normal(nk(), (1, fc_dim), jnp.float32),
    }
    for g in ("wi", "wf", "wo"):  # W_in, W_fg, W_out (FullyCon3D, assumed)
        params[g + "_x"] = lin_w(nk(), fc_dim, hid_dim)
        params[g + "_h"] = lin_w(nk(), hid_dim, hid_dim)
        params[g + "_b"] = 0.1 * jax.random.normal(nk(), (1, hid_dim), jnp.float32)
    return params


if __name__ == "__main__":
    # 8x8 spatial: the module's fc sizing chain (x//2+1 six times -> 2) matches the
    # actual head output (8 - 6 = 2), so fc in_features = conv_shapes[-1] * 2 * 2.
    B, C, H, W = 2, 4, 8, 8
    conv_shapes = [8, 8, 8, 8, 8, 16]
    fc_dim = 32   # fc_shapes[0]
    hid_dim = 32  # conv3_shape == out_shape == hidden dim
    fc_in = conv_shapes[-1] * 2 * 2

    key = jax.random.PRNGKey(0)
    kx, kh, kp = jax.random.split(key, 3)
    x = jax.random.normal(kx, (B, C, H, W), jnp.float32)
    hidden = jax.random.normal(kh, (B, hid_dim), jnp.float32)
    params = init_params(kp, C, conv_shapes, fc_in, fc_dim, hid_dim)

    fwd = jax.jit(gru_encoder_forward)
    h_new, gate = fwd(x, hidden, params)
    h_new, gate = jax.block_until_ready((h_new, gate))

    h_ref, g_ref = reference_forward(x, hidden, params)
    # Kernel matmuls run at default MXU precision (single-pass bf16, f32 accumulate)
    # while the reference uses Precision.HIGHEST, so allow ~8x bf16 eps across the
    # 7 matmul stages.
    np.testing.assert_allclose(np.asarray(h_new), np.asarray(h_ref),
                               rtol=3e-2, atol=3e-2)
    np.testing.assert_allclose(np.asarray(gate), np.asarray(g_ref),
                               rtol=3e-2, atol=3e-2)
    print("KERNEL_OK")
</pallas_src>

<mosaic_0001>
module attributes {stable_mosaic.version = 11 : i64} {
  func.func @kernel(%arg0: i32, %arg1: memref<1x64x4xf32, #tpu.memory_space<vmem>>, %arg2: memref<1x1x32xf32, #tpu.memory_space<vmem>>, %arg3: memref<49x4x8xf32, #tpu.memory_space<vmem>>, %arg4: memref<1x8xf32, #tpu.memory_space<vmem>>, %arg5: memref<9x8x8xf32, #tpu.memory_space<vmem>>, %arg6: memref<1x8xf32, #tpu.memory_space<vmem>>, %arg7: memref<9x8x8xf32, #tpu.memory_space<vmem>>, %arg8: memref<1x8xf32, #tpu.memory_space<vmem>>, %arg9: memref<9x8x8xf32, #tpu.memory_space<vmem>>, %arg10: memref<1x8xf32, #tpu.memory_space<vmem>>, %arg11: memref<9x8x8xf32, #tpu.memory_space<vmem>>, %arg12: memref<1x8xf32, #tpu.memory_space<vmem>>, %arg13: memref<9x8x16xf32, #tpu.memory_space<vmem>>, %arg14: memref<1x16xf32, #tpu.memory_space<vmem>>, %arg15: memref<4x16x32xf32, #tpu.memory_space<vmem>>, %arg16: memref<1x32xf32, #tpu.memory_space<vmem>>, %arg17: memref<3x32x32xf32, #tpu.memory_space<vmem>>, %arg18: memref<3x32x32xf32, #tpu.memory_space<vmem>>, %arg19: memref<3x1x32xf32, #tpu.memory_space<vmem>>, %arg20: memref<1x1x32xf32, #tpu.memory_space<vmem>>, %arg21: memref<1x1x32xf32, #tpu.memory_space<vmem>>, %arg22: memref<196x4xf32, #tpu.memory_space<vmem>>, %arg23: memref<81x8xf32, #tpu.memory_space<vmem>>, %arg24: memref<64x8xf32, #tpu.memory_space<vmem>>, %arg25: memref<49x8xf32, #tpu.memory_space<vmem>>, %arg26: memref<36x8xf32, #tpu.memory_space<vmem>>, %arg27: memref<25x8xf32, #tpu.memory_space<vmem>>) attributes {dimension_semantics = [#tpu.dimension_semantics<parallel>], iteration_bounds = array<i64: 2>, scalar_prefetch = 0 : i64, scratch_operands = 6 : i64, tpu.core_type = #tpu.core_type<tc>, window_params = [{transform_indices = @transform_0, window_bounds = array<i64: 1, 64, 4>}, {transform_indices = @transform_1, window_bounds = array<i64: 1, 1, 32>}, {pipeline_mode = #tpu.pipeline_mode<synchronous>, transform_indices = @transform_2, window_bounds = array<i64: 49, 4, 8>}, {pipeline_mode = #tpu.pipeline_mode<synchronous>, transform_indices = @transform_3, window_bounds = array<i64: 1, 8>}, {pipeline_mode = #tpu.pipeline_mode<synchronous>, transform_indices = @transform_4, window_bounds = array<i64: 9, 8, 8>}, {pipeline_mode = #tpu.pipeline_mode<synchronous>, transform_indices = @transform_5, window_bounds = array<i64: 1, 8>}, {pipeline_mode = #tpu.pipeline_mode<synchronous>, transform_indices = @transform_6, window_bounds = array<i64: 9, 8, 8>}, {pipeline_mode = #tpu.pipeline_mode<synchronous>, transform_indices = @transform_7, window_bounds = array<i64: 1, 8>}, {pipeline_mode = #tpu.pipeline_mode<synchronous>, transform_indices = @transform_8, window_bounds = array<i64: 9, 8, 8>}, {pipeline_mode = #tpu.pipeline_mode<synchronous>, transform_indices = @transform_9, window_bounds = array<i64: 1, 8>}, {pipeline_mode = #tpu.pipeline_mode<synchronous>, transform_indices = @transform_10, window_bounds = array<i64: 9, 8, 8>}, {pipeline_mode = #tpu.pipeline_mode<synchronous>, transform_indices = @transform_11, window_bounds = array<i64: 1, 8>}, {pipeline_mode = #tpu.pipeline_mode<synchronous>, transform_indices = @transform_12, window_bounds = array<i64: 9, 8, 16>}, {pipeline_mode = #tpu.pipeline_mode<synchronous>, transform_indices = @transform_13, window_bounds = array<i64: 1, 16>}, {pipeline_mode = #tpu.pipeline_mode<synchronous>, transform_indices = @transform_14, window_bounds = array<i64: 4, 16, 32>}, {pipeline_mode = #tpu.pipeline_mode<synchronous>, transform_indices = @transform_15, window_bounds = array<i64: 1, 32>}, {pipeline_mode = #tpu.pipeline_mode<synchronous>, transform_indices = @transform_16, window_bounds = array<i64: 3, 32, 32>}, {pipeline_mode = #tpu.pipeline_mode<synchronous>, transform_indices = @transform_17, window_bounds = array<i64: 3, 32, 32>}, {pipeline_mode = #tpu.pipeline_mode<synchronous>, transform_indices = @transform_18, window_bounds = array<i64: 3, 1, 32>}, {transform_indices = @transform_19, window_bounds = array<i64: 1, 1, 32>}, {transform_indices = @transform_20, window_bounds = array<i64: 1, 1, 32>}]} {
    %c0 = arith.constant 0 : index
    %c0_0 = arith.constant 0 : index
    %c0_1 = arith.constant 0 : index
    %0 = vector.load %arg1[%c0, %c0_0, %c0_1] : memref<1x64x4xf32, #tpu.memory_space<vmem>>, vector<1x64x4xf32>
    %1 = vector.shape_cast %0 : vector<1x64x4xf32> to vector<64x4xf32>
    %cst = arith.constant 0.000000e+00 : f32
    %2 = vector.broadcast %cst : f32 to vector<196x4xf32>
    %c0_2 = arith.constant 0 : index
    %c0_3 = arith.constant 0 : index
    %3 = vector.load %arg22[%c0_2, %c0_3] : memref<196x4xf32, #tpu.memory_space<vmem>>, vector<196x4xf32>
    tpu.vector_store %arg22[%c0_2, %c0_3], %2 {strides = array<i32>} : memref<196x4xf32, #tpu.memory_space<vmem>>, vector<196x4xf32>,
    %4 = vector.extract_strided_slice %1 {offsets = [0, 0], sizes = [8, 4], strides = [1, 1]} : vector<64x4xf32> to vector<8x4xf32>
    %c45 = arith.constant 45 : index
    %c0_4 = arith.constant 0 : index
    %5 = vector.load %arg22[%c45, %c0_4] : memref<196x4xf32, #tpu.memory_space<vmem>>, vector<8x4xf32>
    tpu.vector_store %arg22[%c45, %c0_4], %4 {strides = array<i32>} : memref<196x4xf32, #tpu.memory_space<vmem>>, vector<8x4xf32>,
    %6 = vector.extract_strided_slice %1 {offsets = [8, 0], sizes = [8, 4], strides = [1, 1]} : vector<64x4xf32> to vector<8x4xf32>
    %c59 = arith.constant 59 : index
    %c0_5 = arith.constant 0 : index
    %7 = vector.load %arg22[%c59, %c0_5] : memref<196x4xf32, #tpu.memory_space<vmem>>, vector<8x4xf32>
    tpu.vector_store %arg22[%c59, %c0_5], %6 {strides = array<i32>} : memref<196x4xf32, #tpu.memory_space<vmem>>, vector<8x4xf32>,
    %8 = vector.extract_strided_slice %1 {offsets = [16, 0], sizes = [8, 4], strides = [1, 1]} : vector<64x4xf32> to vector<8x4xf32>
    %c73 = arith.constant 73 : index
    %c0_6 = arith.constant 0 : index
    %9 = vector.load %arg22[%c73, %c0_6] : memref<196x4xf32, #tpu.memory_space<vmem>>, vector<8x4xf32>
    tpu.vector_store %arg22[%c73, %c0_6], %8 {strides = array<i32>} : memref<196x4xf32, #tpu.memory_space<vmem>>, vector<8x4xf32>,
    %10 = vector.extract_strided_slice %1 {offsets = [24, 0], sizes = [8, 4], strides = [1, 1]} : vector<64x4xf32> to vector<8x4xf32>
    %c87 = arith.constant 87 : index
    %c0_7 = arith.constant 0 : index
    %11 = vector.load %arg22[%c87, %c0_7] : memref<196x4xf32, #tpu.memory_space<vmem>>, vector<8x4xf32>
    tpu.vector_store %arg22[%c87, %c0_7], %10 {strides = array<i32>} : memref<196x4xf32, #tpu.memory_space<vmem>>, vector<8x4xf32>,
    %12 = vector.extract_strided_slice %1 {offsets = [32, 0], sizes = [8, 4], strides = [1, 1]} : vector<64x4xf32> to vector<8x4xf32>
    %c101 = arith.constant 101 : index
    %c0_8 = arith.constant 0 : index
    %13 = vector.load %arg22[%c101, %c0_8] : memref<196x4xf32, #tpu.memory_space<vmem>>, vector<8x4xf32>
    tpu.vector_store %arg22[%c101, %c0_8], %12 {strides = array<i32>} : memref<196x4xf32, #tpu.memory_space<vmem>>, vector<8x4xf32>,
    %14 = vector.extract_strided_slice %1 {offsets = [40, 0], sizes = [8, 4], strides = [1, 1]} : vector<64x4xf32> to vector<8x4xf32>
    %c115 = arith.constant 115 : index
    %c0_9 = arith.constant 0 : index
    %15 = vector.load %arg22[%c115, %c0_9] : memref<196x4xf32, #tpu.memory_space<vmem>>, vector<8x4xf32>
    tpu.vector_store %arg22[%c115, %c0_9], %14 {strides = array<i32>} : memref<196x4xf32, #tpu.memory_space<vmem>>, vector<8x4xf32>,
    %16 = vector.extract_strided_slice %1 {offsets = [48, 0], sizes = [8, 4], strides = [1, 1]} : vector<64x4xf32> to vector<8x4xf32>
    %c129 = arith.constant 129 : index
    %c0_10 = arith.constant 0 : index
    %17 = vector.load %arg22[%c129, %c0_10] : memref<196x4xf32, #tpu.memory_space<vmem>>, vector<8x4xf32>
    tpu.vector_store %arg22[%c129, %c0_10], %16 {strides = array<i32>} : memref<196x4xf32, #tpu.memory_space<vmem>>, vector<8x4xf32>,
    %18 = vector.extract_strided_slice %1 {offsets = [56, 0], sizes = [8, 4], strides = [1, 1]} : vector<64x4xf32> to vector<8x4xf32>
    %c143 = arith.constant 143 : index
    %c0_11 = arith.constant 0 : index
    %19 = vector.load %arg22[%c143, %c0_11] : memref<196x4xf32, #tpu.memory_space<vmem>>, vector<8x4xf32>
    tpu.vector_store %arg22[%c143, %c0_11], %18 {strides = array<i32>} : memref<196x4xf32, #tpu.memory_space<vmem>>, vector<8x4xf32>,
    %c0_12 = arith.constant 0 : index
    %c0_13 = arith.constant 0 : index
    %20 = vector.load %arg22[%c0_12, %c0_13] : memref<196x4xf32, #tpu.memory_space<vmem>>, vector<196x4xf32>
    %21 = vector.extract_strided_slice %20 {offsets = [0, 0], sizes = [106, 4], strides = [1, 1]} : vector<196x4xf32> to vector<106x4xf32>
    %c0_14 = arith.constant 0 : index
    %c0_15 = arith.constant 0 : index
    %c0_16 = arith.constant 0 : index
    %22 = vector.load %arg3[%c0_14, %c0_15, %c0_16] : memref<49x4x8xf32, #tpu.memory_space<vmem>>, vector<1x4x8xf32>
    %23 = vector.shape_cast %22 : vector<1x4x8xf32> to vector<4x8xf32>
    %cst_17 = arith.constant dense<0.000000e+00> : vector<106x8xf32>
    %24 = tpu.matmul %21, %23, %cst_17 {dimension_numbers = #tpu.dot_dimension_numbers<[1], [0], [0], [1], [0, 0, 1, 1], [], []>} : vector<106x4xf32>, vector<4x8xf32>, vector<106x8xf32> -> vector<106x8xf32>
    %25 = vector.extract_strided_slice %20 {offsets = [1, 0], sizes = [106, 4], strides = [1, 1]} : vector<196x4xf32> to vector<106x4xf32>
    %c1 = arith.constant 1 : index
    %c0_18 = arith.constant 0 : index
    %c0_19 = arith.constant 0 : index
    %26 = vector.load %arg3[%c1, %c0_18, %c0_19] : memref<49x4x8xf32, #tpu.memory_space<vmem>>, vector<1x4x8xf32>
    %27 = vector.shape_cast %26 : vector<1x4x8xf32> to vector<4x8xf32>
    %cst_20 = arith.constant dense<0.000000e+00> : vector<106x8xf32>
    %28 = tpu.matmul %25, %27, %cst_20 {dimension_numbers = #tpu.dot_dimension_numbers<[1], [0], [0], [1], [0, 0, 1, 1], [], []>} : vector<106x4xf32>, vector<4x8xf32>, vector<106x8xf32> -> vector<106x8xf32>
    %29 = arith.addf %24, %28 : vector<106x8xf32>
    %30 = vector.extract_strided_slice %20 {offsets = [2, 0], sizes = [106, 4], strides = [1, 1]} : vector<196x4xf32> to vector<106x4xf32>
    %c2 = arith.constant 2 : index
    %c0_21 = arith.constant 0 : index
    %c0_22 = arith.constant 0 : index
    %31 = vector.load %arg3[%c2, %c0_21, %c0_22] : memref<49x4x8xf32, #tpu.memory_space<vmem>>, vector<1x4x8xf32>
    %32 = vector.shape_cast %31 : vector<1x4x8xf32> to vector<4x8xf32>
    %cst_23 = arith.constant dense<0.000000e+00> : vector<106x8xf32>
    %33 = tpu.matmul %30, %32, %cst_23 {dimension_numbers = #tpu.dot_dimension_numbers<[1], [0], [0], [1], [0, 0, 1, 1], [], []>} : vector<106x4xf32>, vector<4x8xf32>, vector<106x8xf32> -> vector<106x8xf32>
    %34 = arith.addf %29, %33 : vector<106x8xf32>
    %35 = vector.extract_strided_slice %20 {offsets = [3, 0], sizes = [106, 4], strides = [1, 1]} : vector<196x4xf32> to vector<106x4xf32>
    %c3 = arith.constant 3 : index
    %c0_24 = arith.constant 0 : index
    %c0_25 = arith.constant 0 : index
    %36 = vector.load %arg3[%c3, %c0_24, %c0_25] : memref<49x4x8xf32, #tpu.memory_space<vmem>>, vector<1x4x8xf32>
    %37 = vector.shape_cast %36 : vector<1x4x8xf32> to vector<4x8xf32>
    %cst_26 = arith.constant dense<0.000000e+00> : vector<106x8xf32>
    %38 = tpu.matmul %35, %37, %cst_26 {dimension_numbers = #tpu.dot_dimension_numbers<[1], [0], [0], [1], [0, 0, 1, 1], [], []>} : vector<106x4xf32>, vector<4x8xf32>, vector<106x8xf32> -> vector<106x8xf32>
    %39 = arith.addf %34, %38 : vector<106x8xf32>
    %40 = vector.extract_strided_slice %20 {offsets = [4, 0], sizes = [106, 4], strides = [1, 1]} : vector<196x4xf32> to vector<106x4xf32>
    %c4 = arith.constant 4 : index
    %c0_27 = arith.constant 0 : index
    %c0_28 = arith.constant 0 : index
    %41 = vector.load %arg3[%c4, %c0_27, %c0_28] : memref<49x4x8xf32, #tpu.memory_space<vmem>>, vector<1x4x8xf32>
    %42 = vector.shape_cast %41 : vector<1x4x8xf32> to vector<4x8xf32>
    %cst_29 = arith.constant dense<0.000000e+00> : vector<106x8xf32>
    %43 = tpu.matmul %40, %42, %cst_29 {dimension_numbers = #tpu.dot_dimension_numbers<[1], [0], [0], [1], [0, 0, 1, 1], [], []>} : vector<106x4xf32>, vector<4x8xf32>, vector<106x8xf32> -> vector<106x8xf32>
    %44 = arith.addf %39, %43 : vector<106x8xf32>
    %45 = vector.extract_strided_slice %20 {offsets = [5, 0], sizes = [106, 4], strides = [1, 1]} : vector<196x4xf32> to vector<106x4xf32>
    %c5 = arith.constant 5 : index
    %c0_30 = arith.constant 0 : index
    %c0_31 = arith.constant 0 : index
    %46 = vector.load %arg3[%c5, %c0_30, %c0_31] : memref<49x4x8xf32, #tpu.memory_space<vmem>>, vector<1x4x8xf32>
    %47 = vector.shape_cast %46 : vector<1x4x8xf32> to vector<4x8xf32>
    %cst_32 = arith.constant dense<0.000000e+00> : vector<106x8xf32>
    %48 = tpu.matmul %45, %47, %cst_32 {dimension_numbers = #tpu.dot_dimension_numbers<[1], [0], [0], [1], [0, 0, 1, 1], [], []>} : vector<106x4xf32>, vector<4x8xf32>, vector<106x8xf32> -> vector<106x8xf32>
    %49 = arith.addf %44, %48 : vector<106x8xf32>
    %50 = vector.extract_strided_slice %20 {offsets = [6, 0], sizes = [106, 4], strides = [1, 1]} : vector<196x4xf32> to vector<106x4xf32>
    %c6 = arith.constant 6 : index
    %c0_33 = arith.constant 0 : index
    %c0_34 = arith.constant 0 : index
    %51 = vector.load %arg3[%c6, %c0_33, %c0_34] : memref<49x4x8xf32, #tpu.memory_space<vmem>>, vector<1x4x8xf32>
    %52 = vector.shape_cast %51 : vector<1x4x8xf32> to vector<4x8xf32>
    %cst_35 = arith.constant dense<0.000000e+00> : vector<106x8xf32>
    %53 = tpu.matmul %50, %52, %cst_35 {dimension_numbers = #tpu.dot_dimension_numbers<[1], [0], [0], [1], [0, 0, 1, 1], [], []>} : vector<106x4xf32>, vector<4x8xf32>, vector<106x8xf32> -> vector<106x8xf32>
    %54 = arith.addf %49, %53 : vector<106x8xf32>
    %55 = vector.extract_strided_slice %20 {offsets = [14, 0], sizes = [106, 4], strides = [1, 1]} : vector<196x4xf32> to vector<106x4xf32>
    %c7 = arith.constant 7 : index
    %c0_36 = arith.constant 0 : index
    %c0_37 = arith.constant 0 : index
    %56 = vector.load %arg3[%c7, %c0_36, %c0_37] : memref<49x4x8xf32, #tpu.memory_space<vmem>>, vector<1x4x8xf32>
    %57 = vector.shape_cast %56 : vector<1x4x8xf32> to vector<4x8xf32>
    %cst_38 = arith.constant dense<0.000000e+00> : vector<106x8xf32>
    %58 = tpu.matmul %55, %57, %cst_38 {dimension_numbers = #tpu.dot_dimension_numbers<[1], [0], [0], [1], [0, 0, 1, 1], [], []>} : vector<106x4xf32>, vector<4x8xf32>, vector<106x8xf32> -> vector<106x8xf32>
    %59 = arith.addf %54, %58 : vector<106x8xf32>
    %60 = vector.extract_strided_slice %20 {offsets = [15, 0], sizes = [106, 4], strides = [1, 1]} : vector<196x4xf32> to vector<106x4xf32>
    %c8 = arith.constant 8 : index
    %c0_39 = arith.constant 0 : index
    %c0_40 = arith.constant 0 : index
    %61 = vector.load %arg3[%c8, %c0_39, %c0_40] : memref<49x4x8xf32, #tpu.memory_space<vmem>>, vector<1x4x8xf32>
    %62 = vector.shape_cast %61 : vector<1x4x8xf32> to vector<4x8xf32>
    %cst_41 = arith.constant dense<0.000000e+00> : vector<106x8xf32>
    %63 = tpu.matmul %60, %62, %cst_41 {dimension_numbers = #tpu.dot_dimension_numbers<[1], [0], [0], [1], [0, 0, 1, 1], [], []>} : vector<106x4xf32>, vector<4x8xf32>, vector<106x8xf32> -> vector<106x8xf32>
    %64 = arith.addf %59, %63 : vector<106x8xf32>
    %65 = vector.extract_strided_slice %20 {offsets = [16, 0], sizes = [106, 4], strides = [1, 1]} : vector<196x4xf32> to vector<106x4xf32>
    %c9 = arith.constant 9 : index
    %c0_42 = arith.constant 0 : index
    %c0_43 = arith.constant 0 : index
    %66 = vector.load %arg3[%c9, %c0_42, %c0_43] : memref<49x4x8xf32, #tpu.memory_space<vmem>>, vector<1x4x8xf32>
    %67 = vector.shape_cast %66 : vector<1x4x8xf32> to vector<4x8xf32>
    %cst_44 = arith.constant dense<0.000000e+00> : vector<106x8xf32>
    %68 = tpu.matmul %65, %67, %cst_44 {dimension_numbers = #tpu.dot_dimension_numbers<[1], [0], [0], [1], [0, 0, 1, 1], [], []>} : vector<106x4xf32>, vector<4x8xf32>, vector<106x8xf32> -> vector<106x8xf32>
    %69 = arith.addf %64, %68 : vector<106x8xf32>
    %70 = vector.extract_strided_slice %20 {offsets = [17, 0], sizes = [106, 4], strides = [1, 1]} : vector<196x4xf32> to vector<106x4xf32>
    %c10 = arith.constant 10 : index
    %c0_45 = arith.constant 0 : index
    %c0_46 = arith.constant 0 : index
    %71 = vector.load %arg3[%c10, %c0_45, %c0_46] : memref<49x4x8xf32, #tpu.memory_space<vmem>>, vector<1x4x8xf32>
    %72 = vector.shape_cast %71 : vector<1x4x8xf32> to vector<4x8xf32>
    %cst_47 = arith.constant dense<0.000000e+00> : vector<106x8xf32>
    %73 = tpu.matmul %70, %72, %cst_47 {dimension_numbers = #tpu.dot_dimension_numbers<[1], [0], [0], [1], [0, 0, 1, 1], [], []>} : vector<106x4xf32>, vector<4x8xf32>, vector<106x8xf32> -> vector<106x8xf32>
    %74 = arith.addf %69, %73 : vector<106x8xf32>
    %75 = vector.extract_strided_slice %20 {offsets = [18, 0], sizes = [106, 4], strides = [1, 1]} : vector<196x4xf32> to vector<106x4xf32>
    %c11 = arith.constant 11 : index
    %c0_48 = arith.constant 0 : index
    %c0_49 = arith.constant 0 : index
    %76 = vector.load %arg3[%c11, %c0_48, %c0_49] : memref<49x4x8xf32, #tpu.memory_space<vmem>>, vector<1x4x8xf32>
    %77 = vector.shape_cast %76 : vector<1x4x8xf32> to vector<4x8xf32>
    %cst_50 = arith.constant dense<0.000000e+00> : vector<106x8xf32>
    %78 = tpu.matmul %75, %77, %cst_50 {dimension_numbers = #tpu.dot_dimension_numbers<[1], [0], [0], [1], [0, 0, 1, 1], [], []>} : vector<106x4xf32>, vector<4x8xf32>, vector<106x8xf32> -> vector<106x8xf32>
    %79 = arith.addf %74, %78 : vector<106x8xf32>
    %80 = vector.extract_strided_slice %20 {offsets = [19, 0], sizes = [106, 4], strides = [1, 1]} : vector<196x4xf32> to vector<106x4xf32>
    %c12 = arith.constant 12 : index
    %c0_51 = arith.constant 0 : index
    %c0_52 = arith.constant 0 : index
    %81 = vector.load %arg3[%c12, %c0_51, %c0_52] : memref<49x4x8xf32, #tpu.memory_space<vmem>>, vector<1x4x8xf32>
    %82 = vector.shape_cast %81 : vector<1x4x8xf32> to vector<4x8xf32>
    %cst_53 = arith.constant dense<0.000000e+00> : vector<106x8xf32>
    %83 = tpu.matmul %80, %82, %cst_53 {dimension_numbers = #tpu.dot_dimension_numbers<[1], [0], [0], [1], [0, 0, 1, 1], [], []>} : vector<106x4xf32>, vector<4x8xf32>, vector<106x8xf32> -> vector<106x8xf32>
    %84 = arith.addf %79, %83 : vector<106x8xf32>
    %85 = vector.extract_strided_slice %20 {offsets = [20, 0], sizes = [106, 4], strides = [1, 1]} : vector<196x4xf32> to vector<106x4xf32>
    %c13 = arith.constant 13 : index
    %c0_54 = arith.constant 0 : index
    %c0_55 = arith.constant 0 : index
    %86 = vector.load %arg3[%c13, %c0_54, %c0_55] : memref<49x4x8xf32, #tpu.memory_space<vmem>>, vector<1x4x8xf32>
    %87 = vector.shape_cast %86 : vector<1x4x8xf32> to vector<4x8xf32>
    %cst_56 = arith.constant dense<0.000000e+00> : vector<106x8xf32>
    %88 = tpu.matmul %85, %87, %cst_56 {dimension_numbers = #tpu.dot_dimension_numbers<[1], [0], [0], [1], [0, 0, 1, 1], [], []>} : vector<106x4xf32>, vector<4x8xf32>, vector<106x8xf32> -> vector<106x8xf32>
    %89 = arith.addf %84, %88 : vector<106x8xf32>
    %90 = vector.extract_strided_slice %20 {offsets = [28, 0], sizes = [106, 4], strides = [1, 1]} : vector<196x4xf32> to vector<106x4xf32>
    %c14 = arith.constant 14 : index
    %c0_57 = arith.constant 0 : index
    %c0_58 = arith.constant 0 : index
    %91 = vector.load %arg3[%c14, %c0_57, %c0_58] : memref<49x4x8xf32, #tpu.memory_space<vmem>>, vector<1x4x8xf32>
    %92 = vector.shape_cast %91 : vector<1x4x8xf32> to vector<4x8xf32>
    %cst_59 = arith.constant dense<0.000000e+00> : vector<106x8xf32>
    %93 = tpu.matmul %90, %92, %cst_59 {dimension_numbers = #tpu.dot_dimension_numbers<[1], [0], [0], [1], [0, 0, 1, 1], [], []>} : vector<106x4xf32>, vector<4x8xf32>, vector<106x8xf32> -> vector<106x8xf32>
    %94 = arith.addf %89, %93 : vector<106x8xf32>
    %95 = vector.extract_strided_slice %20 {offsets = [29, 0], sizes = [106, 4], strides = [1, 1]} : vector<196x4xf32> to vector<106x4xf32>
    %c15 = arith.constant 15 : index
    %c0_60 = arith.constant 0 : index
    %c0_61 = arith.constant 0 : index
    %96 = vector.load %arg3[%c15, %c0_60, %c0_61] : memref<49x4x8xf32, #tpu.memory_space<vmem>>, vector<1x4x8xf32>
    %97 = vector.shape_cast %96 : vector<1x4x8xf32> to vector<4x8xf32>
    %cst_62 = arith.constant dense<0.000000e+00> : vector<106x8xf32>
    %98 = tpu.matmul %95, %97, %cst_62 {dimension_numbers = #tpu.dot_dimension_numbers<[1], [0], [0], [1], [0, 0, 1, 1], [], []>} : vector<106x4xf32>, vector<4x8xf32>, vector<106x8xf32> -> vector<106x8xf32>
    %99 = arith.addf %94, %98 : vector<106x8xf32>
    %100 = vector.extract_strided_slice %20 {offsets = [30, 0], sizes = [106, 4], strides = [1, 1]} : vector<196x4xf32> to vector<106x4xf32>
    %c16 = arith.constant 16 : index
    %c0_63 = arith.constant 0 : index
    %c0_64 = arith.constant 0 : index
    %101 = vector.load %arg3[%c16, %c0_63, %c0_64] : memref<49x4x8xf32, #tpu.memory_space<vmem>>, vector<1x4x8xf32>
    %102 = vector.shape_cast %101 : vector<1x4x8xf32> to vector<4x8xf32>
    %cst_65 = arith.constant dense<0.000000e+00> : vector<106x8xf32>
    %103 = tpu.matmul %100, %102, %cst_65 {dimension_numbers = #tpu.dot_dimension_numbers<[1], [0], [0], [1], [0, 0, 1, 1], [], []>} : vector<106x4xf32>, vector<4x8xf32>, vector<106x8xf32> -> vector<106x8xf32>
    %104 = arith.addf %99, %103 : vector<106x8xf32>
    %105 = vector.extract_strided_slice %20 {offsets = [31, 0], sizes = [106, 4], strides = [1, 1]} : vector<196x4xf32> to vector<106x4xf32>
    %c17 = arith.constant 17 : index
    %c0_66 = arith.constant 0 : index
    %c0_67 = arith.constant 0 : index
    %106 = vector.load %arg3[%c17, %c0_66, %c0_67] : memref<49x4x8xf32, #tpu.memory_space<vmem>>, vector<1x4x8xf32>
    %107 = vector.shape_cast %106 : vector<1x4x8xf32> to vector<4x8xf32>
    %cst_68 = arith.constant dense<0.000000e+00> : vector<106x8xf32>
    %108 = tpu.matmul %105, %107, %cst_68 {dimension_numbers = #tpu.dot_dimension_numbers<[1], [0], [0], [1], [0, 0, 1, 1], [], []>} : vector<106x4xf32>, vector<4x8xf32>, vector<106x8xf32> -> vector<106x8xf32>
    %109 = arith.addf %104, %108 : vector<106x8xf32>
    %110 = vector.extract_strided_slice %20 {offsets = [32, 0], sizes = [106, 4], strides = [1, 1]} : vector<196x4xf32> to vector<106x4xf32>
    %c18 = arith.constant 18 : index
    %c0_69 = arith.constant 0 : index
    %c0_70 = arith.constant 0 : index
    %111 = vector.load %arg3[%c18, %c0_69, %c0_70] : memref<49x4x8xf32, #tpu.memory_space<vmem>>, vector<1x4x8xf32>
    %112 = vector.shape_cast %111 : vector<1x4x8xf32> to vector<4x8xf32>
    %cst_71 = arith.constant dense<0.000000e+00> : vector<106x8xf32>
    %113 = tpu.matmul %110, %112, %cst_71 {dimension_numbers = #tpu.dot_dimension_numbers<[1], [0], [0], [1], [0, 0, 1, 1], [], []>} : vector<106x4xf32>, vector<4x8xf32>, vector<106x8xf32> -> vector<106x8xf32>
    %114 = arith.addf %109, %113 : vector<106x8xf32>
    %115 = vector.extract_strided_slice %20 {offsets = [33, 0], sizes = [106, 4], strides = [1, 1]} : vector<196x4xf32> to vector<106x4xf32>
    %c19 = arith.constant 19 : index
    %c0_72 = arith.constant 0 : index
    %c0_73 = arith.constant 0 : index
    %116 = vector.load %arg3[%c19, %c0_72, %c0_73] : memref<49x4x8xf32, #tpu.memory_space<vmem>>, vector<1x4x8xf32>
    %117 = vector.shape_cast %116 : vector<1x4x8xf32> to vector<4x8xf32>
    %cst_74 = arith.constant dense<0.000000e+00> : vector<106x8xf32>
    %118 = tpu.matmul %115, %117, %cst_74 {dimension_numbers = #tpu.dot_dimension_numbers<[1], [0], [0], [1], [0, 0, 1, 1], [], []>} : vector<106x4xf32>, vector<4x8xf32>, vector<106x8xf32> -> vector<106x8xf32>
    %119 = arith.addf %114, %118 : vector<106x8xf32>
    %120 = vector.extract_strided_slice %20 {offsets = [34, 0], sizes = [106, 4], strides = [1, 1]} : vector<196x4xf32> to vector<106x4xf32>
    %c20 = arith.constant 20 : index
    %c0_75 = arith.constant 0 : index
    %c0_76 = arith.constant 0 : index
    %121 = vector.load %arg3[%c20, %c0_75, %c0_76] : memref<49x4x8xf32, #tpu.memory_space<vmem>>, vector<1x4x8xf32>
    %122 = vector.shape_cast %121 : vector<1x4x8xf32> to vector<4x8xf32>
    %cst_77 = arith.constant dense<0.000000e+00> : vector<106x8xf32>
    %123 = tpu.matmul %120, %122, %cst_77 {dimension_numbers = #tpu.dot_dimension_numbers<[1], [0], [0], [1], [0, 0, 1, 1], [], []>} : vector<106x4xf32>, vector<4x8xf32>, vector<106x8xf32> -> vector<106x8xf32>
    %124 = arith.addf %119, %123 : vector<106x8xf32>
    %125 = vector.extract_strided_slice %20 {offsets = [42, 0], sizes = [106, 4], strides = [1, 1]} : vector<196x4xf32> to vector<106x4xf32>
    %c21 = arith.constant 21 : index
    %c0_78 = arith.constant 0 : index
    %c0_79 = arith.constant 0 : index
    %126 = vector.load %arg3[%c21, %c0_78, %c0_79] : memref<49x4x8xf32, #tpu.memory_space<vmem>>, vector<1x4x8xf32>
    %127 = vector.shape_cast %126 : vector<1x4x8xf32> to vector<4x8xf32>
    %cst_80 = arith.constant dense<0.000000e+00> : vector<106x8xf32>
    %128 = tpu.matmul %125, %127, %cst_80 {dimension_numbers = #tpu.dot_dimension_numbers<[1], [0], [0], [1], [0, 0, 1, 1], [], []>} : vector<106x4xf32>, vector<4x8xf32>, vector<106x8xf32> -> vector<106x8xf32>
    %129 = arith.addf %124, %128 : vector<106x8xf32>
    %130 = vector.extract_strided_slice %20 {offsets = [43, 0], sizes = [106, 4], strides = [1, 1]} : vector<196x4xf32> to vector<106x4xf32>
    %c22 = arith.constant 22 : index
    %c0_81 = arith.constant 0 : index
    %c0_82 = arith.constant 0 : index
    %131 = vector.load %arg3[%c22, %c0_81, %c0_82] : memref<49x4x8xf32, #tpu.memory_space<vmem>>, vector<1x4x8xf32>
    %132 = vector.shape_cast %131 : vector<1x4x8xf32> to vector<4x8xf32>
    %cst_83 = arith.constant dense<0.000000e+00> : vector<106x8xf32>
    %133 = tpu.matmul %130, %132, %cst_83 {dimension_numbers = #tpu.dot_dimension_numbers<[1], [0], [0], [1], [0, 0, 1, 1], [], []>} : vector<106x4xf32>, vector<4x8xf32>, vector<106x8xf32> -> vector<106x8xf32>
    %134 = arith.addf %129, %133 : vector<106x8xf32>
    %135 = vector.extract_strided_slice %20 {offsets = [44, 0], sizes = [106, 4], strides = [1, 1]} : vector<196x4xf32> to vector<106x4xf32>
    %c23 = arith.constant 23 : index
    %c0_84 = arith.constant 0 : index
    %c0_85 = arith.constant 0 : index
    %136 = vector.load %arg3[%c23, %c0_84, %c0_85] : memref<49x4x8xf32, #tpu.memory_space<vmem>>, vector<1x4x8xf32>
    %137 = vector.shape_cast %136 : vector<1x4x8xf32> to vector<4x8xf32>
    %cst_86 = arith.constant dense<0.000000e+00> : vector<106x8xf32>
    %138 = tpu.matmul %135, %137, %cst_86 {dimension_numbers = #tpu.dot_dimension_numbers<[1], [0], [0], [1], [0, 0, 1, 1], [], []>} : vector<106x4xf32>, vector<4x8xf32>, vector<106x8xf32> -> vector<106x8xf32>
    %139 = arith.addf %134, %138 : vector<106x8xf32>
    %140 = vector.extract_strided_slice %20 {offsets = [45, 0], sizes = [106, 4], strides = [1, 1]} : vector<196x4xf32> to vector<106x4xf32>
    %c24 = arith.constant 24 : index
    %c0_87 = arith.constant 0 : index
    %c0_88 = arith.constant 0 : index
    %141 = vector.load %arg3[%c24, %c0_87, %c0_88] : memref<49x4x8xf32, #tpu.memory_space<vmem>>, vector<1x4x8xf32>
    %142 = vector.shape_cast %141 : vector<1x4x8xf32> to vector<4x8xf32>
    %cst_89 = arith.constant dense<0.000000e+00> : vector<106x8xf32>
    %143 = tpu.matmul %140, %142, %cst_89 {dimension_numbers = #tpu.dot_dimension_numbers<[1], [0], [0], [1], [0, 0, 1, 1], [], []>} : vector<106x4xf32>, vector<4x8xf32>, vector<106x8xf32> -> vector<106x8xf32>
    %144 = arith.addf %139, %143 : vector<106x8xf32>
    %145 = vector.extract_strided_slice %20 {offsets = [46, 0], sizes = [106, 4], strides = [1, 1]} : vector<196x4xf32> to vector<106x4xf32>
    %c25 = arith.constant 25 : index
    %c0_90 = arith.constant 0 : index
    %c0_91 = arith.constant 0 : index
    %146 = vector.load %arg3[%c25, %c0_90, %c0_91] : memref<49x4x8xf32, #tpu.memory_space<vmem>>, vector<1x4x8xf32>
    %147 = vector.shape_cast %146 : vector<1x4x8xf32> to vector<4x8xf32>
    %cst_92 = arith.constant dense<0.000000e+00> : vector<106x8xf32>
    %148 = tpu.matmul %145, %147, %cst_92 {dimension_numbers = #tpu.dot_dimension_numbers<[1], [0], [0], [1], [0, 0, 1, 1], [], []>} : vector<106x4xf32>, vector<4x8xf32>, vector<106x8xf32> -> vector<106x8xf32>
    %149 = arith.addf %144, %148 : vector<106x8xf32>
    %150 = vector.extract_strided_slice %20 {offsets = [47, 0], sizes = [106, 4], strides = [1, 1]} : vector<196x4xf32> to vector<106x4xf32>
    %c26 = arith.constant 26 : index
    %c0_93 = arith.constant 0 : index
    %c0_94 = arith.constant 0 : index
    %151 = vector.load %arg3[%c26, %c0_93, %c0_94] : memref<49x4x8xf32, #tpu.memory_space<vmem>>, vector<1x4x8xf32>
    %152 = vector.shape_cast %151 : vector<1x4x8xf32> to vector<4x8xf32>
    %cst_95 = arith.constant dense<0.000000e+00> : vector<106x8xf32>
    %153 = tpu.matmul %150, %152, %cst_95 {dimension_numbers = #tpu.dot_dimension_numbers<[1], [0], [0], [1], [0, 0, 1, 1], [], []>} : vector<106x4xf32>, vector<4x8xf32>, vector<106x8xf32> -> vector<106x8xf32>
    %154 = arith.addf %149, %153 : vector<106x8xf32>
    %155 = vector.extract_strided_slice %20 {offsets = [48, 0], sizes = [106, 4], strides = [1, 1]} : vector<196x4xf32> to vector<106x4xf32>
    %c27 = arith.constant 27 : index
    %c0_96 = arith.constant 0 : index
    %c0_97 = arith.constant 0 : index
    %156 = vector.load %arg3[%c27, %c0_96, %c0_97] : memref<49x4x8xf32, #tpu.memory_space<vmem>>, vector<1x4x8xf32>
    %157 = vector.shape_cast %156 : vector<1x4x8xf32> to vector<4x8xf32>
    %cst_98 = arith.constant dense<0.000000e+00> : vector<106x8xf32>
    %158 = tpu.matmul %155, %157, %cst_98 {dimension_numbers = #tpu.dot_dimension_numbers<[1], [0], [0], [1], [0, 0, 1, 1], [], []>} : vector<106x4xf32>, vector<4x8xf32>, vector<106x8xf32> -> vector<106x8xf32>
    %159 = arith.addf %154, %158 : vector<106x8xf32>
    %160 = vector.extract_strided_slice %20 {offsets = [56, 0], sizes = [106, 4], strides = [1, 1]} : vector<196x4xf32> to vector<106x4xf32>
    %c28 = arith.constant 28 : index
    %c0_99 = arith.constant 0 : index
    %c0_100 = arith.constant 0 : index
    %161 = vector.load %arg3[%c28, %c0_99, %c0_100] : memref<49x4x8xf32, #tpu.memory_space<vmem>>, vector<1x4x8xf32>
    %162 = vector.shape_cast %161 : vector<1x4x8xf32> to vector<4x8xf32>
    %cst_101 = arith.constant dense<0.000000e+00> : vector<106x8xf32>
    %163 = tpu.matmul %160, %162, %cst_101 {dimension_numbers = #tpu.dot_dimension_numbers<[1], [0], [0], [1], [0, 0, 1, 1], [], []>} : vector<106x4xf32>, vector<4x8xf32>, vector<106x8xf32> -> vector<106x8xf32>
    %164 = arith.addf %159, %163 : vector<106x8xf32>
    %165 = vector.extract_strided_slice %20 {offsets = [57, 0], sizes = [106, 4], strides = [1, 1]} : vector<196x4xf32> to vector<106x4xf32>
    %c29 = arith.constant 29 : index
    %c0_102 = arith.constant 0 : index
    %c0_103 = arith.constant 0 : index
    %166 = vector.load %arg3[%c29, %c0_102, %c0_103] : memref<49x4x8xf32, #tpu.memory_space<vmem>>, vector<1x4x8xf32>
    %167 = vector.shape_cast %166 : vector<1x4x8xf32> to vector<4x8xf32>
    %cst_104 = arith.constant dense<0.000000e+00> : vector<106x8xf32>
    %168 = tpu.matmul %165, %167, %cst_104 {dimension_numbers = #tpu.dot_dimension_numbers<[1], [0], [0], [1], [0, 0, 1, 1], [], []>} : vector<106x4xf32>, vector<4x8xf32>, vector<106x8xf32> -> vector<106x8xf32>
    %169 = arith.addf %164, %168 : vector<106x8xf32>
    %170 = vector.extract_strided_slice %20 {offsets = [58, 0], sizes = [106, 4], strides = [1, 1]} : vector<196x4xf32> to vector<106x4xf32>
    %c30 = arith.constant 30 : index
    %c0_105 = arith.constant 0 : index
    %c0_106 = arith.constant 0 : index
    %171 = vector.load %arg3[%c30, %c0_105, %c0_106] : memref<49x4x8xf32, #tpu.memory_space<vmem>>, vector<1x4x8xf32>
    %172 = vector.shape_cast %171 : vector<1x4x8xf32> to vector<4x8xf32>
    %cst_107 = arith.constant dense<0.000000e+00> : vector<106x8xf32>
    %173 = tpu.matmul %170, %172, %cst_107 {dimension_numbers = #tpu.dot_dimension_numbers<[1], [0], [0], [1], [0, 0, 1, 1], [], []>} : vector<106x4xf32>, vector<4x8xf32>, vector<106x8xf32> -> vector<106x8xf32>
    %174 = arith.addf %169, %173 : vector<106x8xf32>
    %175 = vector.extract_strided_slice %20 {offsets = [59, 0], sizes = [106, 4], strides = [1, 1]} : vector<196x4xf32> to vector<106x4xf32>
    %c31 = arith.constant 31 : index
    %c0_108 = arith.constant 0 : index
    %c0_109 = arith.constant 0 : index
    %176 = vector.load %arg3[%c31, %c0_108, %c0_109] : memref<49x4x8xf32, #tpu.memory_space<vmem>>, vector<1x4x8xf32>
    %177 = vector.shape_cast %176 : vector<1x4x8xf32> to vector<4x8xf32>
    %cst_110 = arith.constant dense<0.000000e+00> : vector<106x8xf32>
    %178 = tpu.matmul %175, %177, %cst_110 {dimension_numbers = #tpu.dot_dimension_numbers<[1], [0], [0], [1], [0, 0, 1, 1], [], []>} : vector<106x4xf32>, vector<4x8xf32>, vector<106x8xf32> -> vector<106x8xf32>
    %179 = arith.addf %174, %178 : vector<106x8xf32>
    %180 = vector.extract_strided_slice %20 {offsets = [60, 0], sizes = [106, 4], strides = [1, 1]} : vector<196x4xf32> to vector<106x4xf32>
    %c32 = arith.constant 32 : index
    %c0_111 = arith.constant 0 : index
    %c0_112 = arith.constant 0 : index
    %181 = vector.load %arg3[%c32, %c0_111, %c0_112] : memref<49x4x8xf32, #tpu.memory_space<vmem>>, vector<1x4x8xf32>
    %182 = vector.shape_cast %181 : vector<1x4x8xf32> to vector<4x8xf32>
    %cst_113 = arith.constant dense<0.000000e+00> : vector<106x8xf32>
    %183 = tpu.matmul %180, %182, %cst_113 {dimension_numbers = #tpu.dot_dimension_numbers<[1], [0], [0], [1], [0, 0, 1, 1], [], []>} : vector<106x4xf32>, vector<4x8xf32>, vector<106x8xf32> -> vector<106x8xf32>
    %184 = arith.addf %179, %183 : vector<106x8xf32>
    %185 = vector.extract_strided_slice %20 {offsets = [61, 0], sizes = [106, 4], strides = [1, 1]} : vector<196x4xf32> to vector<106x4xf32>
    %c33 = arith.constant 33 : index
    %c0_114 = arith.constant 0 : index
    %c0_115 = arith.constant 0 : index
    %186 = vector.load %arg3[%c33, %c0_114, %c0_115] : memref<49x4x8xf32, #tpu.memory_space<vmem>>, vector<1x4x8xf32>
    %187 = vector.shape_cast %186 : vector<1x4x8xf32> to vector<4x8xf32>
    %cst_116 = arith.constant dense<0.000000e+00> : vector<106x8xf32>
    %188 = tpu.matmul %185, %187, %cst_116 {dimension_numbers = #tpu.dot_dimension_numbers<[1], [0], [0], [1], [0, 0, 1, 1], [], []>} : vector<106x4xf32>, vector<4x8xf32>, vector<106x8xf32> -> vector<106x8xf32>
    %189 = arith.addf %184, %188 : vector<106x8xf32>
    %190 = vector.extract_strided_slice %20 {offsets = [62, 0], sizes = [106, 4], strides = [1, 1]} : vector<196x4xf32> to vector<106x4xf32>
    %c34 = arith.constant 34 : index
    %c0_117 = arith.constant 0 : index
    %c0_118 = arith.constant 0 : index
    %191 = vector.load %arg3[%c34, %c0_117, %c0_118] : memref<49x4x8xf32, #tpu.memory_space<vmem>>, vector<1x4x8xf32>
    %192 = vector.shape_cast %191 : vector<1x4x8xf32> to vector<4x8xf32>
    %cst_119 = arith.constant dense<0.000000e+00> : vector<106x8xf32>
    %193 = tpu.matmul %190, %192, %cst_119 {dimension_numbers = #tpu.dot_dimension_numbers<[1], [0], [0], [1], [0, 0, 1, 1], [], []>} : vector<106x4xf32>, vector<4x8xf32>, vector<106x8xf32> -> vector<106x8xf32>
    %194 = arith.addf %189, %193 : vector<106x8xf32>
    %195 = vector.extract_strided_slice %20 {offsets = [70, 0], sizes = [106, 4], strides = [1, 1]} : vector<196x4xf32> to vector<106x4xf32>
    %c35 = arith.constant 35 : index
    %c0_120 = arith.constant 0 : index
    %c0_121 = arith.constant 0 : index
    %196 = vector.load %arg3[%c35, %c0_120, %c0_121] : memref<49x4x8xf32, #tpu.memory_space<vmem>>, vector<1x4x8xf32>
    %197 = vector.shape_cast %196 : vector<1x4x8xf32> to vector<4x8xf32>
    %cst_122 = arith.constant dense<0.000000e+00> : vector<106x8xf32>
    %198 = tpu.matmul %195, %197, %cst_122 {dimension_numbers = #tpu.dot_dimension_numbers<[1], [0], [0], [1], [0, 0, 1, 1], [], []>} : vector<106x4xf32>, vector<4x8xf32>, vector<106x8xf32> -> vector<106x8xf32>
    %199 = arith.addf %194, %198 : vector<106x8xf32>
    %200 = vector.extract_strided_slice %20 {offsets = [71, 0], sizes = [106, 4], strides = [1, 1]} : vector<196x4xf32> to vector<106x4xf32>
    %c36 = arith.constant 36 : index
    %c0_123 = arith.constant 0 : index
    %c0_124 = arith.constant 0 : index
    %201 = vector.load %arg3[%c36, %c0_123, %c0_124] : memref<49x4x8xf32, #tpu.memory_space<vmem>>, vector<1x4x8xf32>
    %202 = vector.shape_cast %201 : vector<1x4x8xf32> to vector<4x8xf32>
    %cst_125 = arith.constant dense<0.000000e+00> : vector<106x8xf32>
    %203 = tpu.matmul %200, %202, %cst_125 {dimension_numbers = #tpu.dot_dimension_numbers<[1], [0], [0], [1], [0, 0, 1, 1], [], []>} : vector<106x4xf32>, vector<4x8xf32>, vector<106x8xf32> -> vector<106x8xf32>
    %204 = arith.addf %199, %203 : vector<106x8xf32>
    %205 = vector.extract_strided_slice %20 {offsets = [72, 0], sizes = [106, 4], strides = [1, 1]} : vector<196x4xf32> to vector<106x4xf32>
    %c37 = arith.constant 37 : index
    %c0_126 = arith.constant 0 : index
    %c0_127 = arith.constant 0 : index
    %206 = vector.load %arg3[%c37, %c0_126, %c0_127] : memref<49x4x8xf32, #tpu.memory_space<vmem>>, vector<1x4x8xf32>
    %207 = vector.shape_cast %206 : vector<1x4x8xf32> to vector<4x8xf32>
    %cst_128 = arith.constant dense<0.000000e+00> : vector<106x8xf32>
    %208 = tpu.matmul %205, %207, %cst_128 {dimension_numbers = #tpu.dot_dimension_numbers<[1], [0], [0], [1], [0, 0, 1, 1], [], []>} : vector<106x4xf32>, vector<4x8xf32>, vector<106x8xf32> -> vector<106x8xf32>
    %209 = arith.addf %204, %208 : vector<106x8xf32>
    %210 = vector.extract_strided_slice %20 {offsets = [73, 0], sizes = [106, 4], strides = [1, 1]} : vector<196x4xf32> to vector<106x4xf32>
    %c38 = arith.constant 38 : index
    %c0_129 = arith.constant 0 : index
    %c0_130 = arith.constant 0 : index
    %211 = vector.load %arg3[%c38, %c0_129, %c0_130] : memref<49x4x8xf32, #tpu.memory_space<vmem>>, vector<1x4x8xf32>
    %212 = vector.shape_cast %211 : vector<1x4x8xf32> to vector<4x8xf32>
    %cst_131 = arith.constant dense<0.000000e+00> : vector<106x8xf32>
    %213 = tpu.matmul %210, %212, %cst_131 {dimension_numbers = #tpu.dot_dimension_numbers<[1], [0], [0], [1], [0, 0, 1, 1], [], []>} : vector<106x4xf32>, vector<4x8xf32>, vector<106x8xf32> -> vector<106x8xf32>
    %214 = arith.addf %209, %213 : vector<106x8xf32>
    %215 = vector.extract_strided_slice %20 {offsets = [74, 0], sizes = [106, 4], strides = [1, 1]} : vector<196x4xf32> to vector<106x4xf32>
    %c39 = arith.constant 39 : index
    %c0_132 = arith.constant 0 : index
    %c0_133 = arith.constant 0 : index
    %216 = vector.load %arg3[%c39, %c0_132, %c0_133] : memref<49x4x8xf32, #tpu.memory_space<vmem>>, vector<1x4x8xf32>
    %217 = vector.shape_cast %216 : vector<1x4x8xf32> to vector<4x8xf32>
    %cst_134 = arith.constant dense<0.000000e+00> : vector<106x8xf32>
    %218 = tpu.matmul %215, %217, %cst_134 {dimension_numbers = #tpu.dot_dimension_numbers<[1], [0], [0], [1], [0, 0, 1, 1], [], []>} : vector<106x4xf32>, vector<4x8xf32>, vector<106x8xf32> -> vector<106x8xf32>
    %219 = arith.addf %214, %218 : vector<106x8xf32>
    %220 = vector.extract_strided_slice %20 {offsets = [75, 0], sizes = [106, 4], strides = [1, 1]} : vector<196x4xf32> to vector<106x4xf32>
    %c40 = arith.constant 40 : index
    %c0_135 = arith.constant 0 : index
    %c0_136 = arith.constant 0 : index
    %221 = vector.load %arg3[%c40, %c0_135, %c0_136] : memref<49x4x8xf32, #tpu.memory_space<vmem>>, vector<1x4x8xf32>
    %222 = vector.shape_cast %221 : vector<1x4x8xf32> to vector<4x8xf32>
    %cst_137 = arith.constant dense<0.000000e+00> : vector<106x8xf32>
    %223 = tpu.matmul %220, %222, %cst_137 {dimension_numbers = #tpu.dot_dimension_numbers<[1], [0], [0], [1], [0, 0, 1, 1], [], []>} : vector<106x4xf32>, vector<4x8xf32>, vector<106x8xf32> -> vector<106x8xf32>
    %224 = arith.addf %219, %223 : vector<106x8xf32>
    %225 = vector.extract_strided_slice %20 {offsets = [76, 0], sizes = [106, 4], strides = [1, 1]} : vector<196x4xf32> to vector<106x4xf32>
    %c41 = arith.constant 41 : index
    %c0_138 = arith.constant 0 : index
    %c0_139 = arith.constant 0 : index
    %226 = vector.load %arg3[%c41, %c0_138, %c0_139] : memref<49x4x8xf32, #tpu.memory_space<vmem>>, vector<1x4x8xf32>
    %227 = vector.shape_cast %226 : vector<1x4x8xf32> to vector<4x8xf32>
    %cst_140 = arith.constant dense<0.000000e+00> : vector<106x8xf32>
    %228 = tpu.matmul %225, %227, %cst_140 {dimension_numbers = #tpu.dot_dimension_numbers<[1], [0], [0], [1], [0, 0, 1, 1], [], []>} : vector<106x4xf32>, vector<4x8xf32>, vector<106x8xf32> -> vector<106x8xf32>
    %229 = arith.addf %224, %228 : vector<106x8xf32>
    %230 = vector.extract_strided_slice %20 {offsets = [84, 0], sizes = [106, 4], strides = [1, 1]} : vector<196x4xf32> to vector<106x4xf32>
    %c42 = arith.constant 42 : index
    %c0_141 = arith.constant 0 : index
    %c0_142 = arith.constant 0 : index
    %231 = vector.load %arg3[%c42, %c0_141, %c0_142] : memref<49x4x8xf32, #tpu.memory_space<vmem>>, vector<1x4x8xf32>
    %232 = vector.shape_cast %231 : vector<1x4x8xf32> to vector<4x8xf32>
    %cst_143 = arith.constant dense<0.000000e+00> : vector<106x8xf32>
    %233 = tpu.matmul %230, %232, %cst_143 {dimension_numbers = #tpu.dot_dimension_numbers<[1], [0], [0], [1], [0, 0, 1, 1], [], []>} : vector<106x4xf32>, vector<4x8xf32>, vector<106x8xf32> -> vector<106x8xf32>
    %234 = arith.addf %229, %233 : vector<106x8xf32>
    %235 = vector.extract_strided_slice %20 {offsets = [85, 0], sizes = [106, 4], strides = [1, 1]} : vector<196x4xf32> to vector<106x4xf32>
    %c43 = arith.constant 43 : index
    %c0_144 = arith.constant 0 : index
    %c0_145 = arith.constant 0 : index
    %236 = vector.load %arg3[%c43, %c0_144, %c0_145] : memref<49x4x8xf32, #tpu.memory_space<vmem>>, vector<1x4x8xf32>
    %237 = vector.shape_cast %236 : vector<1x4x8xf32> to vector<4x8xf32>
    %cst_146 = arith.constant dense<0.000000e+00> : vector<106x8xf32>
    %238 = tpu.matmul %235, %237, %cst_146 {dimension_numbers = #tpu.dot_dimension_numbers<[1], [0], [0], [1], [0, 0, 1, 1], [], []>} : vector<106x4xf32>, vector<4x8xf32>, vector<106x8xf32> -> vector<106x8xf32>
    %239 = arith.addf %234, %238 : vector<106x8xf32>
    %240 = vector.extract_strided_slice %20 {offsets = [86, 0], sizes = [106, 4], strides = [1, 1]} : vector<196x4xf32> to vector<106x4xf32>
    %c44 = arith.constant 44 : index
    %c0_147 = arith.constant 0 : index
    %c0_148 = arith.constant 0 : index
    %241 = vector.load %arg3[%c44, %c0_147, %c0_148] : memref<49x4x8xf32, #tpu.memory_space<vmem>>, vector<1x4x8xf32>
    %242 = vector.shape_cast %241 : vector<1x4x8xf32> to vector<4x8xf32>
    %cst_149 = arith.constant dense<0.000000e+00> : vector<106x8xf32>
    %243 = tpu.matmul %240, %242, %cst_149 {dimension_numbers = #tpu.dot_dimension_numbers<[1], [0], [0], [1], [0, 0, 1, 1], [], []>} : vector<106x4xf32>, vector<4x8xf32>, vector<106x8xf32> -> vector<106x8xf32>
    %244 = arith.addf %239, %243 : vector<106x8xf32>
    %245 = vector.extract_strided_slice %20 {offsets = [87, 0], sizes = [106, 4], strides = [1, 1]} : vector<196x4xf32> to vector<106x4xf32>
    %c45_150 = arith.constant 45 : index
    %c0_151 = arith.constant 0 : index
    %c0_152 = arith.constant 0 : index
    %246 = vector.load %arg3[%c45_150, %c0_151, %c0_152] : memref<49x4x8xf32, #tpu.memory_space<vmem>>, vector<1x4x8xf32>
    %247 = vector.shape_cast %246 : vector<1x4x8xf32> to vector<4x8xf32>
    %cst_153 = arith.constant dense<0.000000e+00> : vector<106x8xf32>
    %248 = tpu.matmul %245, %247, %cst_153 {dimension_numbers = #tpu.dot_dimension_numbers<[1], [0], [0], [1], [0, 0, 1, 1], [], []>} : vector<106x4xf32>, vector<4x8xf32>, vector<106x8xf32> -> vector<106x8xf32>
    %249 = arith.addf %244, %248 : vector<106x8xf32>
    %250 = vector.extract_strided_slice %20 {offsets = [88, 0], sizes = [106, 4], strides = [1, 1]} : vector<196x4xf32> to vector<106x4xf32>
    %c46 = arith.constant 46 : index
    %c0_154 = arith.constant 0 : index
    %c0_155 = arith.constant 0 : index
    %251 = vector.load %arg3[%c46, %c0_154, %c0_155] : memref<49x4x8xf32, #tpu.memory_space<vmem>>, vector<1x4x8xf32>
    %252 = vector.shape_cast %251 : vector<1x4x8xf32> to vector<4x8xf32>
    %cst_156 = arith.constant dense<0.000000e+00> : vector<106x8xf32>
    %253 = tpu.matmul %250, %252, %cst_156 {dimension_numbers = #tpu.dot_dimension_numbers<[1], [0], [0], [1], [0, 0, 1, 1], [], []>} : vector<106x4xf32>, vector<4x8xf32>, vector<106x8xf32> -> vector<106x8xf32>
    %254 = arith.addf %249, %253 : vector<106x8xf32>
    %255 = vector.extract_strided_slice %20 {offsets = [89, 0], sizes = [106, 4], strides = [1, 1]} : vector<196x4xf32> to vector<106x4xf32>
    %c47 = arith.constant 47 : index
    %c0_157 = arith.constant 0 : index
    %c0_158 = arith.constant 0 : index
    %256 = vector.load %arg3[%c47, %c0_157, %c0_158] : memref<49x4x8xf32, #tpu.memory_space<vmem>>, vector<1x4x8xf32>
    %257 = vector.shape_cast %256 : vector<1x4x8xf32> to vector<4x8xf32>
    %cst_159 = arith.constant dense<0.000000e+00> : vector<106x8xf32>
    %258 = tpu.matmul %255, %257, %cst_159 {dimension_numbers = #tpu.dot_dimension_numbers<[1], [0], [0], [1], [0, 0, 1, 1], [], []>} : vector<106x4xf32>, vector<4x8xf32>, vector<106x8xf32> -> vector<106x8xf32>
    %259 = arith.addf %254, %258 : vector<106x8xf32>
    %260 = vector.extract_strided_slice %20 {offsets = [90, 0], sizes = [106, 4], strides = [1, 1]} : vector<196x4xf32> to vector<106x4xf32>
    %c48 = arith.constant 48 : index
    %c0_160 = arith.constant 0 : index
    %c0_161 = arith.constant 0 : index
    %261 = vector.load %arg3[%c48, %c0_160, %c0_161] : memref<49x4x8xf32, #tpu.memory_space<vmem>>, vector<1x4x8xf32>
    %262 = vector.shape_cast %261 : vector<1x4x8xf32> to vector<4x8xf32>
    %cst_162 = arith.constant dense<0.000000e+00> : vector<106x8xf32>
    %263 = tpu.matmul %260, %262, %cst_162 {dimension_numbers = #tpu.dot_dimension_numbers<[1], [0], [0], [1], [0, 0, 1, 1], [], []>} : vector<106x4xf32>, vector<4x8xf32>, vector<106x8xf32> -> vector<106x8xf32>
    %264 = arith.addf %259, %263 : vector<106x8xf32>
    %c0_163 = arith.constant 0 : index
    %c0_164 = arith.constant 0 : index
    %265 = vector.load %arg4[%c0_163, %c0_164] : memref<1x8xf32, #tpu.memory_space<vmem>>, vector<1x8xf32>
    %266 = vector.broadcast %265 : vector<1x8xf32> to vector<106x8xf32>
    %267 = arith.addf %264, %266 : vector<106x8xf32>
    %268 = vector.extract_strided_slice %267 {offsets = [0, 0], sizes = [91, 8], strides = [1, 1]} : vector<106x8xf32> to vector<91x8xf32>
    %269 = vector.extract_strided_slice %267 {offsets = [1, 0], sizes = [91, 8], strides = [1, 1]} : vector<106x8xf32> to vector<91x8xf32>
    %270 = arith.maximumf %268, %269 : vector<91x8xf32>
    %271 = vector.extract_strided_slice %267 {offsets = [14, 0], sizes = [91, 8], strides = [1, 1]} : vector<106x8xf32> to vector<91x8xf32>
    %272 = vector.extract_strided_slice %267 {offsets = [15, 0], sizes = [91, 8], strides = [1, 1]} : vector<106x8xf32> to vector<91x8xf32>
    %273 = arith.maximumf %271, %272 : vector<91x8xf32>
    %274 = arith.maximumf %270, %273 : vector<91x8xf32>
    %cst_165 = arith.constant 0.000000e+00 : f32
    %275 = vector.broadcast %cst_165 : f32 to vector<91x8xf32>
    %276 = arith.cmpf ogt, %274, %275 : vector<91x8xf32>
    %cst_166 = arith.constant 0.00999999977 : f32
    %277 = vector.broadcast %cst_166 : f32 to vector<91x8xf32>
    %278 = arith.mulf %277, %274 : vector<91x8xf32>
    %279 = arith.select %276, %274, %278 : vector<91x8xi1>, vector<91x8xf32>
    %cst_167 = arith.constant 0.000000e+00 : f32
    %280 = vector.broadcast %cst_167 : f32 to vector<81x8xf32>
    %c0_168 = arith.constant 0 : index
    %c0_169 = arith.constant 0 : index
    %281 = vector.load %arg23[%c0_168, %c0_169] : memref<81x8xf32, #tpu.memory_space<vmem>>, vector<81x8xf32>
    tpu.vector_store %arg23[%c0_168, %c0_169], %280 {strides = array<i32>} : memref<81x8xf32, #tpu.memory_space<vmem>>, vector<81x8xf32>,
    %282 = vector.extract_strided_slice %279 {offsets = [0, 0], sizes = [7, 8], strides = [1, 1]} : vector<91x8xf32> to vector<7x8xf32>
    %c10_170 = arith.constant 10 : index
    %c0_171 = arith.constant 0 : index
    %283 = vector.load %arg23[%c10_170, %c0_171] : memref<81x8xf32, #tpu.memory_space<vmem>>, vector<7x8xf32>
    tpu.vector_store %arg23[%c10_170, %c0_171], %282 {strides = array<i32>} : memref<81x8xf32, #tpu.memory_space<vmem>>, vector<7x8xf32>,
    %284 = vector.extract_strided_slice %279 {offsets = [14, 0], sizes = [7, 8], strides = [1, 1]} : vector<91x8xf32> to vector<7x8xf32>
    %c19_172 = arith.constant 19 : index
    %c0_173 = arith.constant 0 : index
    %285 = vector.load %arg23[%c19_172, %c0_173] : memref<81x8xf32, #tpu.memory_space<vmem>>, vector<7x8xf32>
    tpu.vector_store %arg23[%c19_172, %c0_173], %284 {strides = array<i32>} : memref<81x8xf32, #tpu.memory_space<vmem>>, vector<7x8xf32>,
    %286 = vector.extract_strided_slice %279 {offsets = [28, 0], sizes = [7, 8], strides = [1, 1]} : vector<91x8xf32> to vector<7x8xf32>
    %c28_174 = arith.constant 28 : index
    %c0_175 = arith.constant 0 : index
    %287 = vector.load %arg23[%c28_174, %c0_175] : memref<81x8xf32, #tpu.memory_space<vmem>>, vector<7x8xf32>
    tpu.vector_store %arg23[%c28_174, %c0_175], %286 {strides = array<i32>} : memref<81x8xf32, #tpu.memory_space<vmem>>, vector<7x8xf32>,
    %288 = vector.extract_strided_slice %279 {offsets = [42, 0], sizes = [7, 8], strides = [1, 1]} : vector<91x8xf32> to vector<7x8xf32>
    %c37_176 = arith.constant 37 : index
    %c0_177 = arith.constant 0 : index
    %289 = vector.load %arg23[%c37_176, %c0_177] : memref<81x8xf32, #tpu.memory_space<vmem>>, vector<7x8xf32>
    tpu.vector_store %arg23[%c37_176, %c0_177], %288 {strides = array<i32>} : memref<81x8xf32, #tpu.memory_space<vmem>>, vector<7x8xf32>,
    %290 = vector.extract_strided_slice %279 {offsets = [56, 0], sizes = [7, 8], strides = [1, 1]} : vector<91x8xf32> to vector<7x8xf32>
    %c46_178 = arith.constant 46 : index
    %c0_179 = arith.constant 0 : index
    %291 = vector.load %arg23[%c46_178, %c0_179] : memref<81x8xf32, #tpu.memory_space<vmem>>, vector<7x8xf32>
    tpu.vector_store %arg23[%c46_178, %c0_179], %290 {strides = array<i32>} : memref<81x8xf32, #tpu.memory_space<vmem>>, vector<7x8xf32>,
    %292 = vector.extract_strided_slice %279 {offsets = [70, 0], sizes = [7, 8], strides = [1, 1]} : vector<91x8xf32> to vector<7x8xf32>
    %c55 = arith.constant 55 : index
    %c0_180 = arith.constant 0 : index
    %293 = vector.load %arg23[%c55, %c0_180] : memref<81x8xf32, #tpu.memory_space<vmem>>, vector<7x8xf32>
    tpu.vector_store %arg23[%c55, %c0_180], %292 {strides = array<i32>} : memref<81x8xf32, #tpu.memory_space<vmem>>, vector<7x8xf32>,
    %294 = vector.extract_strided_slice %279 {offsets = [84, 0], sizes = [7, 8], strides = [1, 1]} : vector<91x8xf32> to vector<7x8xf32>
    %c64 = arith.constant 64 : index
    %c0_181 = arith.constant 0 : index
    %295 = vector.load %arg23[%c64, %c0_181] : memref<81x8xf32, #tpu.memory_space<vmem>>, vector<7x8xf32>
    tpu.vector_store %arg23[%c64, %c0_181], %294 {strides = array<i32>} : memref<81x8xf32, #tpu.memory_space<vmem>>, vector<7x8xf32>,
    %c0_182 = arith.constant 0 : index
    %c0_183 = arith.constant 0 : index
    %296 = vector.load %arg23[%c0_182, %c0_183] : memref<81x8xf32, #tpu.memory_space<vmem>>, vector<81x8xf32>
    %297 = vector.extract_strided_slice %296 {offsets = [0, 0], sizes = [61, 8], strides = [1, 1]} : vector<81x8xf32> to vector<61x8xf32>
    %c0_184 = arith.constant 0 : index
    %c0_185 = arith.constant 0 : index
    %c0_186 = arith.constant 0 : index
    %298 = vector.load %arg5[%c0_184, %c0_185, %c0_186] : memref<9x8x8xf32, #tpu.memory_space<vmem>>, vector<1x8x8xf32>
    %299 = vector.shape_cast %298 : vector<1x8x8xf32> to vector<8x8xf32>
    %cst_187 = arith.constant dense<0.000000e+00> : vector<61x8xf32>
    %300 = tpu.matmul %297, %299, %cst_187 {dimension_numbers = #tpu.dot_dimension_numbers<[1], [0], [0], [1], [0, 0, 1, 1], [], []>} : vector<61x8xf32>, vector<8x8xf32>, vector<61x8xf32> -> vector<61x8xf32>
    %301 = vector.extract_strided_slice %296 {offsets = [1, 0], sizes = [61, 8], strides = [1, 1]} : vector<81x8xf32> to vector<61x8xf32>
    %c1_188 = arith.constant 1 : index
    %c0_189 = arith.constant 0 : index
    %c0_190 = arith.constant 0 : index
    %302 = vector.load %arg5[%c1_188, %c0_189, %c0_190] : memref<9x8x8xf32, #tpu.memory_space<vmem>>, vector<1x8x8xf32>
    %303 = vector.shape_cast %302 : vector<1x8x8xf32> to vector<8x8xf32>
    %cst_191 = arith.constant dense<0.000000e+00> : vector<61x8xf32>
    %304 = tpu.matmul %301, %303, %cst_191 {dimension_numbers = #tpu.dot_dimension_numbers<[1], [0], [0], [1], [0, 0, 1, 1], [], []>} : vector<61x8xf32>, vector<8x8xf32>, vector<61x8xf32> -> vector<61x8xf32>
    %305 = arith.addf %300, %304 : vector<61x8xf32>
    %306 = vector.extract_strided_slice %296 {offsets = [2, 0], sizes = [61, 8], strides = [1, 1]} : vector<81x8xf32> to vector<61x8xf32>
    %c2_192 = arith.constant 2 : index
    %c0_193 = arith.constant 0 : index
    %c0_194 = arith.constant 0 : index
    %307 = vector.load %arg5[%c2_192, %c0_193, %c0_194] : memref<9x8x8xf32, #tpu.memory_space<vmem>>, vector<1x8x8xf32>
    %308 = vector.shape_cast %307 : vector<1x8x8xf32> to vector<8x8xf32>
    %cst_195 = arith.constant dense<0.000000e+00> : vector<61x8xf32>
    %309 = tpu.matmul %306, %308, %cst_195 {dimension_numbers = #tpu.dot_dimension_numbers<[1], [0], [0], [1], [0, 0, 1, 1], [], []>} : vector<61x8xf32>, vector<8x8xf32>, vector<61x8xf32> -> vector<61x8xf32>
    %310 = arith.addf %305, %309 : vector<61x8xf32>
    %311 = vector.extract_strided_slice %296 {offsets = [9, 0], sizes = [61, 8], strides = [1, 1]} : vector<81x8xf32> to vector<61x8xf32>
    %c3_196 = arith.constant 3 : index
    %c0_197 = arith.constant 0 : index
    %c0_198 = arith.constant 0 : index
    %312 = vector.load %arg5[%c3_196, %c0_197, %c0_198] : memref<9x8x8xf32, #tpu.memory_space<vmem>>, vector<1x8x8xf32>
    %313 = vector.shape_cast %312 : vector<1x8x8xf32> to vector<8x8xf32>
    %cst_199 = arith.constant dense<0.000000e+00> : vector<61x8xf32>
    %314 = tpu.matmul %311, %313, %cst_199 {dimension_numbers = #tpu.dot_dimension_numbers<[1], [0], [0], [1], [0, 0, 1, 1], [], []>} : vector<61x8xf32>, vector<8x8xf32>, vector<61x8xf32> -> vector<61x8xf32>
    %315 = arith.addf %310, %314 : vector<61x8xf32>
    %316 = vector.extract_strided_slice %296 {offsets = [10, 0], sizes = [61, 8], strides = [1, 1]} : vector<81x8xf32> to vector<61x8xf32>
    %c4_200 = arith.constant 4 : index
    %c0_201 = arith.constant 0 : index
    %c0_202 = arith.constant 0 : index
    %317 = vector.load %arg5[%c4_200, %c0_201, %c0_202] : memref<9x8x8xf32, #tpu.memory_space<vmem>>, vector<1x8x8xf32>
    %318 = vector.shape_cast %317 : vector<1x8x8xf32> to vector<8x8xf32>
    %cst_203 = arith.constant dense<0.000000e+00> : vector<61x8xf32>
    %319 = tpu.matmul %316, %318, %cst_203 {dimension_numbers = #tpu.dot_dimension_numbers<[1], [0], [0], [1], [0, 0, 1, 1], [], []>} : vector<61x8xf32>, vector<8x8xf32>, vector<61x8xf32> -> vector<61x8xf32>
    %320 = arith.addf %315, %319 : vector<61x8xf32>
    %321 = vector.extract_strided_slice %296 {offsets = [11, 0], sizes = [61, 8], strides = [1, 1]} : vector<81x8xf32> to vector<61x8xf32>
    %c5_204 = arith.constant 5 : index
    %c0_205 = arith.constant 0 : index
    %c0_206 = arith.constant 0 : index
    %322 = vector.load %arg5[%c5_204, %c0_205, %c0_206] : memref<9x8x8xf32, #tpu.memory_space<vmem>>, vector<1x8x8xf32>
    %323 = vector.shape_cast %322 : vector<1x8x8xf32> to vector<8x8xf32>
    %cst_207 = arith.constant dense<0.000000e+00> : vector<61x8xf32>
    %324 = tpu.matmul %321, %323, %cst_207 {dimension_numbers = #tpu.dot_dimension_numbers<[1], [0], [0], [1], [0, 0, 1, 1], [], []>} : vector<61x8xf32>, vector<8x8xf32>, vector<61x8xf32> -> vector<61x8xf32>
    %325 = arith.addf %320, %324 : vector<61x8xf32>
    %326 = vector.extract_strided_slice %296 {offsets = [18, 0], sizes = [61, 8], strides = [1, 1]} : vector<81x8xf32> to vector<61x8xf32>
    %c6_208 = arith.constant 6 : index
    %c0_209 = arith.constant 0 : index
    %c0_210 = arith.constant 0 : index
    %327 = vector.load %arg5[%c6_208, %c0_209, %c0_210] : memref<9x8x8xf32, #tpu.memory_space<vmem>>, vector<1x8x8xf32>
    %328 = vector.shape_cast %327 : vector<1x8x8xf32> to vector<8x8xf32>
    %cst_211 = arith.constant dense<0.000000e+00> : vector<61x8xf32>
    %329 = tpu.matmul %326, %328, %cst_211 {dimension_numbers = #tpu.dot_dimension_numbers<[1], [0], [0], [1], [0, 0, 1, 1], [], []>} : vector<61x8xf32>, vector<8x8xf32>, vector<61x8xf32> -> vector<61x8xf32>
    %330 = arith.addf %325, %329 : vector<61x8xf32>
    %331 = vector.extract_strided_slice %296 {offsets = [19, 0], sizes = [61, 8], strides = [1, 1]} : vector<81x8xf32> to vector<61x8xf32>
    %c7_212 = arith.constant 7 : index
    %c0_213 = arith.constant 0 : index
    %c0_214 = arith.constant 0 : index
    %332 = vector.load %arg5[%c7_212, %c0_213, %c0_214] : memref<9x8x8xf32, #tpu.memory_space<vmem>>, vector<1x8x8xf32>
    %333 = vector.shape_cast %332 : vector<1x8x8xf32> to vector<8x8xf32>
    %cst_215 = arith.constant dense<0.000000e+00> : vector<61x8xf32>
    %334 = tpu.matmul %331, %333, %cst_215 {dimension_numbers = #tpu.dot_dimension_numbers<[1], [0], [0], [1], [0, 0, 1, 1], [], []>} : vector<61x8xf32>, vector<8x8xf32>, vector<61x8xf32> -> vector<61x8xf32>
    %335 = arith.addf %330, %334 : vector<61x8xf32>
    %336 = vector.extract_strided_slice %296 {offsets = [20, 0], sizes = [61, 8], strides = [1, 1]} : vector<81x8xf32> to vector<61x8xf32>
    %c8_216 = arith.constant 8 : index
    %c0_217 = arith.constant 0 : index
    %c0_218 = arith.constant 0 : index
    %337 = vector.load %arg5[%c8_216, %c0_217, %c0_218] : memref<9x8x8xf32, #tpu.memory_space<vmem>>, vector<1x8x8xf32>
    %338 = vector.shape_cast %337 : vector<1x8x8xf32> to vector<8x8xf32>
    %cst_219 = arith.constant dense<0.000000e+00> : vector<61x8xf32>
    %339 = tpu.matmul %336, %338, %cst_219 {dimension_numbers = #tpu.dot_dimension_numbers<[1], [0], [0], [1], [0, 0, 1, 1], [], []>} : vector<61x8xf32>, vector<8x8xf32>, vector<61x8xf32> -> vector<61x8xf32>
    %340 = arith.addf %335, %339 : vector<61x8xf32>
    %c0_220 = arith.constant 0 : index
    %c0_221 = arith.constant 0 : index
    %341 = vector.load %arg6[%c0_220, %c0_221] : memref<1x8xf32, #tpu.memory_space<vmem>>, vector<1x8xf32>
    %342 = vector.broadcast %341 : vector<1x8xf32> to vector<61x8xf32>
    %343 = arith.addf %340, %342 : vector<61x8xf32>
    %344 = vector.extract_strided_slice %343 {offsets = [0, 0], sizes = [51, 8], strides = [1, 1]} : vector<61x8xf32> to vector<51x8xf32>
    %345 = vector.extract_strided_slice %343 {offsets = [1, 0], sizes = [51, 8], strides = [1, 1]} : vector<61x8xf32> to vector<51x8xf32>
    %346 = arith.maximumf %344, %345 : vector<51x8xf32>
    %347 = vector.extract_strided_slice %343 {offsets = [9, 0], sizes = [51, 8], strides = [1, 1]} : vector<61x8xf32> to vector<51x8xf32>
    %348 = vector.extract_strided_slice %343 {offsets = [10, 0], sizes = [51, 8], strides = [1, 1]} : vector<61x8xf32> to vector<51x8xf32>
    %349 = arith.maximumf %347, %348 : vector<51x8xf32>
    %350 = arith.maximumf %346, %349 : vector<51x8xf32>
    %cst_222 = arith.constant 0.000000e+00 : f32
    %351 = vector.broadcast %cst_222 : f32 to vector<51x8xf32>
    %352 = arith.cmpf ogt, %350, %351 : vector<51x8xf32>
    %cst_223 = arith.constant 0.00999999977 : f32
    %353 = vector.broadcast %cst_223 : f32 to vector<51x8xf32>
    %354 = arith.mulf %353, %350 : vector<51x8xf32>
    %355 = arith.select %352, %350, %354 : vector<51x8xi1>, vector<51x8xf32>
    %cst_224 = arith.constant 0.000000e+00 : f32
    %356 = vector.broadcast %cst_224 : f32 to vector<64x8xf32>
    %c0_225 = arith.constant 0 : index
    %c0_226 = arith.constant 0 : index
    %357 = vector.load %arg24[%c0_225, %c0_226] : memref<64x8xf32, #tpu.memory_space<vmem>>, vector<64x8xf32>
    tpu.vector_store %arg24[%c0_225, %c0_226], %356 {strides = array<i32>} : memref<64x8xf32, #tpu.memory_space<vmem>>, vector<64x8xf32>,
    %358 = vector.extract_strided_slice %355 {offsets = [0, 0], sizes = [6, 8], strides = [1, 1]} : vector<51x8xf32> to vector<6x8xf32>
    %c9_227 = arith.constant 9 : index
    %c0_228 = arith.constant 0 : index
    %359 = vector.load %arg24[%c9_227, %c0_228] : memref<64x8xf32, #tpu.memory_space<vmem>>, vector<6x8xf32>
    tpu.vector_store %arg24[%c9_227, %c0_228], %358 {strides = array<i32>} : memref<64x8xf32, #tpu.memory_space<vmem>>, vector<6x8xf32>,
    %360 = vector.extract_strided_slice %355 {offsets = [9, 0], sizes = [6, 8], strides = [1, 1]} : vector<51x8xf32> to vector<6x8xf32>
    %c17_229 = arith.constant 17 : index
    %c0_230 = arith.constant 0 : index
    %361 = vector.load %arg24[%c17_229, %c0_230] : memref<64x8xf32, #tpu.memory_space<vmem>>, vector<6x8xf32>
    tpu.vector_store %arg24[%c17_229, %c0_230], %360 {strides = array<i32>} : memref<64x8xf32, #tpu.memory_space<vmem>>, vector<6x8xf32>,
    %362 = vector.extract_strided_slice %355 {offsets = [18, 0], sizes = [6, 8], strides = [1, 1]} : vector<51x8xf32> to vector<6x8xf32>
    %c25_231 = arith.constant 25 : index
    %c0_232 = arith.constant 0 : index
    %363 = vector.load %arg24[%c25_231, %c0_232] : memref<64x8xf32, #tpu.memory_space<vmem>>, vector<6x8xf32>
    tpu.vector_store %arg24[%c25_231, %c0_232], %362 {strides = array<i32>} : memref<64x8xf32, #tpu.memory_space<vmem>>, vector<6x8xf32>,
    %364 = vector.extract_strided_slice %355 {offsets = [27, 0], sizes = [6, 8], strides = [1, 1]} : vector<51x8xf32> to vector<6x8xf32>
    %c33_233 = arith.constant 33 : index
    %c0_234 = arith.constant 0 : index
    %365 = vector.load %arg24[%c33_233, %c0_234] : memref<64x8xf32, #tpu.memory_space<vmem>>, vector<6x8xf32>
    tpu.vector_store %arg24[%c33_233, %c0_234], %364 {strides = array<i32>} : memref<64x8xf32, #tpu.memory_space<vmem>>, vector<6x8xf32>,
    %366 = vector.extract_strided_slice %355 {offsets = [36, 0], sizes = [6, 8], strides = [1, 1]} : vector<51x8xf32> to vector<6x8xf32>
    %c41_235 = arith.constant 41 : index
    %c0_236 = arith.constant 0 : index
    %367 = vector.load %arg24[%c41_235, %c0_236] : memref<64x8xf32, #tpu.memory_space<vmem>>, vector<6x8xf32>
    tpu.vector_store %arg24[%c41_235, %c0_236], %366 {strides = array<i32>} : memref<64x8xf32, #tpu.memory_space<vmem>>, vector<6x8xf32>,
    %368 = vector.extract_strided_slice %355 {offsets = [45, 0], sizes = [6, 8], strides = [1, 1]} : vector<51x8xf32> to vector<6x8xf32>
    %c49 = arith.constant 49 : index
    %c0_237 = arith.constant 0 : index
    %369 = vector.load %arg24[%c49, %c0_237] : memref<64x8xf32, #tpu.memory_space<vmem>>, vector<6x8xf32>
    tpu.vector_store %arg24[%c49, %c0_237], %368 {strides = array<i32>} : memref<64x8xf32, #tpu.memory_space<vmem>>, vector<6x8xf32>,
    %c0_238 = arith.constant 0 : index
    %c0_239 = arith.constant 0 : index
    %370 = vector.load %arg24[%c0_238, %c0_239] : memref<64x8xf32, #tpu.memory_space<vmem>>, vector<64x8xf32>
    %371 = vector.extract_strided_slice %370 {offsets = [0, 0], sizes = [46, 8], strides = [1, 1]} : vector<64x8xf32> to vector<46x8xf32>
    %c0_240 = arith.constant 0 : index
    %c0_241 = arith.constant 0 : index
    %c0_242 = arith.constant 0 : index
    %372 = vector.load %arg7[%c0_240, %c0_241, %c0_242] : memref<9x8x8xf32, #tpu.memory_space<vmem>>, vector<1x8x8xf32>
    %373 = vector.shape_cast %372 : vector<1x8x8xf32> to vector<8x8xf32>
    %cst_243 = arith.constant dense<0.000000e+00> : vector<46x8xf32>
    %374 = tpu.matmul %371, %373, %cst_243 {dimension_numbers = #tpu.dot_dimension_numbers<[1], [0], [0], [1], [0, 0, 1, 1], [], []>} : vector<46x8xf32>, vector<8x8xf32>, vector<46x8xf32> -> vector<46x8xf32>
    %375 = vector.extract_strided_slice %370 {offsets = [1, 0], sizes = [46, 8], strides = [1, 1]} : vector<64x8xf32> to vector<46x8xf32>
    %c1_244 = arith.constant 1 : index
    %c0_245 = arith.constant 0 : index
    %c0_246 = arith.constant 0 : index
    %376 = vector.load %arg7[%c1_244, %c0_245, %c0_246] : memref<9x8x8xf32, #tpu.memory_space<vmem>>, vector<1x8x8xf32>
    %377 = vector.shape_cast %376 : vector<1x8x8xf32> to vector<8x8xf32>
    %cst_247 = arith.constant dense<0.000000e+00> : vector<46x8xf32>
    %378 = tpu.matmul %375, %377, %cst_247 {dimension_numbers = #tpu.dot_dimension_numbers<[1], [0], [0], [1], [0, 0, 1, 1], [], []>} : vector<46x8xf32>, vector<8x8xf32>, vector<46x8xf32> -> vector<46x8xf32>
    %379 = arith.addf %374, %378 : vector<46x8xf32>
    %380 = vector.extract_strided_slice %370 {offsets = [2, 0], sizes = [46, 8], strides = [1, 1]} : vector<64x8xf32> to vector<46x8xf32>
    %c2_248 = arith.constant 2 : index
    %c0_249 = arith.constant 0 : index
    %c0_250 = arith.constant 0 : index
    %381 = vector.load %arg7[%c2_248, %c0_249, %c0_250] : memref<9x8x8xf32, #tpu.memory_space<vmem>>, vector<1x8x8xf32>
    %382 = vector.shape_cast %381 : vector<1x8x8xf32> to vector<8x8xf32>
    %cst_251 = arith.constant dense<0.000000e+00> : vector<46x8xf32>
    %383 = tpu.matmul %380, %382, %cst_251 {dimension_numbers = #tpu.dot_dimension_numbers<[1], [0], [0], [1], [0, 0, 1, 1], [], []>} : vector<46x8xf32>, vector<8x8xf32>, vector<46x8xf32> -> vector<46x8xf32>
    %384 = arith.addf %379, %383 : vector<46x8xf32>
    %385 = vector.extract_strided_slice %370 {offsets = [8, 0], sizes = [46, 8], strides = [1, 1]} : vector<64x8xf32> to vector<46x8xf32>
    %c3_252 = arith.constant 3 : index
    %c0_253 = arith.constant 0 : index
    %c0_254 = arith.constant 0 : index
    %386 = vector.load %arg7[%c3_252, %c0_253, %c0_254] : memref<9x8x8xf32, #tpu.memory_space<vmem>>, vector<1x8x8xf32>
    %387 = vector.shape_cast %386 : vector<1x8x8xf32> to vector<8x8xf32>
    %cst_255 = arith.constant dense<0.000000e+00> : vector<46x8xf32>
    %388 = tpu.matmul %385, %387, %cst_255 {dimension_numbers = #tpu.dot_dimension_numbers<[1], [0], [0], [1], [0, 0, 1, 1], [], []>} : vector<46x8xf32>, vector<8x8xf32>, vector<46x8xf32> -> vector<46x8xf32>
    %389 = arith.addf %384, %388 : vector<46x8xf32>
    %390 = vector.extract_strided_slice %370 {offsets = [9, 0], sizes = [46, 8], strides = [1, 1]} : vector<64x8xf32> to vector<46x8xf32>
    %c4_256 = arith.constant 4 : index
    %c0_257 = arith.constant 0 : index
    %c0_258 = arith.constant 0 : index
    %391 = vector.load %arg7[%c4_256, %c0_257, %c0_258] : memref<9x8x8xf32, #tpu.memory_space<vmem>>, vector<1x8x8xf32>
    %392 = vector.shape_cast %391 : vector<1x8x8xf32> to vector<8x8xf32>
    %cst_259 = arith.constant dense<0.000000e+00> : vector<46x8xf32>
    %393 = tpu.matmul %390, %392, %cst_259 {dimension_numbers = #tpu.dot_dimension_numbers<[1], [0], [0], [1], [0, 0, 1, 1], [], []>} : vector<46x8xf32>, vector<8x8xf32>, vector<46x8xf32> -> vector<46x8xf32>
    %394 = arith.addf %389, %393 : vector<46x8xf32>
    %395 = vector.extract_strided_slice %370 {offsets = [10, 0], sizes = [46, 8], strides = [1, 1]} : vector<64x8xf32> to vector<46x8xf32>
    %c5_260 = arith.constant 5 : index
    %c0_261 = arith.constant 0 : index
    %c0_262 = arith.constant 0 : index
    %396 = vector.load %arg7[%c5_260, %c0_261, %c0_262] : memref<9x8x8xf32, #tpu.memory_space<vmem>>, vector<1x8x8xf32>
    %397 = vector.shape_cast %396 : vector<1x8x8xf32> to vector<8x8xf32>
    %cst_263 = arith.constant dense<0.000000e+00> : vector<46x8xf32>
    %398 = tpu.matmul %395, %397, %cst_263 {dimension_numbers = #tpu.dot_dimension_numbers<[1], [0], [0], [1], [0, 0, 1, 1], [], []>} : vector<46x8xf32>, vector<8x8xf32>, vector<46x8xf32> -> vector<46x8xf32>
    %399 = arith.addf %394, %398 : vector<46x8xf32>
    %400 = vector.extract_strided_slice %370 {offsets = [16, 0], sizes = [46, 8], strides = [1, 1]} : vector<64x8xf32> to vector<46x8xf32>
    %c6_264 = arith.constant 6 : index
    %c0_265 = arith.constant 0 : index
    %c0_266 = arith.constant 0 : index
    %401 = vector.load %arg7[%c6_264, %c0_265, %c0_266] : memref<9x8x8xf32, #tpu.memory_space<vmem>>, vector<1x8x8xf32>
    %402 = vector.shape_cast %401 : vector<1x8x8xf32> to vector<8x8xf32>
    %cst_267 = arith.constant dense<0.000000e+00> : vector<46x8xf32>
    %403 = tpu.matmul %400, %402, %cst_267 {dimension_numbers = #tpu.dot_dimension_numbers<[1], [0], [0], [1], [0, 0, 1, 1], [], []>} : vector<46x8xf32>, vector<8x8xf32>, vector<46x8xf32> -> vector<46x8xf32>
    %404 = arith.addf %399, %403 : vector<46x8xf32>
    %405 = vector.extract_strided_slice %370 {offsets = [17, 0], sizes = [46, 8], strides = [1, 1]} : vector<64x8xf32> to vector<46x8xf32>
    %c7_268 = arith.constant 7 : index
    %c0_269 = arith.constant 0 : index
    %c0_270 = arith.constant 0 : index
    %406 = vector.load %arg7[%c7_268, %c0_269, %c0_270] : memref<9x8x8xf32, #tpu.memory_space<vmem>>, vector<1x8x8xf32>
    %407 = vector.shape_cast %406 : vector<1x8x8xf32> to vector<8x8xf32>
    %cst_271 = arith.constant dense<0.000000e+00> : vector<46x8xf32>
    %408 = tpu.matmul %405, %407, %cst_271 {dimension_numbers = #tpu.dot_dimension_numbers<[1], [0], [0], [1], [0, 0, 1, 1], [], []>} : vector<46x8xf32>, vector<8x8xf32>, vector<46x8xf32> -> vector<46x8xf32>
    %409 = arith.addf %404, %408 : vector<46x8xf32>
    %410 = vector.extract_strided_slice %370 {offsets = [18, 0], sizes = [46, 8], strides = [1, 1]} : vector<64x8xf32> to vector<46x8xf32>
    %c8_272 = arith.constant 8 : index
    %c0_273 = arith.constant 0 : index
    %c0_274 = arith.constant 0 : index
    %411 = vector.load %arg7[%c8_272, %c0_273, %c0_274] : memref<9x8x8xf32, #tpu.memory_space<vmem>>, vector<1x8x8xf32>
    %412 = vector.shape_cast %411 : vector<1x8x8xf32> to vector<8x8xf32>
    %cst_275 = arith.constant dense<0.000000e+00> : vector<46x8xf32>
    %413 = tpu.matmul %410, %412, %cst_275 {dimension_numbers = #tpu.dot_dimension_numbers<[1], [0], [0], [1], [0, 0, 1, 1], [], []>} : vector<46x8xf32>, vector<8x8xf32>, vector<46x8xf32> -> vector<46x8xf32>
    %414 = arith.addf %409, %413 : vector<46x8xf32>
    %c0_276 = arith.constant 0 : index
    %c0_277 = arith.constant 0 : index
    %415 = vector.load %arg8[%c0_276, %c0_277] : memref<1x8xf32, #tpu.memory_space<vmem>>, vector<1x8xf32>
    %416 = vector.broadcast %415 : vector<1x8xf32> to vector<46x8xf32>
    %417 = arith.addf %414, %416 : vector<46x8xf32>
    %418 = vector.extract_strided_slice %417 {offsets = [0, 0], sizes = [37, 8], strides = [1, 1]} : vector<46x8xf32> to vector<37x8xf32>
    %419 = vector.extract_strided_slice %417 {offsets = [1, 0], sizes = [37, 8], strides = [1, 1]} : vector<46x8xf32> to vector<37x8xf32>
    %420 = arith.maximumf %418, %419 : vector<37x8xf32>
    %421 = vector.extract_strided_slice %417 {offsets = [8, 0], sizes = [37, 8], strides = [1, 1]} : vector<46x8xf32> to vector<37x8xf32>
    %422 = vector.extract_strided_slice %417 {offsets = [9, 0], sizes = [37, 8], strides = [1, 1]} : vector<46x8xf32> to vector<37x8xf32>
    %423 = arith.maximumf %421, %422 : vector<37x8xf32>
    %424 = arith.maximumf %420, %423 : vector<37x8xf32>
    %cst_278 = arith.constant 0.000000e+00 : f32
    %425 = vector.broadcast %cst_278 : f32 to vector<37x8xf32>
    %426 = arith.cmpf ogt, %424, %425 : vector<37x8xf32>
    %cst_279 = arith.constant 0.00999999977 : f32
    %427 = vector.broadcast %cst_279 : f32 to vector<37x8xf32>
    %428 = arith.mulf %427, %424 : vector<37x8xf32>
    %429 = arith.select %426, %424, %428 : vector<37x8xi1>, vector<37x8xf32>
    %cst_280 = arith.constant 0.000000e+00 : f32
    %430 = vector.broadcast %cst_280 : f32 to vector<49x8xf32>
    %c0_281 = arith.constant 0 : index
    %c0_282 = arith.constant 0 : index
    %431 = vector.load %arg25[%c0_281, %c0_282] : memref<49x8xf32, #tpu.memory_space<vmem>>, vector<49x8xf32>
    tpu.vector_store %arg25[%c0_281, %c0_282], %430 {strides = array<i32>} : memref<49x8xf32, #tpu.memory_space<vmem>>, vector<49x8xf32>,
    %432 = vector.extract_strided_slice %429 {offsets = [0, 0], sizes = [5, 8], strides = [1, 1]} : vector<37x8xf32> to vector<5x8xf32>
    %c8_283 = arith.constant 8 : index
    %c0_284 = arith.constant 0 : index
    %433 = vector.load %arg25[%c8_283, %c0_284] : memref<49x8xf32, #tpu.memory_space<vmem>>, vector<5x8xf32>
    tpu.vector_store %arg25[%c8_283, %c0_284], %432 {strides = array<i32>} : memref<49x8xf32, #tpu.memory_space<vmem>>, vector<5x8xf32>,
    %434 = vector.extract_strided_slice %429 {offsets = [8, 0], sizes = [5, 8], strides = [1, 1]} : vector<37x8xf32> to vector<5x8xf32>
    %c15_285 = arith.constant 15 : index
    %c0_286 = arith.constant 0 : index
    %435 = vector.load %arg25[%c15_285, %c0_286] : memref<49x8xf32, #tpu.memory_space<vmem>>, vector<5x8xf32>
    tpu.vector_store %arg25[%c15_285, %c0_286], %434 {strides = array<i32>} : memref<49x8xf32, #tpu.memory_space<vmem>>, vector<5x8xf32>,
    %436 = vector.extract_strided_slice %429 {offsets = [16, 0], sizes = [5, 8], strides = [1, 1]} : vector<37x8xf32> to vector<5x8xf32>
    %c22_287 = arith.constant 22 : index
    %c0_288 = arith.constant 0 : index
    %437 = vector.load %arg25[%c22_287, %c0_288] : memref<49x8xf32, #tpu.memory_space<vmem>>, vector<5x8xf32>
    tpu.vector_store %arg25[%c22_287, %c0_288], %436 {strides = array<i32>} : memref<49x8xf32, #tpu.memory_space<vmem>>, vector<5x8xf32>,
    %438 = vector.extract_strided_slice %429 {offsets = [24, 0], sizes = [5, 8], strides = [1, 1]} : vector<37x8xf32> to vector<5x8xf32>
    %c29_289 = arith.constant 29 : index
    %c0_290 = arith.constant 0 : index
    %439 = vector.load %arg25[%c29_289, %c0_290] : memref<49x8xf32, #tpu.memory_space<vmem>>, vector<5x8xf32>
    tpu.vector_store %arg25[%c29_289, %c0_290], %438 {strides = array<i32>} : memref<49x8xf32, #tpu.memory_space<vmem>>, vector<5x8xf32>,
    %440 = vector.extract_strided_slice %429 {offsets = [32, 0], sizes = [5, 8], strides = [1, 1]} : vector<37x8xf32> to vector<5x8xf32>
    %c36_291 = arith.constant 36 : index
    %c0_292 = arith.constant 0 : index
    %441 = vector.load %arg25[%c36_291, %c0_292] : memref<49x8xf32, #tpu.memory_space<vmem>>, vector<5x8xf32>
    tpu.vector_store %arg25[%c36_291, %c0_292], %440 {strides = array<i32>} : memref<49x8xf32, #tpu.memory_space<vmem>>, vector<5x8xf32>,
    %c0_293 = arith.constant 0 : index
    %c0_294 = arith.constant 0 : index
    %442 = vector.load %arg25[%c0_293, %c0_294] : memref<49x8xf32, #tpu.memory_space<vmem>>, vector<49x8xf32>
    %443 = vector.extract_strided_slice %442 {offsets = [0, 0], sizes = [33, 8], strides = [1, 1]} : vector<49x8xf32> to vector<33x8xf32>
    %c0_295 = arith.constant 0 : index
    %c0_296 = arith.constant 0 : index
    %c0_297 = arith.constant 0 : index
    %444 = vector.load %arg9[%c0_295, %c0_296, %c0_297] : memref<9x8x8xf32, #tpu.memory_space<vmem>>, vector<1x8x8xf32>
    %445 = vector.shape_cast %444 : vector<1x8x8xf32> to vector<8x8xf32>
    %cst_298 = arith.constant dense<0.000000e+00> : vector<33x8xf32>
    %446 = tpu.matmul %443, %445, %cst_298 {dimension_numbers = #tpu.dot_dimension_numbers<[1], [0], [0], [1], [0, 0, 1, 1], [], []>} : vector<33x8xf32>, vector<8x8xf32>, vector<33x8xf32> -> vector<33x8xf32>
    %447 = vector.extract_strided_slice %442 {offsets = [1, 0], sizes = [33, 8], strides = [1, 1]} : vector<49x8xf32> to vector<33x8xf32>
    %c1_299 = arith.constant 1 : index
    %c0_300 = arith.constant 0 : index
    %c0_301 = arith.constant 0 : index
    %448 = vector.load %arg9[%c1_299, %c0_300, %c0_301] : memref<9x8x8xf32, #tpu.memory_space<vmem>>, vector<1x8x8xf32>
    %449 = vector.shape_cast %448 : vector<1x8x8xf32> to vector<8x8xf32>
    %cst_302 = arith.constant dense<0.000000e+00> : vector<33x8xf32>
    %450 = tpu.matmul %447, %449, %cst_302 {dimension_numbers = #tpu.dot_dimension_numbers<[1], [0], [0], [1], [0, 0, 1, 1], [], []>} : vector<33x8xf32>, vector<8x8xf32>, vector<33x8xf32> -> vector<33x8xf32>
    %451 = arith.addf %446, %450 : vector<33x8xf32>
    %452 = vector.extract_strided_slice %442 {offsets = [2, 0], sizes = [33, 8], strides = [1, 1]} : vector<49x8xf32> to vector<33x8xf32>
    %c2_303 = arith.constant 2 : index
    %c0_304 = arith.constant 0 : index
    %c0_305 = arith.constant 0 : index
    %453 = vector.load %arg9[%c2_303, %c0_304, %c0_305] : memref<9x8x8xf32, #tpu.memory_space<vmem>>, vector<1x8x8xf32>
    %454 = vector.shape_cast %453 : vector<1x8x8xf32> to vector<8x8xf32>
    %cst_306 = arith.constant dense<0.000000e+00> : vector<33x8xf32>
    %455 = tpu.matmul %452, %454, %cst_306 {dimension_numbers = #tpu.dot_dimension_numbers<[1], [0], [0], [1], [0, 0, 1, 1], [], []>} : vector<33x8xf32>, vector<8x8xf32>, vector<33x8xf32> -> vector<33x8xf32>
    %456 = arith.addf %451, %455 : vector<33x8xf32>
    %457 = vector.extract_strided_slice %442 {offsets = [7, 0], sizes = [33, 8], strides = [1, 1]} : vector<49x8xf32> to vector<33x8xf32>
    %c3_307 = arith.constant 3 : index
    %c0_308 = arith.constant 0 : index
    %c0_309 = arith.constant 0 : index
    %458 = vector.load %arg9[%c3_307, %c0_308, %c0_309] : memref<9x8x8xf32, #tpu.memory_space<vmem>>, vector<1x8x8xf32>
    %459 = vector.shape_cast %458 : vector<1x8x8xf32> to vector<8x8xf32>
    %cst_310 = arith.constant dense<0.000000e+00> : vector<33x8xf32>
    %460 = tpu.matmul %457, %459, %cst_310 {dimension_numbers = #tpu.dot_dimension_numbers<[1], [0], [0], [1], [0, 0, 1, 1], [], []>} : vector<33x8xf32>, vector<8x8xf32>, vector<33x8xf32> -> vector<33x8xf32>
    %461 = arith.addf %456, %460 : vector<33x8xf32>
    %462 = vector.extract_strided_slice %442 {offsets = [8, 0], sizes = [33, 8], strides = [1, 1]} : vector<49x8xf32> to vector<33x8xf32>
    %c4_311 = arith.constant 4 : index
    %c0_312 = arith.constant 0 : index
    %c0_313 = arith.constant 0 : index
    %463 = vector.load %arg9[%c4_311, %c0_312, %c0_313] : memref<9x8x8xf32, #tpu.memory_space<vmem>>, vector<1x8x8xf32>
    %464 = vector.shape_cast %463 : vector<1x8x8xf32> to vector<8x8xf32>
    %cst_314 = arith.constant dense<0.000000e+00> : vector<33x8xf32>
    %465 = tpu.matmul %462, %464, %cst_314 {dimension_numbers = #tpu.dot_dimension_numbers<[1], [0], [0], [1], [0, 0, 1, 1], [], []>} : vector<33x8xf32>, vector<8x8xf32>, vector<33x8xf32> -> vector<33x8xf32>
    %466 = arith.addf %461, %465 : vector<33x8xf32>
    %467 = vector.extract_strided_slice %442 {offsets = [9, 0], sizes = [33, 8], strides = [1, 1]} : vector<49x8xf32> to vector<33x8xf32>
    %c5_315 = arith.constant 5 : index
    %c0_316 = arith.constant 0 : index
    %c0_317 = arith.constant 0 : index
    %468 = vector.load %arg9[%c5_315, %c0_316, %c0_317] : memref<9x8x8xf32, #tpu.memory_space<vmem>>, vector<1x8x8xf32>
    %469 = vector.shape_cast %468 : vector<1x8x8xf32> to vector<8x8xf32>
    %cst_318 = arith.constant dense<0.000000e+00> : vector<33x8xf32>
    %470 = tpu.matmul %467, %469, %cst_318 {dimension_numbers = #tpu.dot_dimension_numbers<[1], [0], [0], [1], [0, 0, 1, 1], [], []>} : vector<33x8xf32>, vector<8x8xf32>, vector<33x8xf32> -> vector<33x8xf32>
    %471 = arith.addf %466, %470 : vector<33x8xf32>
    %472 = vector.extract_strided_slice %442 {offsets = [14, 0], sizes = [33, 8], strides = [1, 1]} : vector<49x8xf32> to vector<33x8xf32>
    %c6_319 = arith.constant 6 : index
    %c0_320 = arith.constant 0 : index
    %c0_321 = arith.constant 0 : index
    %473 = vector.load %arg9[%c6_319, %c0_320, %c0_321] : memref<9x8x8xf32, #tpu.memory_space<vmem>>, vector<1x8x8xf32>
    %474 = vector.shape_cast %473 : vector<1x8x8xf32> to vector<8x8xf32>
    %cst_322 = arith.constant dense<0.000000e+00> : vector<33x8xf32>
    %475 = tpu.matmul %472, %474, %cst_322 {dimension_numbers = #tpu.dot_dimension_numbers<[1], [0], [0], [1], [0, 0, 1, 1], [], []>} : vector<33x8xf32>, vector<8x8xf32>, vector<33x8xf32> -> vector<33x8xf32>
    %476 = arith.addf %471, %475 : vector<33x8xf32>
    %477 = vector.extract_strided_slice %442 {offsets = [15, 0], sizes = [33, 8], strides = [1, 1]} : vector<49x8xf32> to vector<33x8xf32>
    %c7_323 = arith.constant 7 : index
    %c0_324 = arith.constant 0 : index
    %c0_325 = arith.constant 0 : index
    %478 = vector.load %arg9[%c7_323, %c0_324, %c0_325] : memref<9x8x8xf32, #tpu.memory_space<vmem>>, vector<1x8x8xf32>
    %479 = vector.shape_cast %478 : vector<1x8x8xf32> to vector<8x8xf32>
    %cst_326 = arith.constant dense<0.000000e+00> : vector<33x8xf32>
    %480 = tpu.matmul %477, %479, %cst_326 {dimension_numbers = #tpu.dot_dimension_numbers<[1], [0], [0], [1], [0, 0, 1, 1], [], []>} : vector<33x8xf32>, vector<8x8xf32>, vector<33x8xf32> -> vector<33x8xf32>
    %481 = arith.addf %476, %480 : vector<33x8xf32>
    %482 = vector.extract_strided_slice %442 {offsets = [16, 0], sizes = [33, 8], strides = [1, 1]} : vector<49x8xf32> to vector<33x8xf32>
    %c8_327 = arith.constant 8 : index
    %c0_328 = arith.constant 0 : index
    %c0_329 = arith.constant 0 : index
    %483 = vector.load %arg9[%c8_327, %c0_328, %c0_329] : memref<9x8x8xf32, #tpu.memory_space<vmem>>, vector<1x8x8xf32>
    %484 = vector.shape_cast %483 : vector<1x8x8xf32> to vector<8x8xf32>
    %cst_330 = arith.constant dense<0.000000e+00> : vector<33x8xf32>
    %485 = tpu.matmul %482, %484, %cst_330 {dimension_numbers = #tpu.dot_dimension_numbers<[1], [0], [0], [1], [0, 0, 1, 1], [], []>} : vector<33x8xf32>, vector<8x8xf32>, vector<33x8xf32> -> vector<33x8xf32>
    %486 = arith.addf %481, %485 : vector<33x8xf32>
    %c0_331 = arith.constant 0 : index
    %c0_332 = arith.constant 0 : index
    %487 = vector.load %arg10[%c0_331, %c0_332] : memref<1x8xf32, #tpu.memory_space<vmem>>, vector<1x8xf32>
    %488 = vector.broadcast %487 : vector<1x8xf32> to vector<33x8xf32>
    %489 = arith.addf %486, %488 : vector<33x8xf32>
    %490 = vector.extract_strided_slice %489 {offsets = [0, 0], sizes = [25, 8], strides = [1, 1]} : vector<33x8xf32> to vector<25x8xf32>
    %491 = vector.extract_strided_slice %489 {offsets = [1, 0], sizes = [25, 8], strides = [1, 1]} : vector<33x8xf32> to vector<25x8xf32>
    %492 = arith.maximumf %490, %491 : vector<25x8xf32>
    %493 = vector.extract_strided_slice %489 {offsets = [7, 0], sizes = [25, 8], strides = [1, 1]} : vector<33x8xf32> to vector<25x8xf32>
    %494 = vector.extract_strided_slice %489 {offsets = [8, 0], sizes = [25, 8], strides = [1, 1]} : vector<33x8xf32> to vector<25x8xf32>
    %495 = arith.maximumf %493, %494 : vector<25x8xf32>
    %496 = arith.maximumf %492, %495 : vector<25x8xf32>
    %cst_333 = arith.constant 0.000000e+00 : f32
    %497 = vector.broadcast %cst_333 : f32 to vector<25x8xf32>
    %498 = arith.cmpf ogt, %496, %497 : vector<25x8xf32>
    %cst_334 = arith.constant 0.00999999977 : f32
    %499 = vector.broadcast %cst_334 : f32 to vector<25x8xf32>
    %500 = arith.mulf %499, %496 : vector<25x8xf32>
    %501 = arith.select %498, %496, %500 : vector<25x8xi1>, vector<25x8xf32>
    %cst_335 = arith.constant 0.000000e+00 : f32
    %502 = vector.broadcast %cst_335 : f32 to vector<36x8xf32>
    %c0_336 = arith.constant 0 : index
    %c0_337 = arith.constant 0 : index
    %503 = vector.load %arg26[%c0_336, %c0_337] : memref<36x8xf32, #tpu.memory_space<vmem>>, vector<36x8xf32>
    tpu.vector_store %arg26[%c0_336, %c0_337], %502 {strides = array<i32>} : memref<36x8xf32, #tpu.memory_space<vmem>>, vector<36x8xf32>,
    %504 = vector.extract_strided_slice %501 {offsets = [0, 0], sizes = [4, 8], strides = [1, 1]} : vector<25x8xf32> to vector<4x8xf32>
    %c7_338 = arith.constant 7 : index
    %c0_339 = arith.constant 0 : index
    %505 = vector.load %arg26[%c7_338, %c0_339] : memref<36x8xf32, #tpu.memory_space<vmem>>, vector<4x8xf32>
    tpu.vector_store %arg26[%c7_338, %c0_339], %504 {strides = array<i32>} : memref<36x8xf32, #tpu.memory_space<vmem>>, vector<4x8xf32>,
    %506 = vector.extract_strided_slice %501 {offsets = [7, 0], sizes = [4, 8], strides = [1, 1]} : vector<25x8xf32> to vector<4x8xf32>
    %c13_340 = arith.constant 13 : index
    %c0_341 = arith.constant 0 : index
    %507 = vector.load %arg26[%c13_340, %c0_341] : memref<36x8xf32, #tpu.memory_space<vmem>>, vector<4x8xf32>
    tpu.vector_store %arg26[%c13_340, %c0_341], %506 {strides = array<i32>} : memref<36x8xf32, #tpu.memory_space<vmem>>, vector<4x8xf32>,
    %508 = vector.extract_strided_slice %501 {offsets = [14, 0], sizes = [4, 8], strides = [1, 1]} : vector<25x8xf32> to vector<4x8xf32>
    %c19_342 = arith.constant 19 : index
    %c0_343 = arith.constant 0 : index
    %509 = vector.load %arg26[%c19_342, %c0_343] : memref<36x8xf32, #tpu.memory_space<vmem>>, vector<4x8xf32>
    tpu.vector_store %arg26[%c19_342, %c0_343], %508 {strides = array<i32>} : memref<36x8xf32, #tpu.memory_space<vmem>>, vector<4x8xf32>,
    %510 = vector.extract_strided_slice %501 {offsets = [21, 0], sizes = [4, 8], strides = [1, 1]} : vector<25x8xf32> to vector<4x8xf32>
    %c25_344 = arith.constant 25 : index
    %c0_345 = arith.constant 0 : index
    %511 = vector.load %arg26[%c25_344, %c0_345] : memref<36x8xf32, #tpu.memory_space<vmem>>, vector<4x8xf32>
    tpu.vector_store %arg26[%c25_344, %c0_345], %510 {strides = array<i32>} : memref<36x8xf32, #tpu.memory_space<vmem>>, vector<4x8xf32>,
    %c0_346 = arith.constant 0 : index
    %c0_347 = arith.constant 0 : index
    %512 = vector.load %arg26[%c0_346, %c0_347] : memref<36x8xf32, #tpu.memory_space<vmem>>, vector<36x8xf32>
    %513 = vector.extract_strided_slice %512 {offsets = [0, 0], sizes = [22, 8], strides = [1, 1]} : vector<36x8xf32> to vector<22x8xf32>
    %c0_348 = arith.constant 0 : index
    %c0_349 = arith.constant 0 : index
    %c0_350 = arith.constant 0 : index
    %514 = vector.load %arg11[%c0_348, %c0_349, %c0_350] : memref<9x8x8xf32, #tpu.memory_space<vmem>>, vector<1x8x8xf32>
    %515 = vector.shape_cast %514 : vector<1x8x8xf32> to vector<8x8xf32>
    %cst_351 = arith.constant dense<0.000000e+00> : vector<22x8xf32>
    %516 = tpu.matmul %513, %515, %cst_351 {dimension_numbers = #tpu.dot_dimension_numbers<[1], [0], [0], [1], [0, 0, 1, 1], [], []>} : vector<22x8xf32>, vector<8x8xf32>, vector<22x8xf32> -> vector<22x8xf32>
    %517 = vector.extract_strided_slice %512 {offsets = [1, 0], sizes = [22, 8], strides = [1, 1]} : vector<36x8xf32> to vector<22x8xf32>
    %c1_352 = arith.constant 1 : index
    %c0_353 = arith.constant 0 : index
    %c0_354 = arith.constant 0 : index
    %518 = vector.load %arg11[%c1_352, %c0_353, %c0_354] : memref<9x8x8xf32, #tpu.memory_space<vmem>>, vector<1x8x8xf32>
    %519 = vector.shape_cast %518 : vector<1x8x8xf32> to vector<8x8xf32>
    %cst_355 = arith.constant dense<0.000000e+00> : vector<22x8xf32>
    %520 = tpu.matmul %517, %519, %cst_355 {dimension_numbers = #tpu.dot_dimension_numbers<[1], [0], [0], [1], [0, 0, 1, 1], [], []>} : vector<22x8xf32>, vector<8x8xf32>, vector<22x8xf32> -> vector<22x8xf32>
    %521 = arith.addf %516, %520 : vector<22x8xf32>
    %522 = vector.extract_strided_slice %512 {offsets = [2, 0], sizes = [22, 8], strides = [1, 1]} : vector<36x8xf32> to vector<22x8xf32>
    %c2_356 = arith.constant 2 : index
    %c0_357 = arith.constant 0 : index
    %c0_358 = arith.constant 0 : index
    %523 = vector.load %arg11[%c2_356, %c0_357, %c0_358] : memref<9x8x8xf32, #tpu.memory_space<vmem>>, vector<1x8x8xf32>
    %524 = vector.shape_cast %523 : vector<1x8x8xf32> to vector<8x8xf32>
    %cst_359 = arith.constant dense<0.000000e+00> : vector<22x8xf32>
    %525 = tpu.matmul %522, %524, %cst_359 {dimension_numbers = #tpu.dot_dimension_numbers<[1], [0], [0], [1], [0, 0, 1, 1], [], []>} : vector<22x8xf32>, vector<8x8xf32>, vector<22x8xf32> -> vector<22x8xf32>
    %526 = arith.addf %521, %525 : vector<22x8xf32>
    %527 = vector.extract_strided_slice %512 {offsets = [6, 0], sizes = [22, 8], strides = [1, 1]} : vector<36x8xf32> to vector<22x8xf32>
    %c3_360 = arith.constant 3 : index
    %c0_361 = arith.constant 0 : index
    %c0_362 = arith.constant 0 : index
    %528 = vector.load %arg11[%c3_360, %c0_361, %c0_362] : memref<9x8x8xf32, #tpu.memory_space<vmem>>, vector<1x8x8xf32>
    %529 = vector.shape_cast %528 : vector<1x8x8xf32> to vector<8x8xf32>
    %cst_363 = arith.constant dense<0.000000e+00> : vector<22x8xf32>
    %530 = tpu.matmul %527, %529, %cst_363 {dimension_numbers = #tpu.dot_dimension_numbers<[1], [0], [0], [1], [0, 0, 1, 1], [], []>} : vector<22x8xf32>, vector<8x8xf32>, vector<22x8xf32> -> vector<22x8xf32>
    %531 = arith.addf %526, %530 : vector<22x8xf32>
    %532 = vector.extract_strided_slice %512 {offsets = [7, 0], sizes = [22, 8], strides = [1, 1]} : vector<36x8xf32> to vector<22x8xf32>
    %c4_364 = arith.constant 4 : index
    %c0_365 = arith.constant 0 : index
    %c0_366 = arith.constant 0 : index
    %533 = vector.load %arg11[%c4_364, %c0_365, %c0_366] : memref<9x8x8xf32, #tpu.memory_space<vmem>>, vector<1x8x8xf32>
    %534 = vector.shape_cast %533 : vector<1x8x8xf32> to vector<8x8xf32>
    %cst_367 = arith.constant dense<0.000000e+00> : vector<22x8xf32>
    %535 = tpu.matmul %532, %534, %cst_367 {dimension_numbers = #tpu.dot_dimension_numbers<[1], [0], [0], [1], [0, 0, 1, 1], [], []>} : vector<22x8xf32>, vector<8x8xf32>, vector<22x8xf32> -> vector<22x8xf32>
    %536 = arith.addf %531, %535 : vector<22x8xf32>
    %537 = vector.extract_strided_slice %512 {offsets = [8, 0], sizes = [22, 8], strides = [1, 1]} : vector<36x8xf32> to vector<22x8xf32>
    %c5_368 = arith.constant 5 : index
    %c0_369 = arith.constant 0 : index
    %c0_370 = arith.constant 0 : index
    %538 = vector.load %arg11[%c5_368, %c0_369, %c0_370] : memref<9x8x8xf32, #tpu.memory_space<vmem>>, vector<1x8x8xf32>
    %539 = vector.shape_cast %538 : vector<1x8x8xf32> to vector<8x8xf32>
    %cst_371 = arith.constant dense<0.000000e+00> : vector<22x8xf32>
    %540 = tpu.matmul %537, %539, %cst_371 {dimension_numbers = #tpu.dot_dimension_numbers<[1], [0], [0], [1], [0, 0, 1, 1], [], []>} : vector<22x8xf32>, vector<8x8xf32>, vector<22x8xf32> -> vector<22x8xf32>
    %541 = arith.addf %536, %540 : vector<22x8xf32>
    %542 = vector.extract_strided_slice %512 {offsets = [12, 0], sizes = [22, 8], strides = [1, 1]} : vector<36x8xf32> to vector<22x8xf32>
    %c6_372 = arith.constant 6 : index
    %c0_373 = arith.constant 0 : index
    %c0_374 = arith.constant 0 : index
    %543 = vector.load %arg11[%c6_372, %c0_373, %c0_374] : memref<9x8x8xf32, #tpu.memory_space<vmem>>, vector<1x8x8xf32>
    %544 = vector.shape_cast %543 : vector<1x8x8xf32> to vector<8x8xf32>
    %cst_375 = arith.constant dense<0.000000e+00> : vector<22x8xf32>
    %545 = tpu.matmul %542, %544, %cst_375 {dimension_numbers = #tpu.dot_dimension_numbers<[1], [0], [0], [1], [0, 0, 1, 1], [], []>} : vector<22x8xf32>, vector<8x8xf32>, vector<22x8xf32> -> vector<22x8xf32>
    %546 = arith.addf %541, %545 : vector<22x8xf32>
    %547 = vector.extract_strided_slice %512 {offsets = [13, 0], sizes = [22, 8], strides = [1, 1]} : vector<36x8xf32> to vector<22x8xf32>
    %c7_376 = arith.constant 7 : index
    %c0_377 = arith.constant 0 : index
    %c0_378 = arith.constant 0 : index
    %548 = vector.load %arg11[%c7_376, %c0_377, %c0_378] : memref<9x8x8xf32, #tpu.memory_space<vmem>>, vector<1x8x8xf32>
    %549 = vector.shape_cast %548 : vector<1x8x8xf32> to vector<8x8xf32>
    %cst_379 = arith.constant dense<0.000000e+00> : vector<22x8xf32>
    %550 = tpu.matmul %547, %549, %cst_379 {dimension_numbers = #tpu.dot_dimension_numbers<[1], [0], [0], [1], [0, 0, 1, 1], [], []>} : vector<22x8xf32>, vector<8x8xf32>, vector<22x8xf32> -> vector<22x8xf32>
    %551 = arith.addf %546, %550 : vector<22x8xf32>
    %552 = vector.extract_strided_slice %512 {offsets = [14, 0], sizes = [22, 8], strides = [1, 1]} : vector<36x8xf32> to vector<22x8xf32>
    %c8_380 = arith.constant 8 : index
    %c0_381 = arith.constant 0 : index
    %c0_382 = arith.constant 0 : index
    %553 = vector.load %arg11[%c8_380, %c0_381, %c0_382] : memref<9x8x8xf32, #tpu.memory_space<vmem>>, vector<1x8x8xf32>
    %554 = vector.shape_cast %553 : vector<1x8x8xf32> to vector<8x8xf32>
    %cst_383 = arith.constant dense<0.000000e+00> : vector<22x8xf32>
    %555 = tpu.matmul %552, %554, %cst_383 {dimension_numbers = #tpu.dot_dimension_numbers<[1], [0], [0], [1], [0, 0, 1, 1], [], []>} : vector<22x8xf32>, vector<8x8xf32>, vector<22x8xf32> -> vector<22x8xf32>
    %556 = arith.addf %551, %555 : vector<22x8xf32>
    %c0_384 = arith.constant 0 : index
    %c0_385 = arith.constant 0 : index
    %557 = vector.load %arg12[%c0_384, %c0_385] : memref<1x8xf32, #tpu.memory_space<vmem>>, vector<1x8xf32>
    %558 = vector.broadcast %557 : vector<1x8xf32> to vector<22x8xf32>
    %559 = arith.addf %556, %558 : vector<22x8xf32>
    %560 = vector.extract_strided_slice %559 {offsets = [0, 0], sizes = [15, 8], strides = [1, 1]} : vector<22x8xf32> to vector<15x8xf32>
    %561 = vector.extract_strided_slice %559 {offsets = [1, 0], sizes = [15, 8], strides = [1, 1]} : vector<22x8xf32> to vector<15x8xf32>
    %562 = arith.maximumf %560, %561 : vector<15x8xf32>
    %563 = vector.extract_strided_slice %559 {offsets = [6, 0], sizes = [15, 8], strides = [1, 1]} : vector<22x8xf32> to vector<15x8xf32>
    %564 = vector.extract_strided_slice %559 {offsets = [7, 0], sizes = [15, 8], strides = [1, 1]} : vector<22x8xf32> to vector<15x8xf32>
    %565 = arith.maximumf %563, %564 : vector<15x8xf32>
    %566 = arith.maximumf %562, %565 : vector<15x8xf32>
    %cst_386 = arith.constant 0.000000e+00 : f32
    %567 = vector.broadcast %cst_386 : f32 to vector<15x8xf32>
    %568 = arith.cmpf ogt, %566, %567 : vector<15x8xf32>
    %cst_387 = arith.constant 0.00999999977 : f32
    %569 = vector.broadcast %cst_387 : f32 to vector<15x8xf32>
    %570 = arith.mulf %569, %566 : vector<15x8xf32>
    %571 = arith.select %568, %566, %570 : vector<15x8xi1>, vector<15x8xf32>
    %cst_388 = arith.constant 0.000000e+00 : f32
    %572 = vector.broadcast %cst_388 : f32 to vector<25x8xf32>
    %c0_389 = arith.constant 0 : index
    %c0_390 = arith.constant 0 : index
    %573 = vector.load %arg27[%c0_389, %c0_390] : memref<25x8xf32, #tpu.memory_space<vmem>>, vector<25x8xf32>
    tpu.vector_store %arg27[%c0_389, %c0_390], %572 {strides = array<i32>} : memref<25x8xf32, #tpu.memory_space<vmem>>, vector<25x8xf32>,
    %574 = vector.extract_strided_slice %571 {offsets = [0, 0], sizes = [3, 8], strides = [1, 1]} : vector<15x8xf32> to vector<3x8xf32>
    %c6_391 = arith.constant 6 : index
    %c0_392 = arith.constant 0 : index
    %575 = vector.load %arg27[%c6_391, %c0_392] : memref<25x8xf32, #tpu.memory_space<vmem>>, vector<3x8xf32>
    tpu.vector_store %arg27[%c6_391, %c0_392], %574 {strides = array<i32>} : memref<25x8xf32, #tpu.memory_space<vmem>>, vector<3x8xf32>,
    %576 = vector.extract_strided_slice %571 {offsets = [6, 0], sizes = [3, 8], strides = [1, 1]} : vector<15x8xf32> to vector<3x8xf32>
    %c11_393 = arith.constant 11 : index
    %c0_394 = arith.constant 0 : index
    %577 = vector.load %arg27[%c11_393, %c0_394] : memref<25x8xf32, #tpu.memory_space<vmem>>, vector<3x8xf32>
    tpu.vector_store %arg27[%c11_393, %c0_394], %576 {strides = array<i32>} : memref<25x8xf32, #tpu.memory_space<vmem>>, vector<3x8xf32>,
    %578 = vector.extract_strided_slice %571 {offsets = [12, 0], sizes = [3, 8], strides = [1, 1]} : vector<15x8xf32> to vector<3x8xf32>
    %c16_395 = arith.constant 16 : index
    %c0_396 = arith.constant 0 : index
    %579 = vector.load %arg27[%c16_395, %c0_396] : memref<25x8xf32, #tpu.memory_space<vmem>>, vector<3x8xf32>
    tpu.vector_store %arg27[%c16_395, %c0_396], %578 {strides = array<i32>} : memref<25x8xf32, #tpu.memory_space<vmem>>, vector<3x8xf32>,
    %c0_397 = arith.constant 0 : index
    %c0_398 = arith.constant 0 : index
    %580 = vector.load %arg27[%c0_397, %c0_398] : memref<25x8xf32, #tpu.memory_space<vmem>>, vector<25x8xf32>
    %581 = vector.extract_strided_slice %580 {offsets = [0, 0], sizes = [13, 8], strides = [1, 1]} : vector<25x8xf32> to vector<13x8xf32>
    %c0_399 = arith.constant 0 : index
    %c0_400 = arith.constant 0 : index
    %c0_401 = arith.constant 0 : index
    %582 = vector.load %arg13[%c0_399, %c0_400, %c0_401] : memref<9x8x16xf32, #tpu.memory_space<vmem>>, vector<1x8x16xf32>
    %583 = vector.shape_cast %582 : vector<1x8x16xf32> to vector<8x16xf32>
    %cst_402 = arith.constant dense<0.000000e+00> : vector<13x16xf32>
    %584 = tpu.matmul %581, %583, %cst_402 {dimension_numbers = #tpu.dot_dimension_numbers<[1], [0], [0], [1], [0, 0, 1, 1], [], []>} : vector<13x8xf32>, vector<8x16xf32>, vector<13x16xf32> -> vector<13x16xf32>
    %585 = vector.extract_strided_slice %580 {offsets = [1, 0], sizes = [13, 8], strides = [1, 1]} : vector<25x8xf32> to vector<13x8xf32>
    %c1_403 = arith.constant 1 : index
    %c0_404 = arith.constant 0 : index
    %c0_405 = arith.constant 0 : index
    %586 = vector.load %arg13[%c1_403, %c0_404, %c0_405] : memref<9x8x16xf32, #tpu.memory_space<vmem>>, vector<1x8x16xf32>
    %587 = vector.shape_cast %586 : vector<1x8x16xf32> to vector<8x16xf32>
    %cst_406 = arith.constant dense<0.000000e+00> : vector<13x16xf32>
    %588 = tpu.matmul %585, %587, %cst_406 {dimension_numbers = #tpu.dot_dimension_numbers<[1], [0], [0], [1], [0, 0, 1, 1], [], []>} : vector<13x8xf32>, vector<8x16xf32>, vector<13x16xf32> -> vector<13x16xf32>
    %589 = arith.addf %584, %588 : vector<13x16xf32>
    %590 = vector.extract_strided_slice %580 {offsets = [2, 0], sizes = [13, 8], strides = [1, 1]} : vector<25x8xf32> to vector<13x8xf32>
    %c2_407 = arith.constant 2 : index
    %c0_408 = arith.constant 0 : index
    %c0_409 = arith.constant 0 : index
    %591 = vector.load %arg13[%c2_407, %c0_408, %c0_409] : memref<9x8x16xf32, #tpu.memory_space<vmem>>, vector<1x8x16xf32>
    %592 = vector.shape_cast %591 : vector<1x8x16xf32> to vector<8x16xf32>
    %cst_410 = arith.constant dense<0.000000e+00> : vector<13x16xf32>
    %593 = tpu.matmul %590, %592, %cst_410 {dimension_numbers = #tpu.dot_dimension_numbers<[1], [0], [0], [1], [0, 0, 1, 1], [], []>} : vector<13x8xf32>, vector<8x16xf32>, vector<13x16xf32> -> vector<13x16xf32>
    %594 = arith.addf %589, %593 : vector<13x16xf32>
    %595 = vector.extract_strided_slice %580 {offsets = [5, 0], sizes = [13, 8], strides = [1, 1]} : vector<25x8xf32> to vector<13x8xf32>
    %c3_411 = arith.constant 3 : index
    %c0_412 = arith.constant 0 : index
    %c0_413 = arith.constant 0 : index
    %596 = vector.load %arg13[%c3_411, %c0_412, %c0_413] : memref<9x8x16xf32, #tpu.memory_space<vmem>>, vector<1x8x16xf32>
    %597 = vector.shape_cast %596 : vector<1x8x16xf32> to vector<8x16xf32>
    %cst_414 = arith.constant dense<0.000000e+00> : vector<13x16xf32>
    %598 = tpu.matmul %595, %597, %cst_414 {dimension_numbers = #tpu.dot_dimension_numbers<[1], [0], [0], [1], [0, 0, 1, 1], [], []>} : vector<13x8xf32>, vector<8x16xf32>, vector<13x16xf32> -> vector<13x16xf32>
    %599 = arith.addf %594, %598 : vector<13x16xf32>
    %600 = vector.extract_strided_slice %580 {offsets = [6, 0], sizes = [13, 8], strides = [1, 1]} : vector<25x8xf32> to vector<13x8xf32>
    %c4_415 = arith.constant 4 : index
    %c0_416 = arith.constant 0 : index
    %c0_417 = arith.constant 0 : index
    %601 = vector.load %arg13[%c4_415, %c0_416, %c0_417] : memref<9x8x16xf32, #tpu.memory_space<vmem>>, vector<1x8x16xf32>
    %602 = vector.shape_cast %601 : vector<1x8x16xf32> to vector<8x16xf32>
    %cst_418 = arith.constant dense<0.000000e+00> : vector<13x16xf32>
    %603 = tpu.matmul %600, %602, %cst_418 {dimension_numbers = #tpu.dot_dimension_numbers<[1], [0], [0], [1], [0, 0, 1, 1], [], []>} : vector<13x8xf32>, vector<8x16xf32>, vector<13x16xf32> -> vector<13x16xf32>
    %604 = arith.addf %599, %603 : vector<13x16xf32>
    %605 = vector.extract_strided_slice %580 {offsets = [7, 0], sizes = [13, 8], strides = [1, 1]} : vector<25x8xf32> to vector<13x8xf32>
    %c5_419 = arith.constant 5 : index
    %c0_420 = arith.constant 0 : index
    %c0_421 = arith.constant 0 : index
    %606 = vector.load %arg13[%c5_419, %c0_420, %c0_421] : memref<9x8x16xf32, #tpu.memory_space<vmem>>, vector<1x8x16xf32>
    %607 = vector.shape_cast %606 : vector<1x8x16xf32> to vector<8x16xf32>
    %cst_422 = arith.constant dense<0.000000e+00> : vector<13x16xf32>
    %608 = tpu.matmul %605, %607, %cst_422 {dimension_numbers = #tpu.dot_dimension_numbers<[1], [0], [0], [1], [0, 0, 1, 1], [], []>} : vector<13x8xf32>, vector<8x16xf32>, vector<13x16xf32> -> vector<13x16xf32>
    %609 = arith.addf %604, %608 : vector<13x16xf32>
    %610 = vector.extract_strided_slice %580 {offsets = [10, 0], sizes = [13, 8], strides = [1, 1]} : vector<25x8xf32> to vector<13x8xf32>
    %c6_423 = arith.constant 6 : index
    %c0_424 = arith.constant 0 : index
    %c0_425 = arith.constant 0 : index
    %611 = vector.load %arg13[%c6_423, %c0_424, %c0_425] : memref<9x8x16xf32, #tpu.memory_space<vmem>>, vector<1x8x16xf32>
    %612 = vector.shape_cast %611 : vector<1x8x16xf32> to vector<8x16xf32>
    %cst_426 = arith.constant dense<0.000000e+00> : vector<13x16xf32>
    %613 = tpu.matmul %610, %612, %cst_426 {dimension_numbers = #tpu.dot_dimension_numbers<[1], [0], [0], [1], [0, 0, 1, 1], [], []>} : vector<13x8xf32>, vector<8x16xf32>, vector<13x16xf32> -> vector<13x16xf32>
    %614 = arith.addf %609, %613 : vector<13x16xf32>
    %615 = vector.extract_strided_slice %580 {offsets = [11, 0], sizes = [13, 8], strides = [1, 1]} : vector<25x8xf32> to vector<13x8xf32>
    %c7_427 = arith.constant 7 : index
    %c0_428 = arith.constant 0 : index
    %c0_429 = arith.constant 0 : index
    %616 = vector.load %arg13[%c7_427, %c0_428, %c0_429] : memref<9x8x16xf32, #tpu.memory_space<vmem>>, vector<1x8x16xf32>
    %617 = vector.shape_cast %616 : vector<1x8x16xf32> to vector<8x16xf32>
    %cst_430 = arith.constant dense<0.000000e+00> : vector<13x16xf32>
    %618 = tpu.matmul %615, %617, %cst_430 {dimension_numbers = #tpu.dot_dimension_numbers<[1], [0], [0], [1], [0, 0, 1, 1], [], []>} : vector<13x8xf32>, vector<8x16xf32>, vector<13x16xf32> -> vector<13x16xf32>
    %619 = arith.addf %614, %618 : vector<13x16xf32>
    %620 = vector.extract_strided_slice %580 {offsets = [12, 0], sizes = [13, 8], strides = [1, 1]} : vector<25x8xf32> to vector<13x8xf32>
    %c8_431 = arith.constant 8 : index
    %c0_432 = arith.constant 0 : index
    %c0_433 = arith.constant 0 : index
    %621 = vector.load %arg13[%c8_431, %c0_432, %c0_433] : memref<9x8x16xf32, #tpu.memory_space<vmem>>, vector<1x8x16xf32>
    %622 = vector.shape_cast %621 : vector<1x8x16xf32> to vector<8x16xf32>
    %cst_434 = arith.constant dense<0.000000e+00> : vector<13x16xf32>
    %623 = tpu.matmul %620, %622, %cst_434 {dimension_numbers = #tpu.dot_dimension_numbers<[1], [0], [0], [1], [0, 0, 1, 1], [], []>} : vector<13x8xf32>, vector<8x16xf32>, vector<13x16xf32> -> vector<13x16xf32>
    %624 = arith.addf %619, %623 : vector<13x16xf32>
    %c0_435 = arith.constant 0 : index
    %c0_436 = arith.constant 0 : index
    %625 = vector.load %arg14[%c0_435, %c0_436] : memref<1x16xf32, #tpu.memory_space<vmem>>, vector<1x16xf32>
    %626 = vector.broadcast %625 : vector<1x16xf32> to vector<13x16xf32>
    %627 = arith.addf %624, %626 : vector<13x16xf32>
    %628 = vector.extract_strided_slice %627 {offsets = [0, 0], sizes = [7, 16], strides = [1, 1]} : vector<13x16xf32> to vector<7x16xf32>
    %629 = vector.extract_strided_slice %627 {offsets = [1, 0], sizes = [7, 16], strides = [1, 1]} : vector<13x16xf32> to vector<7x16xf32>
    %630 = arith.maximumf %628, %629 : vector<7x16xf32>
    %631 = vector.extract_strided_slice %627 {offsets = [5, 0], sizes = [7, 16], strides = [1, 1]} : vector<13x16xf32> to vector<7x16xf32>
    %632 = vector.extract_strided_slice %627 {offsets = [6, 0], sizes = [7, 16], strides = [1, 1]} : vector<13x16xf32> to vector<7x16xf32>
    %633 = arith.maximumf %631, %632 : vector<7x16xf32>
    %634 = arith.maximumf %630, %633 : vector<7x16xf32>
    %cst_437 = arith.constant 0.000000e+00 : f32
    %635 = vector.broadcast %cst_437 : f32 to vector<7x16xf32>
    %636 = arith.cmpf ogt, %634, %635 : vector<7x16xf32>
    %cst_438 = arith.constant 0.00999999977 : f32
    %637 = vector.broadcast %cst_438 : f32 to vector<7x16xf32>
    %638 = arith.mulf %637, %634 : vector<7x16xf32>
    %639 = arith.select %636, %634, %638 : vector<7x16xi1>, vector<7x16xf32>
    %c0_439 = arith.constant 0 : index
    %c0_440 = arith.constant 0 : index
    %640 = vector.load %arg16[%c0_439, %c0_440] : memref<1x32xf32, #tpu.memory_space<vmem>>, vector<1x32xf32>
    %641 = vector.extract_strided_slice %639 {offsets = [0, 0], sizes = [1, 16], strides = [1, 1]} : vector<7x16xf32> to vector<1x16xf32>
    %c0_441 = arith.constant 0 : index
    %c0_442 = arith.constant 0 : index
    %c0_443 = arith.constant 0 : index
    %642 = vector.load %arg15[%c0_441, %c0_442, %c0_443] : memref<4x16x32xf32, #tpu.memory_space<vmem>>, vector<1x16x32xf32>
    %643 = vector.shape_cast %642 : vector<1x16x32xf32> to vector<16x32xf32>
    %cst_444 = arith.constant dense<0.000000e+00> : vector<1x32xf32>
    %644 = tpu.matmul %641, %643, %cst_444 {dimension_numbers = #tpu.dot_dimension_numbers<[1], [0], [0], [1], [0, 0, 1, 1], [], []>} : vector<1x16xf32>, vector<16x32xf32>, vector<1x32xf32> -> vector<1x32xf32>
    %645 = arith.addf %640, %644 : vector<1x32xf32>
    %646 = vector.extract_strided_slice %639 {offsets = [1, 0], sizes = [1, 16], strides = [1, 1]} : vector<7x16xf32> to vector<1x16xf32>
    %c1_445 = arith.constant 1 : index
    %c0_446 = arith.constant 0 : index
    %c0_447 = arith.constant 0 : index
    %647 = vector.load %arg15[%c1_445, %c0_446, %c0_447] : memref<4x16x32xf32, #tpu.memory_space<vmem>>, vector<1x16x32xf32>
    %648 = vector.shape_cast %647 : vector<1x16x32xf32> to vector<16x32xf32>
    %cst_448 = arith.constant dense<0.000000e+00> : vector<1x32xf32>
    %649 = tpu.matmul %646, %648, %cst_448 {dimension_numbers = #tpu.dot_dimension_numbers<[1], [0], [0], [1], [0, 0, 1, 1], [], []>} : vector<1x16xf32>, vector<16x32xf32>, vector<1x32xf32> -> vector<1x32xf32>
    %650 = arith.addf %645, %649 : vector<1x32xf32>
    %651 = vector.extract_strided_slice %639 {offsets = [5, 0], sizes = [1, 16], strides = [1, 1]} : vector<7x16xf32> to vector<1x16xf32>
    %c2_449 = arith.constant 2 : index
    %c0_450 = arith.constant 0 : index
    %c0_451 = arith.constant 0 : index
    %652 = vector.load %arg15[%c2_449, %c0_450, %c0_451] : memref<4x16x32xf32, #tpu.memory_space<vmem>>, vector<1x16x32xf32>
    %653 = vector.shape_cast %652 : vector<1x16x32xf32> to vector<16x32xf32>
    %cst_452 = arith.constant dense<0.000000e+00> : vector<1x32xf32>
    %654 = tpu.matmul %651, %653, %cst_452 {dimension_numbers = #tpu.dot_dimension_numbers<[1], [0], [0], [1], [0, 0, 1, 1], [], []>} : vector<1x16xf32>, vector<16x32xf32>, vector<1x32xf32> -> vector<1x32xf32>
    %655 = arith.addf %650, %654 : vector<1x32xf32>
    %656 = vector.extract_strided_slice %639 {offsets = [6, 0], sizes = [1, 16], strides = [1, 1]} : vector<7x16xf32> to vector<1x16xf32>
    %c3_453 = arith.constant 3 : index
    %c0_454 = arith.constant 0 : index
    %c0_455 = arith.constant 0 : index
    %657 = vector.load %arg15[%c3_453, %c0_454, %c0_455] : memref<4x16x32xf32, #tpu.memory_space<vmem>>, vector<1x16x32xf32>
    %658 = vector.shape_cast %657 : vector<1x16x32xf32> to vector<16x32xf32>
    %cst_456 = arith.constant dense<0.000000e+00> : vector<1x32xf32>
    %659 = tpu.matmul %656, %658, %cst_456 {dimension_numbers = #tpu.dot_dimension_numbers<[1], [0], [0], [1], [0, 0, 1, 1], [], []>} : vector<1x16xf32>, vector<16x32xf32>, vector<1x32xf32> -> vector<1x32xf32>
    %660 = arith.addf %655, %659 : vector<1x32xf32>
    %cst_457 = arith.constant 0.000000e+00 : f32
    %661 = vector.broadcast %cst_457 : f32 to vector<1x32xf32>
    %662 = arith.cmpf ogt, %660, %661 : vector<1x32xf32>
    %cst_458 = arith.constant 0.00999999977 : f32
    %663 = vector.broadcast %cst_458 : f32 to vector<1x32xf32>
    %664 = arith.mulf %663, %660 : vector<1x32xf32>
    %665 = arith.select %662, %660, %664 : vector<1x32xi1>, vector<1x32xf32>
    %c0_459 = arith.constant 0 : index
    %c0_460 = arith.constant 0 : index
    %c0_461 = arith.constant 0 : index
    %666 = vector.load %arg2[%c0_459, %c0_460, %c0_461] : memref<1x1x32xf32, #tpu.memory_space<vmem>>, vector<1x1x32xf32>
    %667 = vector.shape_cast %666 : vector<1x1x32xf32> to vector<1x32xf32>
    %c0_462 = arith.constant 0 : index
    %c0_463 = arith.constant 0 : index
    %c0_464 = arith.constant 0 : index
    %668 = vector.load %arg17[%c0_462, %c0_463, %c0_464] : memref<3x32x32xf32, #tpu.memory_space<vmem>>, vector<1x32x32xf32>
    %669 = vector.shape_cast %668 : vector<1x32x32xf32> to vector<32x32xf32>
    %cst_465 = arith.constant dense<0.000000e+00> : vector<1x32xf32>
    %670 = tpu.matmul %665, %669, %cst_465 {dimension_numbers = #tpu.dot_dimension_numbers<[1], [0], [0], [1], [0, 0, 1, 1], [], []>} : vector<1x32xf32>, vector<32x32xf32>, vector<1x32xf32> -> vector<1x32xf32>
    %c0_466 = arith.constant 0 : index
    %c0_467 = arith.constant 0 : index
    %c0_468 = arith.constant 0 : index
    %671 = vector.load %arg18[%c0_466, %c0_467, %c0_468] : memref<3x32x32xf32, #tpu.memory_space<vmem>>, vector<1x32x32xf32>
    %672 = vector.shape_cast %671 : vector<1x32x32xf32> to vector<32x32xf32>
    %cst_469 = arith.constant dense<0.000000e+00> : vector<1x32xf32>
    %673 = tpu.matmul %667, %672, %cst_469 {dimension_numbers = #tpu.dot_dimension_numbers<[1], [0], [0], [1], [0, 0, 1, 1], [], []>} : vector<1x32xf32>, vector<32x32xf32>, vector<1x32xf32> -> vector<1x32xf32>
    %674 = arith.addf %670, %673 : vector<1x32xf32>
    %c0_470 = arith.constant 0 : index
    %c0_471 = arith.constant 0 : index
    %c0_472 = arith.constant 0 : index
    %675 = vector.load %arg19[%c0_470, %c0_471, %c0_472] : memref<3x1x32xf32, #tpu.memory_space<vmem>>, vector<1x1x32xf32>
    %676 = vector.shape_cast %675 : vector<1x1x32xf32> to vector<1x32xf32>
    %677 = arith.addf %674, %676 : vector<1x32xf32>
    %cst_473 = arith.constant 0.000000e+00 : f32
    %678 = vector.broadcast %cst_473 : f32 to vector<1x32xf32>
    %679 = arith.subf %678, %677 : vector<1x32xf32>
    %680 = math.exp %679 : vector<1x32xf32>
    %cst_474 = arith.constant 1.000000e+00 : f32
    %681 = vector.broadcast %cst_474 : f32 to vector<1x32xf32>
    %682 = arith.addf %681, %680 : vector<1x32xf32>
    %683 = tpu.reciprocal %682 {approx = true} : vector<1x32xf32> -> vector<1x32xf32>
    %c1_475 = arith.constant 1 : index
    %c0_476 = arith.constant 0 : index
    %c0_477 = arith.constant 0 : index
    %684 = vector.load %arg17[%c1_475, %c0_476, %c0_477] : memref<3x32x32xf32, #tpu.memory_space<vmem>>, vector<1x32x32xf32>
    %685 = vector.shape_cast %684 : vector<1x32x32xf32> to vector<32x32xf32>
    %cst_478 = arith.constant dense<0.000000e+00> : vector<1x32xf32>
    %686 = tpu.matmul %665, %685, %cst_478 {dimension_numbers = #tpu.dot_dimension_numbers<[1], [0], [0], [1], [0, 0, 1, 1], [], []>} : vector<1x32xf32>, vector<32x32xf32>, vector<1x32xf32> -> vector<1x32xf32>
    %c1_479 = arith.constant 1 : index
    %c0_480 = arith.constant 0 : index
    %c0_481 = arith.constant 0 : index
    %687 = vector.load %arg18[%c1_479, %c0_480, %c0_481] : memref<3x32x32xf32, #tpu.memory_space<vmem>>, vector<1x32x32xf32>
    %688 = vector.shape_cast %687 : vector<1x32x32xf32> to vector<32x32xf32>
    %cst_482 = arith.constant dense<0.000000e+00> : vector<1x32xf32>
    %689 = tpu.matmul %667, %688, %cst_482 {dimension_numbers = #tpu.dot_dimension_numbers<[1], [0], [0], [1], [0, 0, 1, 1], [], []>} : vector<1x32xf32>, vector<32x32xf32>, vector<1x32xf32> -> vector<1x32xf32>
    %690 = arith.addf %686, %689 : vector<1x32xf32>
    %c1_483 = arith.constant 1 : index
    %c0_484 = arith.constant 0 : index
    %c0_485 = arith.constant 0 : index
    %691 = vector.load %arg19[%c1_483, %c0_484, %c0_485] : memref<3x1x32xf32, #tpu.memory_space<vmem>>, vector<1x1x32xf32>
    %692 = vector.shape_cast %691 : vector<1x1x32xf32> to vector<1x32xf32>
    %693 = arith.addf %690, %692 : vector<1x32xf32>
    %cst_486 = arith.constant 0.000000e+00 : f32
    %694 = vector.broadcast %cst_486 : f32 to vector<1x32xf32>
    %695 = arith.subf %694, %693 : vector<1x32xf32>
    %696 = math.exp %695 : vector<1x32xf32>
    %cst_487 = arith.constant 1.000000e+00 : f32
    %697 = vector.broadcast %cst_487 : f32 to vector<1x32xf32>
    %698 = arith.addf %697, %696 : vector<1x32xf32>
    %699 = tpu.reciprocal %698 {approx = true} : vector<1x32xf32> -> vector<1x32xf32>
    %c2_488 = arith.constant 2 : index
    %c0_489 = arith.constant 0 : index
    %c0_490 = arith.constant 0 : index
    %700 = vector.load %arg17[%c2_488, %c0_489, %c0_490] : memref<3x32x32xf32, #tpu.memory_space<vmem>>, vector<1x32x32xf32>
    %701 = vector.shape_cast %700 : vector<1x32x32xf32> to vector<32x32xf32>
    %cst_491 = arith.constant dense<0.000000e+00> : vector<1x32xf32>
    %702 = tpu.matmul %665, %701, %cst_491 {dimension_numbers = #tpu.dot_dimension_numbers<[1], [0], [0], [1], [0, 0, 1, 1], [], []>} : vector<1x32xf32>, vector<32x32xf32>, vector<1x32xf32> -> vector<1x32xf32>
    %703 = arith.mulf %699, %667 : vector<1x32xf32>
    %c2_492 = arith.constant 2 : index
    %c0_493 = arith.constant 0 : index
    %c0_494 = arith.constant 0 : index
    %704 = vector.load %arg18[%c2_492, %c0_493, %c0_494] : memref<3x32x32xf32, #tpu.memory_space<vmem>>, vector<1x32x32xf32>
    %705 = vector.shape_cast %704 : vector<1x32x32xf32> to vector<32x32xf32>
    %cst_495 = arith.constant dense<0.000000e+00> : vector<1x32xf32>
    %706 = tpu.matmul %703, %705, %cst_495 {dimension_numbers = #tpu.dot_dimension_numbers<[1], [0], [0], [1], [0, 0, 1, 1], [], []>} : vector<1x32xf32>, vector<32x32xf32>, vector<1x32xf32> -> vector<1x32xf32>
    %707 = arith.addf %702, %706 : vector<1x32xf32>
    %c2_496 = arith.constant 2 : index
    %c0_497 = arith.constant 0 : index
    %c0_498 = arith.constant 0 : index
    %708 = vector.load %arg19[%c2_496, %c0_497, %c0_498] : memref<3x1x32xf32, #tpu.memory_space<vmem>>, vector<1x1x32xf32>
    %709 = vector.shape_cast %708 : vector<1x1x32xf32> to vector<1x32xf32>
    %710 = arith.addf %707, %709 : vector<1x32xf32>
    %711 = math.tanh %710 : vector<1x32xf32>
    %712 = arith.mulf %683, %667 : vector<1x32xf32>
    %cst_499 = arith.constant 1.000000e+00 : f32
    %713 = vector.broadcast %cst_499 : f32 to vector<1x32xf32>
    %714 = arith.subf %713, %683 : vector<1x32xf32>
    %715 = arith.mulf %714, %711 : vector<1x32xf32>
    %716 = arith.addf %712, %715 : vector<1x32xf32>
    %c0_500 = arith.constant 0 : index
    %c0_501 = arith.constant 0 : index
    %c0_502 = arith.constant 0 : index
    %717 = vector.load %arg20[%c0_500, %c0_501, %c0_502] : memref<1x1x32xf32, #tpu.memory_space<vmem>>, vector<1x1x32xf32>
    %718 = vector.shape_cast %717 : vector<1x1x32xf32> to vector<1x32xf32>
    %719 = vector.shape_cast %716 : vector<1x32xf32> to vector<1x1x32xf32>
    tpu.vector_store %arg20[%c0_500, %c0_501, %c0_502], %719 {strides = array<i32>} : memref<1x1x32xf32, #tpu.memory_space<vmem>>, vector<1x1x32xf32>,
    %c0_503 = arith.constant 0 : index
    %c0_504 = arith.constant 0 : index
    %c0_505 = arith.constant 0 : index
    %720 = vector.load %arg21[%c0_503, %c0_504, %c0_505] : memref<1x1x32xf32, #tpu.memory_space<vmem>>, vector<1x1x32xf32>
    %721 = vector.shape_cast %720 : vector<1x1x32xf32> to vector<1x32xf32>
    %722 = vector.shape_cast %683 : vector<1x32xf32> to vector<1x1x32xf32>
    tpu.vector_store %arg21[%c0_503, %c0_504, %c0_505], %722 {strides = array<i32>} : memref<1x1x32xf32, #tpu.memory_space<vmem>>, vector<1x1x32xf32>,
    return
  }
  func.func @transform_0(%arg0: i32) -> (i32, i32, i32) {
    %c0_i32 = arith.constant 0 : i32
    %c0_i32_0 = arith.constant 0 : i32
    %c0_i32_1 = arith.constant 0 : i32
    return %arg0, %c0_i32, %c0_i32_0 : i32, i32, i32
  }
  func.func @transform_1(%arg0: i32) -> (i32, i32, i32) {
    %c0_i32 = arith.constant 0 : i32
    %c0_i32_0 = arith.constant 0 : i32
    %c0_i32_1 = arith.constant 0 : i32
    return %arg0, %c0_i32, %c0_i32_0 : i32, i32, i32
  }
  func.func @transform_2(%arg0: i32) -> (i32, i32, i32) {
    %c0_i32 = arith.constant 0 : i32
    %c0_i32_0 = arith.constant 0 : i32
    %c0_i32_1 = arith.constant 0 : i32
    %c0_i32_2 = arith.constant 0 : i32
    return %c0_i32, %c0_i32_0, %c0_i32_1 : i32, i32, i32
  }
  func.func @transform_3(%arg0: i32) -> (i32, i32) {
    %c0_i32 = arith.constant 0 : i32
    %c0_i32_0 = arith.constant 0 : i32
    %c0_i32_1 = arith.constant 0 : i32
    return %c0_i32, %c0_i32_0 : i32, i32
  }
  func.func @transform_4(%arg0: i32) -> (i32, i32, i32) {
    %c0_i32 = arith.constant 0 : i32
    %c0_i32_0 = arith.constant 0 : i32
    %c0_i32_1 = arith.constant 0 : i32
    %c0_i32_2 = arith.constant 0 : i32
    return %c0_i32, %c0_i32_0, %c0_i32_1 : i32, i32, i32
  }
  func.func @transform_5(%arg0: i32) -> (i32, i32) {
    %c0_i32 = arith.constant 0 : i32
    %c0_i32_0 = arith.constant 0 : i32
    %c0_i32_1 = arith.constant 0 : i32
    return %c0_i32, %c0_i32_0 : i32, i32
  }
  func.func @transform_6(%arg0: i32) -> (i32, i32, i32) {
    %c0_i32 = arith.constant 0 : i32
    %c0_i32_0 = arith.constant 0 : i32
    %c0_i32_1 = arith.constant 0 : i32
    %c0_i32_2 = arith.constant 0 : i32
    return %c0_i32, %c0_i32_0, %c0_i32_1 : i32, i32, i32
  }
  func.func @transform_7(%arg0: i32) -> (i32, i32) {
    %c0_i32 = arith.constant 0 : i32
    %c0_i32_0 = arith.constant 0 : i32
    %c0_i32_1 = arith.constant 0 : i32
    return %c0_i32, %c0_i32_0 : i32, i32
  }
  func.func @transform_8(%arg0: i32) -> (i32, i32, i32) {
    %c0_i32 = arith.constant 0 : i32
    %c0_i32_0 = arith.constant 0 : i32
    %c0_i32_1 = arith.constant 0 : i32
    %c0_i32_2 = arith.constant 0 : i32
    return %c0_i32, %c0_i32_0, %c0_i32_1 : i32, i32, i32
  }
  func.func @transform_9(%arg0: i32) -> (i32, i32) {
    %c0_i32 = arith.constant 0 : i32
    %c0_i32_0 = arith.constant 0 : i32
    %c0_i32_1 = arith.constant 0 : i32
    return %c0_i32, %c0_i32_0 : i32, i32
  }
  func.func @transform_10(%arg0: i32) -> (i32, i32, i32) {
    %c0_i32 = arith.constant 0 : i32
    %c0_i32_0 = arith.constant 0 : i32
    %c0_i32_1 = arith.constant 0 : i32
    %c0_i32_2 = arith.constant 0 : i32
    return %c0_i32, %c0_i32_0, %c0_i32_1 : i32, i32, i32
  }
  func.func @transform_11(%arg0: i32) -> (i32, i32) {
    %c0_i32 = arith.constant 0 : i32
    %c0_i32_0 = arith.constant 0 : i32
    %c0_i32_1 = arith.constant 0 : i32
    return %c0_i32, %c0_i32_0 : i32, i32
  }
  func.func @transform_12(%arg0: i32) -> (i32, i32, i32) {
    %c0_i32 = arith.constant 0 : i32
    %c0_i32_0 = arith.constant 0 : i32
    %c0_i32_1 = arith.constant 0 : i32
    %c0_i32_2 = arith.constant 0 : i32
    return %c0_i32, %c0_i32_0, %c0_i32_1 : i32, i32, i32
  }
  func.func @transform_13(%arg0: i32) -> (i32, i32) {
    %c0_i32 = arith.constant 0 : i32
    %c0_i32_0 = arith.constant 0 : i32
    %c0_i32_1 = arith.constant 0 : i32
    return %c0_i32, %c0_i32_0 : i32, i32
  }
  func.func @transform_14(%arg0: i32) -> (i32, i32, i32) {
    %c0_i32 = arith.constant 0 : i32
    %c0_i32_0 = arith.constant 0 : i32
    %c0_i32_1 = arith.constant 0 : i32
    %c0_i32_2 = arith.constant 0 : i32
    return %c0_i32, %c0_i32_0, %c0_i32_1 : i32, i32, i32
  }
  func.func @transform_15(%arg0: i32) -> (i32, i32) {
    %c0_i32 = arith.constant 0 : i32
    %c0_i32_0 = arith.constant 0 : i32
    %c0_i32_1 = arith.constant 0 : i32
    return %c0_i32, %c0_i32_0 : i32, i32
  }
  func.func @transform_16(%arg0: i32) -> (i32, i32, i32) {
    %c0_i32 = arith.constant 0 : i32
    %c0_i32_0 = arith.constant 0 : i32
    %c0_i32_1 = arith.constant 0 : i32
    %c0_i32_2 = arith.constant 0 : i32
    return %c0_i32, %c0_i32_0, %c0_i32_1 : i32, i32, i32
  }
  func.func @transform_17(%arg0: i32) -> (i32, i32, i32) {
    %c0_i32 = arith.constant 0 : i32
    %c0_i32_0 = arith.constant 0 : i32
    %c0_i32_1 = arith.constant 0 : i32
    %c0_i32_2 = arith.constant 0 : i32
    return %c0_i32, %c0_i32_0, %c0_i32_1 : i32, i32, i32
  }
  func.func @transform_18(%arg0: i32) -> (i32, i32, i32) {
    %c0_i32 = arith.constant 0 : i32
    %c0_i32_0 = arith.constant 0 : i32
    %c0_i32_1 = arith.constant 0 : i32
    %c0_i32_2 = arith.constant 0 : i32
    return %c0_i32, %c0_i32_0, %c0_i32_1 : i32, i32, i32
  }
  func.func @transform_19(%arg0: i32) -> (i32, i32, i32) {
    %c0_i32 = arith.constant 0 : i32
    %c0_i32_0 = arith.constant 0 : i32
    %c0_i32_1 = arith.constant 0 : i32
    return %arg0, %c0_i32, %c0_i32_0 : i32, i32, i32
  }
  func.func @transform_20(%arg0: i32) -> (i32, i32, i32) {
    %c0_i32 = arith.constant 0 : i32
    %c0_i32_0 = arith.constant 0 : i32
    %c0_i32_1 = arith.constant 0 : i32
    return %arg0, %c0_i32, %c0_i32_0 : i32, i32, i32
  }
}

</mosaic_0001>

<bundles_post_ra>
// kernel: gru_encoder_forward.1
= control target key start
LH: loop header
LB: loop body
LE: loop exit
PB: predicated region body
PF: predicated region fallthrough
CT: control target
= control target key end

     0   :  { %s24744_s0 = inlined_call_operand.vmem [shape: f32[2,64,4], index: 0, kind: input, shape index: {}]   ;;  %s24745_s1 = inlined_call_operand.vmem [shape: f32[2,1,32], index: 1, kind: input, shape index: {}]   ;;  %s24746_s2 = inlined_call_operand.vmem [shape: f32[49,4,8], index: 2, kind: input, shape index: {}]   ;;  %s24747_s3 = inlined_call_operand.vmem [shape: f32[1,8], index: 3, kind: input, shape index: {}]   ;;  %s24748_s4 = inlined_call_operand.vmem [shape: f32[9,8,8], index: 4, kind: input, shape index: {}]   ;;  %s24749_s5 = inlined_call_operand.vmem [shape: f32[1,8], index: 5, kind: input, shape index: {}]   ;;  %s24750_s6 = inlined_call_operand.vmem [shape: f32[9,8,8], index: 6, kind: input, shape index: {}]   ;;  %s24751_s7 = inlined_call_operand.vmem [shape: f32[1,8], index: 7, kind: input, shape index: {}]   ;;  %s24752_s8 = inlined_call_operand.vmem [shape: f32[9,8,8], index: 8, kind: input, shape index: {}]   ;;  %s24753_s9 = inlined_call_operand.vmem [shape: f32[1,8], index: 9, kind: input, shape index: {}]   ;;  %s24754_s10 = inlined_call_operand.vmem [shape: f32[9,8,8], index: 10, kind: input, shape index: {}]   ;;  %s24755_s11 = inlined_call_operand.vmem [shape: f32[1,8], index: 11, kind: input, shape index: {}]   ;;  %s24756_s12 = inlined_call_operand.vmem [shape: f32[9,8,16], index: 12, kind: input, shape index: {}]   ;;  %s24757_s13 = inlined_call_operand.vmem [shape: f32[1,16], index: 13, kind: input, shape index: {}]   ;;  %s24758_s14 = inlined_call_operand.vmem [shape: f32[4,16,32], index: 14, kind: input, shape index: {}]   ;;  %s24759_s15 = inlined_call_operand.vmem [shape: f32[1,32], index: 15, kind: input, shape index: {}]   ;;  %s24760_s16 = inlined_call_operand.vmem [shape: f32[3,32,32], index: 16, kind: input, shape index: {}]   ;;  %s24761_s17 = inlined_call_operand.vmem [shape: f32[3,32,32], index: 17, kind: input, shape index: {}]   ;;  %s24762_s18 = inlined_call_operand.vmem [shape: f32[3,1,32], index: 18, kind: input, shape index: {}]   ;;  %s24763_s19 = inlined_call_operand.hbm [shape: f32[2,1,32], index: 19, kind: output, shape index: {0}]   ;;  %s24764_s20 = inlined_call_operand.hbm [shape: f32[2,1,32], index: 20, kind: output, shape index: {1}]  }
   0x1   :  { %25014 = sst [smem:[#allocation91_spill]] %s24744_s0 }
   0x2   :  { %25015 = sst [smem:[#allocation92_spill]] %s24745_s1 }
   0x3   :  { %25016 = sst [smem:[#allocation93_spill]] %s24746_s2 }
   0x4   :  { %25017 = sst [smem:[#allocation94_spill]] %s24747_s3 }
   0x5   :  { %25018 = sst [smem:[#allocation95_spill]] %s24748_s4 }
   0x6   :  { %25019 = sst [smem:[#allocation96_spill]] %s24749_s5 }
   0x7   :  { %25020 = sst [smem:[#allocation97_spill]] %s24750_s6 }
   0x8   :  { %25021 = sst [smem:[#allocation98_spill]] %s24751_s7 }
   0x9   :  { %25022 = sst [smem:[#allocation99_spill]] %s24752_s8 }
   0xa   :  { %25023 = sst [smem:[#allocation100_spill]] %s24753_s9 }
   0xb   :  { %25024 = sst [smem:[#allocation101_spill]] %s24754_s10 }
   0xc   :  { %25025 = sst [smem:[#allocation102_spill]] %s24755_s11 }
   0xd   :  { %26 = vsyncpa [#allocation9], 0 }
   0xe   :  { %28 = vsyncpa [#allocation9 + $0x1], 0 }
   0xf   :  { %29 = vsyncpa [#allocation11], 0 }
  0x10   :  { %31 = vsyncpa [#allocation11 + $0x1], 0  ;;  %s19553_s1 = smov 0   ;;  %s19555_s22 = smov 0  }
  0x11   :  { %s19557_s23 = smov 0   ;;  %s19559_s24 = smov 0  }
  0x12 LB: > { %25026 = sst [smem:[#allocation14_spill]] %s19438_s23  ;;  %s19574_s2 = sadd.s32 4294967295, %s19442_s24   ;;  %s19442_s24 = sphi %s19559_s24, %s25572_s24   ;;  %s19438_s23 = sphi %s19557_s23, %s25574_s23   ;;  %s19434_s22 = sphi %s19555_s22, %s25576_s22   ;;  %s19430_s1 = sphi %s19553_s1, %s25575_s1  }
  0x13   : > { %s15398_s25 = sadd.s32 4294967294, %s19442_s24   ;;  %s19578_s3 = sadd.s32 1, %s19442_s24  }
  0x14   : > { %25027 = sst [smem:[#allocation15_spill]] %s19578_s3  ;;  %s453_s26 = sadd.s32 1, %s19438_s23 }
  0x15   : > { %s450_s27 = ssub.s32 %s19442_s24, %s19578_s3  ;;  %p463_p0 = scmp.ne.s32.totalorder %s19438_s23, %s19434_s22 }
  0x16   : > { %p451_p1 = scmp.eq.s32.totalorder %s450_s27, 0  ;;  %p464_p2 = scmp.eq.s32.totalorder %s19574_s2, 1 }
  0x17   : > { %p469_p3 = scmp.ne.s32.totalorder %s19434_s22, %s19430_s1  ;;  %p470_p4 = scmp.eq.s32.totalorder %s15398_s25, 1 }
  0x18   : > { %s19589_s28 = scalar_select %p451_p1, %s19438_s23, %s453_s26  }
  0x19   : > { %p19591_p5 = por %p464_p2, %p463_p0  ;;  %p19595_p6 = por %p470_p4, %p469_p3 }
  0x1a   : > { %25028 = sst [smem:[#allocation16_spill]] %s19589_s28  ;;  %p15401_p7 = scmp.ge.s32.totalorder %s19442_s24, 1 }
  0x1b   : > { %p579_p8 = scmp.lt.s32.totalorder %s19442_s24, 3 }
  0x1d   : > { %p580_p9 = pnand %p15401_p7, %p579_p8 }
  0x1f   : > { %583 = sbr.rel (%p580_p9) target bundleno = 3039 (0xbdf), region = 96 }
  0x24   : > { %s25031_s21 = sld [smem:[#allocation93_spill]]  ;;  %vm25010_vm0 = vcmask 1043456   ;;  %vm659_vm1 = vcmask 31744   ;;  %p643_p10 = scmp.lt.s32.totalorder %s19574_s2, 1  ;;  %v24770_v3 = vmov 0.0   ;;  %vm736_vm2 = vcmask 1046528  }
  0x25   : > { %660 = vst.msk [vmem:[#allocation2] sm:$0xff] %vm659_vm1, %v24770_v3  ;;  %661 = vst.msk [vmem:[#allocation2 + $0x8] sm:$0xff] %vm659_vm1, %v24770_v3  ;;  %s25032_s23 = sld [smem:[#allocation91_spill]]  ;;  %vm25009_vm3 = vcmask 1044480   ;;  %vm1099_vm4 = vcmask 1045504   ;;  %vm25012_vm5 = vcmask 1041408  }
  0x26   : > { %662 = vst.msk [vmem:[#allocation2 + $0x10] sm:$0xff] %vm659_vm1, %v24770_v3  ;;  %663 = vst.msk [vmem:[#allocation2 + $0x18] sm:$0xff] %vm659_vm1, %v24770_v3  ;;  %s19673_s0 = scalar_select %p643_p10, %s19574_s2, 1  ;;  %vm25003_vm6 = vcmask 1042432   ;;  %vm25004_vm7 = vcmask 1040384   ;;  %vm684_vm8 = vcmask 27648  }
  0x27   : > { %664 = vst.msk [vmem:[#allocation2 + $0x20] sm:$0xff] %vm659_vm1, %v24770_v3  ;;  %665 = vst.msk [vmem:[#allocation2 + $0x28] sm:$0xff] %vm659_vm1, %v24770_v3  ;;  %vm9237_vm9 = vcmask 64512   ;;  %vm9248_vm10 = vcmask 57344   ;;  %vm9250_vm11 = vcmask 63488   ;;  %vm25011_vm12 = vcmask 64518  }
  0x28   : > { %666 = vst.msk [vmem:[#allocation2 + $0x30] sm:$0xff] %vm659_vm1, %v24770_v3  ;;  %667 = vst.msk [vmem:[#allocation2 + $0x38] sm:$0xff] %vm659_vm1, %v24770_v3  ;;  %s16487_s25 = sshll.u32 %s19673_s0, 6  ;;  %vm9254_vm13 = vcmask 61440   ;;  %vm9258_vm15 = vcmask 59392   ;;  %s25511_s6 = sld [smem:[#allocation97_spill]] }
  0x29   : > { %668 = vst.msk [vmem:[#allocation2 + $0x40] sm:$0xff] %vm659_vm1, %v24770_v3  ;;  %669 = vst.msk [vmem:[#allocation2 + $0x48] sm:$0xff] %vm659_vm1, %v24770_v3  ;;  %s25518_s5 = sld [smem:[#allocation96_spill]] }
  0x2a   : > { %v15404_v0 = vld [vmem:[%s25031_s21 + $0x4] sm:$0xf]  ;;  %v719_v1 = vld [vmem:[%s25031_s21] sm:$0xf]  ;;  %v19612_v2 = vld [vmem:[%s25031_s21 + $0x8] sm:$0xf] }
  0x2b   : > { %17526 = vmatprep.subr.msk.mxu0 %vm25010_vm0, %v15404_v0  ;;  %17549 = vmatprep.subr.msk.mxu1 %vm25010_vm0, %v719_v1  ;;  %670 = vst.msk [vmem:[#allocation2 + $0x50] sm:$0xff] %vm659_vm1, %v24770_v3  ;;  %671 = vst.msk [vmem:[#allocation2 + $0x58] sm:$0xff] %vm659_vm1, %v24770_v3  ;;  %v15451_v4 = vld [vmem:[%s25031_s21 + $0xc] sm:$0xf]  ;;  %s19680_s3 = scalar_lea.vmem %s25032_s23, %s16487_s25  ;;  %v19716_v21 = vld [vmem:[%s25031_s21 + $0x14] sm:$0xf] }
  0x2c   : > { %17527 = vmatpush3.msk.msra.mxu0 %vm25010_vm0, %v15404_v0  ;;  %672 = vst.msk [vmem:[#allocation2 + $0x60] sm:$0xff] %vm659_vm1, %v24770_v3  ;;  %673 = vst.msk [vmem:[#allocation2 + $0x68] sm:$0xff] %vm659_vm1, %v24770_v3  ;;  %17550 = vmatpush3.msk.msra.mxu1 %vm25010_vm0, %v719_v1  ;;  %v651_v5 = vld [vmem:[%s19680_s3] sm:$0xff]  ;;  %v652_v6 = vld [vmem:[%s19680_s3 + $0x8] sm:$0xff]  ;;  %s25405_s25 = sld [smem:[#allocation95_spill]] }
  0x2d   : > { %674 = vst.msk [vmem:[#allocation2 + $0x70] sm:$0xff] %vm659_vm1, %v24770_v3  ;;  %675 = vst.msk [vmem:[#allocation2 + $0x78] sm:$0xff] %vm659_vm1, %v24770_v3  ;;  %17572 = vmatprep.subr.msk.mxu0 %vm25010_vm0, %v19612_v2  ;;  %17595 = vmatprep.subr.msk.mxu1 %vm25010_vm0, %v15451_v4  ;;  %v653_v7 = vld [vmem:[%s19680_s3 + $0x10] sm:$0xff]  ;;  %v654_v8 = vld [vmem:[%s19680_s3 + $0x18] sm:$0xff]  ;;  %s25502_s23 = sld [smem:[#allocation94_spill]] }
  0x2e   : > { %676 = vst.msk [vmem:[#allocation2 + $0x80] sm:$0xff] %vm659_vm1, %v24770_v3  ;;  %677 = vst.msk [vmem:[#allocation2 + $0x88] sm:$0xff] %vm659_vm1, %v24770_v3  ;;  %v655_v9 = vld [vmem:[%s19680_s3 + $0x20] sm:$0xff]  ;;  %v656_v10 = vld [vmem:[%s19680_s3 + $0x28] sm:$0xff]  ;;  %s25526_s8 = sld [smem:[#allocation99_spill]] }
  0x2f   : > { %678 = vst.msk [vmem:[#allocation2 + $0x90] sm:$0xff] %vm659_vm1, %v24770_v3  ;;  %679 = vst.msk [vmem:[#allocation2 + $0x98] sm:$0xff] %vm659_vm1, %v24770_v3  ;;  %v19691_v11 = vld [vmem:[#allocation2] sm:$0xff]  ;;  %v19693_v12 = vld [vmem:[#allocation2 + $0x8] sm:$0xff]  ;;  %s25527_s7 = sld [smem:[#allocation98_spill]] }
  0x30   : > { %680 = vst.msk [vmem:[#allocation2 + $0xa0] sm:$0xff] %vm659_vm1, %v24770_v3  ;;  %681 = vst.msk [vmem:[#allocation2 + $0xa8] sm:$0xff] %vm659_vm1, %v24770_v3  ;;  %v19695_v13 = vld [vmem:[#allocation2 + $0x10] sm:$0xff]  ;;  %v737_v14 = vrot.slane %v19691_v11, 1  ;;  %v738_v15 = vrot.slane %v19693_v12, 1  ;;  %17551 = vmatprep.mubr.msk.f32.mxu1 %vm659_vm1, %v19691_v11  ;;  %v19705_v17 = vld [vmem:[#allocation2 + $0x18] sm:$0xff] }
  0x31   : > { %682 = vst.msk [vmem:[#allocation2 + $0xb0] sm:$0xff] %vm659_vm1, %v24770_v3  ;;  %683 = vst.msk [vmem:[#allocation2 + $0xb8] sm:$0xff] %vm659_vm1, %v24770_v3  ;;  %v740_v16 = vrot.slane %v19695_v13, 1  ;;  %v19707_v18 = vld [vmem:[#allocation2 + $0x20] sm:$0xff]  ;;  %17552 = vmatmul.mubr.msk.f32.vlgmr.msra.gmra.mxu1 %vm659_vm1, %v19693_v12  ;;  %v742_v19 = vrot.slane %v19705_v17, 1  ;;  %v1310_v52 = vrot.slane %v19691_v11, 3 }
  0x32   : > { %686 = vst.msk [vmem:[#allocation2 + $0x2d] sm:$0xff] %vm659_vm1, %v651_v5  ;;  %687 = vst.msk [vmem:[#allocation2 + $0x3b] sm:$0xff] %vm659_vm1, %v652_v6  ;;  %v744_v20 = vrot.slane %v19707_v18, 1  ;;  %v739_v22 = vsel %vm736_vm2, %v737_v14, %v738_v15  ;;  %17554 = vmatprep.mubr.msk.f32.mxu1 %vm659_vm1, %v19695_v13  ;;  %17596 = vmatpush3.msk.msra.mxu1 %vm25010_vm0, %v15451_v4  ;;  %v19730_v25 = vld [vmem:[%s25031_s21 + $0x10] sm:$0xf]  ;;  %v1311_v53 = vrot.slane %v19693_v12, 3 }
  0x33   : > { %688 = vst.msk [vmem:[#allocation2 + $0x49] sm:$0xff] %vm659_vm1, %v653_v7  ;;  %689 = vst.msk [vmem:[#allocation2 + $0x57] sm:$0xff] %vm659_vm1, %v654_v8  ;;  %v741_v23 = vsel %vm736_vm2, %v738_v15, %v740_v16  ;;  %17528 = vmatprep.mubr.msk.f32.mxu0 %vm659_vm1, %v739_v22  ;;  %v19725_v24 = vsel %vm736_vm2, %v740_v16, %v742_v19  ;;  %17641 = vmatprep.subr.msk.mxu1 %vm25010_vm0, %v19716_v21  ;;  %v1100_v56 = vrot.slane %v19691_v11, 2  ;;  %v19868_v7 = vld [vmem:[%s25031_s21 + $0x1c] sm:$0xf]  ;;  %s25537_s10 = sld [smem:[#allocation101_spill]] }
  0x34   : > { %690 = vst.msk [vmem:[#allocation2 + $0x65] sm:$0xff] %vm659_vm1, %v655_v9  ;;  %691 = vst.msk [vmem:[#allocation2 + $0x73] sm:$0xff] %vm659_vm1, %v656_v10  ;;  %17529 = vmatmul.mubr.msk.f32.vlgmr.msra.gmra.mxu0 %vm659_vm1, %v741_v23  ;;  %v19740_v26 = vsel %vm736_vm2, %v742_v19, %v744_v20  ;;  %v1101_v57 = vrot.slane %v19693_v12, 2  ;;  %v1313_v58 = vrot.slane %v19695_v13, 3  ;;  %v1312_v59 = vsel %vm25009_vm3, %v1310_v52, %v1311_v53  ;;  %v19886_v15 = vld [vmem:[%s25031_s21 + $0x18] sm:$0xf] }
  0x35   : > { %17573 = vmatpush3.msk.msra.mxu0 %vm25010_vm0, %v19612_v2  ;;  %17531 = vmatprep.mubr.msk.f32.mxu0 %vm659_vm1, %v19725_v24  ;;  %v1315_v60 = vrot.slane %v19705_v17, 3  ;;  %v1103_v61 = vrot.slane %v19695_v13, 2  ;;  %v1105_v63 = vrot.slane %v19705_v17, 2  ;;  %v1317_v1 = vrot.slane %v19707_v18, 3  ;;  %s25538_s9 = sld [smem:[#allocation100_spill]] }
  0x36   : > { %17555 = vmatmul.mubr.msk.f32.gmra.mxu1 %vm659_vm1, %v19705_v17  ;;  %17618 = vmatprep.subr.msk.mxu0 %vm25010_vm0, %v19730_v25  ;;  %v1102_v62 = vsel %vm1099_vm4, %v1100_v56, %v1101_v57  ;;  %v1314_v0 = vsel %vm25009_vm3, %v1311_v53, %v1313_v58  ;;  %v1107_v6 = vrot.slane %v19707_v18, 2  ;;  %v1939_v22 = vrot.slane %v19691_v11, 6  ;;  %s25556_s11 = sld [smem:[#allocation102_spill]] }
  0x37   : > { %17557 = vmatprep.mubr.msk.f32.mxu1 %vm659_vm1, %v19707_v18  ;;  %v19859_v2 = vsel %vm25009_vm3, %v1313_v58, %v1315_v60  ;;  %v1104_v5 = vsel %vm1099_vm4, %v1101_v57, %v1103_v61  ;;  %v19872_v8 = vsel %vm1099_vm4, %v1103_v61, %v1105_v63  ;;  %v19878_v10 = vsel %vm25009_vm3, %v1315_v60, %v1317_v1 }
  0x38   : > { %17532 = vmatmul.mubr.msk.f32.gmra.mxu0 %vm659_vm1, %v19740_v26  ;;  %v24772_v23 = vrot.slane %v19693_v12, 6 }
  0x39   : > { %v19742_v27 = vld [vmem:[#allocation2 + $0x28] sm:$0xff]  ;;  %v19744_v28 = vld [vmem:[#allocation2 + $0x30] sm:$0xff]  ;;  %v19746_v29 = vld [vmem:[#allocation2 + $0x38] sm:$0xff] }
  0x3a   : > { %v746_v30 = vrot.slane %v19742_v27, 1  ;;  %v748_v31 = vrot.slane %v19744_v28, 1  ;;  %v750_v32 = vrot.slane %v19746_v29, 1  ;;  %v19753_v33 = vld [vmem:[#allocation2 + $0x40] sm:$0xff]  ;;  %v19759_v34 = vld [vmem:[#allocation2 + $0x48] sm:$0xff]  ;;  %17558 = vmatmul.mubr.msk.f32.gmra.mxu1 %vm659_vm1, %v19742_v27  ;;  %v19778_v40 = vld [vmem:[#allocation2 + $0x50] sm:$0xff] }
  0x3b   : > { %v752_v37 = vrot.slane %v19753_v33, 1  ;;  %v754_v39 = vrot.slane %v19759_v34, 1  ;;  %17560 = vmatprep.mubr.msk.f32.mxu1 %vm659_vm1, %v19744_v28  ;;  %v19782_v41 = vld [vmem:[#allocation2 + $0x58] sm:$0xff]  ;;  %v756_v43 = vrot.slane %v19778_v40, 1  ;;  %v19798_v46 = vld [vmem:[#allocation2 + $0x60] sm:$0xff]  ;;  %v19802_v47 = vld [vmem:[#allocation2 + $0x68] sm:$0xff] }
  0x3c   : > { %v19764_v35 = vsel %vm736_vm2, %v744_v20, %v746_v30  ;;  %v19769_v36 = vsel %vm736_vm2, %v746_v30, %v748_v31  ;;  %v19775_v38 = vsel %vm736_vm2, %v748_v31, %v750_v32  ;;  %v758_v45 = vrot.slane %v19782_v41, 1 }
  0x3d   : > { %17534 = vmatprep.mubr.msk.f32.mxu0 %vm659_vm1, %v19764_v35  ;;  %v19789_v42 = vsel %vm736_vm2, %v750_v32, %v752_v37  ;;  %v19795_v44 = vsel %vm736_vm2, %v752_v37, %v754_v39  ;;  %v19809_v48 = vsel %vm736_vm2, %v754_v39, %v756_v43  ;;  %v760_v49 = vrot.slane %v19798_v46, 1 }
  0x3e   : > { %17535 = vmatmul.mubr.msk.f32.gmra.mxu0 %vm659_vm1, %v19769_v36  ;;  %17561 = vmatmul.mubr.msk.f32.gmra.mxu1 %vm659_vm1, %v19746_v29  ;;  %25033 = vst [vmem:[#allocation17_spill] sm:$0xff] %v19809_v48  ;;  %v19815_v50 = vsel %vm736_vm2, %v756_v43, %v758_v45  ;;  %v19818_v51 = vrot.slane %v19802_v47, 1  ;;  %v1319_v4 = vrot.slane %v19742_v27, 3  ;;  %v1109_v9 = vrot.slane %v19742_v27, 2 }
  0x3f   : > { %17537 = vmatprep.mubr.msk.f32.mxu0 %vm659_vm1, %v19775_v38  ;;  %17563 = vmatprep.mubr.msk.f32.mxu1 %vm659_vm1, %v19753_v33  ;;  %25034 = vst [vmem:[#allocation18_spill] sm:$0xff] %v19815_v50  ;;  %v19829_v54 = vsel %vm736_vm2, %v758_v45, %v760_v49  ;;  %v1321_v14 = vrot.slane %v19744_v28, 3  ;;  %v1323_v19 = vrot.slane %v19746_v29, 3  ;;  %v19900_v20 = vsel %vm1099_vm4, %v1105_v63, %v1107_v6 }
  0x40   : > { %25035 = vst [vmem:[#allocation19_spill] sm:$0xff] %v19829_v54  ;;  %v19835_v55 = vsel %vm736_vm2, %v760_v49, %v19818_v51  ;;  %v19890_v16 = vsel %vm25009_vm3, %v1317_v1, %v1319_v4  ;;  %v19908_v30 = vsel %vm1099_vm4, %v1107_v6, %v1109_v9  ;;  %v1325_v32 = vrot.slane %v19753_v33, 3 }
  0x41   : > { %25036 = vst [vmem:[#allocation20_spill] sm:$0xff] %v19835_v55  ;;  %v19916_v31 = vsel %vm25009_vm3, %v1319_v4, %v1321_v14  ;;  %v19922_v37 = vsel %vm25012_vm5, %v1939_v22, %v24772_v23  ;;  %v19927_v39 = vsel %vm25009_vm3, %v1321_v14, %v1323_v19  ;;  %v1327_v43 = vrot.slane %v19759_v34, 3 }
  0x42   : > { %17538 = vmatmul.mubr.msk.f32.gmra.mxu0 %vm659_vm1, %v19789_v42  ;;  %17564 = vmatmul.mubr.msk.f32.gmra.mxu1 %vm659_vm1, %v19759_v34  ;;  %25037 = vst [vmem:[#allocation21_spill] sm:$0xff] %v19916_v31  ;;  %25038 = vst [vmem:[#allocation22_spill] sm:$0xff] %v19927_v39  ;;  %v1115_v49 = vrot.slane %v19753_v33, 2  ;;  %v1117_v53 = vrot.slane %v19759_v34, 2  ;;  %v19945_v56 = vsel %vm25009_vm3, %v1323_v19, %v1325_v32  ;;  %v1329_v57 = vrot.slane %v19778_v40, 3 }
  0x43   : > { %17540 = vmatprep.mubr.msk.f32.mxu0 %vm659_vm1, %v19795_v44  ;;  %17566 = vmatprep.mubr.msk.f32.mxu1 %vm659_vm1, %v19778_v40  ;;  %25039 = vst [vmem:[#allocation23_spill] sm:$0xff] %v19945_v56  ;;  %v19951_v58 = vsel %vm25009_vm3, %v1325_v32, %v1327_v43  ;;  %v1119_v61 = vrot.slane %v19778_v40, 2  ;;  %v1121_v63 = vrot.slane %v19782_v41, 2  ;;  %v1333_v1 = vrot.slane %v19798_v46, 3 }
  0x44   : > { %25040 = vst [vmem:[#allocation24_spill] sm:$0xff] %v19951_v58  ;;  %v19992_v19 = vrot.slane %v19802_v47, 2  ;;  %v1730_v32 = vrot.slane %v19693_v12, 5 }
  0x45   : > { %v19983_v6 = vsel %vm1099_vm4, %v1117_v53, %v1119_v61  ;;  %v19989_v14 = vsel %vm1099_vm4, %v1119_v61, %v1121_v63 }
  0x46   : > { %17541 = vmatmul.mubr.msk.f32.gmra.mxu0 %vm659_vm1, %v19809_v48  ;;  %17567 = vmatmul.mubr.msk.f32.gmra.mxu1 %vm659_vm1, %v19782_v41  ;;  %25046 = vst [vmem:[#allocation30_spill] sm:$0xff] %v19983_v6  ;;  %25047 = vst [vmem:[#allocation31_spill] sm:$0xff] %v19989_v14 }
  0x47   : > { %17543 = vmatprep.mubr.msk.f32.mxu0 %vm659_vm1, %v19815_v50  ;;  %17569 = vmatprep.mubr.msk.f32.mxu1 %vm659_vm1, %v19798_v46 }
  0x4a   : > { %17544 = vmatmul.mubr.msk.f32.gmra.mxu0 %vm659_vm1, %v19829_v54  ;;  %17570 = vmatmul.mubr.msk.f32.gmra.mxu1 %vm659_vm1, %v19802_v47 }
  0x4b   : > { %17546 = vmatprep.mubr.msk.f32.mxu0 %vm659_vm1, %v19835_v55  ;;  %17597 = vmatprep.mubr.msk.f32.mxu1 %vm659_vm1, %v1312_v59  ;;  %v1331_v59 = vrot.slane %v19782_v41, 3 }
  0x4d   : > { %v19975_v4 = vsel %vm25009_vm3, %v1329_v57, %v1331_v59 }
  0x4e   : > { %17547 = vmatmul.mubr.msk.f32.gmra.mxu0 %vm659_vm1, %v19818_v51  ;;  %17598 = vmatmul.mubr.msk.f32.vlgmr.msra.gmra.mxu1 %vm659_vm1, %v1314_v0  ;;  %v19969_v0 = vsel %vm25009_vm3, %v1327_v43, %v1329_v57  ;;  %25044 = vst [vmem:[#allocation28_spill] sm:$0xff] %v19975_v4  ;;  %v1520_v57 = vrot.slane %v19693_v12, 4 }
  0x4f   : > { %17574 = vmatprep.mubr.msk.f32.mxu0 %vm659_vm1, %v1102_v62  ;;  %17600 = vmatprep.mubr.msk.f32.mxu1 %vm659_vm1, %v19859_v2  ;;  %v19963_v62 = vsel %vm1099_vm4, %v1115_v49, %v1117_v53  ;;  %25043 = vst [vmem:[#allocation27_spill] sm:$0xff] %v19969_v0  ;;  %v1519_v53 = vrot.slane %v19691_v11, 4 }
  0x50   : > { %17642 = vmatpush3.msk.msra.mxu1 %vm25010_vm0, %v19716_v21  ;;  %v1111_v21 = vrot.slane %v19744_v28, 2  ;;  %25042 = vst [vmem:[#allocation26_spill] sm:$0xff] %v19963_v62 }
  0x51   : > { %17687 = vmatprep.subr.msk.mxu1 %vm25010_vm0, %v19868_v7 }
  0x52   : > { %17575 = vmatmul.mubr.msk.f32.vlgmr.msra.gmra.mxu0 %vm659_vm1, %v1104_v5  ;;  %17601 = vmatmul.mubr.msk.f32.gmra.mxu1 %vm659_vm1, %v19878_v10  ;;  %v19933_v45 = vsel %vm1099_vm4, %v1109_v9, %v1111_v21  ;;  %v19978_v5 = vrot.slane %v19802_v47, 3  ;;  %v1123_v9 = vrot.slane %v19798_v46, 2 }
  0x53   : > { %17619 = vmatpush3.msk.msra.mxu0 %vm25010_vm0, %v19730_v25  ;;  %17577 = vmatprep.mubr.msk.f32.mxu0 %vm659_vm1, %v19872_v8  ;;  %v1113_v25 = vrot.slane %v19746_v29, 2 }
  0x54   : > { %17664 = vmatprep.subr.msk.mxu0 %vm25010_vm0, %v19886_v15  ;;  %17603 = vmatprep.mubr.msk.f32.mxu1 %vm659_vm1, %v19890_v16  ;;  %25045 = vst [vmem:[#allocation29_spill] sm:$0xff] %v19978_v5  ;;  %v20003_v22 = vsel %vm25009_vm3, %v1333_v1, %v19978_v5  ;;  %v20010_v43 = vsel %vm1099_vm4, %v1121_v63, %v1123_v9  ;;  %v1734_v63 = vrot.slane %v19705_v17, 5 }
  0x55   : > { %v19939_v52 = vsel %vm1099_vm4, %v1111_v21, %v1113_v25  ;;  %v19957_v60 = vsel %vm1099_vm4, %v1113_v25, %v1115_v49  ;;  %v19997_v21 = vsel %vm25009_vm3, %v1331_v59, %v1333_v1  ;;  %25049 = vst [vmem:[#allocation33_spill] sm:$0xff] %v20003_v22  ;;  %v1729_v25 = vrot.slane %v19691_v11, 5  ;;  %25050 = vst [vmem:[#allocation34_spill] sm:$0xff] %v20010_v43 }
  0x56   : > { %17578 = vmatmul.mubr.msk.f32.gmra.mxu0 %vm659_vm1, %v19900_v20  ;;  %17604 = vmatmul.mubr.msk.f32.gmra.mxu1 %vm659_vm1, %v19916_v31  ;;  %25041 = vst [vmem:[#allocation25_spill] sm:$0xff] %v19957_v60  ;;  %25048 = vst [vmem:[#allocation32_spill] sm:$0xff] %v19997_v21  ;;  %v20016_v49 = vsel %vm1099_vm4, %v1123_v9, %v19992_v19  ;;  %v1732_v59 = vrot.slane %v19695_v13, 5  ;;  %v1522_v1 = vrot.slane %v19695_v13, 4  ;;  %v1524_v9 = vrot.slane %v19705_v17, 4 }
  0x57   : > { %17580 = vmatprep.mubr.msk.f32.mxu0 %vm659_vm1, %v19908_v30  ;;  %17606 = vmatprep.mubr.msk.f32.mxu1 %vm659_vm1, %v19927_v39  ;;  %25051 = vst [vmem:[#allocation35_spill] sm:$0xff] %v20016_v49  ;;  %v1731_v61 = vsel %vm25003_vm6, %v1729_v25, %v1730_v32  ;;  %v1521_v11 = vsel %vm25010_vm0, %v1519_v53, %v1520_v57  ;;  %v1736_v25 = vrot.slane %v19707_v18, 5  ;;  %v1526_v53 = vrot.slane %v19707_v18, 4 }
  0x58   : > { %v1733_v3 = vsel %vm25003_vm6, %v1730_v32, %v1732_v59  ;;  %v1735_v23 = vsel %vm25003_vm6, %v1732_v59, %v1734_v63  ;;  %v20051_v32 = vsel %vm25010_vm0, %v1522_v1, %v1524_v9  ;;  %v1528_v59 = vrot.slane %v19742_v27, 4 }
  0x5a   : > { %17581 = vmatmul.mubr.msk.f32.gmra.mxu0 %vm659_vm1, %v19933_v45  ;;  %17607 = vmatmul.mubr.msk.f32.gmra.mxu1 %vm659_vm1, %v19945_v56  ;;  %v1752_v56 = vrot.slane %v19798_v46, 5 }
  0x5b   : > { %17583 = vmatprep.mubr.msk.f32.mxu0 %vm659_vm1, %v19939_v52  ;;  %17609 = vmatprep.mubr.msk.f32.mxu1 %vm659_vm1, %v19951_v58  ;;  %v1540_v58 = vrot.slane %v19782_v41, 4 }
  0x5e   : > { %17584 = vmatmul.mubr.msk.f32.gmra.mxu0 %vm659_vm1, %v19957_v60  ;;  %17610 = vmatmul.mubr.msk.f32.gmra.mxu1 %vm659_vm1, %v19969_v0  ;;  %v1748_v0 = vrot.slane %v19778_v40, 5 }
  0x5f   : > { %17586 = vmatprep.mubr.msk.f32.mxu0 %vm659_vm1, %v19963_v62  ;;  %17612 = vmatprep.mubr.msk.f32.mxu1 %vm659_vm1, %v19975_v4  ;;  %v1536_v4 = vrot.slane %v19759_v34, 4 }
  0x62   : > { %17587 = vmatmul.mubr.msk.f32.gmra.mxu0 %vm659_vm1, %v19983_v6  ;;  %17613 = vmatmul.mubr.msk.f32.gmra.mxu1 %vm659_vm1, %v19997_v21  ;;  %v20064_v21 = vld [vmem:[%s25031_s21 + $0x20] sm:$0xf] }
  0x63   : > { %17589 = vmatprep.mubr.msk.f32.mxu0 %vm659_vm1, %v19989_v14  ;;  %17615 = vmatprep.mubr.msk.f32.mxu1 %vm659_vm1, %v20003_v22  ;;  %v1738_v22 = vrot.slane %v19742_v27, 5 }
  0x66   : > { %17590 = vmatmul.mubr.msk.f32.gmra.mxu0 %vm659_vm1, %v20010_v43  ;;  %17616 = vmatmul.mubr.msk.f32.gmra.mxu1 %vm659_vm1, %v19978_v5  ;;  %v1523_v5 = vsel %vm25010_vm0, %v1520_v57, %v1522_v1  ;;  %v1740_v57 = vrot.slane %v19744_v28, 5  ;;  %v1532_v1 = vrot.slane %v19746_v29, 4 }
  0x67   : > { %17592 = vmatprep.mubr.msk.f32.mxu0 %vm659_vm1, %v20016_v49  ;;  %17643 = vmatprep.mubr.msk.f32.mxu1 %vm659_vm1, %v1731_v61  ;;  %v20047_v61 = vld [vmem:[%s25031_s21 + $0x24] sm:$0xf] }
  0x6a   : > { %17593 = vmatmul.mubr.msk.f32.gmra.mxu0 %vm659_vm1, %v19992_v19  ;;  %17644 = vmatmul.mubr.msk.f32.vlgmr.msra.gmra.mxu1 %vm659_vm1, %v1733_v3  ;;  %v20068_v3 = vsel %vm25003_vm6, %v1736_v25, %v1738_v22 }
  0x6b   : > { %17620 = vmatprep.mubr.msk.f32.mxu0 %vm659_vm1, %v1521_v11  ;;  %17646 = vmatprep.mubr.msk.f32.mxu1 %vm659_vm1, %v1735_v23  ;;  %v20056_v11 = vsel %vm25003_vm6, %v1734_v63, %v1736_v25  ;;  %25053 = vst [vmem:[#allocation37_spill] sm:$0xff] %v20068_v3  ;;  %v1742_v23 = vrot.slane %v19746_v29, 5  ;;  %v1530_v63 = vrot.slane %v19744_v28, 4 }
  0x6c   : > { %25052 = vst [vmem:[#allocation36_spill] sm:$0xff] %v20056_v11  ;;  %17688 = vmatpush3.msk.msra.mxu1 %vm25010_vm0, %v19868_v7  ;;  %v20078_v7 = vsel %vm25010_vm0, %v1524_v9, %v1526_v53  ;;  %v1744_v9 = vrot.slane %v19753_v33, 5 }
  0x6d   : > { %17733 = vmatprep.subr.msk.mxu1 %vm25010_vm0, %v20047_v61  ;;  %v20098_v25 = vsel %vm25003_vm6, %v1740_v57, %v1742_v23 }
  0x6e   : > { %17621 = vmatmul.mubr.msk.f32.vlgmr.msra.gmra.mxu0 %vm659_vm1, %v1523_v5  ;;  %17647 = vmatmul.mubr.msk.f32.gmra.mxu1 %vm659_vm1, %v20056_v11  ;;  %v20084_v5 = vsel %vm25010_vm0, %v1526_v53, %v1528_v59  ;;  %25055 = vst [vmem:[#allocation39_spill] sm:$0xff] %v20098_v25  ;;  %v1746_v53 = vrot.slane %v19759_v34, 5  ;;  %v20104_v11 = vsel %vm25010_vm0, %v1528_v59, %v1530_v63 }
  0x6f   : > { %17665 = vmatpush3.msk.msra.mxu0 %vm25010_vm0, %v19886_v15  ;;  %17623 = vmatprep.mubr.msk.f32.mxu0 %vm659_vm1, %v20051_v32  ;;  %v20092_v15 = vsel %vm25003_vm6, %v1738_v22, %v1740_v57  ;;  %25056 = vst [vmem:[#allocation40_spill] sm:$0xff] %v20104_v11  ;;  %v20110_v22 = vsel %vm25010_vm0, %v1530_v63, %v1532_v1 }
  0x70   : > { %17710 = vmatprep.subr.msk.mxu0 %vm25010_vm0, %v20064_v21  ;;  %17649 = vmatprep.mubr.msk.f32.mxu1 %vm659_vm1, %v20068_v3  ;;  %25054 = vst [vmem:[#allocation38_spill] sm:$0xff] %v20092_v15  ;;  %v1534_v3 = vrot.slane %v19753_v33, 4  ;;  %25057 = vst [vmem:[#allocation41_spill] sm:$0xff] %v20110_v22  ;;  %v20116_v57 = vsel %vm25003_vm6, %v1742_v23, %v1744_v9  ;;  %v20122_v59 = vsel %vm25003_vm6, %v1744_v9, %v1746_v53 }
  0x71   : > { %25058 = vst [vmem:[#allocation42_spill] sm:$0xff] %v20116_v57  ;;  %25059 = vst [vmem:[#allocation43_spill] sm:$0xff] %v20122_v59  ;;  %v20140_v9 = vsel %vm25003_vm6, %v1746_v53, %v1748_v0  ;;  %v1542_v53 = vrot.slane %v19798_v46, 4 }
  0x72   : > { %17624 = vmatmul.mubr.msk.f32.gmra.mxu0 %vm659_vm1, %v20078_v7  ;;  %17650 = vmatmul.mubr.msk.f32.gmra.mxu1 %vm659_vm1, %v20092_v15  ;;  %v1750_v15 = vrot.slane %v19782_v41, 5  ;;  %v20128_v63 = vsel %vm25010_vm0, %v1532_v1, %v1534_v3  ;;  %v20134_v23 = vsel %vm25010_vm0, %v1534_v3, %v1536_v4  ;;  %25062 = vst [vmem:[#allocation46_spill] sm:$0xff] %v20140_v9 }
  0x73   : > { %17626 = vmatprep.mubr.msk.f32.mxu0 %vm659_vm1, %v20084_v5  ;;  %17652 = vmatprep.mubr.msk.f32.mxu1 %vm659_vm1, %v20098_v25  ;;  %25060 = vst [vmem:[#allocation44_spill] sm:$0xff] %v20128_v63  ;;  %v1538_v25 = vrot.slane %v19778_v40, 4  ;;  %25061 = vst [vmem:[#allocation45_spill] sm:$0xff] %v20134_v23 }
  0x74   : > { %v20146_v1 = vsel %vm25003_vm6, %v1748_v0, %v1750_v15  ;;  %v20163_v0 = vrot.slane %v19802_v47, 4 }
  0x75   : > { %25063 = vst [vmem:[#allocation47_spill] sm:$0xff] %v20146_v1  ;;  %v20154_v3 = vsel %vm25010_vm0, %v1536_v4, %v1538_v25 }
  0x76   : > { %17627 = vmatmul.mubr.msk.f32.gmra.mxu0 %vm659_vm1, %v20104_v11  ;;  %17653 = vmatmul.mubr.msk.f32.gmra.mxu1 %vm659_vm1, %v20116_v57  ;;  %v20149_v57 = vrot.slane %v19802_v47, 5  ;;  %25065 = vst [vmem:[#allocation49_spill] sm:$0xff] %v20154_v3  ;;  %25067 = vst [vmem:[#allocation51_spill] sm:$0xff] %v20163_v0 }
  0x77   : > { %17629 = vmatprep.mubr.msk.f32.mxu0 %vm659_vm1, %v20110_v22  ;;  %17655 = vmatprep.mubr.msk.f32.mxu1 %vm659_vm1, %v20122_v59  ;;  %v20160_v59 = vsel %vm25010_vm0, %v1538_v25, %v1540_v58  ;;  %v1942_v25 = vrot.slane %v19695_v13, 6 }
  0x78   : > { %25064 = vst [vmem:[#allocation48_spill] sm:$0xff] %v20149_v57  ;;  %25066 = vst [vmem:[#allocation50_spill] sm:$0xff] %v20160_v59  ;;  %v20174_v4 = vsel %vm25003_vm6, %v1752_v56, %v20149_v57 }
  0x79   : > { %25069 = vst [vmem:[#allocation53_spill] sm:$0xff] %v20174_v4 }
  0x7a   : > { %17630 = vmatmul.mubr.msk.f32.gmra.mxu0 %vm659_vm1, %v20128_v63  ;;  %17656 = vmatmul.mubr.msk.f32.gmra.mxu1 %vm659_vm1, %v20140_v9  ;;  %v20168_v63 = vsel %vm25003_vm6, %v1750_v15, %v1752_v56  ;;  %v20180_v9 = vsel %vm25010_vm0, %v1540_v58, %v1542_v53  ;;  %v20186_v15 = vsel %vm25010_vm0, %v1542_v53, %v20163_v0  ;;  %v1944_v56 = vrot.slane %v19705_v17, 6 }
  0x7b   : > { %17632 = vmatprep.mubr.msk.f32.mxu0 %vm659_vm1, %v20134_v23  ;;  %17658 = vmatprep.mubr.msk.f32.mxu1 %vm659_vm1, %v20146_v1  ;;  %25068 = vst [vmem:[#allocation52_spill] sm:$0xff] %v20168_v63  ;;  %25070 = vst [vmem:[#allocation54_spill] sm:$0xff] %v20180_v9  ;;  %v25072_v1 = vrot.slane %v19693_v12, 6 }
  0x7c   : > { %25071 = vst [vmem:[#allocation55_spill] sm:$0xff] %v20186_v15  ;;  %v1945_v53 = vsel %vm25012_vm5, %v1942_v25, %v1944_v56 }
  0x7d   : > { %v1943_v58 = vsel %vm25012_vm5, %v25072_v1, %v1942_v25  ;;  %v20217_v25 = vld [vmem:[%s25031_s21 + $0x2c] sm:$0xf] }
  0x7e   : > { %17633 = vmatmul.mubr.msk.f32.gmra.mxu0 %vm659_vm1, %v20154_v3  ;;  %17659 = vmatmul.mubr.msk.f32.gmra.mxu1 %vm659_vm1, %v20168_v63  ;;  %v657_v63 = vld [vmem:[%s19680_s3 + $0x30] sm:$0xff] }
  0x7f   : > { %17635 = vmatprep.mubr.msk.f32.mxu0 %vm659_vm1, %v20160_v59  ;;  %17661 = vmatprep.mubr.msk.f32.mxu1 %vm659_vm1, %v20174_v4  ;;  %v1946_v59 = vrot.slane %v19707_v18, 6  ;;  %v1948_v4 = vrot.slane %v19742_v27, 6  ;;  %692 = vst.msk [vmem:[#allocation2 + $0x81] sm:$0xff] %vm659_vm1, %v657_v63 }
  0x81   : > { %v20208_v1 = vsel %vm25012_vm5, %v1944_v56, %v1946_v59  ;;  %v20223_v56 = vsel %vm25012_vm5, %v1946_v59, %v1948_v4  ;;  %v1956_v59 = vrot.slane %v19759_v34, 6 }
  0x82   : > { %17636 = vmatmul.mubr.msk.f32.gmra.mxu0 %vm659_vm1, %v20180_v9  ;;  %17662 = vmatmul.mubr.msk.f32.gmra.mxu1 %vm659_vm1, %v20149_v57  ;;  %v1950_v9 = vrot.slane %v19744_v28, 6  ;;  %25073 = vst [vmem:[#allocation56_spill] sm:$0xff] %v20223_v56  ;;  %v1952_v57 = vrot.slane %v19746_v29, 6 }
  0x83   : > { %17638 = vmatprep.mubr.msk.f32.mxu0 %vm659_vm1, %v20186_v15  ;;  %17689 = vmatprep.mubr.msk.f32.mxu1 %vm659_vm1, %v1943_v58 }
  0x84   : > { %v20235_v63 = vsel %vm25012_vm5, %v1948_v4, %v1950_v9  ;;  %v1958_v4 = vrot.slane %v19778_v40, 6 }
  0x85   : > { %25074 = vst [vmem:[#allocation57_spill] sm:$0xff] %v20235_v63 }
  0x86   : > { %17639 = vmatmul.mubr.msk.f32.gmra.mxu0 %vm659_vm1, %v20163_v0  ;;  %17690 = vmatmul.mubr.msk.f32.vlgmr.msra.gmra.mxu1 %vm659_vm1, %v1945_v53  ;;  %v1954_v0 = vrot.slane %v19753_v33, 6 }
  0x87   : > { %17666 = vmatprep.mubr.msk.f32.mxu0 %vm659_vm1, %v19922_v37  ;;  %17692 = vmatprep.mubr.msk.f32.mxu1 %vm659_vm1, %v20208_v1  ;;  %v20231_v37 = vld [vmem:[%s25031_s21 + $0x28] sm:$0xf] }
  0x88   : > { %17734 = vmatpush3.msk.msra.mxu1 %vm25010_vm0, %v20047_v61  ;;  %v20250_v61 = vsel %vm25012_vm5, %v1950_v9, %v1952_v57  ;;  %v20266_v9 = vsel %vm25012_vm5, %v1954_v0, %v1956_v59 }
  0x89   : > { %17779 = vmatprep.subr.msk.mxu1 %vm25010_vm0, %v20217_v25  ;;  %25075 = vst [vmem:[#allocation58_spill] sm:$0xff] %v20250_v61  ;;  %25077 = vst [vmem:[#allocation60_spill] sm:$0xff] %v20266_v9 }
  0x8a   : > { %17667 = vmatmul.mubr.msk.f32.vlgmr.msra.gmra.mxu0 %vm659_vm1, %v1943_v58  ;;  %17693 = vmatmul.mubr.msk.f32.gmra.mxu1 %vm659_vm1, %v20223_v56  ;;  %v1960_v58 = vrot.slane %v19782_v41, 6 }
  0x8b   : > { %17711 = vmatpush3.msk.msra.mxu0 %vm25010_vm0, %v20064_v21  ;;  %17669 = vmatprep.mubr.msk.f32.mxu0 %vm659_vm1, %v1945_v53  ;;  %v20256_v21 = vsel %vm25012_vm5, %v1952_v57, %v1954_v0  ;;  %v20272_v57 = vsel %vm25012_vm5, %v1956_v59, %v1958_v4  ;;  %v1962_v53 = vrot.slane %v19798_v46, 6 }
  0x8c   : > { %17756 = vmatprep.subr.msk.mxu0 %vm25010_vm0, %v20231_v37  ;;  %17695 = vmatprep.mubr.msk.f32.mxu1 %vm659_vm1, %v20235_v63  ;;  %25076 = vst [vmem:[#allocation59_spill] sm:$0xff] %v20256_v21  ;;  %25078 = vst [vmem:[#allocation61_spill] sm:$0xff] %v20272_v57  ;;  %v20284_v0 = vsel %vm25012_vm5, %v1958_v4, %v1960_v58 }
  0x8d   : > { %25079 = vst [vmem:[#allocation62_spill] sm:$0xff] %v20284_v0  ;;  %v20290_v59 = vsel %vm25012_vm5, %v1960_v58, %v1962_v53 }
  0x8e   : > { %17670 = vmatmul.mubr.msk.f32.gmra.mxu0 %vm659_vm1, %v20208_v1  ;;  %17696 = vmatmul.mubr.msk.f32.gmra.mxu1 %vm659_vm1, %v20250_v61  ;;  %25080 = vst [vmem:[#allocation63_spill] sm:$0xff] %v20290_v59 }
  0x8f   : > { %17672 = vmatprep.mubr.msk.f32.mxu0 %vm659_vm1, %v20223_v56  ;;  %17698 = vmatprep.mubr.msk.f32.mxu1 %vm659_vm1, %v20256_v21  ;;  %v20277_v56 = vld [vmem:[#allocation2 + $0x70] sm:$0xff] }
  0x92   : > { %17673 = vmatmul.mubr.msk.f32.gmra.mxu0 %vm659_vm1, %v20235_v63  ;;  %17699 = vmatmul.mubr.msk.f32.gmra.mxu1 %vm659_vm1, %v20266_v9  ;;  %v1964_v63 = vrot.slane %v19802_v47, 6 }
  0x93   : > { %17675 = vmatprep.mubr.msk.f32.mxu0 %vm659_vm1, %v20250_v61  ;;  %17701 = vmatprep.mubr.msk.f32.mxu1 %vm659_vm1, %v20272_v57  ;;  %v20293_v61 = vrot.slane %v20277_v56, 6 }
  0x94   : > { %v20302_v4 = vsel %vm25012_vm5, %v1962_v53, %v1964_v63  ;;  %v2314_v53 = vrot.slane %v19705_v17, 7 }
  0x95   : > { %25081 = vst [vmem:[#allocation64_spill] sm:$0xff] %v20293_v61  ;;  %25082 = vst [vmem:[#allocation65_spill] sm:$0xff] %v20302_v4  ;;  %v20308_v58 = vsel %vm25012_vm5, %v1964_v63, %v20293_v61 }
  0x96   : > { %17676 = vmatmul.mubr.msk.f32.gmra.mxu0 %vm659_vm1, %v20256_v21  ;;  %17702 = vmatmul.mubr.msk.f32.gmra.mxu1 %vm659_vm1, %v20284_v0  ;;  %25083 = vst [vmem:[#allocation66_spill] sm:$0xff] %v20308_v58  ;;  %v2312_v21 = vrot.slane %v19695_v13, 7 }
  0x97   : > { %17678 = vmatprep.mubr.msk.f32.mxu0 %vm659_vm1, %v20266_v9  ;;  %17704 = vmatprep.mubr.msk.f32.mxu1 %vm659_vm1, %v20290_v59  ;;  %v2311_v9 = vrot.slane %v19693_v12, 7 }
  0x99   : > { %v2313_v12 = vsel %vm25004_vm7, %v2311_v9, %v2312_v21 }
  0x9a   : > { %17679 = vmatmul.mubr.msk.f32.gmra.mxu0 %vm659_vm1, %v20272_v57  ;;  %17705 = vmatmul.mubr.msk.f32.gmra.mxu1 %vm659_vm1, %v20302_v4 }
  0x9b   : > { %17681 = vmatprep.mubr.msk.f32.mxu0 %vm659_vm1, %v20284_v0  ;;  %17707 = vmatprep.mubr.msk.f32.mxu1 %vm659_vm1, %v20308_v58  ;;  %v2316_v0 = vrot.slane %v19707_v18, 7  ;;  %v2315_v58 = vsel %vm25004_vm7, %v2312_v21, %v2314_v53 }
  0x9d   : > { %v20339_v9 = vsel %vm25004_vm7, %v2314_v53, %v2316_v0  ;;  %v2334_v53 = vrot.slane %v19802_v47, 7 }
  0x9e   : > { %17682 = vmatmul.mubr.msk.f32.gmra.mxu0 %vm659_vm1, %v20290_v59  ;;  %17708 = vmatmul.mubr.msk.f32.gmra.mxu1 %vm659_vm1, %v20293_v61  ;;  %v15611_v59 = vld [vmem:[%s25031_s21 + $0x34] sm:$0xf]  ;;  %v658_v61 = vld [vmem:[%s19680_s3 + $0x38] sm:$0xff]  ;;  %s24678_s3 = sand.u32 1, %s19434_s22  }
  0x9f   : > { %17684 = vmatprep.mubr.msk.f32.mxu0 %vm659_vm1, %v20302_v4  ;;  %17735 = vmatprep.mubr.msk.f32.mxu1 %vm659_vm1, %v19695_v13  ;;  %v2318_v4 = vrot.slane %v19742_v27, 7  ;;  %v2320_v13 = vrot.slane %v19744_v28, 7  ;;  %693 = vst.msk [vmem:[#allocation2 + $0x8f] sm:$0xff] %vm659_vm1, %v658_v61  ;;  %v2324_v61 = vrot.slane %v19753_v33, 7  ;;  %s15281_s26 = scalar_lea.sflag [#allocation11], %s24678_s3 }
  0xa2   : > { %17685 = vmatmul.mubr.msk.f32.gmra.mxu0 %vm659_vm1, %v1964_v63  ;;  %17736 = vmatmul.mubr.msk.f32.vlgmr.msra.gmra.mxu1 %vm659_vm1, %v19705_v17  ;;  %v15595_v63 = vld [vmem:[%s25031_s21 + $0x30] sm:$0xf]  ;;  %v20358_v17 = vsel %vm25004_vm7, %v2316_v0, %v2318_v4  ;;  %v2328_v0 = vrot.slane %v19778_v40, 7 }
  0xa3   : > { %17712 = vmatprep.mubr.msk.f32.mxu0 %vm659_vm1, %v2313_v12  ;;  %17738 = vmatprep.mubr.msk.f32.mxu1 %vm659_vm1, %v19707_v18  ;;  %v2322_v18 = vrot.slane %v19746_v29, 7  ;;  %v2336_v12 = vrot.slane %v20277_v56, 7 }
  0xa4   : > { %17780 = vmatpush3.msk.msra.mxu1 %vm25010_vm0, %v20217_v25  ;;  %v20364_v25 = vsel %vm25004_vm7, %v2318_v4, %v2320_v13  ;;  %v2330_v4 = vrot.slane %v19782_v41, 7 }
  0xa5   : > { %17825 = vmatprep.subr.msk.mxu1 %vm25010_vm0, %v15611_v59  ;;  %25084 = vst [vmem:[#allocation67_spill] sm:$0xff] %v20364_v25  ;;  %v20381_v21 = vsel %vm25004_vm7, %v2322_v18, %v2324_v61 }
  0xa6   : > { %17713 = vmatmul.mubr.msk.f32.vlgmr.msra.gmra.mxu0 %vm659_vm1, %v2315_v58  ;;  %17739 = vmatmul.mubr.msk.f32.gmra.mxu1 %vm659_vm1, %v19742_v27  ;;  %v2326_v27 = vrot.slane %v19759_v34, 7  ;;  %25086 = vst [vmem:[#allocation69_spill] sm:$0xff] %v20381_v21  ;;  %v2332_v58 = vrot.slane %v19798_v46, 7 }
  0xa7   : > { %17757 = vmatpush3.msk.msra.mxu0 %vm25010_vm0, %v20231_v37  ;;  %17715 = vmatprep.mubr.msk.f32.mxu0 %vm659_vm1, %v20339_v9  ;;  %v20375_v37 = vsel %vm25004_vm7, %v2320_v13, %v2322_v18  ;;  %v20431_v18 = vsel %vm25004_vm7, %v2334_v53, %v2336_v12 }
  0xa8   : > { %17802 = vmatprep.subr.msk.mxu0 %vm25010_vm0, %v15595_v63  ;;  %17741 = vmatprep.mubr.msk.f32.mxu1 %vm659_vm1, %v19744_v28  ;;  %25085 = vst [vmem:[#allocation68_spill] sm:$0xff] %v20375_v37  ;;  %v20391_v28 = vsel %vm25004_vm7, %v2324_v61, %v2326_v27  ;;  %v20425_v13 = vsel %vm25004_vm7, %v2332_v58, %v2334_v53  ;;  %25092 = vst [vmem:[#allocation75_spill] sm:$0xff] %v20431_v18 }
  0xa9   : > { %25087 = vst [vmem:[#allocation70_spill] sm:$0xff] %v20391_v28  ;;  %25091 = vst [vmem:[#allocation74_spill] sm:$0xff] %v20425_v13 }
  0xaa   : > { %17716 = vmatmul.mubr.msk.f32.gmra.mxu0 %vm659_vm1, %v20358_v17  ;;  %17742 = vmatmul.mubr.msk.f32.gmra.mxu1 %vm659_vm1, %v19746_v29  ;;  %v20397_v29 = vsel %vm25004_vm7, %v2326_v27, %v2328_v0 }
  0xab   : > { %17718 = vmatprep.mubr.msk.f32.mxu0 %vm659_vm1, %v20364_v25  ;;  %17744 = vmatprep.mubr.msk.f32.mxu1 %vm659_vm1, %v19753_v33  ;;  %25088 = vst [vmem:[#allocation71_spill] sm:$0xff] %v20397_v29  ;;  %v20407_v33 = vsel %vm25004_vm7, %v2328_v0, %v2330_v4  ;;  %v25102_v0 = vld [vmem:[#allocation50_spill] sm:$0xff] }
  0xac   : > { %25089 = vst [vmem:[#allocation72_spill] sm:$0xff] %v20407_v33 }
  0xae   : > { %17719 = vmatmul.mubr.msk.f32.gmra.mxu0 %vm659_vm1, %v20375_v37  ;;  %17745 = vmatmul.mubr.msk.f32.gmra.mxu1 %vm659_vm1, %v19759_v34  ;;  %v20413_v34 = vsel %vm25004_vm7, %v2330_v4, %v2332_v58  ;;  %v3172_v4 = vrot.slane %v20277_v56, 4  ;;  %v25103_v58 = vld [vmem:[#allocation27_spill] sm:$0xff] }
  0xaf   : > { %17721 = vmatprep.mubr.msk.f32.mxu0 %vm659_vm1, %v20381_v21  ;;  %17747 = vmatprep.mubr.msk.f32.mxu1 %vm659_vm1, %v19778_v40  ;;  %25090 = vst [vmem:[#allocation73_spill] sm:$0xff] %v20413_v34  ;;  %v20416_v40 = vld [vmem:[#allocation2 + $0x78] sm:$0xff] }
  0xb0   : > { %v20584_v53 = vrot.slane %v20416_v40, 4 }
  0xb2   : > { %17722 = vmatmul.mubr.msk.f32.gmra.mxu0 %vm659_vm1, %v20391_v28  ;;  %17748 = vmatmul.mubr.msk.f32.gmra.mxu1 %vm659_vm1, %v19782_v41  ;;  %v24830_v41 = vrot.slane %v20416_v40, 7 }
  0xb3   : > { %17724 = vmatprep.mubr.msk.f32.mxu0 %vm659_vm1, %v20397_v29  ;;  %17750 = vmatprep.mubr.msk.f32.mxu1 %vm659_vm1, %v19798_v46 }
  0xb4   : > { %v20442_v46 = vsel %vm25004_vm7, %v2336_v12, %v24830_v41  ;;  %v25104_v12 = vld [vmem:[#allocation28_spill] sm:$0xff] }
  0xb5   : > { %25093 = vst [vmem:[#allocation76_spill] sm:$0xff] %v20442_v46 }
  0xb6   : > { %17725 = vmatmul.mubr.msk.f32.gmra.mxu0 %vm659_vm1, %v20407_v33  ;;  %17751 = vmatmul.mubr.msk.f32.gmra.mxu1 %vm659_vm1, %v19802_v47  ;;  %v15643_v47 = vld [vmem:[%s25031_s21 + $0x3c] sm:$0xf] }
  0xb7   : > { %17727 = vmatprep.mubr.msk.f32.mxu0 %vm659_vm1, %v20413_v34  ;;  %17753 = vmatprep.mubr.msk.f32.mxu1 %vm659_vm1, %v20277_v56 }
  0xba   : > { %17728 = vmatmul.mubr.msk.f32.gmra.mxu0 %vm659_vm1, %v20425_v13  ;;  %17754 = vmatmul.mubr.msk.f32.gmra.mxu1 %vm659_vm1, %v20416_v40 }
  0xbb   : > { %17730 = vmatprep.mubr.msk.f32.mxu0 %vm659_vm1, %v20431_v18  ;;  %17781 = vmatprep.mubr.msk.f32.mxu1 %vm659_vm1, %v19872_v8  ;;  %v15627_v8 = vld [vmem:[%s25031_s21 + $0x38] sm:$0xf] }
  0xbe   : > { %17731 = vmatmul.mubr.msk.f32.gmra.mxu0 %vm659_vm1, %v20442_v46  ;;  %17782 = vmatmul.mubr.msk.f32.vlgmr.msra.gmra.mxu1 %vm659_vm1, %v19900_v20  ;;  %v2680_v20 = vrot.slane %v20277_v56, 1 }
  0xbf   : > { %17758 = vmatprep.mubr.msk.f32.mxu0 %vm659_vm1, %v19725_v24  ;;  %17784 = vmatprep.mubr.msk.f32.mxu1 %vm659_vm1, %v19908_v30  ;;  %v2844_v24 = vrot.slane %v20277_v56, 2 }
  0xc0   : > { %17826 = vmatpush3.msk.msra.mxu1 %vm25010_vm0, %v15611_v59  ;;  %v20502_v59 = vrot.slane %v20416_v40, 1  ;;  %v20520_v27 = vsel %vm736_vm2, %v19818_v51, %v2680_v20  ;;  %v15675_v51 = vld [vmem:[%s25031_s21 + $0x44] sm:$0xf] }
  0xc1   : > { %17871 = vmatprep.subr.msk.mxu1 %vm25010_vm0, %v15643_v47  ;;  %25097 = vst [vmem:[#allocation80_spill] sm:$0xff] %v20520_v27 }
  0xc2   : > { %17759 = vmatmul.mubr.msk.f32.vlgmr.msra.gmra.mxu0 %vm659_vm1, %v19740_v26  ;;  %17785 = vmatmul.mubr.msk.f32.gmra.mxu1 %vm659_vm1, %v19933_v45  ;;  %v20494_v26 = vrot.slane %v20416_v40, 2 }
  0xc3   : > { %17803 = vmatpush3.msk.msra.mxu0 %vm25010_vm0, %v15595_v63  ;;  %17761 = vmatprep.mubr.msk.f32.mxu0 %vm659_vm1, %v19764_v35  ;;  %v20508_v63 = vsel %vm1099_vm4, %v19992_v19, %v2844_v24  ;;  %v20526_v19 = vsel %vm736_vm2, %v2680_v20, %v20502_v59  ;;  %v25107_v20 = vld [vmem:[#allocation51_spill] sm:$0xff] }
  0xc4   : > { %17848 = vmatprep.subr.msk.mxu0 %vm25010_vm0, %v15627_v8  ;;  %17787 = vmatprep.mubr.msk.f32.mxu1 %vm659_vm1, %v19939_v52  ;;  %25094 = vst [vmem:[#allocation77_spill] sm:$0xff] %v20494_v26  ;;  %25095 = vst [vmem:[#allocation78_spill] sm:$0xff] %v20508_v63  ;;  %v20514_v61 = vsel %vm1099_vm4, %v2844_v24, %v20494_v26  ;;  %v20592_v24 = vrot.slane %v20416_v40, 3  ;;  %v20598_v41 = vsel %vm25010_vm0, %v25107_v20, %v3172_v4 }
  0xc5   : > { %25096 = vst [vmem:[#allocation79_spill] sm:$0xff] %v20514_v61  ;;  %25098 = vst [vmem:[#allocation81_spill] sm:$0xff] %v20526_v19 }
  0xc6   : > { %17762 = vmatmul.mubr.msk.f32.gmra.mxu0 %vm659_vm1, %v19769_v36  ;;  %17788 = vmatmul.mubr.msk.f32.gmra.mxu1 %vm659_vm1, %v19957_v60  ;;  %25106 = vst [vmem:[#allocation82_spill] sm:$0xff] %v20592_v24  ;;  %25108 = vst [vmem:[#allocation51_spill] sm:$0xff] %v20598_v41 }
  0xc7   : > { %17764 = vmatprep.mubr.msk.f32.mxu0 %vm659_vm1, %v19775_v38  ;;  %17790 = vmatprep.mubr.msk.f32.mxu1 %vm659_vm1, %v19963_v62 }
  0xca   : > { %17765 = vmatmul.mubr.msk.f32.gmra.mxu0 %vm659_vm1, %v19789_v42  ;;  %17791 = vmatmul.mubr.msk.f32.gmra.mxu1 %vm659_vm1, %v19983_v6 }
  0xcb   : > { %17767 = vmatprep.mubr.msk.f32.mxu0 %vm659_vm1, %v19795_v44  ;;  %17793 = vmatprep.mubr.msk.f32.mxu1 %vm659_vm1, %v19989_v14 }
  0xce   : > { %17768 = vmatmul.mubr.msk.f32.gmra.mxu0 %vm659_vm1, %v19809_v48  ;;  %17794 = vmatmul.mubr.msk.f32.gmra.mxu1 %vm659_vm1, %v20010_v43  ;;  %v25127_v43 = vld [vmem:[#allocation53_spill] sm:$0xff] }
  0xcf   : > { %17770 = vmatprep.mubr.msk.f32.mxu0 %vm659_vm1, %v19815_v50  ;;  %17796 = vmatprep.mubr.msk.f32.mxu1 %vm659_vm1, %v20016_v49 }
  0xd2   : > { %17771 = vmatmul.mubr.msk.f32.gmra.mxu0 %vm659_vm1, %v19829_v54  ;;  %17797 = vmatmul.mubr.msk.f32.gmra.mxu1 %vm659_vm1, %v20508_v63 }
  0xd3   : > { %17773 = vmatprep.mubr.msk.f32.mxu0 %vm659_vm1, %v19835_v55  ;;  %17799 = vmatprep.mubr.msk.f32.mxu1 %vm659_vm1, %v20514_v61  ;;  %v25116_v61 = vld [vmem:[#allocation37_spill] sm:$0xff] }
  0xd6   : > { %17774 = vmatmul.mubr.msk.f32.gmra.mxu0 %vm659_vm1, %v20520_v27  ;;  %17800 = vmatmul.mubr.msk.f32.gmra.mxu1 %vm659_vm1, %v20494_v26  ;;  %v25117_v26 = vld [vmem:[#allocation38_spill] sm:$0xff] }
  0xd7   : > { %17776 = vmatprep.mubr.msk.f32.mxu0 %vm659_vm1, %v20526_v19  ;;  %17827 = vmatprep.mubr.msk.f32.mxu1 %vm659_vm1, %v20051_v32  ;;  %v15659_v32 = vld [vmem:[%s25031_s21 + $0x40] sm:$0xf] }
  0xda   : > { %17777 = vmatmul.mubr.msk.f32.gmra.mxu0 %vm659_vm1, %v20502_v59  ;;  %17828 = vmatmul.mubr.msk.f32.vlgmr.msra.gmra.mxu1 %vm659_vm1, %v20078_v7 }
  0xdb   : > { %17804 = vmatprep.mubr.msk.f32.mxu0 %vm659_vm1, %v19859_v2  ;;  %17830 = vmatprep.mubr.msk.f32.mxu1 %vm659_vm1, %v20084_v5  ;;  %v25099_v2 = vld [vmem:[#allocation44_spill] sm:$0xff] }
  0xdc   : > { %17872 = vmatpush3.msk.msra.mxu1 %vm25010_vm0, %v15643_v47  ;;  %v3008_v47 = vrot.slane %v20277_v56, 3 }
  0xdd   : > { %17917 = vmatprep.subr.msk.mxu1 %vm25010_vm0, %v15675_v51 }
  0xde   : > { %17805 = vmatmul.mubr.msk.f32.vlgmr.msra.gmra.mxu0 %vm659_vm1, %v19878_v10  ;;  %17831 = vmatmul.mubr.msk.f32.gmra.mxu1 %vm659_vm1, %v20104_v11  ;;  %v25100_v10 = vld [vmem:[#allocation23_spill] sm:$0xff]  ;;  %v20616_v20 = vsel %vm25009_vm3, %v3008_v47, %v20592_v24 }
  0xdf   : > { %17849 = vmatpush3.msk.msra.mxu0 %vm25010_vm0, %v15627_v8  ;;  %17807 = vmatprep.mubr.msk.f32.mxu0 %vm659_vm1, %v19890_v16  ;;  %v25101_v16 = vld [vmem:[#allocation24_spill] sm:$0xff]  ;;  %v25105_v8 = vld [vmem:[#allocation54_spill] sm:$0xff]  ;;  %25114 = vst [vmem:[#allocation84_spill] sm:$0xff] %v20616_v20 }
  0xe0   : > { %17894 = vmatprep.subr.msk.mxu0 %vm25010_vm0, %v15659_v32  ;;  %17833 = vmatprep.mubr.msk.f32.mxu1 %vm659_vm1, %v20110_v22 }
  0xe2   : > { %17808 = vmatmul.mubr.msk.f32.gmra.mxu0 %vm659_vm1, %v19916_v31  ;;  %17834 = vmatmul.mubr.msk.f32.gmra.mxu1 %vm659_vm1, %v25099_v2 }
  0xe3   : > { %17810 = vmatprep.mubr.msk.f32.mxu0 %vm659_vm1, %v19927_v39  ;;  %17836 = vmatprep.mubr.msk.f32.mxu1 %vm659_vm1, %v20134_v23 }
  0xe6   : > { %17811 = vmatmul.mubr.msk.f32.gmra.mxu0 %vm659_vm1, %v25100_v10  ;;  %17837 = vmatmul.mubr.msk.f32.gmra.mxu1 %vm659_vm1, %v20154_v3  ;;  %v25112_v10 = vld [vmem:[#allocation29_spill] sm:$0xff] }
  0xe7   : > { %17813 = vmatprep.mubr.msk.f32.mxu0 %vm659_vm1, %v25101_v16  ;;  %17839 = vmatprep.mubr.msk.f32.mxu1 %vm659_vm1, %v25102_v0  ;;  %v25111_v16 = vld [vmem:[#allocation33_spill] sm:$0xff]  ;;  %v20610_v39 = vsel %vm25009_vm3, %v25112_v10, %v3008_v47 }
  0xe8   : > { %25113 = vst [vmem:[#allocation29_spill] sm:$0xff] %v20610_v39 }
  0xea   : > { %17814 = vmatmul.mubr.msk.f32.gmra.mxu0 %vm659_vm1, %v25103_v58  ;;  %17840 = vmatmul.mubr.msk.f32.gmra.mxu1 %vm659_vm1, %v25105_v8  ;;  %v25109_v58 = vld [vmem:[#allocation32_spill] sm:$0xff] }
  0xeb   : > { %17816 = vmatprep.mubr.msk.f32.mxu0 %vm659_vm1, %v25104_v12  ;;  %17842 = vmatprep.mubr.msk.f32.mxu1 %vm659_vm1, %v20186_v15  ;;  %v20604_v12 = vsel %vm25010_vm0, %v3172_v4, %v20584_v53 }
  0xec   : > { %25110 = vst [vmem:[#allocation83_spill] sm:$0xff] %v20604_v12 }
  0xee   : > { %17817 = vmatmul.mubr.msk.f32.gmra.mxu0 %vm659_vm1, %v25109_v58  ;;  %17843 = vmatmul.mubr.msk.f32.gmra.mxu1 %vm659_vm1, %v20598_v41 }
  0xef   : > { %17819 = vmatprep.mubr.msk.f32.mxu0 %vm659_vm1, %v25111_v16  ;;  %17845 = vmatprep.mubr.msk.f32.mxu1 %vm659_vm1, %v20604_v12  ;;  %v25115_v16 = vld [vmem:[#allocation36_spill] sm:$0xff] }
  0xf1   : > { %v17553_v4 = vpop.f32.mrf.mxu1 }
  0xf2   : > { %17820 = vmatmul.mubr.msk.f32.gmra.mxu0 %vm659_vm1, %v20610_v39  ;;  %17846 = vmatmul.mubr.msk.f32.gmra.mxu1 %vm659_vm1, %v20584_v53 }
  0xf3   : > { %17822 = vmatprep.mubr.msk.f32.mxu0 %vm659_vm1, %v20616_v20  ;;  %v1028_v10 = vpop.f32.mrf.mxu1  ;;  %17873 = vmatprep.mubr.msk.f32.mxu1 %vm659_vm1, %v25115_v16  ;;  %v20637_v20 = vld [vmem:[%s25031_s21 + $0x4c] sm:$0xf] }
  0xf4   : > { %v17530_v58 = vpop.f32.mrf.mxu0 }
  0xf5   : > { %v20630_v47 = vadd.f32 %v17553_v4, %v17530_v58 }
  0xf6   : > { %17823 = vmatmul.mubr.msk.f32.gmra.mxu0 %vm659_vm1, %v20592_v24  ;;  %v862_v39 = vpop.f32.mrf.mxu0  ;;  %v17556_v31 = vpop.f32.mrf.mxu1  ;;  %17874 = vmatmul.mubr.msk.f32.vlgmr.msra.gmra.mxu1 %vm659_vm1, %v25116_v61 }
  0xf7   : > { %17850 = vmatprep.mubr.msk.f32.mxu0 %vm659_vm1, %v20078_v7  ;;  %v20641_v16 = vadd.f32 %v1028_v10, %v862_v39  ;;  %17876 = vmatprep.mubr.msk.f32.mxu1 %vm659_vm1, %v25117_v26  ;;  %v20649_v7 = vld [vmem:[%s25031_s21 + $0x48] sm:$0xf]  ;;  %v25118_v10 = vld [vmem:[#allocation39_spill] sm:$0xff]  ;;  %v25119_v26 = vld [vmem:[#allocation42_spill] sm:$0xff] }
  0xf8   : > { %17918 = vmatpush3.msk.msra.mxu1 %vm25010_vm0, %v15675_v51  ;;  %v17533_v58 = vpop.f32.mrf.mxu0  ;;  %v1038_v4 = vpop.f32.mrf.mxu1 }
  0xf9   : > { %17963 = vmatprep.subr.msk.mxu1 %vm25010_vm0, %v20637_v20  ;;  %v20655_v39 = vadd.f32 %v17556_v31, %v17533_v58 }
  0xfa   : > { %17851 = vmatmul.mubr.msk.f32.vlgmr.msra.gmra.mxu0 %vm659_vm1, %v20084_v5  ;;  %v872_v61 = vpop.f32.mrf.mxu0  ;;  %v17559_v51 = vpop.f32.mrf.mxu1  ;;  %17877 = vmatmul.mubr.msk.f32.gmra.mxu1 %vm659_vm1, %v25118_v10 }
  0xfb   : > { %17895 = vmatpush3.msk.msra.mxu0 %vm25010_vm0, %v15659_v32  ;;  %17853 = vmatprep.mubr.msk.f32.mxu0 %vm659_vm1, %v20104_v11  ;;  %v20664_v5 = vadd.f32 %v1038_v4, %v872_v61  ;;  %v25120_v11 = vld [vmem:[#allocation43_spill] sm:$0xff]  ;;  %v25121_v61 = vld [vmem:[#allocation46_spill] sm:$0xff] }
  0xfc   : > { %17940 = vmatprep.subr.msk.mxu0 %vm25010_vm0, %v20649_v7  ;;  %17879 = vmatprep.mubr.msk.f32.mxu1 %vm659_vm1, %v25119_v26  ;;  %v1048_v32 = vpop.f32.mrf.mxu1 }
  0xfe   : > { %v17536_v31 = vpop.f32.mrf.mxu0  ;;  %17854 = vmatmul.mubr.msk.f32.gmra.mxu0 %vm659_vm1, %v20110_v22  ;;  %v17562_v10 = vpop.f32.mrf.mxu1  ;;  %17880 = vmatmul.mubr.msk.f32.gmra.mxu1 %vm659_vm1, %v25120_v11  ;;  %v25122_v11 = vld [vmem:[#allocation47_spill] sm:$0xff] }
  0xff   : > { %v20670_v58 = vadd.f32 %v17559_v51, %v17536_v31  ;;  %17856 = vmatprep.mubr.msk.f32.mxu0 %vm659_vm1, %v25099_v2  ;;  %17882 = vmatprep.mubr.msk.f32.mxu1 %vm659_vm1, %v25121_v61  ;;  %v3497_v51 = vrot.slane %v20277_v56, 5  ;;  %v3499_v61 = vrot.slane %v20416_v40, 5 }
 0x100   : > { %v882_v24 = vpop.f32.mrf.mxu0  ;;  %v1058_v22 = vpop.f32.mrf.mxu1 }
 0x101   : > { %v20676_v4 = vadd.f32 %v1048_v32, %v882_v24  ;;  %v25123_v32 = vld [vmem:[#allocation52_spill] sm:$0xff] }
 0x102   : > { %v17539_v26 = vpop.f32.mrf.mxu0  ;;  %17857 = vmatmul.mubr.msk.f32.gmra.mxu0 %vm659_vm1, %v20134_v23  ;;  %v17565_v63 = vpop.f32.mrf.mxu1  ;;  %17883 = vmatmul.mubr.msk.f32.gmra.mxu1 %vm659_vm1, %v25122_v11  ;;  %v20694_v23 = vld [vmem:[#allocation2 + $0x80] sm:$0xff] }
 0x103   : > { %v20683_v31 = vadd.f32 %v17562_v10, %v17539_v26  ;;  %17859 = vmatprep.mubr.msk.f32.mxu0 %vm659_vm1, %v20154_v3  ;;  %17885 = vmatprep.mubr.msk.f32.mxu1 %vm659_vm1, %v25123_v32  ;;  %v25124_v10 = vld [vmem:[#allocation48_spill] sm:$0xff]  ;;  %v20703_v11 = vrot.slane %v20694_v23, 5 }
 0x104   : > { %v892_v2 = vpop.f32.mrf.mxu0  ;;  %v1068_v26 = vpop.f32.mrf.mxu1  ;;  %v20700_v3 = vsel %vm25003_vm6, %v25124_v10, %v3497_v51  ;;  %v20719_v10 = vsel %vm25003_vm6, %v3497_v51, %v3499_v61 }
 0x105   : > { %v20689_v24 = vadd.f32 %v1058_v22, %v892_v2  ;;  %25125 = vst [vmem:[#allocation36_spill] sm:$0xff] %v20700_v3  ;;  %25126 = vst [vmem:[#allocation37_spill] sm:$0xff] %v20703_v11 }
 0x106   : > { %v17542_v49 = vpop.f32.mrf.mxu0  ;;  %17860 = vmatmul.mubr.msk.f32.gmra.mxu0 %vm659_vm1, %v25102_v0  ;;  %v17568_v32 = vpop.f32.mrf.mxu1  ;;  %17886 = vmatmul.mubr.msk.f32.gmra.mxu1 %vm659_vm1, %v25127_v43  ;;  %v20712_v0 = vrot.slane %v20694_v23, 4  ;;  %25128 = vst [vmem:[#allocation48_spill] sm:$0xff] %v20719_v10 }
 0x107   : > { %v20705_v22 = vadd.f32 %v17565_v63, %v17542_v49  ;;  %17862 = vmatprep.mubr.msk.f32.mxu0 %vm659_vm1, %v25105_v8  ;;  %17888 = vmatprep.mubr.msk.f32.mxu1 %vm659_vm1, %v20700_v3  ;;  %v20725_v8 = vsel %vm25003_vm6, %v3499_v61, %v20703_v11 }
 0x108   : > { %v902_v2 = vpop.f32.mrf.mxu0  ;;  %v1078_v63 = vpop.f32.mrf.mxu1  ;;  %25129 = vst [vmem:[#allocation85_spill] sm:$0xff] %v20725_v8  ;;  %v20736_v51 = vsel %vm25010_vm0, %v20584_v53, %v20712_v0 }
 0x109   : > { %v20714_v14 = vadd.f32 %v1068_v26, %v902_v2  ;;  %25130 = vst [vmem:[#allocation86_spill] sm:$0xff] %v20736_v51 }
 0x10a   : > { %v17545_v49 = vpop.f32.mrf.mxu0  ;;  %17863 = vmatmul.mubr.msk.f32.gmra.mxu0 %vm659_vm1, %v20186_v15  ;;  %v17571_v2 = vpop.f32.mrf.mxu1  ;;  %17889 = vmatmul.mubr.msk.f32.gmra.mxu1 %vm659_vm1, %v20719_v10 }
 0x10b   : > { %v20727_v43 = vadd.f32 %v17568_v32, %v17545_v49  ;;  %17865 = vmatprep.mubr.msk.f32.mxu0 %vm659_vm1, %v20598_v41  ;;  %17891 = vmatprep.mubr.msk.f32.mxu1 %vm659_vm1, %v20725_v8 }
 0x10c   : > { %v912_v26 = vpop.f32.mrf.mxu0  ;;  %v1088_v32 = vpop.f32.mrf.mxu1 }
 0x10d   : > { %v20738_v3 = vadd.f32 %v1078_v63, %v912_v26 }
 0x10e   : > { %v17548_v61 = vpop.f32.mrf.mxu0  ;;  %17866 = vmatmul.mubr.msk.f32.gmra.mxu0 %vm659_vm1, %v20604_v12  ;;  %v17599_v41 = vpop.f32.mrf.mxu1  ;;  %17892 = vmatmul.mubr.msk.f32.gmra.mxu1 %vm659_vm1, %v20703_v11 }
 0x10f   : > { %v20744_v49 = vadd.f32 %v17571_v2, %v17548_v61  ;;  %17868 = vmatprep.mubr.msk.f32.mxu0 %vm659_vm1, %v20736_v51  ;;  %17919 = vmatprep.mubr.msk.f32.mxu1 %vm659_vm1, %v20339_v9  ;;  %v20762_v61 = vld [vmem:[%s25031_s21 + $0x54] sm:$0xf] }
 0x110   : > { %v922_v10 = vpop.f32.mrf.mxu0  ;;  %v1434_v26 = vpop.f32.mrf.mxu1 }
 0x111   : > { %v20750_v53 = vadd.f32 %v1088_v32, %v922_v10 }
 0x112   : > { %v17576_v63 = vpop.f32.mrf.mxu0  ;;  %17869 = vmatmul.mubr.msk.f32.gmra.mxu0 %vm659_vm1, %v20712_v0  ;;  %v17602_v32 = vpop.f32.mrf.mxu1  ;;  %17920 = vmatmul.mubr.msk.f32.vlgmr.msra.gmra.mxu1 %vm659_vm1, %v20358_v17 }
 0x113   : > { %v1294_v2 = vadd.f32 %v17576_v63, %v20630_v47  ;;  %17896 = vmatprep.mubr.msk.f32.mxu0 %vm659_vm1, %v20208_v1  ;;  %17922 = vmatprep.mubr.msk.f32.mxu1 %vm659_vm1, %v20364_v25  ;;  %v20776_v1 = vld [vmem:[%s25031_s21 + $0x50] sm:$0xf]  ;;  %v25131_v63 = vld [vmem:[#allocation56_spill] sm:$0xff] }
 0x114   : > { %v1224_v10 = vpop.f32.mrf.mxu0  ;;  %17964 = vmatpush3.msk.msra.mxu1 %vm25010_vm0, %v20637_v20  ;;  %v1444_v17 = vpop.f32.mrf.mxu1  ;;  %v25132_v20 = vld [vmem:[#allocation57_spill] sm:$0xff] }
 0x115   : > { %v1293_v9 = vadd.f32 %v1224_v10, %v20641_v16  ;;  %v20767_v11 = vadd.f32 %v17599_v41, %v1294_v2  ;;  %18009 = vmatprep.subr.msk.mxu1 %vm25010_vm0, %v20762_v61 }
 0x116   : > { %v17579_v47 = vpop.f32.mrf.mxu0  ;;  %17897 = vmatmul.mubr.msk.f32.vlgmr.msra.gmra.mxu0 %vm659_vm1, %v25131_v63  ;;  %v17605_v10 = vpop.f32.mrf.mxu1  ;;  %17923 = vmatmul.mubr.msk.f32.gmra.mxu1 %vm659_vm1, %v20375_v37  ;;  %v25134_v37 = vld [vmem:[#allocation59_spill] sm:$0xff] }
 0x117   : > { %v1296_v41 = vadd.f32 %v17579_v47, %v20655_v39  ;;  %v20783_v16 = vadd.f32 %v1434_v26, %v1293_v9  ;;  %17941 = vmatpush3.msk.msra.mxu0 %vm25010_vm0, %v20649_v7  ;;  %17899 = vmatprep.mubr.msk.f32.mxu0 %vm659_vm1, %v25132_v20  ;;  %v25133_v7 = vld [vmem:[#allocation58_spill] sm:$0xff] }
 0x118   : > { %v1234_v2 = vpop.f32.mrf.mxu0  ;;  %17986 = vmatprep.subr.msk.mxu0 %vm25010_vm0, %v20776_v1  ;;  %17925 = vmatprep.mubr.msk.f32.mxu1 %vm659_vm1, %v20381_v21  ;;  %v1454_v26 = vpop.f32.mrf.mxu1 }
 0x119   : > { %v1295_v63 = vadd.f32 %v1234_v2, %v20664_v5  ;;  %v20794_v25 = vadd.f32 %v17602_v32, %v1296_v41  ;;  %v25135_v2 = vld [vmem:[#allocation60_spill] sm:$0xff] }
 0x11a   : > { %v17582_v39 = vpop.f32.mrf.mxu0  ;;  %17900 = vmatmul.mubr.msk.f32.gmra.mxu0 %vm659_vm1, %v25133_v7  ;;  %v17608_v20 = vpop.f32.mrf.mxu1  ;;  %17926 = vmatmul.mubr.msk.f32.gmra.mxu1 %vm659_vm1, %v20391_v28 }
 0x11b   : > { %v1298_v9 = vadd.f32 %v17582_v39, %v20670_v58  ;;  %v20801_v47 = vadd.f32 %v1444_v17, %v1295_v63  ;;  %17902 = vmatprep.mubr.msk.f32.mxu0 %vm659_vm1, %v25134_v37  ;;  %17928 = vmatprep.mubr.msk.f32.mxu1 %vm659_vm1, %v20397_v29 }
 0x11c   : > { %v1244_v8 = vpop.f32.mrf.mxu0  ;;  %v1464_v58 = vpop.f32.mrf.mxu1 }
 0x11d   : > { %v1297_v5 = vadd.f32 %v1244_v8, %v20676_v4  ;;  %v20808_v32 = vadd.f32 %v17605_v10, %v1298_v9  ;;  %v25136_v9 = vld [vmem:[#allocation62_spill] sm:$0xff] }
 0x11e   : > { %v17585_v41 = vpop.f32.mrf.mxu0  ;;  %17903 = vmatmul.mubr.msk.f32.gmra.mxu0 %vm659_vm1, %v25135_v2  ;;  %v17611_v28 = vpop.f32.mrf.mxu1  ;;  %17929 = vmatmul.mubr.msk.f32.gmra.mxu1 %vm659_vm1, %v20407_v33  ;;  %v25137_v33 = vld [vmem:[#allocation63_spill] sm:$0xff] }
 0x11f   : > { %v1300_v17 = vadd.f32 %v17585_v41, %v20683_v31  ;;  %v20815_v63 = vadd.f32 %v1454_v26, %v1297_v5  ;;  %17905 = vmatprep.mubr.msk.f32.mxu0 %vm659_vm1, %v20272_v57  ;;  %17931 = vmatprep.mubr.msk.f32.mxu1 %vm659_vm1, %v20413_v34  ;;  %v3830_v26 = vrot.slane %v20694_v23, 7  ;;  %v20829_v5 = vld [vmem:[#allocation2 + $0x88] sm:$0xff] }
 0x120   : > { %v1254_v39 = vpop.f32.mrf.mxu0  ;;  %v1474_v31 = vpop.f32.mrf.mxu1 }
 0x121   : > { %v1299_v8 = vadd.f32 %v1254_v39, %v20689_v24  ;;  %v20822_v4 = vadd.f32 %v17608_v20, %v1300_v17  ;;  %v3665_v24 = vrot.slane %v20416_v40, 6  ;;  %v20840_v39 = vrot.slane %v20694_v23, 6 }
 0x122   : > { %v17588_v10 = vpop.f32.mrf.mxu0  ;;  %17906 = vmatmul.mubr.msk.f32.gmra.mxu0 %vm659_vm1, %v25136_v9  ;;  %v17614_v17 = vpop.f32.mrf.mxu1  ;;  %17932 = vmatmul.mubr.msk.f32.gmra.mxu1 %vm659_vm1, %v20425_v13 }
 0x123   : > { %v1302_v41 = vadd.f32 %v17588_v10, %v20705_v22  ;;  %v20832_v29 = vadd.f32 %v1464_v58, %v1299_v8  ;;  %17908 = vmatprep.mubr.msk.f32.mxu0 %vm659_vm1, %v25137_v33  ;;  %17934 = vmatprep.mubr.msk.f32.mxu1 %vm659_vm1, %v20431_v18  ;;  %v25138_v8 = vld [vmem:[#allocation65_spill] sm:$0xff]  ;;  %v25139_v33 = vrot.slane %v20416_v40, 7 }
 0x124   : > { %v1264_v20 = vpop.f32.mrf.mxu0  ;;  %v1484_v10 = vpop.f32.mrf.mxu1 }
 0x125   : > { %v1301_v34 = vadd.f32 %v1264_v20, %v20714_v14  ;;  %v20843_v21 = vadd.f32 %v17611_v28, %v1302_v41  ;;  %v20853_v13 = vsel %vm25004_vm7, %v25139_v33, %v3830_v26  ;;  %v25140_v28 = vld [vmem:[#allocation66_spill] sm:$0xff]  ;;  %v25141_v41 = vld [vmem:[#allocation64_spill] sm:$0xff]  ;;  %v20868_v33 = vsel %vm25012_vm5, %v3665_v24, %v20840_v39 }
 0x126   : > { %v17591_v58 = vpop.f32.mrf.mxu0  ;;  %17909 = vmatmul.mubr.msk.f32.gmra.mxu0 %vm659_vm1, %v25138_v8  ;;  %v20862_v20 = vsel %vm25012_vm5, %v25141_v41, %v3665_v24  ;;  %v17617_v18 = vpop.f32.mrf.mxu1  ;;  %17935 = vmatmul.mubr.msk.f32.gmra.mxu1 %vm659_vm1, %v20442_v46  ;;  %25143 = vst [vmem:[#allocation58_spill] sm:$0xff] %v20868_v33 }
 0x127   : > { %v1304_v9 = vadd.f32 %v17591_v58, %v20727_v43  ;;  %v20856_v14 = vadd.f32 %v1474_v31, %v1301_v34  ;;  %17911 = vmatprep.mubr.msk.f32.mxu0 %vm659_vm1, %v25140_v28  ;;  %25142 = vst [vmem:[#allocation56_spill] sm:$0xff] %v20862_v20  ;;  %17937 = vmatprep.mubr.msk.f32.mxu1 %vm659_vm1, %v20853_v13  ;;  %v25144_v31 = vrot.slane %v20829_v5, 7 }
 0x128   : > { %v1274_v22 = vpop.f32.mrf.mxu0  ;;  %v1494_v46 = vpop.f32.mrf.mxu1 }
 0x129   : > { %v1303_v43 = vadd.f32 %v1274_v22, %v20738_v3  ;;  %v20871_v34 = vadd.f32 %v17614_v17, %v1304_v9  ;;  %v20878_v58 = vsel %vm25004_vm7, %v3830_v26, %v25144_v31  ;;  %v19325_v31 = vld [vmem:[#allocation2 + $0x20] sm:$0xff] }
 0x12a   : > { %v17594_v41 = vpop.f32.mrf.mxu0  ;;  %17912 = vmatmul.mubr.msk.f32.gmra.mxu0 %vm659_vm1, %v20862_v20  ;;  %v17645_v9 = vpop.f32.mrf.mxu1  ;;  %17938 = vmatmul.mubr.msk.f32.gmra.mxu1 %vm659_vm1, %v20878_v58 }
 0x12b   : > { %v1306_v24 = vadd.f32 %v17594_v41, %v20744_v49  ;;  %v20883_v28 = vadd.f32 %v1484_v10, %v1303_v43  ;;  %17914 = vmatprep.mubr.msk.f32.mxu0 %vm659_vm1, %v20868_v33  ;;  %17965 = vmatprep.mubr.msk.f32.mxu1 %vm659_vm1, %v19764_v35 }
 0x12c   : > { %v1284_v3 = vpop.f32.mrf.mxu0  ;;  %v1853_v49 = vpop.f32.mrf.mxu1 }
 0x12d   : > { %v1305_v26 = vadd.f32 %v1284_v3, %v20750_v53  ;;  %v20890_v17 = vadd.f32 %v17617_v18, %v1306_v24  ;;  %v20903_v18 = vld [vmem:[%s25031_s21 + $0x5c] sm:$0xf]  ;;  %v19326_v3 = vld [vmem:[#allocation2 + $0x28] sm:$0xff] }
 0x12e   : > { %v17622_v22 = vpop.f32.mrf.mxu0  ;;  %17915 = vmatmul.mubr.msk.f32.gmra.mxu0 %vm659_vm1, %v20840_v39  ;;  %v17648_v41 = vpop.f32.mrf.mxu1  ;;  %17966 = vmatmul.mubr.msk.f32.vlgmr.msra.gmra.mxu1 %vm659_vm1, %v19769_v36 }
 0x12f   : > { %v20896_v10 = vadd.f32 %v1494_v46, %v1305_v26  ;;  %v1713_v43 = vadd.f32 %v17622_v22, %v20767_v11  ;;  %17942 = vmatprep.mubr.msk.f32.mxu0 %vm659_vm1, %v19325_v31  ;;  %17968 = vmatprep.mubr.msk.f32.mxu1 %vm659_vm1, %v19775_v38  ;;  %v20917_v11 = vld [vmem:[%s25031_s21 + $0x58] sm:$0xf]  ;;  %v20927_v38 = vld [vmem:[#allocation2 + $0x30] sm:$0xff] }
 0x130   : > { %v1643_v53 = vpop.f32.mrf.mxu0  ;;  %18010 = vmatpush3.msk.msra.mxu1 %vm25010_vm0, %v20762_v61  ;;  %v1863_v36 = vpop.f32.mrf.mxu1 }
 0x131   : > { %v1712_v35 = vadd.f32 %v1643_v53, %v20783_v16  ;;  %v20908_v24 = vadd.f32 %v17645_v9, %v1713_v43  ;;  %18055 = vmatprep.subr.msk.mxu1 %vm25010_vm0, %v20903_v18 }
 0x132   : > { %v17625_v46 = vpop.f32.mrf.mxu0  ;;  %17943 = vmatmul.mubr.msk.f32.vlgmr.msra.gmra.mxu0 %vm659_vm1, %v19326_v3  ;;  %v17651_v26 = vpop.f32.mrf.mxu1  ;;  %17969 = vmatmul.mubr.msk.f32.gmra.mxu1 %vm659_vm1, %v19789_v42 }
 0x133   : > { %v1715_v16 = vadd.f32 %v17625_v46, %v20794_v25  ;;  %v20923_v9 = vadd.f32 %v1853_v49, %v1712_v35  ;;  %17987 = vmatpush3.msk.msra.mxu0 %vm25010_vm0, %v20776_v1  ;;  %17945 = vmatprep.mubr.msk.f32.mxu0 %vm659_vm1, %v20927_v38  ;;  %v20940_v49 = vld [vmem:[#allocation2 + $0x38] sm:$0xff]  ;;  %v20947_v35 = vld [vmem:[#allocation2 + $0x40] sm:$0xff] }
 0x134   : > { %v1653_v61 = vpop.f32.mrf.mxu0  ;;  %18032 = vmatprep.subr.msk.mxu0 %vm25010_vm0, %v20917_v11  ;;  %17971 = vmatprep.mubr.msk.f32.mxu1 %vm659_vm1, %v19795_v44  ;;  %v1873_v43 = vpop.f32.mrf.mxu1 }
 0x135   : > { %v1714_v25 = vadd.f32 %v1653_v61, %v20801_v47  ;;  %v20936_v22 = vadd.f32 %v17648_v41, %v1715_v16 }
 0x136   : > { %v17628_v1 = vpop.f32.mrf.mxu0  ;;  %17946 = vmatmul.mubr.msk.f32.gmra.mxu0 %vm659_vm1, %v20940_v49  ;;  %v17654_v41 = vpop.f32.mrf.mxu1  ;;  %17972 = vmatmul.mubr.msk.f32.gmra.mxu1 %vm659_vm1, %v19809_v48 }
 0x137   : > { %v1717_v31 = vadd.f32 %v17628_v1, %v20808_v32  ;;  %v20945_v53 = vadd.f32 %v1863_v36, %v1714_v25  ;;  %17948 = vmatprep.mubr.msk.f32.mxu0 %vm659_vm1, %v20947_v35  ;;  %17974 = vmatprep.mubr.msk.f32.mxu1 %vm659_vm1, %v19815_v50  ;;  %v20958_v36 = vld [vmem:[#allocation2 + $0x48] sm:$0xff]  ;;  %v20965_v1 = vld [vmem:[#allocation2 + $0x50] sm:$0xff]  ;;  %v20982_v50 = vrot.slane %v20829_v5, 1 }
 0x138   : > { %v1663_v47 = vpop.f32.mrf.mxu0  ;;  %v1883_v16 = vpop.f32.mrf.mxu1 }
 0x139   : > { %v1716_v46 = vadd.f32 %v1663_v47, %v20815_v63  ;;  %v20954_v3 = vadd.f32 %v17651_v26, %v1717_v31 }
 0x13a   : > { %v17631_v32 = vpop.f32.mrf.mxu0  ;;  %17949 = vmatmul.mubr.msk.f32.gmra.mxu0 %vm659_vm1, %v20958_v36  ;;  %v17657_v26 = vpop.f32.mrf.mxu1  ;;  %17975 = vmatmul.mubr.msk.f32.gmra.mxu1 %vm659_vm1, %v19829_v54 }
 0x13b   : > { %v1719_v61 = vadd.f32 %v17631_v32, %v20822_v4  ;;  %v20963_v25 = vadd.f32 %v1873_v43, %v1716_v46  ;;  %17951 = vmatprep.mubr.msk.f32.mxu0 %vm659_vm1, %v20965_v1  ;;  %17977 = vmatprep.mubr.msk.f32.mxu1 %vm659_vm1, %v19835_v55  ;;  %v4150_v4 = vrot.slane %v20694_v23, 1  ;;  %v20977_v46 = vld [vmem:[#allocation2 + $0x58] sm:$0xff] }
 0x13c   : > { %v1673_v63 = vpop.f32.mrf.mxu0  ;;  %v1893_v32 = vpop.f32.mrf.mxu1 }
 0x13d   : > { %v1718_v31 = vadd.f32 %v1673_v63, %v20832_v29  ;;  %v20972_v47 = vadd.f32 %v17654_v41, %v1719_v61  ;;  %v20987_v41 = vld [vmem:[#allocation2 + $0x60] sm:$0xff] }
 0x13e   : > { %v17634_v43 = vpop.f32.mrf.mxu0  ;;  %17952 = vmatmul.mubr.msk.f32.gmra.mxu0 %vm659_vm1, %v20977_v46  ;;  %v17660_v63 = vpop.f32.mrf.mxu1  ;;  %17978 = vmatmul.mubr.msk.f32.gmra.mxu1 %vm659_vm1, %v20520_v27  ;;  %v21008_v27 = vsel %vm736_vm2, %v4150_v4, %v20982_v50 }
 0x13f   : > { %v1721_v54 = vadd.f32 %v17634_v43, %v20843_v21  ;;  %v20985_v29 = vadd.f32 %v1883_v16, %v1718_v31  ;;  %17954 = vmatprep.mubr.msk.f32.mxu0 %vm659_vm1, %v20987_v41  ;;  %17980 = vmatprep.mubr.msk.f32.mxu1 %vm659_vm1, %v20526_v19  ;;  %v21000_v21 = vsel %vm736_vm2, %v20502_v59, %v4150_v4  ;;  %v21002_v31 = vld [vmem:[#allocation2 + $0x68] sm:$0xff] }
 0x140   : > { %v1683_v61 = vpop.f32.mrf.mxu0  ;;  %25145 = vst [vmem:[#allocation64_spill] sm:$0xff] %v21000_v21  ;;  %v1903_v43 = vpop.f32.mrf.mxu1  ;;  %25146 = vst [vmem:[#allocation87_spill] sm:$0xff] %v21008_v27 }
 0x141   : > { %v1720_v55 = vadd.f32 %v1683_v61, %v20856_v14  ;;  %v20994_v48 = vadd.f32 %v17657_v26, %v1721_v54 }
 0x142   : > { %v17637_v16 = vpop.f32.mrf.mxu0  ;;  %17955 = vmatmul.mubr.msk.f32.gmra.mxu0 %vm659_vm1, %v21002_v31  ;;  %v17663_v26 = vpop.f32.mrf.mxu1  ;;  %17981 = vmatmul.mubr.msk.f32.gmra.mxu1 %vm659_vm1, %v21000_v21 }
 0x143   : > { %v1723_v54 = vadd.f32 %v17637_v16, %v20871_v34  ;;  %v21011_v14 = vadd.f32 %v1893_v32, %v1720_v55  ;;  %17957 = vmatprep.mubr.msk.f32.mxu0 %vm659_vm1, %v20277_v56  ;;  %17983 = vmatprep.mubr.msk.f32.mxu1 %vm659_vm1, %v21008_v27 }
 0x144   : > { %v1693_v59 = vpop.f32.mrf.mxu0  ;;  %v1913_v55 = vpop.f32.mrf.mxu1 }
 0x145   : > { %v1722_v61 = vadd.f32 %v1693_v59, %v20883_v28  ;;  %v21018_v19 = vadd.f32 %v17660_v63, %v1723_v54 }
 0x146   : > { %v17640_v4 = vpop.f32.mrf.mxu0  ;;  %17958 = vmatmul.mubr.msk.f32.gmra.mxu0 %vm659_vm1, %v20416_v40  ;;  %v17691_v16 = vpop.f32.mrf.mxu1  ;;  %17984 = vmatmul.mubr.msk.f32.gmra.mxu1 %vm659_vm1, %v20982_v50 }
 0x147   : > { %v1725_v34 = vadd.f32 %v17640_v4, %v20890_v17  ;;  %v21025_v56 = vadd.f32 %v1903_v43, %v1722_v61  ;;  %17960 = vmatprep.mubr.msk.f32.mxu0 %vm659_vm1, %v20694_v23  ;;  %18011 = vmatprep.mubr.msk.f32.mxu1 %vm659_vm1, %v19933_v45 }
 0x148   : > { %v1703_v32 = vpop.f32.mrf.mxu0  ;;  %v2224_v17 = vpop.f32.mrf.mxu1 }
 0x149   : > { %v1724_v28 = vadd.f32 %v1703_v32, %v20896_v10  ;;  %v21032_v63 = vadd.f32 %v17663_v26, %v1725_v34  ;;  %v21046_v10 = vld [vmem:[%s25031_s21 + $0x64] sm:$0xf] }
 0x14a   : > { %v17668_v40 = vpop.f32.mrf.mxu0  ;;  %17961 = vmatmul.mubr.msk.f32.gmra.mxu0 %vm659_vm1, %v20829_v5  ;;  %v17694_v26 = vpop.f32.mrf.mxu1  ;;  %18012 = vmatmul.mubr.msk.f32.vlgmr.msra.gmra.mxu1 %vm659_vm1, %v19939_v52 }
 0x14b   : > { %v21038_v43 = vadd.f32 %v1913_v55, %v1724_v28  ;;  %v2133_v54 = vadd.f32 %v17668_v40, %v20908_v24  ;;  %17988 = vmatprep.mubr.msk.f32.mxu0 %vm659_vm1, %v19908_v30  ;;  %18014 = vmatprep.mubr.msk.f32.mxu1 %vm659_vm1, %v19957_v60  ;;  %v21060_v30 = vld [vmem:[%s25031_s21 + $0x60] sm:$0xf] }
 0x14c   : > { %v2063_v59 = vpop.f32.mrf.mxu0  ;;  %18056 = vmatpush3.msk.msra.mxu1 %vm25010_vm0, %v20903_v18  ;;  %v2234_v55 = vpop.f32.mrf.mxu1 }
 0x14d   : > { %v2132_v61 = vadd.f32 %v2063_v59, %v20923_v9  ;;  %v21051_v4 = vadd.f32 %v17691_v16, %v2133_v54  ;;  %18101 = vmatprep.subr.msk.mxu1 %vm25010_vm0, %v21046_v10 }
 0x14e   : > { %v17671_v24 = vpop.f32.mrf.mxu0  ;;  %17989 = vmatmul.mubr.msk.f32.vlgmr.msra.gmra.mxu0 %vm659_vm1, %v19933_v45  ;;  %v17697_v32 = vpop.f32.mrf.mxu1  ;;  %18015 = vmatmul.mubr.msk.f32.gmra.mxu1 %vm659_vm1, %v19963_v62 }
 0x14f   : > { %v2135_v9 = vadd.f32 %v17671_v24, %v20936_v22  ;;  %v21067_v34 = vadd.f32 %v2224_v17, %v2132_v61  ;;  %18033 = vmatpush3.msk.msra.mxu0 %vm25010_vm0, %v20917_v11  ;;  %17991 = vmatprep.mubr.msk.f32.mxu0 %vm659_vm1, %v19939_v52  ;;  %v4314_v24 = vrot.slane %v20694_v23, 2 }
 0x150   : > { %v2073_v18 = vpop.f32.mrf.mxu0  ;;  %18078 = vmatprep.subr.msk.mxu0 %vm25010_vm0, %v21060_v30  ;;  %18017 = vmatprep.mubr.msk.f32.mxu1 %vm659_vm1, %v19983_v6  ;;  %v2244_v52 = vpop.f32.mrf.mxu1 }
 0x151   : > { %v2134_v45 = vadd.f32 %v2073_v18, %v20945_v53  ;;  %v21078_v16 = vadd.f32 %v17694_v26, %v2135_v9  ;;  %v25147_v53 = vld [vmem:[#allocation31_spill] sm:$0xff]  ;;  %v25148_v26 = vld [vmem:[#allocation34_spill] sm:$0xff] }
 0x152   : > { %v17674_v22 = vpop.f32.mrf.mxu0  ;;  %17992 = vmatmul.mubr.msk.f32.gmra.mxu0 %vm659_vm1, %v19957_v60  ;;  %v17700_v17 = vpop.f32.mrf.mxu1  ;;  %18018 = vmatmul.mubr.msk.f32.gmra.mxu1 %vm659_vm1, %v25147_v53 }
 0x153   : > { %v2137_v11 = vadd.f32 %v17674_v22, %v20954_v3  ;;  %v21085_v28 = vadd.f32 %v2234_v55, %v2134_v45  ;;  %17994 = vmatprep.mubr.msk.f32.mxu0 %vm659_vm1, %v19963_v62  ;;  %18020 = vmatprep.mubr.msk.f32.mxu1 %vm659_vm1, %v25148_v26  ;;  %v25149_v45 = vld [vmem:[#allocation35_spill] sm:$0xff] }
 0x154   : > { %v2083_v40 = vpop.f32.mrf.mxu0  ;;  %v2254_v3 = vpop.f32.mrf.mxu1  ;;  %v25154_v62 = vld [vmem:[#allocation79_spill] sm:$0xff] }
 0x155   : > { %v2136_v54 = vadd.f32 %v2083_v40, %v20963_v25  ;;  %v21092_v59 = vadd.f32 %v17697_v32, %v2137_v11  ;;  %v21104_v25 = vld [vmem:[#allocation2 + $0x90] sm:$0xff] }
 0x156   : > { %v17677_v61 = vpop.f32.mrf.mxu0  ;;  %17995 = vmatmul.mubr.msk.f32.gmra.mxu0 %vm659_vm1, %v19983_v6  ;;  %v17703_v32 = vpop.f32.mrf.mxu1  ;;  %18021 = vmatmul.mubr.msk.f32.gmra.mxu1 %vm659_vm1, %v25149_v45  ;;  %v25150_v40 = vld [vmem:[#allocation78_spill] sm:$0xff]  ;;  %v21121_v6 = vrot.slane %v21104_v25, 2 }
 0x157   : > { %v2139_v55 = vadd.f32 %v17677_v61, %v20972_v47  ;;  %v21100_v9 = vadd.f32 %v2244_v52, %v2136_v54  ;;  %17997 = vmatprep.mubr.msk.f32.mxu0 %vm659_vm1, %v25147_v53  ;;  %18023 = vmatprep.mubr.msk.f32.mxu1 %vm659_vm1, %v25150_v40  ;;  %v4316_v47 = vrot.slane %v20829_v5, 2  ;;  %v25151_v61 = vld [vmem:[#allocation77_spill] sm:$0xff] }
 0x158   : > { %v2093_v18 = vpop.f32.mrf.mxu0  ;;  %v2264_v54 = vpop.f32.mrf.mxu1  ;;  %v21118_v53 = vsel %vm1099_vm4, %v25151_v61, %v4314_v24  ;;  %25153 = vst [vmem:[#allocation88_spill] sm:$0xff] %v21121_v6 }
 0x159   : > { %v2138_v22 = vadd.f32 %v2093_v18, %v20985_v29  ;;  %v21109_v11 = vadd.f32 %v17700_v17, %v2139_v55  ;;  %25152 = vst [vmem:[#allocation77_spill] sm:$0xff] %v21118_v53  ;;  %v21136_v61 = vsel %vm1099_vm4, %v4314_v24, %v4316_v47 }
 0x15a   : > { %v17680_v52 = vpop.f32.mrf.mxu0  ;;  %17998 = vmatmul.mubr.msk.f32.gmra.mxu0 %vm659_vm1, %v25148_v26  ;;  %v17706_v18 = vpop.f32.mrf.mxu1  ;;  %18024 = vmatmul.mubr.msk.f32.gmra.mxu1 %vm659_vm1, %v25154_v62  ;;  %25155 = vst [vmem:[#allocation89_spill] sm:$0xff] %v21136_v61 }
 0x15b   : > { %v2141_v29 = vadd.f32 %v17680_v52, %v20994_v48  ;;  %v21124_v17 = vadd.f32 %v2254_v3, %v2138_v22  ;;  %18000 = vmatprep.mubr.msk.f32.mxu0 %vm659_vm1, %v25149_v45  ;;  %18026 = vmatprep.mubr.msk.f32.mxu1 %vm659_vm1, %v21118_v53  ;;  %v21142_v22 = vsel %vm1099_vm4, %v4316_v47, %v21121_v6 }
 0x15c   : > { %v2103_v55 = vpop.f32.mrf.mxu0  ;;  %v2274_v3 = vpop.f32.mrf.mxu1  ;;  %25156 = vst [vmem:[#allocation90_spill] sm:$0xff] %v21142_v22 }
 0x15d   : > { %v2140_v26 = vadd.f32 %v2103_v55, %v21011_v14  ;;  %v21131_v60 = vadd.f32 %v17703_v32, %v2141_v29 }
 0x15e   : > { %v17683_v48 = vpop.f32.mrf.mxu0  ;;  %18001 = vmatmul.mubr.msk.f32.gmra.mxu0 %vm659_vm1, %v25150_v40  ;;  %v17709_v29 = vpop.f32.mrf.mxu1  ;;  %18027 = vmatmul.mubr.msk.f32.gmra.mxu1 %vm659_vm1, %v21136_v61 }
 0x15f   : > { %v2143_v52 = vadd.f32 %v17683_v48, %v21018_v19  ;;  %v21145_v14 = vadd.f32 %v2264_v54, %v2140_v26  ;;  %18003 = vmatprep.mubr.msk.f32.mxu0 %vm659_vm1, %v25154_v62  ;;  %18029 = vmatprep.mubr.msk.f32.mxu1 %vm659_vm1, %v21142_v22 }
 0x160   : > { %v2113_v32 = vpop.f32.mrf.mxu0  ;;  %v2284_v19 = vpop.f32.mrf.mxu1 }
 0x161   : > { %v2142_v24 = vadd.f32 %v2113_v32, %v21025_v56  ;;  %v21152_v55 = vadd.f32 %v17706_v18, %v2143_v52  ;;  %v25157_v52 = vld [vmem:[#allocation40_spill] sm:$0xff] }
 0x162   : > { %v17686_v40 = vpop.f32.mrf.mxu0  ;;  %18004 = vmatmul.mubr.msk.f32.gmra.mxu0 %vm659_vm1, %v21118_v53  ;;  %v17737_v62 = vpop.f32.mrf.mxu1  ;;  %18030 = vmatmul.mubr.msk.f32.gmra.mxu1 %vm659_vm1, %v21121_v6  ;;  %v25169_v53 = vld [vmem:[#allocation28_spill] sm:$0xff] }
 0x163   : > { %v2145_v26 = vadd.f32 %v17686_v40, %v21032_v63  ;;  %v21159_v54 = vadd.f32 %v2274_v3, %v2142_v24  ;;  %18006 = vmatprep.mubr.msk.f32.mxu0 %vm659_vm1, %v21136_v61  ;;  %18057 = vmatprep.mubr.msk.f32.mxu1 %vm659_vm1, %v25157_v52  ;;  %v25158_v24 = vld [vmem:[#allocation21_spill] sm:$0xff] }
 0x164   : > { %v2123_v48 = vpop.f32.mrf.mxu0  ;;  %v2595_v63 = vpop.f32.mrf.mxu1 }
 0x165   : > { %v2144_v56 = vadd.f32 %v2123_v48, %v21038_v43  ;;  %v21166_v18 = vadd.f32 %v17709_v29, %v2145_v26  ;;  %v21179_v43 = vld [vmem:[%s25031_s21 + $0x6c] sm:$0xf]  ;;  %v25159_v48 = vld [vmem:[#allocation41_spill] sm:$0xff] }
 0x166   : > { %v17714_v32 = vpop.f32.mrf.mxu0  ;;  %18007 = vmatmul.mubr.msk.f32.gmra.mxu0 %vm659_vm1, %v4316_v47  ;;  %v17740_v26 = vpop.f32.mrf.mxu1  ;;  %18058 = vmatmul.mubr.msk.f32.vlgmr.msra.gmra.mxu1 %vm659_vm1, %v25159_v48  ;;  %v25163_v48 = vld [vmem:[#allocation45_spill] sm:$0xff] }
 0x167   : > { %v21171_v40 = vadd.f32 %v2284_v19, %v2144_v56  ;;  %v2507_v3 = vadd.f32 %v17714_v32, %v21051_v4  ;;  %18034 = vmatprep.mubr.msk.f32.mxu0 %vm659_vm1, %v25158_v24  ;;  %v25160_v19 = vld [vmem:[#allocation44_spill] sm:$0xff]  ;;  %18102 = vmatpush3.msk.msra.mxu1 %vm25010_vm0, %v21046_v10  ;;  %v21193_v4 = vld [vmem:[%s25031_s21 + $0x68] sm:$0xf]  ;;  %v25161_v32 = vld [vmem:[#allocation22_spill] sm:$0xff] }
 0x168   : > { %v2437_v29 = vpop.f32.mrf.mxu0  ;;  %18060 = vmatprep.mubr.msk.f32.mxu1 %vm659_vm1, %v25160_v19  ;;  %v2605_v24 = vpop.f32.mrf.mxu1  ;;  %18147 = vmatprep.subr.msk.mxu1 %vm25010_vm0, %v21179_v43  ;;  %v25162_v10 = vld [vmem:[#allocation23_spill] sm:$0xff] }
 0x169   : > { %v2506_v47 = vadd.f32 %v2437_v29, %v21067_v34  ;;  %v21184_v52 = vadd.f32 %v17737_v62, %v2507_v3 }
 0x16a   : > { %v17717_v56 = vpop.f32.mrf.mxu0  ;;  %18035 = vmatmul.mubr.msk.f32.vlgmr.msra.gmra.mxu0 %vm659_vm1, %v25161_v32  ;;  %v17743_v29 = vpop.f32.mrf.mxu1  ;;  %18061 = vmatmul.mubr.msk.f32.gmra.mxu1 %vm659_vm1, %v25163_v48  ;;  %v25166_v48 = vld [vmem:[#allocation27_spill] sm:$0xff] }
 0x16b   : > { %v2509_v62 = vadd.f32 %v17717_v56, %v21078_v16  ;;  %v21200_v34 = vadd.f32 %v2595_v63, %v2506_v47  ;;  %18079 = vmatpush3.msk.msra.mxu0 %vm25010_vm0, %v21060_v30  ;;  %18037 = vmatprep.mubr.msk.f32.mxu0 %vm659_vm1, %v25162_v10  ;;  %v25164_v16 = vld [vmem:[#allocation49_spill] sm:$0xff]  ;;  %v25165_v30 = vld [vmem:[#allocation24_spill] sm:$0xff] }
 0x16c   : > { %v2447_v3 = vpop.f32.mrf.mxu0  ;;  %18124 = vmatprep.subr.msk.mxu0 %vm25010_vm0, %v21193_v4  ;;  %18063 = vmatprep.mubr.msk.f32.mxu1 %vm659_vm1, %v25164_v16  ;;  %v2615_v47 = vpop.f32.mrf.mxu1 }
 0x16d   : > { %v2508_v32 = vadd.f32 %v2447_v3, %v21085_v28  ;;  %v21211_v19 = vadd.f32 %v17740_v26, %v2509_v62  ;;  %v25167_v28 = vld [vmem:[#allocation50_spill] sm:$0xff] }
 0x16e   : > { %v17720_v63 = vpop.f32.mrf.mxu0  ;;  %18038 = vmatmul.mubr.msk.f32.gmra.mxu0 %vm659_vm1, %v25165_v30  ;;  %v17746_v61 = vpop.f32.mrf.mxu1  ;;  %18064 = vmatmul.mubr.msk.f32.gmra.mxu1 %vm659_vm1, %v25167_v28  ;;  %v25168_v3 = vld [vmem:[#allocation54_spill] sm:$0xff] }
 0x16f   : > { %v2511_v56 = vadd.f32 %v17720_v63, %v21092_v59  ;;  %v21218_v6 = vadd.f32 %v2605_v24, %v2508_v32  ;;  %18040 = vmatprep.mubr.msk.f32.mxu0 %vm659_vm1, %v25166_v48  ;;  %18066 = vmatprep.mubr.msk.f32.mxu1 %vm659_vm1, %v25168_v3  ;;  %v25170_v63 = vld [vmem:[#allocation32_spill] sm:$0xff]  ;;  %v21248_v3 = vrot.slane %v21104_v25, 4 }
 0x170   : > { %v2457_v22 = vpop.f32.mrf.mxu0  ;;  %v2625_v59 = vpop.f32.mrf.mxu1 }
 0x171   : > { %v2510_v26 = vadd.f32 %v2457_v22, %v21100_v9  ;;  %v21225_v62 = vadd.f32 %v17743_v29, %v2511_v56  ;;  %v4639_v9 = vrot.slane %v20694_v23, 3  ;;  %v25171_v56 = vld [vmem:[#allocation51_spill] sm:$0xff]  ;;  %25173 = vst [vmem:[#allocation40_spill] sm:$0xff] %v21248_v3 }
 0x172   : > { %v17723_v16 = vpop.f32.mrf.mxu0  ;;  %18041 = vmatmul.mubr.msk.f32.gmra.mxu0 %vm659_vm1, %v25169_v53  ;;  %v17749_v45 = vpop.f32.mrf.mxu1  ;;  %18067 = vmatmul.mubr.msk.f32.gmra.mxu1 %vm659_vm1, %v20186_v15 }
 0x173   : > { %v2513_v24 = vadd.f32 %v17723_v16, %v21109_v11  ;;  %v21232_v32 = vadd.f32 %v2615_v47, %v2510_v26  ;;  %18043 = vmatprep.mubr.msk.f32.mxu0 %vm659_vm1, %v25170_v63  ;;  %18069 = vmatprep.mubr.msk.f32.mxu1 %vm659_vm1, %v25171_v56  ;;  %v4807_v11 = vrot.slane %v20829_v5, 4  ;;  %v25172_v47 = vld [vmem:[#allocation33_spill] sm:$0xff]  ;;  %v25175_v56 = vld [vmem:[#allocation82_spill] sm:$0xff]  ;;  %v21263_v63 = vrot.slane %v21104_v25, 3 }
 0x174   : > { %v2467_v28 = vpop.f32.mrf.mxu0  ;;  %v2635_v26 = vpop.f32.mrf.mxu1 }
 0x175   : > { %v2512_v22 = vadd.f32 %v2467_v28, %v21124_v17  ;;  %v21240_v29 = vadd.f32 %v17746_v61, %v2513_v24  ;;  %v25174_v17 = vld [vmem:[#allocation29_spill] sm:$0xff]  ;;  %v4641_v61 = vrot.slane %v20829_v5, 3 }
 0x176   : > { %v17726_v16 = vpop.f32.mrf.mxu0  ;;  %18044 = vmatmul.mubr.msk.f32.gmra.mxu0 %vm659_vm1, %v25172_v47  ;;  %v17752_v24 = vpop.f32.mrf.mxu1  ;;  %18070 = vmatmul.mubr.msk.f32.gmra.mxu1 %vm659_vm1, %v20604_v12  ;;  %v21260_v47 = vsel %vm25009_vm3, %v25175_v56, %v4639_v9  ;;  %v25178_v12 = vld [vmem:[#allocation84_spill] sm:$0xff] }
 0x177   : > { %v2515_v15 = vadd.f32 %v17726_v16, %v21131_v60  ;;  %v21251_v23 = vadd.f32 %v2625_v59, %v2512_v22  ;;  %18046 = vmatprep.mubr.msk.f32.mxu0 %vm659_vm1, %v25174_v17  ;;  %25176 = vst [vmem:[#allocation21_spill] sm:$0xff] %v21260_v47  ;;  %18072 = vmatprep.mubr.msk.f32.mxu1 %vm659_vm1, %v20736_v51 }
 0x178   : > { %v2477_v28 = vpop.f32.mrf.mxu0  ;;  %v21272_v22 = vsel %vm25010_vm0, %v20712_v0, %v4807_v11  ;;  %v2645_v56 = vpop.f32.mrf.mxu1  ;;  %v21278_v17 = vsel %vm25010_vm0, %v4807_v11, %v21248_v3  ;;  %v21292_v51 = vsel %vm25009_vm3, %v4641_v61, %v21263_v63 }
 0x179   : > { %v2514_v60 = vadd.f32 %v2477_v28, %v21145_v14  ;;  %v21266_v59 = vadd.f32 %v17749_v45, %v2515_v15  ;;  %25177 = vst [vmem:[#allocation41_spill] sm:$0xff] %v21272_v22  ;;  %25179 = vst [vmem:[#allocation22_spill] sm:$0xff] %v21278_v17  ;;  %v21286_v45 = vsel %vm25009_vm3, %v4639_v9, %v4641_v61 }
 0x17a   : > { %v17729_v16 = vpop.f32.mrf.mxu0  ;;  %18047 = vmatmul.mubr.msk.f32.gmra.mxu0 %vm659_vm1, %v25178_v12  ;;  %25180 = vst [vmem:[#allocation23_spill] sm:$0xff] %v21286_v45  ;;  %v17755_v28 = vpop.f32.mrf.mxu1  ;;  %18073 = vmatmul.mubr.msk.f32.gmra.mxu1 %vm659_vm1, %v21272_v22  ;;  %25181 = vst [vmem:[#allocation24_spill] sm:$0xff] %v21292_v51 }
 0x17b   : > { %v2517_v14 = vadd.f32 %v17729_v16, %v21152_v55  ;;  %v21281_v15 = vadd.f32 %v2635_v26, %v2514_v60  ;;  %18049 = vmatprep.mubr.msk.f32.mxu0 %vm659_vm1, %v21260_v47  ;;  %18075 = vmatprep.mubr.msk.f32.mxu1 %vm659_vm1, %v21278_v17 }
 0x17c   : > { %v2487_v0 = vpop.f32.mrf.mxu0  ;;  %v2655_v9 = vpop.f32.mrf.mxu1 }
 0x17d   : > { %v2516_v11 = vadd.f32 %v2487_v0, %v21159_v54  ;;  %v21295_v55 = vadd.f32 %v17752_v24, %v2517_v14  ;;  %v25182_v14 = vld [vmem:[#allocation57_spill] sm:$0xff] }
 0x17e   : > { %v17732_v26 = vpop.f32.mrf.mxu0  ;;  %18050 = vmatmul.mubr.msk.f32.gmra.mxu0 %vm659_vm1, %v21286_v45  ;;  %v17783_v22 = vpop.f32.mrf.mxu1  ;;  %18076 = vmatmul.mubr.msk.f32.gmra.mxu1 %vm659_vm1, %v21248_v3  ;;  %v25190_v3 = vld [vmem:[#allocation47_spill] sm:$0xff] }
 0x17f   : > { %v2519_v60 = vadd.f32 %v17732_v26, %v21166_v18  ;;  %v21302_v16 = vadd.f32 %v2645_v56, %v2516_v11  ;;  %18052 = vmatprep.mubr.msk.f32.mxu0 %vm659_vm1, %v21292_v51  ;;  %18103 = vmatprep.mubr.msk.f32.mxu1 %vm659_vm1, %v25182_v14  ;;  %v25183_v26 = vld [vmem:[#allocation38_spill] sm:$0xff] }
 0x180   : > { %v2497_v61 = vpop.f32.mrf.mxu0  ;;  %v2923_v18 = vpop.f32.mrf.mxu1 }
 0x181   : > { %v2518_v54 = vadd.f32 %v2497_v61, %v21171_v40  ;;  %v21309_v24 = vadd.f32 %v17755_v28, %v2519_v60  ;;  %v21323_v40 = vld [vmem:[%s25031_s21 + $0x74] sm:$0xf] }
 0x182   : > { %v17760_v0 = vpop.f32.mrf.mxu0  ;;  %18053 = vmatmul.mubr.msk.f32.gmra.mxu0 %vm659_vm1, %v21263_v63  ;;  %v17786_v60 = vpop.f32.mrf.mxu1  ;;  %18104 = vmatmul.mubr.msk.f32.vlgmr.msra.gmra.mxu1 %vm659_vm1, %v25133_v7 }
 0x183   : > { %v21315_v56 = vadd.f32 %v2655_v9, %v2518_v54  ;;  %v2829_v11 = vadd.f32 %v17760_v0, %v21184_v52  ;;  %18080 = vmatprep.mubr.msk.f32.mxu0 %vm659_vm1, %v25183_v26  ;;  %18106 = vmatprep.mubr.msk.f32.mxu1 %vm659_vm1, %v25134_v37  ;;  %v21337_v52 = vld [vmem:[%s25031_s21 + $0x70] sm:$0xf]  ;;  %v25184_v54 = vld [vmem:[#allocation39_spill] sm:$0xff] }
 0x184   : > { %v2759_v28 = vpop.f32.mrf.mxu0  ;;  %18148 = vmatpush3.msk.msra.mxu1 %vm25010_vm0, %v21179_v43  ;;  %v2933_v7 = vpop.f32.mrf.mxu1  ;;  %v25185_v43 = vld [vmem:[#allocation42_spill] sm:$0xff] }
 0x185   : > { %v2828_v61 = vadd.f32 %v2759_v28, %v21200_v34  ;;  %v21328_v14 = vadd.f32 %v17783_v22, %v2829_v11  ;;  %18193 = vmatprep.subr.msk.mxu1 %vm25010_vm0, %v21323_v40 }
 0x186   : > { %v17763_v9 = vpop.f32.mrf.mxu0  ;;  %18081 = vmatmul.mubr.msk.f32.vlgmr.msra.gmra.mxu0 %vm659_vm1, %v25184_v54  ;;  %v17789_v11 = vpop.f32.mrf.mxu1  ;;  %18107 = vmatmul.mubr.msk.f32.gmra.mxu1 %vm659_vm1, %v25135_v2  ;;  %v25187_v54 = vld [vmem:[#allocation46_spill] sm:$0xff] }
 0x187   : > { %v2831_v34 = vadd.f32 %v17763_v9, %v21211_v19  ;;  %v21344_v22 = vadd.f32 %v2923_v18, %v2828_v61  ;;  %18125 = vmatpush3.msk.msra.mxu0 %vm25010_vm0, %v21193_v4  ;;  %18083 = vmatprep.mubr.msk.f32.mxu0 %vm659_vm1, %v25185_v43  ;;  %v25186_v4 = vld [vmem:[#allocation43_spill] sm:$0xff] }
 0x188   : > { %v2769_v0 = vpop.f32.mrf.mxu0  ;;  %18170 = vmatprep.subr.msk.mxu0 %vm25010_vm0, %v21337_v52  ;;  %18109 = vmatprep.mubr.msk.f32.mxu1 %vm659_vm1, %v20272_v57  ;;  %v2943_v18 = vpop.f32.mrf.mxu1 }
 0x189   : > { %v2830_v26 = vadd.f32 %v2769_v0, %v21218_v6  ;;  %v21355_v28 = vadd.f32 %v17786_v60, %v2831_v34  ;;  %v25188_v6 = vld [vmem:[#allocation62_spill] sm:$0xff]  ;;  %v25189_v0 = vld [vmem:[#allocation63_spill] sm:$0xff] }
 0x18a   : > { %v17766_v19 = vpop.f32.mrf.mxu0  ;;  %18084 = vmatmul.mubr.msk.f32.gmra.mxu0 %vm659_vm1, %v25186_v4  ;;  %v17792_v2 = vpop.f32.mrf.mxu1  ;;  %18110 = vmatmul.mubr.msk.f32.gmra.mxu1 %vm659_vm1, %v25188_v6 }
 0x18b   : > { %v2833_v61 = vadd.f32 %v17766_v19, %v21225_v62  ;;  %v21362_v9 = vadd.f32 %v2933_v7, %v2830_v26  ;;  %18086 = vmatprep.mubr.msk.f32.mxu0 %vm659_vm1, %v25187_v54  ;;  %18112 = vmatprep.mubr.msk.f32.mxu1 %vm659_vm1, %v25189_v0  ;;  %v25191_v19 = vld [vmem:[#allocation52_spill] sm:$0xff] }
 0x18c   : > { %v2779_v37 = vpop.f32.mrf.mxu0  ;;  %v2953_v62 = vpop.f32.mrf.mxu1 }
 0x18d   : > { %v2832_v60 = vadd.f32 %v2779_v37, %v21232_v32  ;;  %v21369_v34 = vadd.f32 %v17789_v11, %v2833_v61  ;;  %v25192_v11 = vld [vmem:[#allocation66_spill] sm:$0xff]  ;;  %v5135_v61 = vrot.slane %v20829_v5, 6 }
 0x18e   : > { %v17769_v57 = vpop.f32.mrf.mxu0  ;;  %18087 = vmatmul.mubr.msk.f32.gmra.mxu0 %vm659_vm1, %v25190_v3  ;;  %v17795_v17 = vpop.f32.mrf.mxu1  ;;  %18113 = vmatmul.mubr.msk.f32.gmra.mxu1 %vm659_vm1, %v25138_v8 }
 0x18f   : > { %v2835_v7 = vadd.f32 %v17769_v57, %v21240_v29  ;;  %v21376_v26 = vadd.f32 %v2943_v18, %v2832_v60  ;;  %18089 = vmatprep.mubr.msk.f32.mxu0 %vm659_vm1, %v25191_v19  ;;  %18115 = vmatprep.mubr.msk.f32.mxu1 %vm659_vm1, %v25192_v11  ;;  %v25193_v29 = vld [vmem:[#allocation53_spill] sm:$0xff]  ;;  %v21391_v60 = vrot.slane %v21104_v25, 6  ;;  %v21402_v11 = vrot.slane %v21104_v25, 5 }
 0x190   : > { %v2789_v6 = vpop.f32.mrf.mxu0  ;;  %v2963_v18 = vpop.f32.mrf.mxu1 }
 0x191   : > { %v2834_v37 = vadd.f32 %v2789_v6, %v21251_v23  ;;  %v21383_v32 = vadd.f32 %v17792_v2, %v2835_v7  ;;  %25194 = vst [vmem:[#allocation82_spill] sm:$0xff] %v21391_v60  ;;  %v25195_v23 = vld [vmem:[#allocation36_spill] sm:$0xff]  ;;  %v4971_v2 = vrot.slane %v20829_v5, 5  ;;  %25196 = vst [vmem:[#allocation57_spill] sm:$0xff] %v21402_v11 }
 0x192   : > { %v17772_v57 = vpop.f32.mrf.mxu0  ;;  %18090 = vmatmul.mubr.msk.f32.gmra.mxu0 %vm659_vm1, %v25193_v29  ;;  %v17798_v7 = vpop.f32.mrf.mxu1  ;;  %18116 = vmatmul.mubr.msk.f32.gmra.mxu1 %vm659_vm1, %v20862_v20  ;;  %v21417_v20 = vsel %vm25012_vm5, %v5135_v61, %v21391_v60 }
 0x193   : > { %v2837_v0 = vadd.f32 %v17772_v57, %v21266_v59  ;;  %v21394_v8 = vadd.f32 %v2953_v62, %v2834_v37  ;;  %18092 = vmatprep.mubr.msk.f32.mxu0 %vm659_vm1, %v25195_v23  ;;  %18118 = vmatprep.mubr.msk.f32.mxu1 %vm659_vm1, %v20868_v33  ;;  %v21411_v59 = vsel %vm25012_vm5, %v20840_v39, %v5135_v61  ;;  %v25198_v37 = vld [vmem:[#allocation48_spill] sm:$0xff] }
 0x194   : > { %v2799_v6 = vpop.f32.mrf.mxu0  ;;  %25197 = vst [vmem:[#allocation38_spill] sm:$0xff] %v21411_v59  ;;  %v2973_v57 = vpop.f32.mrf.mxu1  ;;  %25199 = vst [vmem:[#allocation39_spill] sm:$0xff] %v21417_v20  ;;  %v21432_v61 = vsel %vm25003_vm6, %v4971_v2, %v21402_v11 }
 0x195   : > { %v2836_v29 = vadd.f32 %v2799_v6, %v21281_v15  ;;  %v21405_v19 = vadd.f32 %v17795_v17, %v2837_v0  ;;  %v25200_v0 = vld [vmem:[#allocation85_spill] sm:$0xff]  ;;  %25203 = vst [vmem:[#allocation43_spill] sm:$0xff] %v21432_v61 }
 0x196   : > { %v17775_v62 = vpop.f32.mrf.mxu0  ;;  %18093 = vmatmul.mubr.msk.f32.gmra.mxu0 %vm659_vm1, %v25198_v37  ;;  %v25201_v6 = vld [vmem:[#allocation37_spill] sm:$0xff]  ;;  %v17801_v23 = vpop.f32.mrf.mxu1  ;;  %18119 = vmatmul.mubr.msk.f32.gmra.mxu1 %vm659_vm1, %v21411_v59 }
 0x197   : > { %v2839_v15 = vadd.f32 %v17775_v62, %v21295_v55  ;;  %v21420_v17 = vadd.f32 %v2963_v18, %v2836_v29  ;;  %18095 = vmatprep.mubr.msk.f32.mxu0 %vm659_vm1, %v25200_v0  ;;  %v21426_v39 = vsel %vm25003_vm6, %v25201_v6, %v4971_v2  ;;  %18121 = vmatprep.mubr.msk.f32.mxu1 %vm659_vm1, %v21417_v20 }
 0x198   : > { %25202 = vst [vmem:[#allocation42_spill] sm:$0xff] %v21426_v39  ;;  %v2809_v33 = vpop.f32.mrf.mxu0  ;;  %v2983_v62 = vpop.f32.mrf.mxu1 }
 0x199   : > { %v2838_v55 = vadd.f32 %v2809_v33, %v21302_v16  ;;  %v21435_v29 = vadd.f32 %v17798_v7, %v2839_v15 }
 0x19a   : > { %v17778_v18 = vpop.f32.mrf.mxu0  ;;  %18096 = vmatmul.mubr.msk.f32.gmra.mxu0 %vm659_vm1, %v21426_v39  ;;  %v17829_v59 = vpop.f32.mrf.mxu1  ;;  %18122 = vmatmul.mubr.msk.f32.gmra.mxu1 %vm659_vm1, %v21391_v60 }
 0x19b   : > { %v2841_v6 = vadd.f32 %v17778_v18, %v21309_v24  ;;  %v21442_v0 = vadd.f32 %v2973_v57, %v2838_v55  ;;  %18098 = vmatprep.mubr.msk.f32.mxu0 %vm659_vm1, %v21432_v61  ;;  %18149 = vmatprep.mubr.msk.f32.mxu1 %vm659_vm1, %v20927_v38  ;;  %v25204_v55 = vld [vmem:[#allocation67_spill] sm:$0xff] }
 0x19c   : > { %v2819_v2 = vpop.f32.mrf.mxu0  ;;  %v3251_v24 = vpop.f32.mrf.mxu1 }
 0x19d   : > { %v2840_v33 = vadd.f32 %v2819_v2, %v21315_v56  ;;  %v21449_v16 = vadd.f32 %v17801_v23, %v2841_v6  ;;  %v21463_v56 = vld [vmem:[%s25031_s21 + $0x7c] sm:$0xf] }
 0x19e   : > { %v17806_v7 = vpop.f32.mrf.mxu0  ;;  %18099 = vmatmul.mubr.msk.f32.gmra.mxu0 %vm659_vm1, %v21402_v11  ;;  %v17832_v18 = vpop.f32.mrf.mxu1  ;;  %18150 = vmatmul.mubr.msk.f32.vlgmr.msra.gmra.mxu1 %vm659_vm1, %v20940_v49  ;;  %v25205_v2 = vld [vmem:[#allocation68_spill] sm:$0xff] }
 0x19f   : > { %v21455_v57 = vadd.f32 %v2983_v62, %v2840_v33  ;;  %v3157_v15 = vadd.f32 %v17806_v7, %v21328_v14  ;;  %18126 = vmatprep.mubr.msk.f32.mxu0 %vm659_vm1, %v25204_v55  ;;  %18152 = vmatprep.mubr.msk.f32.mxu1 %vm659_vm1, %v20947_v35  ;;  %v21477_v14 = vld [vmem:[%s25031_s21 + $0x78] sm:$0xf] }
 0x1a0   : > { %v3087_v23 = vpop.f32.mrf.mxu0  ;;  %18194 = vmatpush3.msk.msra.mxu1 %vm25010_vm0, %v21323_v40  ;;  %v3261_v33 = vpop.f32.mrf.mxu1  ;;  %v25206_v40 = vld [vmem:[#allocation69_spill] sm:$0xff] }
 0x1a1   : > { %v3156_v38 = vadd.f32 %v3087_v23, %v21344_v22  ;;  %v21468_v6 = vadd.f32 %v17829_v59, %v3157_v15  ;;  %18239 = vmatprep.subr.msk.mxu1 %vm25010_vm0, %v21463_v56 }
 0x1a2   : > { %v17809_v62 = vpop.f32.mrf.mxu0  ;;  %18127 = vmatmul.mubr.msk.f32.vlgmr.msra.gmra.mxu0 %vm659_vm1, %v25205_v2  ;;  %v17835_v15 = vpop.f32.mrf.mxu1  ;;  %18153 = vmatmul.mubr.msk.f32.gmra.mxu1 %vm659_vm1, %v20958_v36  ;;  %v25208_v2 = vld [vmem:[#allocation71_spill] sm:$0xff] }
 0x1a3   : > { %v3159_v22 = vadd.f32 %v17809_v62, %v21355_v28  ;;  %v21484_v59 = vadd.f32 %v3251_v24, %v3156_v38  ;;  %18171 = vmatpush3.msk.msra.mxu0 %vm25010_vm0, %v21337_v52  ;;  %18129 = vmatprep.mubr.msk.f32.mxu0 %vm659_vm1, %v25206_v40  ;;  %v25207_v52 = vld [vmem:[#allocation70_spill] sm:$0xff] }
 0x1a4   : > { %v3097_v7 = vpop.f32.mrf.mxu0  ;;  %18216 = vmatprep.subr.msk.mxu0 %vm25010_vm0, %v21477_v14  ;;  %18155 = vmatprep.mubr.msk.f32.mxu1 %vm659_vm1, %v20965_v1  ;;  %v3271_v24 = vpop.f32.mrf.mxu1 }
 0x1a5   : > { %v3158_v55 = vadd.f32 %v3097_v7, %v21362_v9  ;;  %v21495_v23 = vadd.f32 %v17832_v18, %v3159_v22  ;;  %v25209_v7 = vld [vmem:[#allocation72_spill] sm:$0xff] }
 0x1a6   : > { %v17812_v28 = vpop.f32.mrf.mxu0  ;;  %18130 = vmatmul.mubr.msk.f32.gmra.mxu0 %vm659_vm1, %v25207_v52  ;;  %v17838_v20 = vpop.f32.mrf.mxu1  ;;  %18156 = vmatmul.mubr.msk.f32.gmra.mxu1 %vm659_vm1, %v20977_v46 }
 0x1a7   : > { %v3161_v38 = vadd.f32 %v17812_v28, %v21369_v34  ;;  %v21502_v62 = vadd.f32 %v3261_v33, %v3158_v55  ;;  %18132 = vmatprep.mubr.msk.f32.mxu0 %vm659_vm1, %v25208_v2  ;;  %18158 = vmatprep.mubr.msk.f32.mxu1 %vm659_vm1, %v20987_v41  ;;  %v25210_v28 = vld [vmem:[#allocation73_spill] sm:$0xff] }
 0x1a8   : > { %v3107_v40 = vpop.f32.mrf.mxu0  ;;  %v3281_v34 = vpop.f32.mrf.mxu1 }
 0x1a9   : > { %v3160_v9 = vadd.f32 %v3107_v40, %v21376_v26  ;;  %v21509_v18 = vadd.f32 %v17835_v15, %v3161_v38  ;;  %v21525_v38 = vld [vmem:[#allocation2 + $0x70] sm:$0xff] }
 0x1aa   : > { %v17815_v22 = vpop.f32.mrf.mxu0  ;;  %18133 = vmatmul.mubr.msk.f32.gmra.mxu0 %vm659_vm1, %v25209_v7  ;;  %v17841_v52 = vpop.f32.mrf.mxu1  ;;  %18159 = vmatmul.mubr.msk.f32.gmra.mxu1 %vm659_vm1, %v21002_v31  ;;  %v21541_v7 = vld [vmem:[#allocation2 + $0x98] sm:$0xff] }
 0x1ab   : > { %v3163_v33 = vadd.f32 %v17815_v22, %v21383_v32  ;;  %v21516_v55 = vadd.f32 %v3271_v24, %v3160_v9  ;;  %18135 = vmatprep.mubr.msk.f32.mxu0 %vm659_vm1, %v25210_v28  ;;  %18161 = vmatprep.mubr.msk.f32.mxu1 %vm659_vm1, %v21525_v38  ;;  %v25211_v24 = vld [vmem:[#allocation74_spill] sm:$0xff]  ;;  %v25212_v28 = vld [vmem:[#allocation75_spill] sm:$0xff] }
 0x1ac   : > { %v3117_v2 = vpop.f32.mrf.mxu0  ;;  %v3291_v40 = vpop.f32.mrf.mxu1 }
 0x1ad   : > { %v3162_v26 = vadd.f32 %v3117_v2, %v21394_v8  ;;  %v21523_v15 = vadd.f32 %v17838_v20, %v3163_v33  ;;  %v21536_v2 = vld [vmem:[#allocation2 + $0x78] sm:$0xff]  ;;  %v5300_v33 = vrot.slane %v21104_v25, 7 }
 0x1ae   : > { %v17818_v32 = vpop.f32.mrf.mxu0  ;;  %18136 = vmatmul.mubr.msk.f32.gmra.mxu0 %vm659_vm1, %v25211_v24  ;;  %v17844_v20 = vpop.f32.mrf.mxu1  ;;  %18162 = vmatmul.mubr.msk.f32.gmra.mxu1 %vm659_vm1, %v21536_v2 }
 0x1af   : > { %v3165_v9 = vadd.f32 %v17818_v32, %v21405_v19  ;;  %v21532_v22 = vadd.f32 %v3281_v34, %v3162_v26  ;;  %18138 = vmatprep.mubr.msk.f32.mxu0 %vm659_vm1, %v25212_v28  ;;  %v21546_v19 = vld [vmem:[#allocation2 + $0x80] sm:$0xff] }
 0x1b0   : > { %v3127_v8 = vpop.f32.mrf.mxu0  ;;  %18164 = vmatprep.mubr.msk.f32.mxu1 %vm659_vm1, %v21546_v19  ;;  %v25213_v26 = vld [vmem:[#allocation76_spill] sm:$0xff]  ;;  %v3301_v32 = vpop.f32.mrf.mxu1 }
 0x1b1   : > { %v3164_v24 = vadd.f32 %v3127_v8, %v21420_v17  ;;  %v21544_v60 = vadd.f32 %v17841_v52, %v3165_v9  ;;  %v25214_v8 = vrot.slane %v20829_v5, 7 }
 0x1b2   : > { %v17821_v34 = vpop.f32.mrf.mxu0  ;;  %18139 = vmatmul.mubr.msk.f32.gmra.mxu0 %vm659_vm1, %v25213_v26  ;;  %v17847_v9 = vpop.f32.mrf.mxu1  ;;  %18165 = vmatmul.mubr.msk.f32.gmra.mxu1 %vm659_vm1, %v20829_v5  ;;  %v25215_v5 = vrot.slane %v21541_v7, 7 }
 0x1b3   : > { %v3167_v28 = vadd.f32 %v17821_v34, %v21435_v29  ;;  %v21553_v11 = vadd.f32 %v3291_v40, %v3164_v24  ;;  %18141 = vmatprep.mubr.msk.f32.mxu0 %vm659_vm1, %v20853_v13  ;;  %v21563_v61 = vsel %vm25004_vm7, %v25214_v8, %v5300_v33  ;;  %18167 = vmatprep.mubr.msk.f32.mxu1 %vm659_vm1, %v21104_v25 }
 0x1b4   : > { %v3137_v52 = vpop.f32.mrf.mxu0  ;;  %v3311_v40 = vpop.f32.mrf.mxu1 }
 0x1b5   : > { %v3166_v26 = vadd.f32 %v3137_v52, %v21442_v0  ;;  %v21566_v29 = vadd.f32 %v17844_v20, %v3167_v28  ;;  %v21580_v0 = vsel %vm25004_vm7, %v5300_v33, %v25215_v5 }
 0x1b6   : > { %v17824_v24 = vpop.f32.mrf.mxu0  ;;  %18142 = vmatmul.mubr.msk.f32.gmra.mxu0 %vm659_vm1, %v20878_v58  ;;  %v17875_v20 = vpop.f32.mrf.mxu1  ;;  %18168 = vmatmul.mubr.msk.f32.gmra.mxu1 %vm659_vm1, %v21541_v7 }
 0x1b7   : > { %v3169_v34 = vadd.f32 %v17824_v24, %v21449_v16  ;;  %v21573_v17 = vadd.f32 %v3301_v32, %v3166_v26  ;;  %18144 = vmatprep.mubr.msk.f32.mxu0 %vm659_vm1, %v21563_v61  ;;  %18195 = vmatprep.mubr.msk.f32.mxu1 %vm659_vm1, %v19789_v42 }
 0x1b8   : > { %v3147_v28 = vpop.f32.mrf.mxu0  ;;  %v3580_v26 = vpop.f32.mrf.mxu1 }
 0x1b9   : > { %v3168_v52 = vadd.f32 %v3147_v28, %v21455_v57  ;;  %v21585_v8 = vadd.f32 %v17847_v9, %v3169_v34  ;;  %v21599_v57 = vld [vmem:[%s25031_s21 + $0x84] sm:$0xf] }
 0x1ba   : > { %v17852_v16 = vpop.f32.mrf.mxu0  ;;  %18145 = vmatmul.mubr.msk.f32.gmra.mxu0 %vm659_vm1, %v21580_v0  ;;  %v17878_v24 = vpop.f32.mrf.mxu1  ;;  %18196 = vmatmul.mubr.msk.f32.vlgmr.msra.gmra.mxu1 %vm659_vm1, %v19795_v44 }
 0x1bb   : > { %v21591_v32 = vadd.f32 %v3311_v40, %v3168_v52  ;;  %v3482_v33 = vadd.f32 %v17852_v16, %v21468_v6  ;;  %18172 = vmatprep.mubr.msk.f32.mxu0 %vm659_vm1, %v20940_v49  ;;  %v25216_v40 = vld [vmem:[#allocation17_spill] sm:$0xff]  ;;  %18240 = vmatpush3.msk.msra.mxu1 %vm25010_vm0, %v21463_v56  ;;  %v21613_v49 = vld [vmem:[%s25031_s21 + $0x80] sm:$0xf] }
 0x1bc   : > { %v3412_v9 = vpop.f32.mrf.mxu0  ;;  %18198 = vmatprep.mubr.msk.f32.mxu1 %vm659_vm1, %v25216_v40  ;;  %v3590_v44 = vpop.f32.mrf.mxu1  ;;  %18285 = vmatprep.subr.msk.mxu1 %vm25010_vm0, %v21599_v57 }
 0x1bd   : > { %v3481_v42 = vadd.f32 %v3412_v9, %v21484_v59  ;;  %v21604_v34 = vadd.f32 %v17875_v20, %v3482_v33  ;;  %v25217_v20 = vld [vmem:[#allocation18_spill] sm:$0xff] }
 0x1be   : > { %v17855_v6 = vpop.f32.mrf.mxu0  ;;  %18173 = vmatmul.mubr.msk.f32.vlgmr.msra.gmra.mxu0 %vm659_vm1, %v20947_v35  ;;  %v17881_v28 = vpop.f32.mrf.mxu1  ;;  %18199 = vmatmul.mubr.msk.f32.gmra.mxu1 %vm659_vm1, %v25217_v20 }
 0x1bf   : > { %v3484_v59 = vadd.f32 %v17855_v6, %v21495_v23  ;;  %v21620_v5 = vadd.f32 %v3580_v26, %v3481_v42  ;;  %18217 = vmatpush3.msk.msra.mxu0 %vm25010_vm0, %v21477_v14  ;;  %18175 = vmatprep.mubr.msk.f32.mxu0 %vm659_vm1, %v20958_v36  ;;  %v25218_v23 = vld [vmem:[#allocation19_spill] sm:$0xff]  ;;  %v25220_v6 = vld [vmem:[#allocation80_spill] sm:$0xff] }
 0x1c0   : > { %v3422_v56 = vpop.f32.mrf.mxu0  ;;  %18262 = vmatprep.subr.msk.mxu0 %vm25010_vm0, %v21613_v49  ;;  %18201 = vmatprep.mubr.msk.f32.mxu1 %vm659_vm1, %v25218_v23  ;;  %v3600_v36 = vpop.f32.mrf.mxu1 }
 0x1c1   : > { %v3483_v35 = vadd.f32 %v3422_v56, %v21502_v62  ;;  %v21631_v52 = vadd.f32 %v17878_v24, %v3484_v59  ;;  %v25219_v62 = vld [vmem:[#allocation20_spill] sm:$0xff] }
 0x1c2   : > { %v17858_v16 = vpop.f32.mrf.mxu0  ;;  %18176 = vmatmul.mubr.msk.f32.gmra.mxu0 %vm659_vm1, %v20965_v1  ;;  %v17884_v9 = vpop.f32.mrf.mxu1  ;;  %18202 = vmatmul.mubr.msk.f32.gmra.mxu1 %vm659_vm1, %v25219_v62 }
 0x1c3   : > { %v3486_v14 = vadd.f32 %v17858_v16, %v21509_v18  ;;  %v21638_v26 = vadd.f32 %v3590_v44, %v3483_v35  ;;  %18178 = vmatprep.mubr.msk.f32.mxu0 %vm659_vm1, %v20977_v46  ;;  %18204 = vmatprep.mubr.msk.f32.mxu1 %vm659_vm1, %v25220_v6  ;;  %v5777_v44 = vrot.slane %v21104_v25, 1  ;;  %v25221_v35 = vld [vmem:[#allocation81_spill] sm:$0xff] }
 0x1c4   : > { %v3432_v33 = vpop.f32.mrf.mxu0  ;;  %v3610_v18 = vpop.f32.mrf.mxu1 }
 0x1c5   : > { %v3485_v24 = vadd.f32 %v3432_v33, %v21516_v55  ;;  %v21645_v42 = vadd.f32 %v17881_v28, %v3486_v14  ;;  %v21657_v55 = vld [vmem:[#allocation2 + $0xa0] sm:$0xff]  ;;  %v21671_v14 = vsel %vm736_vm2, %v20982_v50, %v5777_v44 }
 0x1c6   : > { %v17861_v1 = vpop.f32.mrf.mxu0  ;;  %18179 = vmatmul.mubr.msk.f32.gmra.mxu0 %vm659_vm1, %v20987_v41  ;;  %v17887_v28 = vpop.f32.mrf.mxu1  ;;  %18205 = vmatmul.mubr.msk.f32.gmra.mxu1 %vm659_vm1, %v25221_v35  ;;  %25222 = vst [vmem:[#allocation46_spill] sm:$0xff] %v21671_v14  ;;  %v21674_v33 = vrot.slane %v21657_v55, 1 }
 0x1c7   : > { %v3488_v46 = vadd.f32 %v17861_v1, %v21523_v15  ;;  %v21653_v59 = vadd.f32 %v3600_v36, %v3485_v24  ;;  %18181 = vmatprep.mubr.msk.f32.mxu0 %vm659_vm1, %v21002_v31  ;;  %18207 = vmatprep.mubr.msk.f32.mxu1 %vm659_vm1, %v21000_v21  ;;  %v5779_v15 = vrot.slane %v21541_v7, 1 }
 0x1c8   : > { %v3442_v56 = vpop.f32.mrf.mxu0  ;;  %v3620_v31 = vpop.f32.mrf.mxu1  ;;  %25223 = vst [vmem:[#allocation37_spill] sm:$0xff] %v21674_v33 }
 0x1c9   : > { %v3487_v16 = vadd.f32 %v3442_v56, %v21532_v22  ;;  %v21662_v41 = vadd.f32 %v17884_v9, %v3488_v46  ;;  %v21689_v50 = vsel %vm736_vm2, %v5777_v44, %v5779_v15 }
 0x1ca   : > { %v17864_v36 = vpop.f32.mrf.mxu0  ;;  %18182 = vmatmul.mubr.msk.f32.gmra.mxu0 %vm659_vm1, %v21525_v38  ;;  %v17890_v1 = vpop.f32.mrf.mxu1  ;;  %18208 = vmatmul.mubr.msk.f32.gmra.mxu1 %vm659_vm1, %v21008_v27  ;;  %25224 = vst [vmem:[#allocation67_spill] sm:$0xff] %v21689_v50 }
 0x1cb   : > { %v3490_v22 = vadd.f32 %v17864_v36, %v21544_v60  ;;  %v21677_v9 = vadd.f32 %v3610_v18, %v3487_v16  ;;  %18184 = vmatprep.mubr.msk.f32.mxu0 %vm659_vm1, %v21536_v2  ;;  %18210 = vmatprep.mubr.msk.f32.mxu1 %vm659_vm1, %v21671_v14  ;;  %v21695_v16 = vsel %vm736_vm2, %v5779_v15, %v21674_v33 }
 0x1cc   : > { %v3452_v24 = vpop.f32.mrf.mxu0  ;;  %v3630_v18 = vpop.f32.mrf.mxu1  ;;  %25225 = vst [vmem:[#allocation68_spill] sm:$0xff] %v21695_v16 }
 0x1cd   : > { %v3489_v46 = vadd.f32 %v3452_v24, %v21553_v11  ;;  %v21684_v56 = vadd.f32 %v17887_v28, %v3490_v22  ;;  %v21700_v28 = vld [vmem:[#allocation2 + $0x88] sm:$0xff] }
 0x1ce   : > { %v17867_v60 = vpop.f32.mrf.mxu0  ;;  %18185 = vmatmul.mubr.msk.f32.gmra.mxu0 %vm659_vm1, %v21546_v19  ;;  %v17893_v22 = vpop.f32.mrf.mxu1  ;;  %18211 = vmatmul.mubr.msk.f32.gmra.mxu1 %vm659_vm1, %v21689_v50 }
 0x1cf   : > { %v3492_v36 = vadd.f32 %v17867_v60, %v21566_v29  ;;  %v21698_v11 = vadd.f32 %v3620_v31, %v3489_v46  ;;  %18187 = vmatprep.mubr.msk.f32.mxu0 %vm659_vm1, %v21700_v28  ;;  %18213 = vmatprep.mubr.msk.f32.mxu1 %vm659_vm1, %v21695_v16 }
 0x1d0   : > { %v3462_v44 = vpop.f32.mrf.mxu0  ;;  %v3640_v15 = vpop.f32.mrf.mxu1 }
 0x1d1   : > { %v3491_v24 = vadd.f32 %v3462_v44, %v21573_v17  ;;  %v21707_v14 = vadd.f32 %v17890_v1, %v3492_v36  ;;  %v25226_v44 = vld [vmem:[#allocation25_spill] sm:$0xff] }
 0x1d2   : > { %v17870_v29 = vpop.f32.mrf.mxu0  ;;  %18188 = vmatmul.mubr.msk.f32.gmra.mxu0 %vm659_vm1, %v21104_v25  ;;  %v17921_v50 = vpop.f32.mrf.mxu1  ;;  %18214 = vmatmul.mubr.msk.f32.gmra.mxu1 %vm659_vm1, %v21674_v33 }
 0x1d3   : > { %v3494_v31 = vadd.f32 %v17870_v29, %v21585_v8  ;;  %v21714_v46 = vadd.f32 %v3630_v18, %v3491_v24  ;;  %18190 = vmatprep.mubr.msk.f32.mxu0 %vm659_vm1, %v21541_v7  ;;  %18241 = vmatprep.mubr.msk.f32.mxu1 %vm659_vm1, %v25162_v10 }
 0x1d4   : > { %v3472_v60 = vpop.f32.mrf.mxu0  ;;  %v3907_v8 = vpop.f32.mrf.mxu1 }
 0x1d5   : > { %v3493_v17 = vadd.f32 %v3472_v60, %v21591_v32  ;;  %v21721_v1 = vadd.f32 %v17893_v22, %v3494_v31  ;;  %v21735_v32 = vld [vmem:[%s25031_s21 + $0x8c] sm:$0xf] }
 0x1d6   : > { %v17898_v25 = vpop.f32.mrf.mxu0  ;;  %18191 = vmatmul.mubr.msk.f32.gmra.mxu0 %vm659_vm1, %v21657_v55  ;;  %v17924_v24 = vpop.f32.mrf.mxu1  ;;  %18242 = vmatmul.mubr.msk.f32.vlgmr.msra.gmra.mxu1 %vm659_vm1, %v25165_v30  ;;  %v25227_v31 = vld [vmem:[#allocation26_spill] sm:$0xff] }
 0x1d7   : > { %v21727_v18 = vadd.f32 %v3640_v15, %v3493_v17  ;;  %v3814_v36 = vadd.f32 %v17898_v25, %v21604_v34  ;;  %18218 = vmatprep.mubr.msk.f32.mxu0 %vm659_vm1, %v25226_v44  ;;  %18244 = vmatprep.mubr.msk.f32.mxu1 %vm659_vm1, %v25166_v48  ;;  %v21749_v34 = vld [vmem:[%s25031_s21 + $0x88] sm:$0xf]  ;;  %v25234_v48 = vld [vmem:[#allocation35_spill] sm:$0xff] }
 0x1d8   : > { %v3744_v22 = vpop.f32.mrf.mxu0  ;;  %18286 = vmatpush3.msk.msra.mxu1 %vm25010_vm0, %v21599_v57  ;;  %v3917_v30 = vpop.f32.mrf.mxu1  ;;  %v25228_v57 = vld [vmem:[#allocation30_spill] sm:$0xff] }
 0x1d9   : > { %v3813_v10 = vadd.f32 %v3744_v22, %v21620_v5  ;;  %v21740_v29 = vadd.f32 %v17921_v50, %v3814_v36  ;;  %18331 = vmatprep.subr.msk.mxu1 %vm25010_vm0, %v21735_v32 }
 0x1da   : > { %v17901_v15 = vpop.f32.mrf.mxu0  ;;  %18219 = vmatmul.mubr.msk.f32.vlgmr.msra.gmra.mxu0 %vm659_vm1, %v25227_v31  ;;  %v17927_v17 = vpop.f32.mrf.mxu1  ;;  %18245 = vmatmul.mubr.msk.f32.gmra.mxu1 %vm659_vm1, %v25169_v53 }
 0x1db   : > { %v3816_v5 = vadd.f32 %v17901_v15, %v21631_v52  ;;  %v21756_v50 = vadd.f32 %v3907_v8, %v3813_v10  ;;  %18263 = vmatpush3.msk.msra.mxu0 %vm25010_vm0, %v21613_v49  ;;  %18221 = vmatprep.mubr.msk.f32.mxu0 %vm659_vm1, %v25228_v57  ;;  %v25229_v52 = vld [vmem:[#allocation32_spill] sm:$0xff]  ;;  %v25230_v49 = vld [vmem:[#allocation31_spill] sm:$0xff]  ;;  %v25231_v15 = vld [vmem:[#allocation34_spill] sm:$0xff] }
 0x1dc   : > { %v3754_v60 = vpop.f32.mrf.mxu0  ;;  %18308 = vmatprep.subr.msk.mxu0 %vm25010_vm0, %v21749_v34  ;;  %18247 = vmatprep.mubr.msk.f32.mxu1 %vm659_vm1, %v25229_v52  ;;  %v3927_v44 = vpop.f32.mrf.mxu1 }
 0x1dd   : > { %v3815_v25 = vadd.f32 %v3754_v60, %v21638_v26  ;;  %v21767_v36 = vadd.f32 %v17924_v24, %v3816_v5  ;;  %v25232_v26 = vld [vmem:[#allocation33_spill] sm:$0xff] }
 0x1de   : > { %v17904_v8 = vpop.f32.mrf.mxu0  ;;  %18222 = vmatmul.mubr.msk.f32.gmra.mxu0 %vm659_vm1, %v25230_v49  ;;  %v17930_v53 = vpop.f32.mrf.mxu1  ;;  %18248 = vmatmul.mubr.msk.f32.gmra.mxu1 %vm659_vm1, %v25232_v26  ;;  %v25233_v60 = vld [vmem:[#allocation29_spill] sm:$0xff] }
 0x1df   : > { %v3818_v22 = vadd.f32 %v17904_v8, %v21645_v42  ;;  %v21774_v10 = vadd.f32 %v3917_v30, %v3815_v25  ;;  %18224 = vmatprep.mubr.msk.f32.mxu0 %vm659_vm1, %v25231_v15  ;;  %18250 = vmatprep.mubr.msk.f32.mxu1 %vm659_vm1, %v25233_v60  ;;  %v25235_v8 = vld [vmem:[#allocation78_spill] sm:$0xff] }
 0x1e0   : > { %v3764_v31 = vpop.f32.mrf.mxu0  ;;  %v3937_v42 = vpop.f32.mrf.mxu1 }
 0x1e1   : > { %v3817_v24 = vadd.f32 %v3764_v31, %v21653_v59  ;;  %v21781_v5 = vadd.f32 %v17927_v17, %v3818_v22  ;;  %v6109_v22 = vrot.slane %v21541_v7, 3  ;;  %v21803_v31 = vrot.slane %v21657_v55, 3 }
 0x1e2   : > { %v17907_v52 = vpop.f32.mrf.mxu0  ;;  %18225 = vmatmul.mubr.msk.f32.gmra.mxu0 %vm659_vm1, %v25234_v48  ;;  %v17933_v33 = vpop.f32.mrf.mxu1  ;;  %18251 = vmatmul.mubr.msk.f32.gmra.mxu1 %vm659_vm1, %v25178_v12 }
 0x1e3   : > { %v3820_v30 = vadd.f32 %v17907_v52, %v21662_v41  ;;  %v21788_v25 = vadd.f32 %v3927_v44, %v3817_v24  ;;  %18227 = vmatprep.mubr.msk.f32.mxu0 %vm659_vm1, %v25235_v8  ;;  %18253 = vmatprep.mubr.msk.f32.mxu1 %vm659_vm1, %v21260_v47  ;;  %v25236_v52 = vld [vmem:[#allocation79_spill] sm:$0xff]  ;;  %25237 = vst [vmem:[#allocation69_spill] sm:$0xff] %v21803_v31  ;;  %v21814_v47 = vrot.slane %v21657_v55, 2 }
 0x1e4   : > { %v3774_v26 = vpop.f32.mrf.mxu0  ;;  %v3947_v44 = vpop.f32.mrf.mxu1 }
 0x1e5   : > { %v3819_v59 = vadd.f32 %v3774_v26, %v21677_v9  ;;  %v21795_v17 = vadd.f32 %v17930_v53, %v3820_v30  ;;  %v25238_v9 = vld [vmem:[#allocation77_spill] sm:$0xff]  ;;  %v5945_v53 = vrot.slane %v21541_v7, 2 }
 0x1e6   : > { %v17910_v41 = vpop.f32.mrf.mxu0  ;;  %18228 = vmatmul.mubr.msk.f32.gmra.mxu0 %vm659_vm1, %v25236_v52  ;;  %v17936_v30 = vpop.f32.mrf.mxu1  ;;  %18254 = vmatmul.mubr.msk.f32.gmra.mxu1 %vm659_vm1, %v21286_v45  ;;  %v21829_v45 = vsel %vm25009_vm3, %v6109_v22, %v21803_v31 }
 0x1e7   : > { %v3822_v24 = vadd.f32 %v17910_v41, %v21684_v56  ;;  %v21806_v12 = vadd.f32 %v3937_v42, %v3819_v59  ;;  %18230 = vmatprep.mubr.msk.f32.mxu0 %vm659_vm1, %v25238_v9  ;;  %18256 = vmatprep.mubr.msk.f32.mxu1 %vm659_vm1, %v21292_v51  ;;  %v21823_v56 = vsel %vm25009_vm3, %v21263_v63, %v6109_v22  ;;  %v25240_v59 = vld [vmem:[#allocation89_spill] sm:$0xff] }
 0x1e8   : > { %v3784_v26 = vpop.f32.mrf.mxu0  ;;  %25239 = vst [vmem:[#allocation17_spill] sm:$0xff] %v21823_v56  ;;  %v3957_v41 = vpop.f32.mrf.mxu1  ;;  %25241 = vst [vmem:[#allocation18_spill] sm:$0xff] %v21829_v45  ;;  %v21844_v22 = vsel %vm1099_vm4, %v5945_v53, %v21814_v47 }
 0x1e9   : > { %v3821_v60 = vadd.f32 %v3784_v26, %v21698_v11  ;;  %v21817_v16 = vadd.f32 %v17933_v33, %v3822_v24  ;;  %v25242_v24 = vld [vmem:[#allocation90_spill] sm:$0xff]  ;;  %v25243_v26 = vld [vmem:[#allocation88_spill] sm:$0xff]  ;;  %25245 = vst [vmem:[#allocation20_spill] sm:$0xff] %v21844_v22 }
 0x1ea   : > { %v17913_v42 = vpop.f32.mrf.mxu0  ;;  %18231 = vmatmul.mubr.msk.f32.gmra.mxu0 %vm659_vm1, %v25240_v59  ;;  %v21838_v63 = vsel %vm1099_vm4, %v25243_v26, %v5945_v53  ;;  %v17939_v27 = vpop.f32.mrf.mxu1  ;;  %18257 = vmatmul.mubr.msk.f32.gmra.mxu1 %vm659_vm1, %v21823_v56 }
 0x1eb   : > { %v3824_v11 = vadd.f32 %v17913_v42, %v21707_v14  ;;  %v21832_v33 = vadd.f32 %v3947_v44, %v3821_v60  ;;  %18233 = vmatprep.mubr.msk.f32.mxu0 %vm659_vm1, %v25242_v24  ;;  %25244 = vst [vmem:[#allocation19_spill] sm:$0xff] %v21838_v63  ;;  %18259 = vmatprep.mubr.msk.f32.mxu1 %vm659_vm1, %v21829_v45 }
 0x1ec   : > { %v3794_v51 = vpop.f32.mrf.mxu0  ;;  %v3967_v42 = vpop.f32.mrf.mxu1 }
 0x1ed   : > { %v3823_v14 = vadd.f32 %v3794_v51, %v21714_v46  ;;  %v21847_v60 = vadd.f32 %v17936_v30, %v3824_v11 }
 0x1ee   : > { %v17916_v44 = vpop.f32.mrf.mxu0  ;;  %18234 = vmatmul.mubr.msk.f32.gmra.mxu0 %vm659_vm1, %v21838_v63  ;;  %v17967_v56 = vpop.f32.mrf.mxu1  ;;  %18260 = vmatmul.mubr.msk.f32.gmra.mxu1 %vm659_vm1, %v21803_v31  ;;  %v25254_v31 = vld [vmem:[#allocation55_spill] sm:$0xff] }
 0x1ef   : > { %v3826_v26 = vadd.f32 %v17916_v44, %v21721_v1  ;;  %v21854_v24 = vadd.f32 %v3957_v41, %v3823_v14  ;;  %18236 = vmatprep.mubr.msk.f32.mxu0 %vm659_vm1, %v21844_v22  ;;  %18287 = vmatprep.mubr.msk.f32.mxu1 %vm659_vm1, %v25185_v43  ;;  %v25246_v14 = vld [vmem:[#allocation44_spill] sm:$0xff] }
 0x1f0   : > { %v3804_v53 = vpop.f32.mrf.mxu0  ;;  %v4229_v1 = vpop.f32.mrf.mxu1 }
 0x1f1   : > { %v3825_v51 = vadd.f32 %v3804_v53, %v21727_v18  ;;  %v21861_v46 = vadd.f32 %v17939_v27, %v3826_v26  ;;  %v21875_v27 = vld [vmem:[%s25031_s21 + $0x94] sm:$0xf]  ;;  %v25247_v53 = vld [vmem:[#allocation45_spill] sm:$0xff] }
 0x1f2   : > { %v17944_v30 = vpop.f32.mrf.mxu0  ;;  %18237 = vmatmul.mubr.msk.f32.gmra.mxu0 %vm659_vm1, %v21814_v47  ;;  %v17970_v44 = vpop.f32.mrf.mxu1  ;;  %18288 = vmatmul.mubr.msk.f32.vlgmr.msra.gmra.mxu1 %vm659_vm1, %v25186_v4 }
 0x1f3   : > { %v21867_v41 = vadd.f32 %v3967_v42, %v3825_v51  ;;  %v4135_v11 = vadd.f32 %v17944_v30, %v21740_v29  ;;  %18264 = vmatprep.mubr.msk.f32.mxu0 %vm659_vm1, %v25246_v14  ;;  %18290 = vmatprep.mubr.msk.f32.mxu1 %vm659_vm1, %v25187_v54  ;;  %v21889_v29 = vld [vmem:[%s25031_s21 + $0x90] sm:$0xf]  ;;  %v25248_v54 = vld [vmem:[#allocation49_spill] sm:$0xff] }
 0x1f4   : > { %v4065_v18 = vpop.f32.mrf.mxu0  ;;  %18332 = vmatpush3.msk.msra.mxu1 %vm25010_vm0, %v21735_v32  ;;  %v4239_v4 = vpop.f32.mrf.mxu1 }
 0x1f5   : > { %v4134_v43 = vadd.f32 %v4065_v18, %v21756_v50  ;;  %v21880_v26 = vadd.f32 %v17967_v56, %v4135_v11  ;;  %18377 = vmatprep.subr.msk.mxu1 %vm25010_vm0, %v21875_v27 }
 0x1f6   : > { %v17947_v42 = vpop.f32.mrf.mxu0  ;;  %18265 = vmatmul.mubr.msk.f32.vlgmr.msra.gmra.mxu0 %vm659_vm1, %v25247_v53  ;;  %v17973_v51 = vpop.f32.mrf.mxu1  ;;  %18291 = vmatmul.mubr.msk.f32.gmra.mxu1 %vm659_vm1, %v25190_v3 }
 0x1f7   : > { %v4137_v50 = vadd.f32 %v17947_v42, %v21767_v36  ;;  %v21896_v56 = vadd.f32 %v4229_v1, %v4134_v43  ;;  %18309 = vmatpush3.msk.msra.mxu0 %vm25010_vm0, %v21749_v34  ;;  %18267 = vmatprep.mubr.msk.f32.mxu0 %vm659_vm1, %v25248_v54  ;;  %v25249_v36 = vld [vmem:[#allocation52_spill] sm:$0xff]  ;;  %v25250_v34 = vld [vmem:[#allocation50_spill] sm:$0xff] }
 0x1f8   : > { %v4075_v32 = vpop.f32.mrf.mxu0  ;;  %18354 = vmatprep.subr.msk.mxu0 %vm25010_vm0, %v21889_v29  ;;  %18293 = vmatprep.mubr.msk.f32.mxu1 %vm659_vm1, %v25249_v36  ;;  %v4249_v14 = vpop.f32.mrf.mxu1  ;;  %v25251_v42 = vld [vmem:[#allocation54_spill] sm:$0xff] }
 0x1f9   : > { %v4136_v30 = vadd.f32 %v4075_v32, %v21774_v10  ;;  %v21907_v11 = vadd.f32 %v17970_v44, %v4137_v50  ;;  %v25252_v10 = vld [vmem:[#allocation53_spill] sm:$0xff]  ;;  %v25253_v32 = vld [vmem:[#allocation36_spill] sm:$0xff] }
 0x1fa   : > { %v17950_v1 = vpop.f32.mrf.mxu0  ;;  %18268 = vmatmul.mubr.msk.f32.gmra.mxu0 %vm659_vm1, %v25250_v34  ;;  %v17976_v3 = vpop.f32.mrf.mxu1  ;;  %18294 = vmatmul.mubr.msk.f32.gmra.mxu1 %vm659_vm1, %v25252_v10 }
 0x1fb   : > { %v4139_v18 = vadd.f32 %v17950_v1, %v21781_v5  ;;  %v21914_v43 = vadd.f32 %v4239_v4, %v4136_v30  ;;  %18270 = vmatprep.mubr.msk.f32.mxu0 %vm659_vm1, %v25251_v42  ;;  %18296 = vmatprep.mubr.msk.f32.mxu1 %vm659_vm1, %v25253_v32  ;;  %v25255_v1 = vld [vmem:[#allocation51_spill] sm:$0xff] }
 0x1fc   : > { %v4085_v53 = vpop.f32.mrf.mxu0  ;;  %v4259_v5 = vpop.f32.mrf.mxu1 }
 0x1fd   : > { %v4138_v44 = vadd.f32 %v4085_v53, %v21788_v25  ;;  %v21921_v50 = vadd.f32 %v17973_v51, %v4139_v18  ;;  %v25256_v18 = vld [vmem:[#allocation85_spill] sm:$0xff]  ;;  %v6437_v53 = vrot.slane %v21541_v7, 5 }
 0x1fe   : > { %v17953_v36 = vpop.f32.mrf.mxu0  ;;  %18271 = vmatmul.mubr.msk.f32.gmra.mxu0 %vm659_vm1, %v25254_v31  ;;  %v17979_v45 = vpop.f32.mrf.mxu1  ;;  %18297 = vmatmul.mubr.msk.f32.gmra.mxu1 %vm659_vm1, %v25198_v37 }
 0x1ff   : > { %v4141_v4 = vadd.f32 %v17953_v36, %v21795_v17  ;;  %v21928_v30 = vadd.f32 %v4249_v14, %v4138_v44  ;;  %18273 = vmatprep.mubr.msk.f32.mxu0 %vm659_vm1, %v25255_v1  ;;  %18299 = vmatprep.mubr.msk.f32.mxu1 %vm659_vm1, %v25256_v18  ;;  %v25257_v36 = vld [vmem:[#allocation83_spill] sm:$0xff]  ;;  %v21943_v44 = vrot.slane %v21657_v55, 5  ;;  %v21954_v18 = vrot.slane %v21657_v55, 4 }
 0x200   : > { %v4095_v10 = vpop.f32.mrf.mxu0  ;;  %v4269_v14 = vpop.f32.mrf.mxu1 }
 0x201   : > { %v4140_v25 = vadd.f32 %v4095_v10, %v21806_v12  ;;  %v21935_v51 = vadd.f32 %v17976_v3, %v4141_v4  ;;  %25258 = vst [vmem:[#allocation80_spill] sm:$0xff] %v21943_v44  ;;  %v25259_v12 = vld [vmem:[#allocation86_spill] sm:$0xff]  ;;  %v6273_v3 = vrot.slane %v21541_v7, 4  ;;  %25260 = vst [vmem:[#allocation25_spill] sm:$0xff] %v21954_v18 }
 0x202   : > { %v17956_v17 = vpop.f32.mrf.mxu0  ;;  %18274 = vmatmul.mubr.msk.f32.gmra.mxu0 %vm659_vm1, %v25257_v36  ;;  %v17982_v4 = vpop.f32.mrf.mxu1  ;;  %18300 = vmatmul.mubr.msk.f32.gmra.mxu1 %vm659_vm1, %v21426_v39  ;;  %v21969_v39 = vsel %vm25003_vm6, %v6437_v53, %v21943_v44 }
 0x203   : > { %v4143_v32 = vadd.f32 %v17956_v17, %v21817_v16  ;;  %v21946_v37 = vadd.f32 %v4259_v5, %v4140_v25  ;;  %18276 = vmatprep.mubr.msk.f32.mxu0 %vm659_vm1, %v25259_v12  ;;  %v25261_v16 = vld [vmem:[#allocation43_spill] sm:$0xff]  ;;  %v25262_v5 = vld [vmem:[#allocation57_spill] sm:$0xff]  ;;  %25265 = vst [vmem:[#allocation30_spill] sm:$0xff] %v21969_v39 }
 0x204   : > { %v4105_v10 = vpop.f32.mrf.mxu0  ;;  %18302 = vmatprep.mubr.msk.f32.mxu1 %vm659_vm1, %v25261_v16  ;;  %v21963_v25 = vsel %vm25003_vm6, %v25262_v5, %v6437_v53  ;;  %v25264_v12 = vld [vmem:[#allocation41_spill] sm:$0xff]  ;;  %v4279_v31 = vpop.f32.mrf.mxu1  ;;  %v21984_v53 = vsel %vm25010_vm0, %v6273_v3, %v21954_v18 }
 0x205   : > { %v4142_v36 = vadd.f32 %v4105_v10, %v21832_v33  ;;  %v21957_v1 = vadd.f32 %v17979_v45, %v4143_v32  ;;  %25263 = vst [vmem:[#allocation26_spill] sm:$0xff] %v21963_v25  ;;  %v25266_v32 = vld [vmem:[#allocation22_spill] sm:$0xff]  ;;  %v25267_v10 = vld [vmem:[#allocation40_spill] sm:$0xff]  ;;  %25269 = vst [vmem:[#allocation88_spill] sm:$0xff] %v21984_v53 }
 0x206   : > { %v17959_v17 = vpop.f32.mrf.mxu0  ;;  %18277 = vmatmul.mubr.msk.f32.gmra.mxu0 %vm659_vm1, %v25264_v12  ;;  %v21978_v5 = vsel %vm25010_vm0, %v25267_v10, %v6273_v3  ;;  %v17985_v42 = vpop.f32.mrf.mxu1  ;;  %18303 = vmatmul.mubr.msk.f32.gmra.mxu1 %vm659_vm1, %v21963_v25  ;;  %v25282_v12 = vld [vmem:[#allocation39_spill] sm:$0xff] }
 0x207   : > { %v4145_v33 = vadd.f32 %v17959_v17, %v21847_v60  ;;  %v21972_v45 = vadd.f32 %v4269_v14, %v4142_v36  ;;  %18279 = vmatprep.mubr.msk.f32.mxu0 %vm659_vm1, %v25266_v32  ;;  %25268 = vst [vmem:[#allocation31_spill] sm:$0xff] %v21978_v5  ;;  %18305 = vmatprep.mubr.msk.f32.mxu1 %vm659_vm1, %v21969_v39 }
 0x208   : > { %v4115_v16 = vpop.f32.mrf.mxu0  ;;  %v4289_v17 = vpop.f32.mrf.mxu1 }
 0x209   : > { %v4144_v60 = vadd.f32 %v4115_v16, %v21854_v24  ;;  %v21987_v36 = vadd.f32 %v17982_v4, %v4145_v33  ;;  %v25270_v16 = vld [vmem:[#allocation60_spill] sm:$0xff] }
 0x20a   : > { %v17962_v14 = vpop.f32.mrf.mxu0  ;;  %18280 = vmatmul.mubr.msk.f32.gmra.mxu0 %vm659_vm1, %v21978_v5  ;;  %v18013_v25 = vpop.f32.mrf.mxu1  ;;  %18306 = vmatmul.mubr.msk.f32.gmra.mxu1 %vm659_vm1, %v21943_v44 }
 0x20b   : > { %v4147_v10 = vadd.f32 %v17962_v14, %v21861_v46  ;;  %v21994_v32 = vadd.f32 %v4279_v31, %v4144_v60  ;;  %18282 = vmatprep.mubr.msk.f32.mxu0 %vm659_vm1, %v21984_v53  ;;  %18333 = vmatprep.mubr.msk.f32.mxu1 %vm659_vm1, %v25270_v16  ;;  %v25271_v14 = vld [vmem:[#allocation59_spill] sm:$0xff]  ;;  %v25279_v53 = vld [vmem:[#allocation38_spill] sm:$0xff] }
 0x20c   : > { %v4125_v3 = vpop.f32.mrf.mxu0  ;;  %v4554_v31 = vpop.f32.mrf.mxu1 }
 0x20d   : > { %v4146_v24 = vadd.f32 %v4125_v3, %v21867_v41  ;;  %v22001_v4 = vadd.f32 %v17985_v42, %v4147_v10  ;;  %v22015_v41 = vld [vmem:[%s25031_s21 + $0x9c] sm:$0xf]  ;;  %v25272_v3 = vld [vmem:[#allocation61_spill] sm:$0xff] }
 0x20e   : > { %v17990_v33 = vpop.f32.mrf.mxu0  ;;  %18283 = vmatmul.mubr.msk.f32.gmra.mxu0 %vm659_vm1, %v21954_v18  ;;  %v18016_v10 = vpop.f32.mrf.mxu1  ;;  %18334 = vmatmul.mubr.msk.f32.vlgmr.msra.gmra.mxu1 %vm659_vm1, %v25272_v3 }
 0x20f   : > { %v22007_v46 = vadd.f32 %v4289_v17, %v4146_v24  ;;  %v4463_v60 = vadd.f32 %v17990_v33, %v21880_v26  ;;  %18310 = vmatprep.mubr.msk.f32.mxu0 %vm659_vm1, %v25271_v14  ;;  %v25273_v17 = vld [vmem:[#allocation62_spill] sm:$0xff]  ;;  %18378 = vmatpush3.msk.msra.mxu1 %vm25010_vm0, %v21875_v27  ;;  %v22029_v26 = vld [vmem:[%s25031_s21 + $0x98] sm:$0xf] }
 0x210   : > { %v4393_v42 = vpop.f32.mrf.mxu0  ;;  %18336 = vmatprep.mubr.msk.f32.mxu1 %vm659_vm1, %v25273_v17  ;;  %v4564_v33 = vpop.f32.mrf.mxu1  ;;  %18423 = vmatprep.subr.msk.mxu1 %vm25010_vm0, %v22015_v41  ;;  %v25274_v14 = vld [vmem:[#allocation63_spill] sm:$0xff] }
 0x211   : > { %v4462_v39 = vadd.f32 %v4393_v42, %v21896_v56  ;;  %v22020_v44 = vadd.f32 %v18013_v25, %v4463_v60 }
 0x212   : > { %v17993_v24 = vpop.f32.mrf.mxu0  ;;  %18311 = vmatmul.mubr.msk.f32.vlgmr.msra.gmra.mxu0 %vm659_vm1, %v25270_v16  ;;  %v18019_v60 = vpop.f32.mrf.mxu1  ;;  %18337 = vmatmul.mubr.msk.f32.gmra.mxu1 %vm659_vm1, %v25274_v14 }
 0x213   : > { %v4465_v56 = vadd.f32 %v17993_v24, %v21907_v11  ;;  %v22036_v25 = vadd.f32 %v4554_v31, %v4462_v39  ;;  %18355 = vmatpush3.msk.msra.mxu0 %vm25010_vm0, %v21889_v29  ;;  %18313 = vmatprep.mubr.msk.f32.mxu0 %vm659_vm1, %v25272_v3  ;;  %v25275_v39 = vld [vmem:[#allocation65_spill] sm:$0xff] }
 0x214   : > { %v4403_v27 = vpop.f32.mrf.mxu0  ;;  %18400 = vmatprep.subr.msk.mxu0 %vm25010_vm0, %v22029_v26  ;;  %18339 = vmatprep.mubr.msk.f32.mxu1 %vm659_vm1, %v25275_v39  ;;  %v4574_v29 = vpop.f32.mrf.mxu1 }
 0x215   : > { %v4464_v16 = vadd.f32 %v4403_v27, %v21914_v43  ;;  %v22047_v42 = vadd.f32 %v18016_v10, %v4465_v56  ;;  %v25276_v43 = vld [vmem:[#allocation66_spill] sm:$0xff]  ;;  %v25277_v27 = vld [vmem:[#allocation56_spill] sm:$0xff] }
 0x216   : > { %v17996_v11 = vpop.f32.mrf.mxu0  ;;  %18314 = vmatmul.mubr.msk.f32.gmra.mxu0 %vm659_vm1, %v25273_v17  ;;  %v18022_v18 = vpop.f32.mrf.mxu1  ;;  %18340 = vmatmul.mubr.msk.f32.gmra.mxu1 %vm659_vm1, %v25276_v43 }
 0x217   : > { %v4467_v31 = vadd.f32 %v17996_v11, %v21921_v50  ;;  %v22054_v3 = vadd.f32 %v4564_v33, %v4464_v16  ;;  %18316 = vmatprep.mubr.msk.f32.mxu0 %vm659_vm1, %v25274_v14  ;;  %18342 = vmatprep.mubr.msk.f32.mxu1 %vm659_vm1, %v25277_v27  ;;  %v6601_v33 = vrot.slane %v21541_v7, 6 }
 0x218   : > { %v4413_v24 = vpop.f32.mrf.mxu0  ;;  %v4584_v50 = vpop.f32.mrf.mxu1 }
 0x219   : > { %v4466_v10 = vadd.f32 %v4413_v24, %v21928_v30  ;;  %v22061_v56 = vadd.f32 %v18019_v60, %v4467_v31  ;;  %v22073_v30 = vld [vmem:[#allocation2 + $0xa8] sm:$0xff] }
 0x21a   : > { %v17999_v17 = vpop.f32.mrf.mxu0  ;;  %18317 = vmatmul.mubr.msk.f32.gmra.mxu0 %vm659_vm1, %v25275_v39  ;;  %v18025_v31 = vpop.f32.mrf.mxu1  ;;  %v25278_v24 = vld [vmem:[#allocation58_spill] sm:$0xff]  ;;  %v22090_v5 = vrot.slane %v22073_v30, 6 }
 0x21b   : > { %v4469_v16 = vadd.f32 %v17999_v17, %v21935_v51  ;;  %v22069_v11 = vadd.f32 %v4574_v29, %v4466_v10  ;;  %18319 = vmatprep.mubr.msk.f32.mxu0 %vm659_vm1, %v25276_v43  ;;  %18343 = vmatmul.mubr.msk.f32.gmra.mxu1 %vm659_vm1, %v25278_v24  ;;  %v6603_v51 = vrot.slane %v21657_v55, 6  ;;  %v25280_v10 = vld [vmem:[#allocation82_spill] sm:$0xff] }
 0x21c   : > { %v4423_v60 = vpop.f32.mrf.mxu0  ;;  %18345 = vmatprep.mubr.msk.f32.mxu1 %vm659_vm1, %v25279_v53  ;;  %v4594_v29 = vpop.f32.mrf.mxu1  ;;  %v22087_v43 = vsel %vm25012_vm5, %v25280_v10, %v6601_v33  ;;  %25281 = vst [vmem:[#allocation44_spill] sm:$0xff] %v22090_v5 }
 0x21d   : > { %v4468_v14 = vadd.f32 %v4423_v60, %v21946_v37  ;;  %v22078_v39 = vadd.f32 %v18022_v18, %v4469_v16  ;;  %v22105_v10 = vsel %vm25012_vm5, %v6601_v33, %v6603_v51 }
 0x21e   : > { %v18002_v17 = vpop.f32.mrf.mxu0  ;;  %18320 = vmatmul.mubr.msk.f32.gmra.mxu0 %vm659_vm1, %v25277_v27  ;;  %v18028_v60 = vpop.f32.mrf.mxu1  ;;  %25283 = vst [vmem:[#allocation45_spill] sm:$0xff] %v22105_v10 }
 0x21f   : > { %v4471_v37 = vadd.f32 %v18002_v17, %v21957_v1  ;;  %v22093_v18 = vadd.f32 %v4584_v50, %v4468_v14  ;;  %18322 = vmatprep.mubr.msk.f32.mxu0 %vm659_vm1, %v25278_v24  ;;  %18346 = vmatmul.mubr.msk.f32.gmra.mxu1 %vm659_vm1, %v25282_v12  ;;  %v22111_v50 = vsel %vm25012_vm5, %v6603_v51, %v22090_v5 }
 0x220   : > { %v4433_v16 = vpop.f32.mrf.mxu0  ;;  %18348 = vmatprep.mubr.msk.f32.mxu1 %vm659_vm1, %v22087_v43  ;;  %v4604_v14 = vpop.f32.mrf.mxu1  ;;  %25284 = vst [vmem:[#allocation49_spill] sm:$0xff] %v22111_v50 }
 0x221   : > { %v4470_v27 = vadd.f32 %v4433_v16, %v21972_v45  ;;  %v22100_v34 = vadd.f32 %v18025_v31, %v4471_v37 }
 0x222   : > { %v18005_v1 = vpop.f32.mrf.mxu0  ;;  %18323 = vmatmul.mubr.msk.f32.gmra.mxu0 %vm659_vm1, %v25279_v53  ;;  %v18031_v37 = vpop.f32.mrf.mxu1 }
 0x223   : > { %v4473_v17 = vadd.f32 %v18005_v1, %v21987_v36  ;;  %v22114_v45 = vadd.f32 %v4594_v29, %v4470_v27  ;;  %18325 = vmatprep.mubr.msk.f32.mxu0 %vm659_vm1, %v25282_v12  ;;  %18349 = vmatmul.mubr.msk.f32.gmra.mxu1 %vm659_vm1, %v22105_v10 }
 0x224   : > { %v4443_v31 = vpop.f32.mrf.mxu0  ;;  %18351 = vmatprep.mubr.msk.f32.mxu1 %vm659_vm1, %v22111_v50  ;;  %v4614_v36 = vpop.f32.mrf.mxu1  ;;  %v25294_v50 = vld [vmem:[#allocation75_spill] sm:$0xff] }
 0x225   : > { %v4472_v33 = vadd.f32 %v4443_v31, %v21994_v32  ;;  %v22121_v16 = vadd.f32 %v18028_v60, %v4473_v17  ;;  %v19339_v17 = vld [vmem:[#allocation2 + $0x48] sm:$0xff] }
 0x226   : > { %v18008_v53 = vpop.f32.mrf.mxu0  ;;  %18326 = vmatmul.mubr.msk.f32.gmra.mxu0 %vm659_vm1, %v22087_v43  ;;  %v18059_v12 = vpop.f32.mrf.mxu1 }
 0x227   : > { %v4475_v27 = vadd.f32 %v18008_v53, %v22001_v4  ;;  %v22128_v29 = vadd.f32 %v4604_v14, %v4472_v33  ;;  %18328 = vmatprep.mubr.msk.f32.mxu0 %vm659_vm1, %v22105_v10  ;;  %18352 = vmatmul.mubr.msk.f32.gmra.mxu1 %vm659_vm1, %v22090_v5  ;;  %v25285_v33 = vld [vmem:[#allocation70_spill] sm:$0xff] }
 0x228   : > { %v4453_v1 = vpop.f32.mrf.mxu0  ;;  %18379 = vmatprep.mubr.msk.f32.mxu1 %vm659_vm1, %v19339_v17  ;;  %v4886_v53 = vpop.f32.mrf.mxu1  ;;  %v25287_v17 = vmov 0.0   ;;  %v25293_v5 = vld [vmem:[#allocation74_spill] sm:$0xff] }
 0x229   : > { %v4474_v32 = vadd.f32 %v4453_v1, %v22007_v46  ;;  %v22135_v60 = vadd.f32 %v18031_v37, %v4475_v27  ;;  %v22147_v46 = vld [vmem:[%s25031_s21 + $0xa4] sm:$0xf]  ;;  %v19340_v1 = vld [vmem:[#allocation2 + $0x50] sm:$0xff]  ;;  %685 = vst.msk [vmem:[#allocation2 + $0xc0] sm:$0xf] %vm684_vm8, %v25287_v17 }
 0x22a   : > { %v18036_v31 = vpop.f32.mrf.mxu0  ;;  %18329 = vmatmul.mubr.msk.f32.gmra.mxu0 %vm659_vm1, %v6603_v51  ;;  %v18062_v27 = vpop.f32.mrf.mxu1  ;;  %v22176_v17 = vld [vmem:[#allocation2 + $0x60] sm:$0xff] }
 0x22b   : > { %v22139_v4 = vadd.f32 %v4614_v36, %v4474_v32  ;;  %v4792_v14 = vadd.f32 %v18036_v31, %v22020_v44  ;;  %18356 = vmatprep.mubr.msk.f32.mxu0 %vm659_vm1, %v25285_v33  ;;  %18380 = vmatmul.mubr.msk.f32.vlgmr.msra.gmra.mxu1 %vm659_vm1, %v19340_v1  ;;  %v22153_v32 = vld [vmem:[#allocation2 + $0x58] sm:$0xff]  ;;  %v22162_v44 = vld [vmem:[%s25031_s21 + $0xa0] sm:$0xf]  ;;  %25290 = vst [vmem:[#allocation40_spill] sm:$0xff] %v22176_v17 }
 0x22c   : > { %v4722_v37 = vpop.f32.mrf.mxu0  ;;  %25286 = vst [vmem:[#allocation57_spill] sm:$0xff] %v22153_v32  ;;  %18382 = vmatprep.mubr.msk.f32.mxu1 %vm659_vm1, %v22153_v32  ;;  %18424 = vmatpush3.msk.msra.mxu1 %vm25010_vm0, %v22015_v41  ;;  %v25288_v33 = vld [vmem:[#allocation71_spill] sm:$0xff]  ;;  %v25289_v41 = vld [vmem:[#allocation72_spill] sm:$0xff] }
 0x22d   : > { %v4791_v51 = vadd.f32 %v4722_v37, %v22036_v25  ;;  %v22151_v36 = vadd.f32 %v18059_v12, %v4792_v14  ;;  %v4896_v12 = vpop.f32.mrf.mxu1  ;;  %18469 = vmatprep.subr.msk.mxu1 %vm25010_vm0, %v22147_v46 }
 0x22e   : > { %v18039_v31 = vpop.f32.mrf.mxu0  ;;  %18357 = vmatmul.mubr.msk.f32.vlgmr.msra.gmra.mxu0 %vm659_vm1, %v25288_v33 }
 0x22f   : > { %v4794_v25 = vadd.f32 %v18039_v31, %v22047_v42  ;;  %v22170_v14 = vadd.f32 %v4886_v53, %v4791_v51  ;;  %18401 = vmatpush3.msk.msra.mxu0 %vm25010_vm0, %v22029_v26  ;;  %18359 = vmatprep.mubr.msk.f32.mxu0 %vm659_vm1, %v25289_v41  ;;  %v18065_v1 = vpop.f32.mrf.mxu1  ;;  %v22185_v51 = vld [vmem:[#allocation2 + $0x68] sm:$0xff] }
 0x230   : > { %v4732_v37 = vpop.f32.mrf.mxu0  ;;  %18383 = vmatmul.mubr.msk.f32.gmra.mxu1 %vm659_vm1, %v22176_v17  ;;  %18446 = vmatprep.subr.msk.mxu0 %vm25010_vm0, %v22162_v44  ;;  %25291 = vst [vmem:[#allocation60_spill] sm:$0xff] %v22185_v51  ;;  %v25292_v31 = vld [vmem:[#allocation73_spill] sm:$0xff] }
 0x231   : > { %v4793_v42 = vadd.f32 %v4732_v37, %v22054_v3  ;;  %v22183_v53 = vadd.f32 %v18062_v27, %v4794_v25  ;;  %18385 = vmatprep.mubr.msk.f32.mxu1 %vm659_vm1, %v22185_v51  ;;  %v4906_v33 = vpop.f32.mrf.mxu1 }
 0x232   : > { %v18042_v26 = vpop.f32.mrf.mxu0  ;;  %18360 = vmatmul.mubr.msk.f32.gmra.mxu0 %vm659_vm1, %v25292_v31 }
 0x233   : > { %v4796_v32 = vadd.f32 %v18042_v26, %v22061_v56  ;;  %v22192_v17 = vadd.f32 %v4896_v12, %v4793_v42  ;;  %18362 = vmatprep.mubr.msk.f32.mxu0 %vm659_vm1, %v25293_v5  ;;  %v18068_v27 = vpop.f32.mrf.mxu1  ;;  %v25295_v26 = vld [vmem:[#allocation76_spill] sm:$0xff] }
 0x234   : > { %v4742_v3 = vpop.f32.mrf.mxu0  ;;  %18386 = vmatmul.mubr.msk.f32.gmra.mxu1 %vm659_vm1, %v21525_v38 }
 0x235   : > { %v4795_v25 = vadd.f32 %v4742_v3, %v22069_v11  ;;  %v22199_v37 = vadd.f32 %v18065_v1, %v4796_v32  ;;  %18388 = vmatprep.mubr.msk.f32.mxu1 %vm659_vm1, %v21536_v2  ;;  %v4916_v56 = vpop.f32.mrf.mxu1  ;;  %v22225_v3 = vld [vmem:[#allocation2 + $0x90] sm:$0xff] }
 0x236   : > { %v18045_v51 = vpop.f32.mrf.mxu0  ;;  %18363 = vmatmul.mubr.msk.f32.gmra.mxu0 %vm659_vm1, %v25294_v50  ;;  %25296 = vst [vmem:[#allocation59_spill] sm:$0xff] %v22225_v3 }
 0x237   : > { %v4798_v12 = vadd.f32 %v18045_v51, %v22078_v39  ;;  %v22206_v42 = vadd.f32 %v4906_v33, %v4795_v25  ;;  %18365 = vmatprep.mubr.msk.f32.mxu0 %vm659_vm1, %v25295_v26  ;;  %v18071_v10 = vpop.f32.mrf.mxu1 }
 0x238   : > { %v4752_v38 = vpop.f32.mrf.mxu0  ;;  %18389 = vmatmul.mubr.msk.f32.gmra.mxu1 %vm659_vm1, %v21546_v19  ;;  %v6927_v19 = vrot.slane %v21657_v55, 7 }
 0x239   : > { %v4797_v11 = vadd.f32 %v4752_v38, %v22093_v18  ;;  %v22213_v2 = vadd.f32 %v18068_v27, %v4798_v12  ;;  %18391 = vmatprep.mubr.msk.f32.mxu1 %vm659_vm1, %v21700_v28  ;;  %v4926_v39 = vpop.f32.mrf.mxu1  ;;  %v6929_v28 = vrot.slane %v22073_v30, 7  ;;  %v22230_v27 = vld [vmem:[#allocation2 + $0xb0] sm:$0xff] }
 0x23a   : > { %v18048_v32 = vpop.f32.mrf.mxu0  ;;  %18366 = vmatmul.mubr.msk.f32.gmra.mxu0 %vm659_vm1, %v20853_v13 }
 0x23b   : > { %v4800_v1 = vadd.f32 %v18048_v32, %v22100_v34  ;;  %v22220_v51 = vadd.f32 %v4916_v56, %v4797_v11  ;;  %18368 = vmatprep.mubr.msk.f32.mxu0 %vm659_vm1, %v20878_v58  ;;  %v18074_v33 = vpop.f32.mrf.mxu1  ;;  %v25297_v32 = vrot.slane %v21541_v7, 7 }
 0x23c   : > { %v4762_v18 = vpop.f32.mrf.mxu0  ;;  %18392 = vmatmul.mubr.msk.f32.gmra.mxu1 %vm659_vm1, %v22225_v3  ;;  %v22253_v3 = vsel %vm25004_vm7, %v6927_v19, %v6929_v28 }
 0x23d   : > { %v4799_v34 = vadd.f32 %v4762_v18, %v22114_v45  ;;  %v22233_v25 = vadd.f32 %v18071_v10, %v4800_v1  ;;  %18394 = vmatprep.mubr.msk.f32.mxu1 %vm659_vm1, %v21541_v7  ;;  %v4936_v12 = vpop.f32.mrf.mxu1  ;;  %v22247_v10 = vsel %vm25004_vm7, %v25297_v32, %v6927_v19  ;;  %v24983_v45 = vrot.slane %v22230_v27, 7 }
 0x23e   : > { %v18051_v56 = vpop.f32.mrf.mxu0  ;;  %18369 = vmatmul.mubr.msk.f32.gmra.mxu0 %vm659_vm1, %v21563_v61 }
 0x23f   : > { %v4802_v38 = vadd.f32 %v18051_v56, %v22121_v16  ;;  %v22240_v11 = vadd.f32 %v4926_v39, %v4799_v34  ;;  %18371 = vmatprep.mubr.msk.f32.mxu0 %vm659_vm1, %v21580_v0  ;;  %v18077_v18 = vpop.f32.mrf.mxu1 }
 0x240   : > { %v4772_v1 = vpop.f32.mrf.mxu0  ;;  %18395 = vmatmul.mubr.msk.f32.gmra.mxu1 %vm659_vm1, %v21657_v55  ;;  %v22270_v55 = vsel %vm25004_vm7, %v6929_v28, %v24983_v45 }
 0x241   : > { %v4801_v16 = vadd.f32 %v4772_v1, %v22128_v29  ;;  %v22256_v39 = vadd.f32 %v18074_v33, %v4802_v38  ;;  %18397 = vmatprep.mubr.msk.f32.mxu1 %vm659_vm1, %v22073_v30  ;;  %v4946_v34 = vpop.f32.mrf.mxu1 }
 0x242   : > { %v18054_v7 = vpop.f32.mrf.mxu0  ;;  %18372 = vmatmul.mubr.msk.f32.gmra.mxu0 %vm659_vm1, %v22247_v10 }
 0x243   : > { %v4804_v56 = vadd.f32 %v18054_v7, %v22135_v60  ;;  %v22263_v32 = vadd.f32 %v4936_v12, %v4801_v16  ;;  %18374 = vmatprep.mubr.msk.f32.mxu0 %vm659_vm1, %v22253_v3  ;;  %v18105_v19 = vpop.f32.mrf.mxu1 }
 0x244   : > { %v4782_v29 = vpop.f32.mrf.mxu0  ;;  %18398 = vmatmul.mubr.msk.f32.gmra.mxu1 %vm659_vm1, %v22230_v27 }
 0x245   : > { %v4803_v33 = vadd.f32 %v4782_v29, %v22139_v4  ;;  %v22275_v38 = vadd.f32 %v18077_v18, %v4804_v56  ;;  %18425 = vmatprep.mubr.msk.f32.mxu1 %vm659_vm1, %v25228_v57  ;;  %v5214_v12 = vpop.f32.mrf.mxu1  ;;  %v22289_v4 = vld [vmem:[%s25031_s21 + $0xac] sm:$0xf] }
 0x246   : > { %v18082_v60 = vpop.f32.mrf.mxu0  ;;  %18375 = vmatmul.mubr.msk.f32.gmra.mxu0 %vm659_vm1, %v22270_v55 }
 0x247   : > { %v22281_v1 = vadd.f32 %v4946_v34, %v4803_v33  ;;  %v5120_v28 = vadd.f32 %v18082_v60, %v22151_v36  ;;  %18402 = vmatprep.mubr.msk.f32.mxu0 %vm659_vm1, %v25216_v40  ;;  %v18108_v16 = vpop.f32.mrf.mxu1  ;;  %v22303_v40 = vld [vmem:[%s25031_s21 + $0xa8] sm:$0xf] }
 0x248   : > { %v5050_v18 = vpop.f32.mrf.mxu0  ;;  %18426 = vmatmul.mubr.msk.f32.vlgmr.msra.gmra.mxu1 %vm659_vm1, %v25230_v49 }
 0x249   : > { %v5119_v57 = vadd.f32 %v5050_v18, %v22170_v14  ;;  %v22294_v7 = vadd.f32 %v18105_v19, %v5120_v28  ;;  %18428 = vmatprep.mubr.msk.f32.mxu1 %vm659_vm1, %v25231_v15  ;;  %18470 = vmatpush3.msk.msra.mxu1 %vm25010_vm0, %v22147_v46  ;;  %v5224_v49 = vpop.f32.mrf.mxu1 }
 0x24a   : > { %v18085_v36 = vpop.f32.mrf.mxu0  ;;  %18403 = vmatmul.mubr.msk.f32.vlgmr.msra.gmra.mxu0 %vm659_vm1, %v25217_v20  ;;  %18515 = vmatprep.subr.msk.mxu1 %vm25010_vm0, %v22289_v4 }
 0x24b   : > { %v5122_v14 = vadd.f32 %v18085_v36, %v22183_v53  ;;  %v22310_v34 = vadd.f32 %v5214_v12, %v5119_v57  ;;  %18447 = vmatpush3.msk.msra.mxu0 %vm25010_vm0, %v22162_v44  ;;  %18405 = vmatprep.mubr.msk.f32.mxu0 %vm659_vm1, %v25218_v23  ;;  %v18111_v56 = vpop.f32.mrf.mxu1 }
 0x24c   : > { %v5060_v46 = vpop.f32.mrf.mxu0  ;;  %18429 = vmatmul.mubr.msk.f32.gmra.mxu1 %vm659_vm1, %v25234_v48  ;;  %18492 = vmatprep.subr.msk.mxu0 %vm25010_vm0, %v22303_v40  ;;  %v25321_v48 = vld [vmem:[#allocation84_spill] sm:$0xff] }
 0x24d   : > { %v5121_v20 = vadd.f32 %v5060_v46, %v22192_v17  ;;  %v22321_v29 = vadd.f32 %v18108_v16, %v5122_v14  ;;  %18431 = vmatprep.mubr.msk.f32.mxu1 %vm659_vm1, %v25235_v8  ;;  %v5234_v44 = vpop.f32.mrf.mxu1  ;;  %v25298_v46 = vld [vmem:[#allocation90_spill] sm:$0xff] }
 0x24e   : > { %v18088_v53 = vpop.f32.mrf.mxu0  ;;  %18406 = vmatmul.mubr.msk.f32.gmra.mxu0 %vm659_vm1, %v25219_v62 }
 0x24f   : > { %v5124_v19 = vadd.f32 %v18088_v53, %v22199_v37  ;;  %v22328_v33 = vadd.f32 %v5224_v49, %v5121_v20  ;;  %18408 = vmatprep.mubr.msk.f32.mxu0 %vm659_vm1, %v25220_v6  ;;  %v18114_v12 = vpop.f32.mrf.mxu1  ;;  %v25299_v20 = vld [vmem:[#allocation87_spill] sm:$0xff] }
 0x250   : > { %v5070_v60 = vpop.f32.mrf.mxu0  ;;  %18432 = vmatmul.mubr.msk.f32.gmra.mxu1 %vm659_vm1, %v25236_v52 }
 0x251   : > { %v5123_v17 = vadd.f32 %v5070_v60, %v22206_v42  ;;  %v22335_v28 = vadd.f32 %v18111_v56, %v5124_v19  ;;  %18434 = vmatprep.mubr.msk.f32.mxu1 %vm659_vm1, %v25238_v9  ;;  %v5244_v37 = vpop.f32.mrf.mxu1  ;;  %v7415_v56 = vrot.slane %v22073_v30, 2  ;;  %v25318_v9 = vld [vmem:[#allocation29_spill] sm:$0xff] }
 0x252   : > { %v18091_v18 = vpop.f32.mrf.mxu0  ;;  %18409 = vmatmul.mubr.msk.f32.gmra.mxu0 %vm659_vm1, %v25221_v35 }
 0x253   : > { %v5126_v16 = vadd.f32 %v18091_v18, %v22213_v2  ;;  %v22342_v57 = vadd.f32 %v5234_v44, %v5123_v17  ;;  %18411 = vmatprep.mubr.msk.f32.mxu0 %vm659_vm1, %v21000_v21  ;;  %v18117_v49 = vpop.f32.mrf.mxu1  ;;  %v22357_v44 = vrot.slane %v22230_v27, 2 }
 0x254   : > { %v5080_v36 = vpop.f32.mrf.mxu0  ;;  %18435 = vmatmul.mubr.msk.f32.gmra.mxu1 %vm659_vm1, %v25240_v59 }
 0x255   : > { %v5125_v42 = vadd.f32 %v5080_v36, %v22220_v51  ;;  %v22349_v14 = vadd.f32 %v18114_v12, %v5126_v16  ;;  %18437 = vmatprep.mubr.msk.f32.mxu1 %vm659_vm1, %v25298_v46  ;;  %v5254_v53 = vpop.f32.mrf.mxu1  ;;  %25300 = vst [vmem:[#allocation61_spill] sm:$0xff] %v22357_v44  ;;  %v25301_v51 = vld [vmem:[#allocation46_spill] sm:$0xff]  ;;  %v7251_v12 = vrot.slane %v22073_v30, 1  ;;  %v22368_v16 = vrot.slane %v22230_v27, 1 }
 0x256   : > { %v18094_v2 = vpop.f32.mrf.mxu0  ;;  %18412 = vmatmul.mubr.msk.f32.gmra.mxu0 %vm659_vm1, %v25299_v20 }
 0x257   : > { %v5128_v19 = vadd.f32 %v18094_v2, %v22233_v25  ;;  %v22360_v60 = vadd.f32 %v5244_v37, %v5125_v42  ;;  %18414 = vmatprep.mubr.msk.f32.mxu0 %vm659_vm1, %v25301_v51  ;;  %v18120_v18 = vpop.f32.mrf.mxu1  ;;  %25302 = vst [vmem:[#allocation58_spill] sm:$0xff] %v22368_v16  ;;  %v22377_v25 = vsel %vm1099_vm4, %v21814_v47, %v7415_v56  ;;  %v25304_v42 = vld [vmem:[#allocation67_spill] sm:$0xff] }
 0x258   : > { %v5090_v17 = vpop.f32.mrf.mxu0  ;;  %18438 = vmatmul.mubr.msk.f32.gmra.mxu1 %vm659_vm1, %v21838_v63  ;;  %25303 = vst [vmem:[#allocation82_spill] sm:$0xff] %v22377_v25  ;;  %v22383_v63 = vsel %vm1099_vm4, %v7415_v56, %v22357_v44  ;;  %v22398_v56 = vsel %vm736_vm2, %v7251_v12, %v22368_v16 }
 0x259   : > { %v5127_v36 = vadd.f32 %v5090_v17, %v22240_v11  ;;  %v22371_v45 = vadd.f32 %v18117_v49, %v5128_v19  ;;  %18440 = vmatprep.mubr.msk.f32.mxu1 %vm659_vm1, %v21844_v22  ;;  %v5264_v2 = vpop.f32.mrf.mxu1  ;;  %25305 = vst [vmem:[#allocation70_spill] sm:$0xff] %v22383_v63  ;;  %v25306_v19 = vld [vmem:[#allocation68_spill] sm:$0xff]  ;;  %v25307_v17 = vld [vmem:[#allocation37_spill] sm:$0xff]  ;;  %25309 = vst [vmem:[#allocation72_spill] sm:$0xff] %v22398_v56 }
 0x25a   : > { %v18097_v37 = vpop.f32.mrf.mxu0  ;;  %18415 = vmatmul.mubr.msk.f32.gmra.mxu0 %vm659_vm1, %v25304_v42  ;;  %v22392_v47 = vsel %vm736_vm2, %v25307_v17, %v7251_v12  ;;  %v25328_v42 = vld [vmem:[#allocation88_spill] sm:$0xff] }
 0x25b   : > { %v5130_v11 = vadd.f32 %v18097_v37, %v22256_v39  ;;  %v22386_v49 = vadd.f32 %v5254_v53, %v5127_v36  ;;  %18417 = vmatprep.mubr.msk.f32.mxu0 %vm659_vm1, %v25306_v19  ;;  %25308 = vst [vmem:[#allocation71_spill] sm:$0xff] %v22392_v47  ;;  %v18123_v46 = vpop.f32.mrf.mxu1 }
 0x25c   : > { %v5100_v22 = vpop.f32.mrf.mxu0  ;;  %18441 = vmatmul.mubr.msk.f32.gmra.mxu1 %vm659_vm1, %v22377_v25 }
 0x25d   : > { %v5129_v39 = vadd.f32 %v5100_v22, %v22263_v32  ;;  %v22401_v53 = vadd.f32 %v18120_v18, %v5130_v11  ;;  %18443 = vmatprep.mubr.msk.f32.mxu1 %vm659_vm1, %v22383_v63  ;;  %v5274_v37 = vpop.f32.mrf.mxu1 }
 0x25e   : > { %v18100_v36 = vpop.f32.mrf.mxu0  ;;  %18418 = vmatmul.mubr.msk.f32.gmra.mxu0 %vm659_vm1, %v22392_v47 }
 0x25f   : > { %v5132_v17 = vadd.f32 %v18100_v36, %v22275_v38  ;;  %v22408_v59 = vadd.f32 %v5264_v2, %v5129_v39  ;;  %18420 = vmatprep.mubr.msk.f32.mxu0 %vm659_vm1, %v22398_v56  ;;  %v18151_v25 = vpop.f32.mrf.mxu1  ;;  %v25310_v39 = vld [vmem:[#allocation27_spill] sm:$0xff] }
 0x260   : > { %v5110_v12 = vpop.f32.mrf.mxu0  ;;  %18444 = vmatmul.mubr.msk.f32.gmra.mxu1 %vm659_vm1, %v22357_v44  ;;  %v25315_v44 = vld [vmem:[#allocation55_spill] sm:$0xff] }
 0x261   : > { %v5131_v22 = vadd.f32 %v5110_v12, %v22281_v1  ;;  %v22415_v32 = vadd.f32 %v18123_v46, %v5132_v17  ;;  %18471 = vmatprep.mubr.msk.f32.mxu1 %vm659_vm1, %v25248_v54  ;;  %v5535_v38 = vpop.f32.mrf.mxu1  ;;  %v22429_v1 = vld [vmem:[%s25031_s21 + $0xb4] sm:$0xf]  ;;  %v25311_v54 = vld [vmem:[#allocation50_spill] sm:$0xff] }
 0x262   : > { %v18128_v18 = vpop.f32.mrf.mxu0  ;;  %18421 = vmatmul.mubr.msk.f32.gmra.mxu0 %vm659_vm1, %v22368_v16  ;;  %v25327_v56 = vld [vmem:[#allocation31_spill] sm:$0xff] }
 0x263   : > { %v22421_v2 = vadd.f32 %v5274_v37, %v5131_v22  ;;  %v5447_v11 = vadd.f32 %v18128_v18, %v22294_v7  ;;  %18448 = vmatprep.mubr.msk.f32.mxu0 %vm659_vm1, %v25310_v39  ;;  %v18154_v36 = vpop.f32.mrf.mxu1  ;;  %v25312_v37 = vld [vmem:[#allocation54_spill] sm:$0xff]  ;;  %v25313_v18 = vld [vmem:[#allocation28_spill] sm:$0xff] }
 0x264   : > { %v5377_v46 = vpop.f32.mrf.mxu0  ;;  %18472 = vmatmul.mubr.msk.f32.vlgmr.msra.gmra.mxu1 %vm659_vm1, %v25311_v54  ;;  %v22443_v7 = vld [vmem:[%s25031_s21 + $0xb0] sm:$0xf] }
 0x265   : > { %v5446_v17 = vadd.f32 %v5377_v46, %v22310_v34  ;;  %v22434_v12 = vadd.f32 %v18151_v25, %v5447_v11  ;;  %18474 = vmatprep.mubr.msk.f32.mxu1 %vm659_vm1, %v25312_v37  ;;  %18516 = vmatpush3.msk.msra.mxu1 %vm25010_vm0, %v22289_v4  ;;  %v5545_v39 = vpop.f32.mrf.mxu1  ;;  %v25314_v4 = vld [vmem:[#allocation32_spill] sm:$0xff] }
 0x266   : > { %v18131_v22 = vpop.f32.mrf.mxu0  ;;  %18449 = vmatmul.mubr.msk.f32.vlgmr.msra.gmra.mxu0 %vm659_vm1, %v25313_v18  ;;  %18561 = vmatprep.subr.msk.mxu1 %vm25010_vm0, %v22429_v1 }
 0x267   : > { %v5449_v34 = vadd.f32 %v18131_v22, %v22321_v29  ;;  %v22450_v25 = vadd.f32 %v5535_v38, %v5446_v17  ;;  %18493 = vmatpush3.msk.msra.mxu0 %vm25010_vm0, %v22303_v40  ;;  %18451 = vmatprep.mubr.msk.f32.mxu0 %vm659_vm1, %v25314_v4  ;;  %v18157_v46 = vpop.f32.mrf.mxu1  ;;  %v25316_v29 = vld [vmem:[#allocation51_spill] sm:$0xff]  ;;  %v25317_v40 = vld [vmem:[#allocation33_spill] sm:$0xff] }
 0x268   : > { %v5387_v11 = vpop.f32.mrf.mxu0  ;;  %18475 = vmatmul.mubr.msk.f32.gmra.mxu1 %vm659_vm1, %v25315_v44  ;;  %18538 = vmatprep.subr.msk.mxu0 %vm25010_vm0, %v22443_v7 }
 0x269   : > { %v5448_v18 = vadd.f32 %v5387_v11, %v22328_v33  ;;  %v22461_v63 = vadd.f32 %v18154_v36, %v5449_v34  ;;  %18477 = vmatprep.mubr.msk.f32.mxu1 %vm659_vm1, %v25316_v29  ;;  %v5555_v17 = vpop.f32.mrf.mxu1  ;;  %v25319_v33 = vld [vmem:[#allocation83_spill] sm:$0xff]  ;;  %v25320_v11 = vld [vmem:[#allocation86_spill] sm:$0xff] }
 0x26a   : > { %v18134_v38 = vpop.f32.mrf.mxu0  ;;  %18452 = vmatmul.mubr.msk.f32.gmra.mxu0 %vm659_vm1, %v25317_v40 }
 0x26b   : > { %v5451_v22 = vadd.f32 %v18134_v38, %v22335_v28  ;;  %v22468_v4 = vadd.f32 %v5545_v39, %v5448_v18  ;;  %18454 = vmatprep.mubr.msk.f32.mxu0 %vm659_vm1, %v25318_v9  ;;  %v18160_v8 = vpop.f32.mrf.mxu1  ;;  %v25322_v18 = vld [vmem:[#allocation21_spill] sm:$0xff] }
 0x26c   : > { %v5397_v52 = vpop.f32.mrf.mxu0  ;;  %18478 = vmatmul.mubr.msk.f32.gmra.mxu1 %vm659_vm1, %v25319_v33 }
 0x26d   : > { %v5450_v36 = vadd.f32 %v5397_v52, %v22342_v57  ;;  %v22475_v34 = vadd.f32 %v18157_v46, %v5451_v22  ;;  %18480 = vmatprep.mubr.msk.f32.mxu1 %vm659_vm1, %v25320_v11  ;;  %v5565_v28 = vpop.f32.mrf.mxu1  ;;  %v25323_v52 = vld [vmem:[#allocation41_spill] sm:$0xff]  ;;  %v25324_v22 = vld [vmem:[#allocation22_spill] sm:$0xff] }
 0x26e   : > { %v18137_v40 = vpop.f32.mrf.mxu0  ;;  %18455 = vmatmul.mubr.msk.f32.gmra.mxu0 %vm659_vm1, %v25321_v48  ;;  %v7743_v48 = vrot.slane %v22073_v30, 4 }
 0x26f   : > { %v5453_v39 = vadd.f32 %v18137_v40, %v22349_v14  ;;  %v22482_v9 = vadd.f32 %v5555_v17, %v5450_v36  ;;  %18457 = vmatprep.mubr.msk.f32.mxu0 %vm659_vm1, %v25322_v18  ;;  %v18163_v15 = vpop.f32.mrf.mxu1  ;;  %v25325_v17 = vld [vmem:[#allocation23_spill] sm:$0xff]  ;;  %v22497_v40 = vrot.slane %v22230_v27, 4 }
 0x270   : > { %v5407_v38 = vpop.f32.mrf.mxu0  ;;  %18481 = vmatmul.mubr.msk.f32.gmra.mxu1 %vm659_vm1, %v25323_v52 }
 0x271   : > { %v5452_v57 = vadd.f32 %v5407_v38, %v22360_v60  ;;  %v22489_v46 = vadd.f32 %v18160_v8, %v5453_v39  ;;  %18483 = vmatprep.mubr.msk.f32.mxu1 %vm659_vm1, %v25324_v22  ;;  %v5575_v36 = vpop.f32.mrf.mxu1  ;;  %v25326_v60 = vld [vmem:[#allocation24_spill] sm:$0xff]  ;;  %v7579_v8 = vrot.slane %v22073_v30, 3  ;;  %v22521_v51 = vsel %vm25010_vm0, %v7743_v48, %v22497_v40 }
 0x272   : > { %v18140_v14 = vpop.f32.mrf.mxu0  ;;  %18458 = vmatmul.mubr.msk.f32.gmra.mxu0 %vm659_vm1, %v25325_v17  ;;  %v7581_v17 = vrot.slane %v22230_v27, 3 }
 0x273   : > { %v5455_v18 = vadd.f32 %v18140_v14, %v22371_v45  ;;  %v22500_v16 = vadd.f32 %v5565_v28, %v5452_v57  ;;  %18460 = vmatprep.mubr.msk.f32.mxu0 %vm659_vm1, %v25326_v60  ;;  %v18166_v38 = vpop.f32.mrf.mxu1  ;;  %v25329_v45 = vld [vmem:[#allocation25_spill] sm:$0xff] }
 0x274   : > { %v5417_v39 = vpop.f32.mrf.mxu0  ;;  %18484 = vmatmul.mubr.msk.f32.gmra.mxu1 %vm659_vm1, %v25327_v56  ;;  %v22515_v28 = vsel %vm25010_vm0, %v25329_v45, %v7743_v48  ;;  %v25330_v14 = vld [vmem:[#allocation17_spill] sm:$0xff] }
 0x275   : > { %v5454_v47 = vadd.f32 %v5417_v39, %v22386_v49  ;;  %v22509_v19 = vadd.f32 %v18163_v15, %v5455_v18  ;;  %18486 = vmatprep.mubr.msk.f32.mxu1 %vm659_vm1, %v25328_v42  ;;  %v5585_v60 = vpop.f32.mrf.mxu1  ;;  %v25331_v18 = vld [vmem:[#allocation18_spill] sm:$0xff]  ;;  %v25332_v39 = vld [vmem:[#allocation69_spill] sm:$0xff] }
 0x276   : > { %v18143_v57 = vpop.f32.mrf.mxu0  ;;  %18461 = vmatmul.mubr.msk.f32.gmra.mxu0 %vm659_vm1, %v25330_v14  ;;  %v7580_v45 = vsel %vm25009_vm3, %v25332_v39, %v7579_v8  ;;  %v7582_v14 = vsel %vm25009_vm3, %v7579_v8, %v7581_v17  ;;  %v25333_v8 = vld [vmem:[#allocation47_spill] sm:$0xff] }
 0x277   : > { %v5457_v49 = vadd.f32 %v18143_v57, %v22401_v53  ;;  %v22524_v15 = vadd.f32 %v5575_v36, %v5454_v47  ;;  %18463 = vmatprep.mubr.msk.f32.mxu0 %vm659_vm1, %v25331_v18  ;;  %v18169_v21 = vpop.f32.mrf.mxu1 }
 0x278   : > { %v5427_v20 = vpop.f32.mrf.mxu0  ;;  %18487 = vmatmul.mubr.msk.f32.gmra.mxu1 %vm659_vm1, %v22515_v28 }
 0x279   : > { %v5456_v48 = vadd.f32 %v5427_v20, %v22408_v59  ;;  %v22534_v35 = vadd.f32 %v18166_v38, %v5457_v49  ;;  %18489 = vmatprep.mubr.msk.f32.mxu1 %vm659_vm1, %v22521_v51  ;;  %v5595_v53 = vpop.f32.mrf.mxu1 }
 0x27a   : > { %v18146_v47 = vpop.f32.mrf.mxu0  ;;  %18464 = vmatmul.mubr.msk.f32.gmra.mxu0 %vm659_vm1, %v7580_v45 }
 0x27b   : > { %v5459_v36 = vadd.f32 %v18146_v47, %v22415_v32  ;;  %v22540_v57 = vadd.f32 %v5585_v60, %v5456_v48  ;;  %18466 = vmatprep.mubr.msk.f32.mxu0 %vm659_vm1, %v7582_v14  ;;  %v18197_v39 = vpop.f32.mrf.mxu1  ;;  %v25334_v14 = vld [vmem:[#allocation52_spill] sm:$0xff]  ;;  %v25335_v47 = vld [vmem:[#allocation53_spill] sm:$0xff] }
 0x27c   : > { %v5437_v18 = vpop.f32.mrf.mxu0  ;;  %18490 = vmatmul.mubr.msk.f32.gmra.mxu1 %vm659_vm1, %v22497_v40 }
 0x27d   : > { %v5458_v59 = vadd.f32 %v5437_v18, %v22421_v2  ;;  %v22546_v20 = vadd.f32 %v18169_v21, %v5459_v36  ;;  %18517 = vmatprep.mubr.msk.f32.mxu1 %vm659_vm1, %v25333_v8  ;;  %v5860_v32 = vpop.f32.mrf.mxu1  ;;  %v22559_v2 = vld [vmem:[%s25031_s21 + $0xbc] sm:$0xf] }
 0x27e   : > { %v18174_v38 = vpop.f32.mrf.mxu0  ;;  %18467 = vmatmul.mubr.msk.f32.gmra.mxu0 %vm659_vm1, %v7581_v17 }
 0x27f   : > { %v22551_v60 = vadd.f32 %v5595_v53, %v5458_v59  ;;  %v5762_v49 = vadd.f32 %v18174_v38, %v22434_v12  ;;  %18494 = vmatprep.mubr.msk.f32.mxu0 %vm659_vm1, %v25311_v54  ;;  %v18200_v45 = vpop.f32.mrf.mxu1  ;;  %v22573_v54 = vld [vmem:[%s25031_s21 + $0xb8] sm:$0xf] }
 0x280   : > { %v5692_v21 = vpop.f32.mrf.mxu0  ;;  %18518 = vmatmul.mubr.msk.f32.vlgmr.msra.gmra.mxu1 %vm659_vm1, %v25334_v14  ;;  %v25339_v14 = vld [vmem:[#allocation42_spill] sm:$0xff] }
 0x281   : > { %v5761_v17 = vadd.f32 %v5692_v21, %v22450_v25  ;;  %v22564_v48 = vadd.f32 %v18197_v39, %v5762_v49  ;;  %18520 = vmatprep.mubr.msk.f32.mxu1 %vm659_vm1, %v25335_v47  ;;  %18562 = vmatpush3.msk.msra.mxu1 %vm25010_vm0, %v22429_v1  ;;  %v5870_v53 = vpop.f32.mrf.mxu1  ;;  %v25336_v39 = vld [vmem:[#allocation36_spill] sm:$0xff] }
 0x282   : > { %v18177_v12 = vpop.f32.mrf.mxu0  ;;  %18495 = vmatmul.mubr.msk.f32.vlgmr.msra.gmra.mxu0 %vm659_vm1, %v25312_v37  ;;  %18607 = vmatprep.subr.msk.mxu1 %vm25010_vm0, %v22559_v2 }
 0x283   : > { %v5764_v25 = vadd.f32 %v18177_v12, %v22461_v63  ;;  %v22580_v36 = vadd.f32 %v5860_v32, %v5761_v17  ;;  %18539 = vmatpush3.msk.msra.mxu0 %vm25010_vm0, %v22443_v7  ;;  %18497 = vmatprep.mubr.msk.f32.mxu0 %vm659_vm1, %v25315_v44  ;;  %v18203_v18 = vpop.f32.mrf.mxu1  ;;  %v25337_v63 = vld [vmem:[#allocation48_spill] sm:$0xff]  ;;  %v8068_v17 = vrot.slane %v22073_v30, 5  ;;  %v8070_v30 = vrot.slane %v22230_v27, 5 }
 0x284   : > { %v5702_v1 = vpop.f32.mrf.mxu0  ;;  %18521 = vmatmul.mubr.msk.f32.gmra.mxu1 %vm659_vm1, %v25336_v39  ;;  %18584 = vmatprep.subr.msk.mxu0 %vm25010_vm0, %v22573_v54  ;;  %v25342_v39 = vld [vmem:[#allocation80_spill] sm:$0xff] }
 0x285   : > { %v5763_v37 = vadd.f32 %v5702_v1, %v22468_v4  ;;  %v22591_v59 = vadd.f32 %v18200_v45, %v5764_v25  ;;  %18523 = vmatprep.mubr.msk.f32.mxu1 %vm659_vm1, %v25337_v63  ;;  %v5880_v44 = vpop.f32.mrf.mxu1  ;;  %v25338_v4 = vld [vmem:[#allocation85_spill] sm:$0xff] }
 0x286   : > { %v18180_v8 = vpop.f32.mrf.mxu0  ;;  %18498 = vmatmul.mubr.msk.f32.gmra.mxu0 %vm659_vm1, %v25316_v29 }
 0x287   : > { %v5766_v7 = vadd.f32 %v18180_v8, %v22475_v34  ;;  %v22598_v38 = vadd.f32 %v5870_v53, %v5763_v37  ;;  %18500 = vmatprep.mubr.msk.f32.mxu0 %vm659_vm1, %v25319_v33  ;;  %v18206_v49 = vpop.f32.mrf.mxu1  ;;  %v25340_v53 = vld [vmem:[#allocation43_spill] sm:$0xff]  ;;  %v8069_v37 = vsel %vm25003_vm6, %v25342_v39, %v8068_v17 }
 0x288   : > { %v5712_v32 = vpop.f32.mrf.mxu0  ;;  %18524 = vmatmul.mubr.msk.f32.gmra.mxu1 %vm659_vm1, %v25338_v4 }
 0x289   : > { %v5765_v21 = vadd.f32 %v5712_v32, %v22482_v9  ;;  %v22605_v45 = vadd.f32 %v18203_v18, %v5766_v7  ;;  %18526 = vmatprep.mubr.msk.f32.mxu1 %vm659_vm1, %v25339_v14  ;;  %v5890_v34 = vpop.f32.mrf.mxu1  ;;  %v25343_v32 = vld [vmem:[#allocation30_spill] sm:$0xff] }
 0x28a   : > { %v18183_v29 = vpop.f32.mrf.mxu0  ;;  %18501 = vmatmul.mubr.msk.f32.gmra.mxu0 %vm659_vm1, %v25320_v11  ;;  %v25341_v11 = vld [vmem:[#allocation26_spill] sm:$0xff] }
 0x28b   : > { %v5768_v33 = vadd.f32 %v18183_v29, %v22489_v46  ;;  %v22613_v47 = vadd.f32 %v5880_v44, %v5765_v21  ;;  %18503 = vmatprep.mubr.msk.f32.mxu0 %vm659_vm1, %v25323_v52  ;;  %v18209_v12 = vpop.f32.mrf.mxu1  ;;  %v22625_v46 = vld [vmem:[#allocation2 + $0xb8] sm:$0xff] }
 0x28c   : > { %v5722_v9 = vpop.f32.mrf.mxu0  ;;  %18527 = vmatmul.mubr.msk.f32.gmra.mxu1 %vm659_vm1, %v25340_v53  ;;  %v8072_v63 = vrot.slane %v22625_v46, 5 }
 0x28d   : > { %v5767_v25 = vadd.f32 %v5722_v9, %v22500_v16  ;;  %v22620_v1 = vadd.f32 %v18206_v49, %v5768_v33  ;;  %18529 = vmatprep.mubr.msk.f32.mxu1 %vm659_vm1, %v25341_v11  ;;  %v5900_v52 = vpop.f32.mrf.mxu1 }
 0x28e   : > { %v18186_v18 = vpop.f32.mrf.mxu0  ;;  %18504 = vmatmul.mubr.msk.f32.gmra.mxu0 %vm659_vm1, %v25324_v22  ;;  %v7908_v22 = vrot.slane %v22625_v46, 4  ;;  %v8073_v14 = vsel %vm25003_vm6, %v8070_v30, %v8072_v63 }
 0x28f   : > { %v5770_v16 = vadd.f32 %v18186_v18, %v22509_v19  ;;  %v22633_v8 = vadd.f32 %v5890_v34, %v5767_v25  ;;  %18506 = vmatprep.mubr.msk.f32.mxu0 %vm659_vm1, %v25327_v56  ;;  %v18212_v7 = vpop.f32.mrf.mxu1  ;;  %v8071_v19 = vsel %vm25003_vm6, %v8068_v17, %v8070_v30 }
 0x290   : > { %v5732_v44 = vpop.f32.mrf.mxu0  ;;  %18530 = vmatmul.mubr.msk.f32.gmra.mxu1 %vm659_vm1, %v25343_v32  ;;  %v7909_v17 = vsel %vm25010_vm0, %v22497_v40, %v7908_v22 }
 0x291   : > { %v5769_v49 = vadd.f32 %v5732_v44, %v22524_v15  ;;  %v22641_v4 = vadd.f32 %v18209_v12, %v5770_v16  ;;  %18532 = vmatprep.mubr.msk.f32.mxu1 %vm659_vm1, %v8069_v37  ;;  %v5910_v56 = vpop.f32.mrf.mxu1  ;;  %v25345_v16 = vld [vmem:[#allocation63_spill] sm:$0xff] }
 0x292   : > { %v18189_v21 = vpop.f32.mrf.mxu0  ;;  %18507 = vmatmul.mubr.msk.f32.gmra.mxu0 %vm659_vm1, %v25328_v42 }
 0x293   : > { %v5772_v29 = vadd.f32 %v18189_v21, %v22534_v35  ;;  %v22649_v34 = vadd.f32 %v5900_v52, %v5769_v49  ;;  %18509 = vmatprep.mubr.msk.f32.mxu0 %vm659_vm1, %v22515_v28  ;;  %v18215_v33 = vpop.f32.mrf.mxu1  ;;  %v25344_v52 = vld [vmem:[#allocation62_spill] sm:$0xff] }
 0x294   : > { %v5742_v15 = vpop.f32.mrf.mxu0  ;;  %18533 = vmatmul.mubr.msk.f32.gmra.mxu1 %vm659_vm1, %v8071_v19 }
 0x295   : > { %v5771_v9 = vadd.f32 %v5742_v15, %v22540_v57  ;;  %v22657_v42 = vadd.f32 %v18212_v7, %v5772_v29  ;;  %18535 = vmatprep.mubr.msk.f32.mxu1 %vm659_vm1, %v8073_v14  ;;  %v5920_v35 = vpop.f32.mrf.mxu1 }
 0x296   : > { %v18192_v12 = vpop.f32.mrf.mxu0  ;;  %18510 = vmatmul.mubr.msk.f32.gmra.mxu0 %vm659_vm1, %v22521_v51 }
 0x297   : > { %v5774_v28 = vadd.f32 %v18192_v12, %v22546_v20  ;;  %v22663_v53 = vadd.f32 %v5910_v56, %v5771_v9  ;;  %18512 = vmatprep.mubr.msk.f32.mxu0 %vm659_vm1, %v7909_v17  ;;  %v18243_v11 = vpop.f32.mrf.mxu1  ;;  %v25349_v17 = vld [vmem:[#allocation38_spill] sm:$0xff]  ;;  %v25350_v12 = vld [vmem:[#allocation39_spill] sm:$0xff] }
 0x298   : > { %v5752_v25 = vpop.f32.mrf.mxu0  ;;  %18536 = vmatmul.mubr.msk.f32.gmra.mxu1 %vm659_vm1, %v8072_v63 }
 0x299   : > { %v5773_v40 = vadd.f32 %v5752_v25, %v22551_v60  ;;  %v22668_v57 = vadd.f32 %v18215_v33, %v5774_v28  ;;  %18563 = vmatprep.mubr.msk.f32.mxu1 %vm659_vm1, %v25289_v41  ;;  %v6188_v51 = vpop.f32.mrf.mxu1  ;;  %v22690_v41 = vld [vmem:[%s25031_s21 + $0xc0] sm:$0xf] }
 0x29a   : > { %v18220_v30 = vpop.f32.mrf.mxu0  ;;  %18513 = vmatmul.mubr.msk.f32.gmra.mxu0 %vm659_vm1, %v7908_v22  ;;  %v22741_v28 = vld [vmem:[#allocation2 + $0xc0] sm:$0xf] }
 0x29b   : > { %v22673_v20 = vadd.f32 %v5920_v35, %v5773_v40  ;;  %v6094_v18 = vadd.f32 %v18220_v30, %v22564_v48  ;;  %18540 = vmatprep.mubr.msk.f32.mxu0 %vm659_vm1, %v25344_v52  ;;  %v18246_v37 = vpop.f32.mrf.mxu1  ;;  %v8401_v35 = vrot.slane %v22625_v46, 7  ;;  %v8238_v40 = vrot.slane %v22625_v46, 6 }
 0x29c   : > { %v6024_v39 = vpop.f32.mrf.mxu0  ;;  %18564 = vmatmul.mubr.msk.f32.vlgmr.msra.gmra.mxu1 %vm659_vm1, %v25292_v31 }
 0x29d   : > { %v6093_v60 = vadd.f32 %v6024_v39, %v22580_v36  ;;  %v22681_v63 = vadd.f32 %v18243_v11, %v6094_v18  ;;  %18566 = vmatprep.mubr.msk.f32.mxu1 %vm659_vm1, %v25293_v5  ;;  %18608 = vmatpush3.msk.msra.mxu1 %vm25010_vm0, %v22559_v2  ;;  %v6198_v31 = vpop.f32.mrf.mxu1  ;;  %v25346_v5 = vld [vmem:[#allocation65_spill] sm:$0xff]  ;;  %v25352_v39 = vrot.slane %v22230_v27, 7 }
 0x29e   : > { %v18223_v48 = vpop.f32.mrf.mxu0  ;;  %18541 = vmatmul.mubr.msk.f32.vlgmr.msra.gmra.mxu0 %vm659_vm1, %v25345_v16 }
 0x29f   : > { %v6096_v36 = vadd.f32 %v18223_v48, %v22591_v59  ;;  %v22695_v44 = vadd.f32 %v6188_v51, %v6093_v60  ;;  %18585 = vmatpush3.msk.msra.mxu0 %vm25010_vm0, %v22573_v54  ;;  %18543 = vmatprep.mubr.msk.f32.mxu0 %vm659_vm1, %v25346_v5  ;;  %v18249_v7 = vpop.f32.mrf.mxu1  ;;  %v25347_v54 = vld [vmem:[#allocation66_spill] sm:$0xff]  ;;  %v25354_v48 = vld [vmem:[#allocation44_spill] sm:$0xff] }
 0x2a0   : > { %v6034_v2 = vpop.f32.mrf.mxu0  ;;  %18567 = vmatmul.mubr.msk.f32.gmra.mxu1 %vm659_vm1, %v25294_v50  ;;  %18630 = vmatprep.subr.msk.mxu0 %vm25010_vm0, %v22690_v41  ;;  %v25348_v50 = vld [vmem:[#allocation56_spill] sm:$0xff] }
 0x2a1   : > { %v6095_v32 = vadd.f32 %v6034_v2, %v22598_v38  ;;  %v22706_v22 = vadd.f32 %v18246_v37, %v6096_v36  ;;  %18569 = vmatprep.mubr.msk.f32.mxu1 %vm659_vm1, %v25295_v26  ;;  %v6208_v49 = vpop.f32.mrf.mxu1 }
 0x2a2   : > { %v18226_v59 = vpop.f32.mrf.mxu0  ;;  %18544 = vmatmul.mubr.msk.f32.gmra.mxu0 %vm659_vm1, %v25347_v54 }
 0x2a3   : > { %v6098_v19 = vadd.f32 %v18226_v59, %v22605_v45  ;;  %v22713_v21 = vadd.f32 %v6198_v31, %v6095_v32  ;;  %18546 = vmatprep.mubr.msk.f32.mxu0 %vm659_vm1, %v25348_v50  ;;  %v18252_v14 = vpop.f32.mrf.mxu1 }
 0x2a4   : > { %v6044_v56 = vpop.f32.mrf.mxu0  ;;  %18570 = vmatmul.mubr.msk.f32.gmra.mxu1 %vm659_vm1, %v20853_v13 }
 0x2a5   : > { %v6097_v38 = vadd.f32 %v6044_v56, %v22613_v47  ;;  %v22720_v26 = vadd.f32 %v18249_v7, %v6098_v19  ;;  %18572 = vmatprep.mubr.msk.f32.mxu1 %vm659_vm1, %v20878_v58  ;;  %v6218_v45 = vpop.f32.mrf.mxu1 }
 0x2a6   : > { %v18229_v29 = vpop.f32.mrf.mxu0  ;;  %18547 = vmatmul.mubr.msk.f32.gmra.mxu0 %vm659_vm1, %v25278_v24 }
 0x2a7   : > { %v6100_v15 = vadd.f32 %v18229_v29, %v22620_v1  ;;  %v22727_v33 = vadd.f32 %v6208_v49, %v6097_v38  ;;  %18549 = vmatprep.mubr.msk.f32.mxu0 %vm659_vm1, %v25349_v17  ;;  %v18255_v9 = vpop.f32.mrf.mxu1  ;;  %v25355_v38 = vld [vmem:[#allocation57_spill] sm:$0xff]  ;;  %v25356_v17 = vld [vmem:[#allocation40_spill] sm:$0xff] }
 0x2a8   : > { %v6054_v13 = vpop.f32.mrf.mxu0  ;;  %18573 = vmatmul.mubr.msk.f32.gmra.mxu1 %vm659_vm1, %v21563_v61  ;;  %v8236_v61 = vrot.slane %v22230_v27, 6 }
 0x2a9   : > { %v6099_v47 = vadd.f32 %v6054_v13, %v22633_v8  ;;  %v22734_v58 = vadd.f32 %v18252_v14, %v6100_v15  ;;  %18575 = vmatprep.mubr.msk.f32.mxu1 %vm659_vm1, %v21580_v0  ;;  %v6228_v1 = vpop.f32.mrf.mxu1 }
 0x2aa   : > { %v18232_v24 = vpop.f32.mrf.mxu0  ;;  %18550 = vmatmul.mubr.msk.f32.gmra.mxu0 %vm659_vm1, %v25350_v12  ;;  %v8239_v36 = vsel %vm25012_vm5, %v8236_v61, %v8238_v40  ;;  %v25359_v12 = vld [vmem:[#allocation64_spill] sm:$0xff] }
 0x2ab   : > { %v6102_v25 = vadd.f32 %v18232_v24, %v22641_v4  ;;  %v22744_v11 = vadd.f32 %v6218_v45, %v6099_v47  ;;  %18552 = vmatprep.mubr.msk.f32.mxu0 %vm659_vm1, %v22087_v43  ;;  %v18258_v0 = vpop.f32.mrf.mxu1  ;;  %v8403_v4 = vrot.slane %v22741_v28, 7  ;;  %v25351_v43 = vld [vmem:[#allocation45_spill] sm:$0xff] }
 0x2ac   : > { %v6064_v8 = vpop.f32.mrf.mxu0  ;;  %18576 = vmatmul.mubr.msk.f32.gmra.mxu1 %vm659_vm1, %v22247_v10  ;;  %v8402_v10 = vsel %vm25004_vm7, %v25352_v39, %v8401_v35  ;;  %v25358_v47 = vld [vmem:[#allocation81_spill] sm:$0xff] }
 0x2ad   : > { %v6101_v30 = vadd.f32 %v6064_v8, %v22649_v34  ;;  %v22753_v51 = vadd.f32 %v18255_v9, %v6102_v25  ;;  %18578 = vmatprep.mubr.msk.f32.mxu1 %vm659_vm1, %v22253_v3  ;;  %v6238_v52 = vpop.f32.mrf.mxu1  ;;  %v25353_v34 = vld [vmem:[#allocation49_spill] sm:$0xff]  ;;  %v8237_v3 = vsel %vm25012_vm5, %v25354_v48, %v8236_v61  ;;  %v19346_v25 = vld [vmem:[#allocation2 + $0x78] sm:$0xff] }
 0x2ae   : > { %v18235_v18 = vpop.f32.mrf.mxu0  ;;  %18553 = vmatmul.mubr.msk.f32.gmra.mxu0 %vm659_vm1, %v25351_v43  ;;  %v25363_v48 = vld [vmem:[#allocation68_spill] sm:$0xff] }
 0x2af   : > { %v6104_v37 = vadd.f32 %v18235_v18, %v22657_v42  ;;  %v22764_v60 = vadd.f32 %v6228_v1, %v6101_v30  ;;  %18555 = vmatprep.mubr.msk.f32.mxu0 %vm659_vm1, %v25353_v34  ;;  %v18261_v31 = vpop.f32.mrf.mxu1  ;;  %v8404_v42 = vsel %vm25004_vm7, %v8401_v35, %v8403_v4  ;;  %v19345_v1 = vld [vmem:[#allocation2 + $0x70] sm:$0xff]  ;;  %v19347_v18 = vld [vmem:[#allocation2 + $0x80] sm:$0xff] }
 0x2b0   : > { %v6074_v16 = vpop.f32.mrf.mxu0  ;;  %18579 = vmatmul.mubr.msk.f32.gmra.mxu1 %vm659_vm1, %v22270_v55  ;;  %v25361_v30 = vld [vmem:[#allocation46_spill] sm:$0xff] }
 0x2b1   : > { %v6103_v5 = vadd.f32 %v6074_v16, %v22663_v53  ;;  %v22774_v2 = vadd.f32 %v18258_v0, %v6104_v37  ;;  %18581 = vmatprep.mubr.msk.f32.mxu1 %vm659_vm1, %v8402_v10  ;;  %v6248_v32 = vpop.f32.mrf.mxu1 }
 0x2b2   : > { %v18238_v7 = vpop.f32.mrf.mxu0  ;;  %18556 = vmatmul.mubr.msk.f32.gmra.mxu0 %vm659_vm1, %v8237_v3  ;;  %v8721_v3 = vrot.slane %v22625_v46, 1 }
 0x2b3   : > { %v6106_v59 = vadd.f32 %v18238_v7, %v22668_v57  ;;  %v22780_v54 = vadd.f32 %v6238_v52, %v6103_v5  ;;  %18558 = vmatprep.mubr.msk.f32.mxu0 %vm659_vm1, %v8239_v36  ;;  %v18289_v49 = vpop.f32.mrf.mxu1  ;;  %v19348_v52 = vld [vmem:[#allocation2 + $0x88] sm:$0xff]  ;;  %v8723_v36 = vrot.slane %v22741_v28, 1 }
 0x2b4   : > { %v6084_v55 = vpop.f32.mrf.mxu0  ;;  %18582 = vmatmul.mubr.msk.f32.gmra.mxu1 %vm659_vm1, %v8404_v42  ;;  %v19349_v42 = vld [vmem:[#allocation2 + $0x98] sm:$0xff] }
 0x2b5   : > { %v6105_v53 = vadd.f32 %v6084_v55, %v22673_v20  ;;  %v22785_v19 = vadd.f32 %v18261_v31, %v6106_v59  ;;  %18609 = vmatprep.mubr.msk.f32.mxu1 %vm659_vm1, %v25218_v23  ;;  %v22790_v56 = vpop.f32.mrf.mxu1 }
 0x2b6   : > { %v18266_v50 = vpop.f32.mrf.mxu0  ;;  %18559 = vmatmul.mubr.msk.f32.gmra.mxu0 %vm659_vm1, %v8238_v40 }
 0x2b7   : > { %v22792_v57 = vadd.f32 %v6248_v32, %v6105_v53  ;;  %v6422_v14 = vadd.f32 %v18266_v50, %v22681_v63  ;;  %18586 = vmatprep.mubr.msk.f32.mxu0 %vm659_vm1, %v25355_v38  ;;  %v18292_v45 = vpop.f32.mrf.mxu1  ;;  %v25365_v32 = vld [vmem:[#allocation71_spill] sm:$0xff]  ;;  %v25367_v53 = vld [vmem:[#allocation58_spill] sm:$0xff] }
 0x2b8   : > { %v6352_v29 = vpop.f32.mrf.mxu0  ;;  %18610 = vmatmul.mubr.msk.f32.vlgmr.msra.gmra.mxu1 %vm659_vm1, %v25219_v62  ;;  %v25357_v62 = vld [vmem:[#allocation60_spill] sm:$0xff]  ;;  %v8722_v50 = vsel %vm736_vm2, %v25367_v53, %v8721_v3 }
 0x2b9   : > { %v22800_v20 = vadd.f32 %v6352_v29, %v22695_v44  ;;  %v22802_v23 = vadd.f32 %v18289_v49, %v6422_v14  ;;  %18612 = vmatprep.mubr.msk.f32.mxu1 %vm659_vm1, %v25220_v6  ;;  %v22808_v63 = vpop.f32.mrf.mxu1  ;;  %v25366_v49 = vld [vmem:[#allocation72_spill] sm:$0xff]  ;;  %v8724_v29 = vsel %vm736_vm2, %v8721_v3, %v8723_v36  ;;  %v25372_v3 = vld [vmem:[#allocation77_spill] sm:$0xff] }
 0x2ba   : > { %v18269_v15 = vpop.f32.mrf.mxu0  ;;  %18587 = vmatmul.mubr.msk.f32.vlgmr.msra.gmra.mxu0 %vm659_vm1, %v25356_v17 }
 0x2bb   : > { %v6424_v13 = vadd.f32 %v18269_v15, %v22706_v22  ;;  %18631 = vmatpush3.msk.msra.mxu0 %vm25010_vm0, %v22690_v41  ;;  %18589 = vmatprep.mubr.msk.f32.mxu0 %vm659_vm1, %v25357_v62  ;;  %v18295_v9 = vpop.f32.mrf.mxu1  ;;  %v19351_v15 = vld [vmem:[#allocation2 + $0xa8] sm:$0xff] }
 0x2bc   : > { %v6362_v44 = vpop.f32.mrf.mxu0  ;;  %18613 = vmatmul.mubr.msk.f32.gmra.mxu1 %vm659_vm1, %v25358_v47 }
 0x2bd   : > { %v22818_v6 = vadd.f32 %v6362_v44, %v22713_v21  ;;  %v22820_v24 = vadd.f32 %v18292_v45, %v6424_v13  ;;  %18615 = vmatprep.mubr.msk.f32.mxu1 %vm659_vm1, %v25359_v12  ;;  %v22825_v41 = vpop.f32.mrf.mxu1  ;;  %v25360_v21 = vld [vmem:[#allocation87_spill] sm:$0xff] }
 0x2be   : > { %v18272_v22 = vpop.f32.mrf.mxu0  ;;  %18590 = vmatmul.mubr.msk.f32.gmra.mxu0 %vm659_vm1, %v19345_v1 }
 0x2bf   : > { %v6426_v35 = vadd.f32 %v18272_v22, %v22720_v26  ;;  %18592 = vmatprep.mubr.msk.f32.mxu0 %vm659_vm1, %v19346_v25  ;;  %v18298_v8 = vpop.f32.mrf.mxu1 }
 0x2c0   : > { %v6372_v61 = vpop.f32.mrf.mxu0  ;;  %18616 = vmatmul.mubr.msk.f32.gmra.mxu1 %vm659_vm1, %v25360_v21 }
 0x2c1   : > { %v22832_v0 = vadd.f32 %v6372_v61, %v22727_v33  ;;  %v22834_v40 = vadd.f32 %v18295_v9, %v6426_v35  ;;  %18618 = vmatprep.mubr.msk.f32.mxu1 %vm659_vm1, %v25361_v30  ;;  %v22839_v26 = vpop.f32.mrf.mxu1  ;;  %v25362_v33 = vld [vmem:[#allocation67_spill] sm:$0xff] }
 0x2c2   : > { %v18275_v4 = vpop.f32.mrf.mxu0  ;;  %18593 = vmatmul.mubr.msk.f32.gmra.mxu0 %vm659_vm1, %v19347_v18  ;;  %v25369_v30 = vld [vmem:[#allocation35_spill] sm:$0xff]  ;;  %v25370_v18 = vld [vmem:[#allocation78_spill] sm:$0xff] }
 0x2c3   : > { %v6428_v43 = vadd.f32 %v18275_v4, %v22734_v58  ;;  %18595 = vmatprep.mubr.msk.f32.mxu0 %vm659_vm1, %v19348_v52  ;;  %v18301_v10 = vpop.f32.mrf.mxu1  ;;  %v25364_v58 = vld [vmem:[#allocation59_spill] sm:$0xff] }
 0x2c4   : > { %v6382_v39 = vpop.f32.mrf.mxu0  ;;  %18619 = vmatmul.mubr.msk.f32.gmra.mxu1 %vm659_vm1, %v25362_v33 }
 0x2c5   : > { %v22846_v37 = vadd.f32 %v6382_v39, %v22744_v11  ;;  %v22848_v34 = vadd.f32 %v18298_v8, %v6428_v43  ;;  %18621 = vmatprep.mubr.msk.f32.mxu1 %vm659_vm1, %v25363_v48  ;;  %v22855_v31 = vpop.f32.mrf.mxu1 }
 0x2c6   : > { %v18278_v16 = vpop.f32.mrf.mxu0  ;;  %18596 = vmatmul.mubr.msk.f32.gmra.mxu0 %vm659_vm1, %v25364_v58 }
 0x2c7   : > { %v6430_v5 = vadd.f32 %v18278_v16, %v22753_v51  ;;  %18598 = vmatprep.mubr.msk.f32.mxu0 %vm659_vm1, %v19349_v42  ;;  %v18304_v7 = vpop.f32.mrf.mxu1  ;;  %v19350_v51 = vld [vmem:[#allocation2 + $0xa0] sm:$0xff] }
 0x2c8   : > { %v6392_v11 = vpop.f32.mrf.mxu0  ;;  %18622 = vmatmul.mubr.msk.f32.gmra.mxu1 %vm659_vm1, %v25365_v32 }
 0x2c9   : > { %v22863_v59 = vadd.f32 %v6392_v11, %v22764_v60  ;;  %v6594_v55 = vadd.f32 %v18301_v10, %v6430_v5  ;;  %18624 = vmatprep.mubr.msk.f32.mxu1 %vm659_vm1, %v25366_v49  ;;  %v22870_v38 = vpop.f32.mrf.mxu1  ;;  %v25371_v10 = vld [vmem:[#allocation79_spill] sm:$0xff]  ;;  %v25373_v5 = vld [vmem:[#allocation89_spill] sm:$0xff] }
 0x2ca   : > { %v18281_v14 = vpop.f32.mrf.mxu0  ;;  %18599 = vmatmul.mubr.msk.f32.gmra.mxu0 %vm659_vm1, %v19350_v51 }
 0x2cb   : > { %v6432_v45 = vadd.f32 %v18281_v14, %v22774_v2  ;;  %18601 = vmatprep.mubr.msk.f32.mxu0 %vm659_vm1, %v19351_v15  ;;  %v18307_v17 = vpop.f32.mrf.mxu1 }
 0x2cc   : > { %v6402_v60 = vpop.f32.mrf.mxu0  ;;  %18625 = vmatmul.mubr.msk.f32.gmra.mxu1 %vm659_vm1, %v8722_v50  ;;  %v25375_v50 = vld [vmem:[#allocation19_spill] sm:$0xff] }
 0x2cd   : > { %v22877_v13 = vadd.f32 %v6402_v60, %v22780_v54  ;;  %v6596_v62 = vadd.f32 %v18304_v7, %v6432_v45  ;;  %18627 = vmatprep.mubr.msk.f32.mxu1 %vm659_vm1, %v8724_v29  ;;  %v22882_v9 = vpop.f32.mrf.mxu1  ;;  %v25374_v7 = vld [vmem:[#allocation90_spill] sm:$0xff]  ;;  %v25376_v29 = vld [vmem:[#allocation20_spill] sm:$0xff]  ;;  %v8885_v45 = vrot.slane %v22625_v46, 2  ;;  %v8887_v60 = vrot.slane %v22741_v28, 2 }
 0x2ce   : > { %v18284_v44 = vpop.f32.mrf.mxu0  ;;  %18602 = vmatmul.mubr.msk.f32.gmra.mxu0 %vm659_vm1, %v22230_v27 }
 0x2cf   : > { %v6434_v2 = vadd.f32 %v18284_v44, %v22785_v19  ;;  %18604 = vmatprep.mubr.msk.f32.mxu0 %vm659_vm1, %v22625_v46  ;;  %v18335_v12 = vpop.f32.mrf.mxu1  ;;  %v25368_v19 = vld [vmem:[#allocation34_spill] sm:$0xff] }
 0x2d0   : > { %v6412_v47 = vpop.f32.mrf.mxu0  ;;  %18628 = vmatmul.mubr.msk.f32.gmra.mxu1 %vm659_vm1, %v8723_v36 }
 0x2d1   : > { %v22889_v54 = vadd.f32 %v6412_v47, %v22792_v57  ;;  %v6598_v22 = vadd.f32 %v18307_v17, %v6434_v2  ;;  %v22893_v27 = vpop.f32.mrf.mxu1  ;;  %v25377_v2 = vld [vmem:[#allocation82_spill] sm:$0xff] }
 0x2d2   : > { %v18312_v1 = vpop.f32.mrf.mxu0  ;;  %18605 = vmatmul.mubr.msk.f32.gmra.mxu0 %vm659_vm1, %v22741_v28 }
 0x2d3   : > { %v6750_v35 = vadd.f32 %v18312_v1, %v22802_v23  ;;  %18632 = vmatprep.mubr.msk.f32.mxu0 %vm659_vm1, %v25368_v19  ;;  %v18338_v61 = vpop.f32.mrf.mxu1  ;;  %v25378_v1 = vld [vmem:[#allocation70_spill] sm:$0xff] }
 0x2d4   : > { %v22898_v25 = vpop.f32.mrf.mxu0 }
 0x2d5   : > { %v6911_v8 = vadd.f32 %v18335_v12, %v6750_v35  ;;  %v22902_v57 = vpop.f32.mrf.mxu1 }
 0x2d6   : > { %v18315_v21 = vpop.f32.mrf.mxu0  ;;  %18633 = vmatmul.mubr.msk.f32.vlgmr.msra.gmra.mxu0 %vm659_vm1, %v25369_v30 }
 0x2d7   : > { %v6752_v4 = vadd.f32 %v18315_v21, %v22820_v24  ;;  %18635 = vmatprep.mubr.msk.f32.mxu0 %vm659_vm1, %v25370_v18  ;;  %v18341_v23 = vpop.f32.mrf.mxu1 }
 0x2d8   : > { %v22907_v43 = vpop.f32.mrf.mxu0 }
 0x2d9   : > { %v6913_v52 = vadd.f32 %v18338_v61, %v6752_v4  ;;  %v22911_v33 = vpop.f32.mrf.mxu1  ;;  %v8888_v61 = vsel %vm1099_vm4, %v8885_v45, %v8887_v60 }
 0x2da   : > { %v18318_v39 = vpop.f32.mrf.mxu0  ;;  %18636 = vmatmul.mubr.msk.f32.gmra.mxu0 %vm659_vm1, %v25371_v10 }
 0x2db   : > { %v6754_v48 = vadd.f32 %v18318_v39, %v22834_v40  ;;  %18638 = vmatprep.mubr.msk.f32.mxu0 %vm659_vm1, %v25372_v3  ;;  %v18344_v24 = vpop.f32.mrf.mxu1 }
 0x2dc   : > { %v22916_v16 = vpop.f32.mrf.mxu0 }
 0x2dd   : > { %v6915_v58 = vadd.f32 %v18341_v23, %v6754_v48  ;;  %v22920_v42 = vpop.f32.mrf.mxu1 }
 0x2de   : > { %v18321_v36 = vpop.f32.mrf.mxu0  ;;  %18639 = vmatmul.mubr.msk.f32.gmra.mxu0 %vm659_vm1, %v25373_v5 }
 0x2df   : > { %v6756_v11 = vadd.f32 %v18321_v36, %v22848_v34  ;;  %18641 = vmatprep.mubr.msk.f32.mxu0 %vm659_vm1, %v25374_v7  ;;  %v18347_v40 = vpop.f32.mrf.mxu1 }
 0x2e0   : > { %v22925_v32 = vpop.f32.mrf.mxu0 }
 0x2e1   : > { %v6917_v49 = vadd.f32 %v18344_v24, %v6756_v11  ;;  %v22929_v14 = vpop.f32.mrf.mxu1 }
 0x2e2   : > { %v18324_v53 = vpop.f32.mrf.mxu0  ;;  %18642 = vmatmul.mubr.msk.f32.gmra.mxu0 %vm659_vm1, %v25375_v50 }
 0x2e3   : > { %v6758_v51 = vadd.f32 %v18324_v53, %v6594_v55  ;;  %18644 = vmatprep.mubr.msk.f32.mxu0 %vm659_vm1, %v25376_v29  ;;  %v18350_v15 = vpop.f32.mrf.mxu1  ;;  %v25379_v55 = vld [vmem:[#allocation61_spill] sm:$0xff] }
 0x2e4   : > { %v22934_v34 = vpop.f32.mrf.mxu0  ;;  %v8886_v35 = vsel %vm1099_vm4, %v25379_v55, %v8885_v45 }
 0x2e5   : > { %v6919_v17 = vadd.f32 %v18347_v40, %v6758_v51  ;;  %v22939_v47 = vpop.f32.mrf.mxu1 }
 0x2e6   : > { %v18327_v44 = vpop.f32.mrf.mxu0  ;;  %18645 = vmatmul.mubr.msk.f32.gmra.mxu0 %vm659_vm1, %v25377_v2 }
 0x2e7   : > { %v6760_v12 = vadd.f32 %v18327_v44, %v6596_v62  ;;  %18647 = vmatprep.mubr.msk.f32.mxu0 %vm659_vm1, %v25378_v1  ;;  %v18353_v19 = vpop.f32.mrf.mxu1 }
 0x2e8   : > { %v22945_v46 = vpop.f32.mrf.mxu0 }
 0x2e9   : > { %v6921_v28 = vadd.f32 %v18350_v15, %v6760_v12  ;;  %v22949_v30 = vpop.f32.mrf.mxu1 }
 0x2ea   : > { %v18330_v21 = vpop.f32.mrf.mxu0  ;;  %18648 = vmatmul.mubr.msk.f32.gmra.mxu0 %vm659_vm1, %v8886_v35 }
 0x2eb   : > { %v6762_v4 = vadd.f32 %v18330_v21, %v6598_v22  ;;  %18650 = vmatprep.mubr.msk.f32.mxu0 %vm659_vm1, %v8888_v61  ;;  %v18381_v18 = vpop.f32.mrf.mxu1 }
 0x2ec   : > { %v22952_v62 = vpop.f32.mrf.mxu0 }
 0x2ed   : > { %v6923_v23 = vadd.f32 %v18353_v19, %v6762_v4  ;;  %v22955_v10 = vpop.f32.mrf.mxu1 }
 0x2ee   : > { %v18358_v39 = vpop.f32.mrf.mxu0  ;;  %18651 = vmatmul.mubr.msk.f32.gmra.mxu0 %vm659_vm1, %v8887_v60  ;;  %vm9256_vm1 = vcmask 64516  }
 0x2ef   : > { %v7078_v48 = vadd.f32 %v18358_v39, %v6911_v8 }
 0x2f0   : > { %v22957_v3 = vpop.f32.mrf.mxu0  ;;  %v18384_v24 = vpop.f32.mrf.mxu1 }
 0x2f1   : > { %v7236_v36 = vadd.f32 %v18381_v18, %v7078_v48 }
 0x2f2   : > { %v18361_v5 = vpop.f32.mrf.mxu0  ;;  %v22959_v11 = vpop.f32.mrf.mxu1 }
 0x2f3   : > { %v7080_v22 = vadd.f32 %v18361_v5, %v6913_v52 }
 0x2f4   : > { %v22961_v7 = vpop.f32.mrf.mxu0  ;;  %v18387_v40 = vpop.f32.mrf.mxu1 }
 0x2f5   : > { %v7238_v53 = vadd.f32 %v18384_v24, %v7080_v22 }
 0x2f6   : > { %v18364_v50 = vpop.f32.mrf.mxu0  ;;  %v22963_v51 = vpop.f32.mrf.mxu1 }
 0x2f7   : > { %v7082_v29 = vadd.f32 %v18364_v50, %v6915_v58 }
 0x2f8   : > { %v22965_v45 = vpop.f32.mrf.mxu0  ;;  %v18390_v15 = vpop.f32.mrf.mxu1 }
 0x2f9   : > { %v7240_v8 = vadd.f32 %v18387_v40, %v7082_v29 }
 0x2fa   : > { %v18367_v60 = vpop.f32.mrf.mxu0  ;;  %v22967_v44 = vpop.f32.mrf.mxu1 }
 0x2fb   : > { %v7084_v2 = vadd.f32 %v18367_v60, %v6917_v49 }
 0x2fc   : > { %v22969_v12 = vpop.f32.mrf.mxu0  ;;  %v18393_v1 = vpop.f32.mrf.mxu1 }
 0x2fd   : > { %v7242_v52 = vadd.f32 %v18390_v15, %v7084_v2 }
 0x2fe   : > { %v18370_v55 = vpop.f32.mrf.mxu0  ;;  %v22971_v35 = vpop.f32.mrf.mxu1 }
 0x2ff   : > { %25380 = vst [vmem:[#allocation73_spill] sm:$0xff] %v22971_v35  ;;  %v7086_v19 = vadd.f32 %v18370_v55, %v6919_v17 }
 0x300   : > { %v22973_v61 = vpop.f32.mrf.mxu0  ;;  %v18396_v21 = vpop.f32.mrf.mxu1 }
 0x301   : > { %v7244_v58 = vadd.f32 %v18393_v1, %v7086_v19 }
 0x302   : > { %v18373_v4 = vpop.f32.mrf.mxu0  ;;  %v22975_v18 = vpop.f32.mrf.mxu1 }
 0x303   : > { %25381 = vst [vmem:[#allocation74_spill] sm:$0xff] %v22975_v18  ;;  %v7088_v39 = vadd.f32 %v18373_v4, %v6921_v28 }
 0x304   : > { %v22977_v48 = vpop.f32.mrf.mxu0  ;;  %v18399_v24 = vpop.f32.mrf.mxu1 }
 0x305   : > { %v7246_v49 = vadd.f32 %v18396_v21, %v7088_v39 }
 0x306   : > { %v18376_v5 = vpop.f32.mrf.mxu0  ;;  %v22979_v22 = vpop.f32.mrf.mxu1 }
 0x307   : > { %25382 = vst [vmem:[#allocation75_spill] sm:$0xff] %v22979_v22  ;;  %v7090_v40 = vadd.f32 %v18376_v5, %v6923_v23 }
 0x308   : > { %v22981_v50 = vpop.f32.mrf.mxu0  ;;  %v18427_v29 = vpop.f32.mrf.mxu1 }
 0x309   : > { %25383 = vst [vmem:[#allocation76_spill] sm:$0xff] %v22981_v50  ;;  %v7248_v17 = vadd.f32 %v18399_v24, %v7090_v40 }
 0x30a   : > { %v18404_v15 = vpop.f32.mrf.mxu0  ;;  %v22983_v60 = vpop.f32.mrf.mxu1 }
 0x30b   : > { %v7400_v2 = vadd.f32 %v18404_v15, %v7236_v36 }
 0x30c   : > { %v22985_v1 = vpop.f32.mrf.mxu0  ;;  %v18430_v55 = vpop.f32.mrf.mxu1 }
 0x30d   : > { %v7564_v28 = vadd.f32 %v18427_v29, %v7400_v2 }
 0x30e   : > { %v18407_v19 = vpop.f32.mrf.mxu0  ;;  %v22987_v4 = vpop.f32.mrf.mxu1 }
 0x30f   : > { %25384 = vst [vmem:[#allocation37_spill] sm:$0xff] %v22987_v4  ;;  %v7402_v21 = vadd.f32 %v18407_v19, %v7238_v53 }
 0x310   : > { %v22989_v39 = vpop.f32.mrf.mxu0  ;;  %v18433_v22 = vpop.f32.mrf.mxu1 }
 0x311   : > { %v7566_v23 = vadd.f32 %v18430_v55, %v7402_v21 }
 0x312   : > { %v18410_v5 = vpop.f32.mrf.mxu0  ;;  %v22991_v18 = vpop.f32.mrf.mxu1 }
 0x313   : > { %25385 = vst [vmem:[#allocation27_spill] sm:$0xff] %v22991_v18  ;;  %v7404_v24 = vadd.f32 %v18410_v5, %v7240_v8 }
 0x314   : > { %v22993_v40 = vpop.f32.mrf.mxu0  ;;  %v18436_v50 = vpop.f32.mrf.mxu1 }
 0x315   : > { %25386 = vst [vmem:[#allocation50_spill] sm:$0xff] %v22993_v40  ;;  %v22995_v36 = vadd.f32 %v18433_v22, %v7404_v24 }
 0x316   : > { %v18413_v15 = vpop.f32.mrf.mxu0  ;;  %v22997_v35 = vpop.f32.mrf.mxu1 }
 0x317   : > { %25387 = vst [vmem:[#allocation54_spill] sm:$0xff] %v22997_v35  ;;  %v7406_v29 = vadd.f32 %v18413_v15, %v7242_v52 }
 0x318   : > { %v22999_v2 = vpop.f32.mrf.mxu0  ;;  %v18439_v53 = vpop.f32.mrf.mxu1 }
 0x319   : > { %25388 = vst [vmem:[#allocation28_spill] sm:$0xff] %v22999_v2  ;;  %v23001_v19 = vadd.f32 %v18436_v50, %v7406_v29 }
 0x31a   : > { %v18416_v4 = vpop.f32.mrf.mxu0  ;;  %v23003_v55 = vpop.f32.mrf.mxu1 }
 0x31b   : > { %25389 = vst [vmem:[#allocation32_spill] sm:$0xff] %v23003_v55  ;;  %v7408_v21 = vadd.f32 %v18416_v4, %v7244_v58 }
 0x31c   : > { %v23005_v18 = vpop.f32.mrf.mxu0  ;;  %v18442_v8 = vpop.f32.mrf.mxu1 }
 0x31d   : > { %25390 = vst [vmem:[#allocation55_spill] sm:$0xff] %v23005_v18  ;;  %v23007_v5 = vadd.f32 %v18439_v53, %v7408_v21 }
 0x31e   : > { %v18419_v22 = vpop.f32.mrf.mxu0  ;;  %v23009_v24 = vpop.f32.mrf.mxu1 }
 0x31f   : > { %25391 = vst [vmem:[#allocation51_spill] sm:$0xff] %v23009_v24  ;;  %v7410_v40 = vadd.f32 %v18419_v22, %v7246_v49 }
 0x320   : > { %v23011_v35 = vpop.f32.mrf.mxu0  ;;  %v18445_v52 = vpop.f32.mrf.mxu1 }
 0x321   : > { %25392 = vst [vmem:[#allocation33_spill] sm:$0xff] %v23011_v35  ;;  %v23013_v15 = vadd.f32 %v18442_v8, %v7410_v40 }
 0x322   : > { %v18422_v50 = vpop.f32.mrf.mxu0  ;;  %v23015_v29 = vpop.f32.mrf.mxu1 }
 0x323   : > { %25393 = vst [vmem:[#allocation29_spill] sm:$0xff] %v23015_v29  ;;  %v7412_v2 = vadd.f32 %v18422_v50, %v7248_v17 }
 0x324   : > { %v23017_v55 = vpop.f32.mrf.mxu0  ;;  %v18473_v58 = vpop.f32.mrf.mxu1 }
 0x325   : > { %25394 = vst [vmem:[#allocation83_spill] sm:$0xff] %v23017_v55  ;;  %v23019_v4 = vadd.f32 %v18445_v52, %v7412_v2  ;;  %v25399_v2 = vmov 0.0  }
 0x326   : > { %v18450_v53 = vpop.f32.mrf.mxu0  ;;  %v23021_v21 = vpop.f32.mrf.mxu1  ;;  %9239 = vst.msk [vmem:[#allocation3 + $0x8] sm:$0xff] %vm9237_vm9, %v25399_v2  ;;  %9240 = vst.msk [vmem:[#allocation3 + $0x10] sm:$0xff] %vm9237_vm9, %v25399_v2 }
 0x327   : > { %25395 = vst [vmem:[#allocation86_spill] sm:$0xff] %v23021_v21  ;;  %v7728_v18 = vadd.f32 %v18450_v53, %v7564_v28  ;;  %9238 = vst.msk [vmem:[#allocation3] sm:$0xff] %vm9237_vm9, %v25399_v2 }
 0x328   : > { %v23023_v24 = vpop.f32.mrf.mxu0  ;;  %v18476_v49 = vpop.f32.mrf.mxu1  ;;  %9241 = vst.msk [vmem:[#allocation3 + $0x18] sm:$0xff] %vm9237_vm9, %v25399_v2  ;;  %9242 = vst.msk [vmem:[#allocation3 + $0x20] sm:$0xff] %vm9237_vm9, %v25399_v2 }
 0x329   : > { %25396 = vst [vmem:[#allocation84_spill] sm:$0xff] %v23023_v24  ;;  %v23025_v22 = vadd.f32 %v18473_v58, %v7728_v18  ;;  %9243 = vst.msk [vmem:[#allocation3 + $0x28] sm:$0xff] %vm9237_vm9, %v25399_v2 }
 0x32a   : > { %v18453_v40 = vpop.f32.mrf.mxu0  ;;  %v23027_v8 = vpop.f32.mrf.mxu1  ;;  %9244 = vst.msk [vmem:[#allocation3 + $0x30] sm:$0xff] %vm9237_vm9, %v25399_v2  ;;  %9245 = vst.msk [vmem:[#allocation3 + $0x38] sm:$0xff] %vm9237_vm9, %v25399_v2 }
 0x32b   : > { %25397 = vst [vmem:[#allocation21_spill] sm:$0xff] %v23027_v8  ;;  %v7730_v35 = vadd.f32 %v18453_v40, %v7566_v23  ;;  %9246 = vst.msk [vmem:[#allocation3 + $0x40] sm:$0xff] %vm9237_vm9, %v25399_v2 }
 0x32c   : > { %v23029_v29 = vpop.f32.mrf.mxu0  ;;  %v18479_v17 = vpop.f32.mrf.mxu1  ;;  %9247 = vst.msk [vmem:[#allocation3 + $0x48] sm:$0xff] %vm9237_vm9, %v25399_v2  ;;  %10585 = vst.msk [vmem:[#allocation4] sm:$0xff] %vm9237_vm9, %v25399_v2 }
 0x32d   : > { %25398 = vst [vmem:[#allocation41_spill] sm:$0xff] %v23029_v29  ;;  %v23031_v50 = vadd.f32 %v18476_v49, %v7730_v35  ;;  %10586 = vst.msk [vmem:[#allocation4 + $0x8] sm:$0xff] %vm9237_vm9, %v25399_v2 }
 0x32e   : > { %10587 = vst.msk [vmem:[#allocation4 + $0x10] sm:$0xff] %vm9237_vm9, %v25399_v2  ;;  %10588 = vst.msk [vmem:[#allocation4 + $0x18] sm:$0xff] %vm9237_vm9, %v25399_v2  ;;  %v18456_v35 = vpop.f32.mrf.mxu0  ;;  %v23095_v18 = vpop.f32.mrf.mxu1 }
 0x32f   : > { %10589 = vst.msk [vmem:[#allocation4 + $0x20] sm:$0xff] %vm9237_vm9, %v25399_v2  ;;  %10590 = vst.msk [vmem:[#allocation4 + $0x28] sm:$0xff] %vm9237_vm9, %v25399_v2  ;;  %v7732_v28 = vadd.f32 %v18456_v35, %v22995_v36  ;;  %v16188_v36 = vld [vmem:[%s25405_s25 + $0x8] sm:$0xff] }
 0x330   : > { %10591 = vst.msk [vmem:[#allocation4 + $0x30] sm:$0xff] %vm9237_vm9, %v25399_v2  ;;  %10592 = vst.msk [vmem:[#allocation4 + $0x38] sm:$0xff] %vm9237_vm9, %v25399_v2  ;;  %v23098_v23 = vpop.f32.mrf.mxu0  ;;  %v18482_v52 = vpop.f32.mrf.mxu1  ;;  %18653 = vmatprep.subr.mxu1 %v16188_v36 }
 0x331   : > { %11687 = vst.msk [vmem:[#allocation5] sm:$0xff] %vm9237_vm9, %v25399_v2  ;;  %11688 = vst.msk [vmem:[#allocation5 + $0x8] sm:$0xff] %vm9237_vm9, %v25399_v2  ;;  %v7896_v58 = vadd.f32 %v18479_v17, %v7732_v28  ;;  %18654 = vmatpush3.msra.mxu1 %v16188_v36  ;;  %v16205_v36 = vld [vmem:[%s25405_s25 + $0x10] sm:$0xff] }
 0x332   : > { %11689 = vst.msk [vmem:[#allocation5 + $0x10] sm:$0xff] %vm9237_vm9, %v25399_v2  ;;  %11690 = vst.msk [vmem:[#allocation5 + $0x18] sm:$0xff] %vm9237_vm9, %v25399_v2  ;;  %v18459_v53 = vpop.f32.mrf.mxu0  ;;  %v23100_v49 = vpop.f32.mrf.mxu1  ;;  %18681 = vmatprep.subr.mxu0 %v16205_v36 }
 0x333   : > { %11691 = vst.msk [vmem:[#allocation5 + $0x20] sm:$0xff] %vm9237_vm9, %v25399_v2  ;;  %11692 = vst.msk [vmem:[#allocation5 + $0x28] sm:$0xff] %vm9237_vm9, %v25399_v2  ;;  %v7734_v40 = vadd.f32 %v18459_v53, %v23001_v19  ;;  %18682 = vmatpush3.msra.mxu0 %v16205_v36 }
 0x334   : > { %12746 = vst.msk [vmem:[#allocation6] sm:$0xff] %vm9237_vm9, %v25399_v2  ;;  %12747 = vst.msk [vmem:[#allocation6 + $0x8] sm:$0xff] %vm9237_vm9, %v25399_v2  ;;  %v23103_v8 = vpop.f32.mrf.mxu0  ;;  %v18485_v55 = vpop.f32.mrf.mxu1 }
 0x335   : > { %12748 = vst.msk [vmem:[#allocation6 + $0x10] sm:$0xff] %vm9237_vm9, %v25399_v2  ;;  %12749 = vst.msk [vmem:[#allocation6 + $0x18] sm:$0xff] %vm9237_vm9, %v25399_v2  ;;  %v7898_v29 = vadd.f32 %v18482_v52, %v7734_v40 }
 0x336   : > { %13658 = vst.msk [vmem:[#allocation7] sm:$0xff] %vm9237_vm9, %v25399_v2  ;;  %13659 = vst.msk [vmem:[#allocation7 + $0x8] sm:$0xff] %vm9237_vm9, %v25399_v2  ;;  %v18462_v21 = vpop.f32.mrf.mxu0  ;;  %v23105_v24 = vpop.f32.mrf.mxu1 }
 0x337   : > { %13660 = vst.msk [vmem:[#allocation7 + $0x10] sm:$0xff] %vm9237_vm9, %v25399_v2  ;;  %25400 = vst [vmem:[#allocation22_spill] sm:$0xff] %v23095_v18  ;;  %v7736_v35 = vadd.f32 %v18462_v21, %v23007_v5 }
 0x338   : > { %25401 = vst [vmem:[#allocation23_spill] sm:$0xff] %v23098_v23  ;;  %25402 = vst [vmem:[#allocation24_spill] sm:$0xff] %v23100_v49  ;;  %v23111_v17 = vpop.f32.mrf.mxu0  ;;  %v18488_v28 = vpop.f32.mrf.mxu1 }
 0x339   : > { %25403 = vst [vmem:[#allocation31_spill] sm:$0xff] %v23103_v8  ;;  %25404 = vst [vmem:[#allocation88_spill] sm:$0xff] %v23105_v24  ;;  %v7900_v49 = vadd.f32 %v18485_v55, %v7736_v35 }
 0x33a   : > { %v18465_v19 = vpop.f32.mrf.mxu0  ;;  %v23113_v53 = vpop.f32.mrf.mxu1  ;;  %13661 = vst.msk [vmem:[#allocation7 + $0x18] sm:$0x1] %vm9248_vm10, %v25399_v2  ;;  %9249 = vst.msk [vmem:[#allocation3 + $0x50] sm:$0x1] %vm9248_vm10, %v25399_v2 }
 0x33b   : > { %25406 = vst [vmem:[#allocation25_spill] sm:$0xff] %v23113_v53  ;;  %v7738_v52 = vadd.f32 %v18465_v19, %v23013_v15  ;;  %11693 = vst.msk [vmem:[#allocation5 + $0x30] sm:$0x1] %vm9248_vm10, %v25399_v2 }
 0x33c   : > { %v23116_v40 = vpop.f32.mrf.mxu0  ;;  %v18491_v24 = vpop.f32.mrf.mxu1 }
 0x33d   : > { %v7902_v18 = vadd.f32 %v18488_v28, %v7738_v52 }
 0x33e   : > { %v18468_v8 = vpop.f32.mrf.mxu0  ;;  %v23118_v23 = vpop.f32.mrf.mxu1 }
 0x33f   : > { %25407 = vst [vmem:[#allocation17_spill] sm:$0xff] %v23118_v23  ;;  %v7740_v55 = vadd.f32 %v18468_v8, %v23019_v4 }
 0x340   : > { %v23127_v5 = vpop.f32.mrf.mxu0  ;;  %v23129_v15 = vpop.f32.mrf.mxu1 }
 0x341   : > { %25408 = vst [vmem:[#allocation18_spill] sm:$0xff] %v23127_v5  ;;  %v7904_v21 = vadd.f32 %v18491_v24, %v7740_v55 }
 0x342   : > { %v18496_v35 = vpop.f32.mrf.mxu0  ;;  %v23134_v28 = vpop.f32.mrf.mxu1 }
 0x343   : > { %25409 = vst [vmem:[#allocation69_spill] sm:$0xff] %v23134_v28  ;;  %v23137_v19 = vadd.f32 %v18496_v35, %v23025_v22  ;;  %v23155_v22 = vld [vmem:[%s25405_s25] sm:$0xff] }
 0x344   : > { %v23139_v52 = vpop.f32.mrf.mxu0  ;;  %v23141_v4 = vpop.f32.mrf.mxu1  ;;  %25415 = vst [vmem:[#allocation85_spill] sm:$0xff] %v23155_v22  ;;  %18667 = vmatprep.subr.mxu1 %v23155_v22  ;;  %v23185_v22 = vld [vmem:[%s25405_s25 + $0x20] sm:$0xff] }
 0x345   : > { %25410 = vst [vmem:[#allocation47_spill] sm:$0xff] %v23141_v4  ;;  %25425 = vst [vmem:[#allocation56_spill] sm:$0xff] %v23185_v22  ;;  %18709 = vmatprep.subr.mxu0 %v23185_v22 }
 0x346   : > { %v18499_v8 = vpop.f32.mrf.mxu0  ;;  %v23143_v2 = vpop.f32.mrf.mxu1 }
 0x347   : > { %25411 = vst [vmem:[#allocation52_spill] sm:$0xff] %v23143_v2  ;;  %v23146_v24 = vadd.f32 %v18499_v8, %v23031_v50 }
 0x348   : > { %v23148_v55 = vpop.f32.mrf.mxu0  ;;  %v23150_v23 = vpop.f32.mrf.mxu1 }
 0x349   : > { %25412 = vst [vmem:[#allocation53_spill] sm:$0xff] %v23146_v24  ;;  %25413 = vst [vmem:[#allocation36_spill] sm:$0xff] %v23148_v55 }
 0x34a   : > { %25414 = vst [vmem:[#allocation48_spill] sm:$0xff] %v23150_v23  ;;  %v18502_v36 = vpop.f32.mrf.mxu0  ;;  %v23157_v35 = vpop.f32.mrf.mxu1 }
 0x34b   : > { %25416 = vst [vmem:[#allocation42_spill] sm:$0xff] %v23157_v35  ;;  %v23160_v53 = vadd.f32 %v18502_v36, %v7896_v58 }
 0x34c   : > { %v23162_v2 = vpop.f32.mrf.mxu0  ;;  %v23164_v50 = vpop.f32.mrf.mxu1 }
 0x34d   : > { %25417 = vst [vmem:[#allocation43_spill] sm:$0xff] %v23160_v53  ;;  %25418 = vst [vmem:[#allocation26_spill] sm:$0xff] %v23164_v50 }
 0x34e   : > { %v18505_v8 = vpop.f32.mrf.mxu0  ;;  %v23166_v4 = vpop.f32.mrf.mxu1 }
 0x34f   : > { %25419 = vst [vmem:[#allocation80_spill] sm:$0xff] %v23166_v4  ;;  %v23168_v23 = vadd.f32 %v18505_v8, %v7898_v29 }
 0x350   : > { %v23170_v24 = vpop.f32.mrf.mxu0  ;;  %v23172_v5 = vpop.f32.mrf.mxu1 }
 0x351   : > { %25420 = vst [vmem:[#allocation30_spill] sm:$0xff] %v23168_v23  ;;  %25421 = vst [vmem:[#allocation62_spill] sm:$0xff] %v23172_v5 }
 0x352   : > { %v18508_v55 = vpop.f32.mrf.mxu0  ;;  %v23174_v28 = vpop.f32.mrf.mxu1 }
 0x353   : > { %25422 = vst [vmem:[#allocation63_spill] sm:$0xff] %v23174_v28  ;;  %v23176_v35 = vadd.f32 %v18508_v55, %v7900_v49 }
 0x354   : > { %v23178_v58 = vpop.f32.mrf.mxu0  ;;  %v23180_v36 = vpop.f32.mrf.mxu1 }
 0x355   : > { %25423 = vst [vmem:[#allocation65_spill] sm:$0xff] %v23176_v35  ;;  %25424 = vst [vmem:[#allocation66_spill] sm:$0xff] %v23180_v36 }
 0x356   : > { %v18511_v29 = vpop.f32.mrf.mxu0  ;;  %v23187_v8 = vpop.f32.mrf.mxu1 }
 0x357   : > { %25426 = vst [vmem:[#allocation38_spill] sm:$0xff] %v23187_v8  ;;  %v23190_v5 = vadd.f32 %v18511_v29, %v7902_v18 }
 0x358   : > { %v23192_v4 = vpop.f32.mrf.mxu0  ;;  %v23194_v49 = vpop.f32.mrf.mxu1 }
 0x359   : > { %25427 = vst [vmem:[#allocation39_spill] sm:$0xff] %v23190_v5  ;;  %25428 = vst [vmem:[#allocation45_spill] sm:$0xff] %v23192_v4 }
 0x35a   : > { %25429 = vst [vmem:[#allocation49_spill] sm:$0xff] %v23194_v49  ;;  %v18514_v55 = vpop.f32.mrf.mxu0  ;;  %v23196_v28 = vpop.f32.mrf.mxu1 }
 0x35b   : > { %25430 = vst [vmem:[#allocation44_spill] sm:$0xff] %v23196_v28  ;;  %v23198_v36 = vadd.f32 %v18514_v55, %v7904_v21 }
 0x35c   : > { %v23200_v35 = vpop.f32.mrf.mxu0  ;;  %v23202_v50 = vpop.f32.mrf.mxu1 }
 0x35d   : > { %25431 = vst [vmem:[#allocation57_spill] sm:$0xff] %v23198_v36  ;;  %25432 = vst [vmem:[#allocation40_spill] sm:$0xff] %v23200_v35 }
 0x35e   : > { %v23204_v23 = vpop.f32.mrf.mxu0  ;;  %v23206_v8 = vpop.f32.mrf.mxu1 }
 0x35f   : > { %25433 = vst [vmem:[#allocation60_spill] sm:$0xff] %v23206_v8 }
 0x360   : > { %v23208_v22 = vpop.f32.mrf.mxu0  ;;  %v23210_v18 = vpop.f32.mrf.mxu1 }
 0x361   : > { %25434 = vst [vmem:[#allocation81_spill] sm:$0xff] %v23210_v18 }
 0x362   : > { %v23212_v29 = vpop.f32.mrf.mxu0  ;;  %v23214_v49 = vpop.f32.mrf.mxu1 }
 0x363   : > { %25435 = vst [vmem:[#allocation64_spill] sm:$0xff] %v23214_v49  ;;  %v6585_v49 = vadd.f32 %v22790_v56, %v22800_v20 }
 0x364   : > { %v23216_v5 = vpop.f32.mrf.mxu0  ;;  %v23218_v21 = vpop.f32.mrf.mxu1 }
 0x365   : > { %25436 = vst [vmem:[#allocation87_spill] sm:$0xff] %v23218_v21 }
 0x366   : > { %v23220_v55 = vpop.f32.mrf.mxu0  ;;  %v23222_v28 = vpop.f32.mrf.mxu1 }
 0x367   : > { %25437 = vst [vmem:[#allocation46_spill] sm:$0xff] %v23220_v55  ;;  %25438 = vst [vmem:[#allocation67_spill] sm:$0xff] %v23222_v28  ;;  %v6749_v28 = vadd.f32 %v22898_v25, %v6585_v49  ;;  %v6591_v25 = vadd.f32 %v22839_v26, %v22846_v37  ;;  %v6593_v49 = vadd.f32 %v22855_v31, %v22863_v59 }
 0x368   : > { %v23224_v36 = vpop.f32.mrf.mxu0  ;;  %v23226_v35 = vpop.f32.mrf.mxu1  ;;  %v6597_v31 = vadd.f32 %v22882_v9, %v22889_v54 }
 0x369   : > { %25439 = vst [vmem:[#allocation68_spill] sm:$0xff] %v23224_v36  ;;  %25440 = vst [vmem:[#allocation59_spill] sm:$0xff] %v23226_v35  ;;  %v6910_v56 = vadd.f32 %v22893_v27, %v6749_v28  ;;  %v6755_v27 = vadd.f32 %v22925_v32, %v6591_v25  ;;  %v25446_v25 = vld [vmem:[#allocation73_spill] sm:$0xff] }
 0x36a   : > { %v23228_v8 = vpop.f32.mrf.mxu0  ;;  %v23230_v4 = vpop.f32.mrf.mxu1 }
 0x36b   : > { %25441 = vst [vmem:[#allocation71_spill] sm:$0xff] %v23228_v8  ;;  %25442 = vst [vmem:[#allocation72_spill] sm:$0xff] %v23230_v4  ;;  %v6587_v4 = vadd.f32 %v22808_v63, %v22818_v6 }
 0x36c   : > { %v23232_v18 = vpop.f32.mrf.mxu0  ;;  %v23234_v53 = vpop.f32.mrf.mxu1 }
 0x36d   : > { %25443 = vst [vmem:[#allocation58_spill] sm:$0xff] %v23232_v18  ;;  %25444 = vst [vmem:[#allocation34_spill] sm:$0xff] %v23234_v53  ;;  %v6589_v18 = vadd.f32 %v22825_v41, %v22832_v0  ;;  %v6751_v20 = vadd.f32 %v22907_v43, %v6587_v4  ;;  %v7077_v41 = vadd.f32 %v22957_v3, %v6910_v56 }
 0x36e   : > { %v23238_v21 = vpop.f32.mrf.mxu0  ;;  %v23240_v55 = vpop.f32.mrf.mxu1  ;;  %v6595_v0 = vadd.f32 %v22870_v38, %v22877_v13  ;;  %v6757_v43 = vadd.f32 %v22934_v34, %v6593_v49  ;;  %v6916_v34 = vadd.f32 %v22920_v42, %v6755_v27 }
 0x36f   : > { %v6912_v37 = vadd.f32 %v22902_v57, %v6751_v20  ;;  %v7235_v13 = vadd.f32 %v22955_v10, %v7077_v41  ;;  %v6761_v57 = vadd.f32 %v22952_v62, %v6597_v31  ;;  %v25447_v41 = vld [vmem:[#allocation76_spill] sm:$0xff] }
 0x370   : > { %v23243_v36 = vpop.f32.mrf.mxu0  ;;  %v23245_v35 = vpop.f32.mrf.mxu1  ;;  %v6918_v4 = vadd.f32 %v22929_v14, %v6757_v43  ;;  %v7083_v10 = vadd.f32 %v22969_v12, %v6916_v34  ;;  %v25450_v43 = vld [vmem:[#allocation74_spill] sm:$0xff]  ;;  %v25451_v31 = vld [vmem:[#allocation28_spill] sm:$0xff]  ;;  %v25454_v34 = vld [vmem:[#allocation75_spill] sm:$0xff] }
 0x371   : > { %25445 = vst [vmem:[#allocation35_spill] sm:$0xff] %v23245_v35  ;;  %v6753_v35 = vadd.f32 %v22916_v16, %v6589_v18  ;;  %v6759_v16 = vadd.f32 %v22945_v46, %v6595_v0  ;;  %v7079_v32 = vadd.f32 %v22961_v7, %v6912_v37  ;;  %v7399_v46 = vadd.f32 %v22985_v1, %v7235_v13  ;;  %v25448_v0 = vld [vmem:[#allocation50_spill] sm:$0xff]  ;;  %v25453_v13 = vld [vmem:[#allocation37_spill] sm:$0xff] }
 0x372   : > { %v23251_v53 = vpop.f32.mrf.mxu0  ;;  %v23253_v8 = vpop.f32.mrf.mxu1  ;;  %v7085_v7 = vadd.f32 %v22973_v61, %v6918_v4  ;;  %v6922_v62 = vadd.f32 %v22949_v30, %v6761_v57  ;;  %v7241_v61 = vadd.f32 %v22967_v44, %v7083_v10  ;;  %v25455_v57 = vld [vmem:[#allocation27_spill] sm:$0xff] }
 0x373   : > { %v6914_v59 = vadd.f32 %v22911_v33, %v6753_v35  ;;  %v6920_v35 = vadd.f32 %v22939_v47, %v6759_v16  ;;  %v7237_v14 = vadd.f32 %v22959_v11, %v7079_v32  ;;  %v7563_v47 = vadd.f32 %v22983_v60, %v7399_v46  ;;  %v25456_v46 = vld [vmem:[#allocation33_spill] sm:$0xff] }
 0x374   : > { %v23262_v63 = vpop.f32.mrf.mxu0  ;;  %v23264_v6 = vpop.f32.mrf.mxu1  ;;  %v7243_v49 = vadd.f32 %v25446_v25, %v7085_v7  ;;  %v7089_v11 = vadd.f32 %v25447_v41, %v6922_v62  ;;  %v7405_v60 = vadd.f32 %v25451_v31, %v7241_v61  ;;  %v25457_v7 = vld [vmem:[#allocation86_spill] sm:$0xff]  ;;  %v25458_v62 = vld [vmem:[#allocation41_spill] sm:$0xff]  ;;  %v25460_v61 = vld [vmem:[#allocation32_spill] sm:$0xff] }
 0x375   : > { %v7081_v9 = vadd.f32 %v22965_v45, %v6914_v59  ;;  %v7087_v56 = vadd.f32 %v22977_v48, %v6920_v35  ;;  %v7401_v12 = vadd.f32 %v22989_v39, %v7237_v14  ;;  %v25452_v59 = vld [vmem:[#allocation55_spill] sm:$0xff] }
 0x376   : > { %v23271_v28 = vpop.f32.mrf.mxu0  ;;  %v23273_v26 = vpop.f32.mrf.mxu1  ;;  %v7407_v39 = vadd.f32 %v25452_v59, %v7243_v49  ;;  %v7247_v4 = vadd.f32 %v25454_v34, %v7089_v11  ;;  %v25461_v49 = vld [vmem:[#allocation83_spill] sm:$0xff]  ;;  %v25466_v34 = vld [vmem:[#allocation29_spill] sm:$0xff] }
 0x377   : > { %v7239_v45 = vadd.f32 %v22963_v51, %v7081_v9  ;;  %v25449_v51 = vld [vmem:[#allocation84_spill] sm:$0xff]  ;;  %v7245_v37 = vadd.f32 %v25450_v43, %v7087_v56  ;;  %v7565_v44 = vadd.f32 %v25453_v13, %v7401_v12  ;;  %v25459_v56 = vld [vmem:[#allocation54_spill] sm:$0xff]  ;;  %v25462_v41 = vld [vmem:[#allocation23_spill] sm:$0xff] }
 0x378   : > { %v23280_v3 = vpop.f32.mrf.mxu0  ;;  %v23282_v38 = vpop.f32.mrf.mxu1  ;;  %v7727_v48 = vadd.f32 %v25449_v51, %v7563_v47  ;;  %v7569_v47 = vadd.f32 %v25459_v56, %v7405_v60  ;;  %v7571_v25 = vadd.f32 %v25460_v61, %v7407_v39  ;;  %v7411_v12 = vadd.f32 %v25461_v49, %v7247_v4  ;;  %v25463_v43 = vld [vmem:[#allocation51_spill] sm:$0xff]  ;;  %v25465_v60 = vld [vmem:[#allocation21_spill] sm:$0xff]  ;;  %v25471_v61 = vld [vmem:[#allocation88_spill] sm:$0xff] }
 0x379   : > { %v7403_v30 = vadd.f32 %v25448_v0, %v7239_v45  ;;  %v7409_v35 = vadd.f32 %v25456_v46, %v7245_v37  ;;  %v7729_v45 = vadd.f32 %v25458_v62, %v7565_v44  ;;  %v25464_v31 = vld [vmem:[#allocation31_spill] sm:$0xff]  ;;  %v8221_v44 = vadd.f32 %v23129_v15, %v23137_v19  ;;  %v25472_v19 = vld [vmem:[#allocation18_spill] sm:$0xff] }
 0x37a   : > { %v23290_v54 = vpop.f32.mrf.mxu0  ;;  %v23292_v33 = vpop.f32.mrf.mxu1  ;;  %v7891_v14 = vadd.f32 %v25457_v7, %v7727_v48  ;;  %v7733_v48 = vadd.f32 %v25464_v31, %v7569_v47  ;;  %v7735_v59 = vadd.f32 %v23111_v17, %v7571_v25  ;;  %v7575_v4 = vadd.f32 %v25466_v34, %v7411_v12 }
 0x37b   : > { %v7567_v9 = vadd.f32 %v25455_v57, %v7403_v30  ;;  %v7573_v37 = vadd.f32 %v25463_v43, %v7409_v35  ;;  %v7893_v39 = vadd.f32 %v25465_v60, %v7729_v45  ;;  %v25467_v57 = vld [vmem:[#allocation22_spill] sm:$0xff]  ;;  %v25468_v35 = vld [vmem:[#allocation69_spill] sm:$0xff]  ;;  %v8385_v17 = vadd.f32 %v23204_v23, %v8221_v44  ;;  %v25470_v45 = vld [vmem:[#allocation24_spill] sm:$0xff] }
 0x37c   : > { %v23298_v18 = vpop.f32.mrf.mxu0  ;;  %v23300_v42 = vpop.f32.mrf.mxu1  ;;  %v8052_v11 = vadd.f32 %v23139_v52, %v7891_v14  ;;  %v25469_v14 = vld [vmem:[#allocation36_spill] sm:$0xff]  ;;  %v7897_v47 = vadd.f32 %v25470_v45, %v7733_v48  ;;  %v7899_v15 = vadd.f32 %v25471_v61, %v7735_v59  ;;  %v7739_v25 = vadd.f32 %v25472_v19, %v7575_v4  ;;  %v25475_v23 = vld [vmem:[#allocation25_spill] sm:$0xff] }
 0x37d   : > { %v7731_v0 = vadd.f32 %v25462_v41, %v7567_v9  ;;  %v7737_v52 = vadd.f32 %v23116_v40, %v7573_v37  ;;  %v8054_v62 = vadd.f32 %v25469_v14, %v7893_v39  ;;  %v23367_v40 = vld [vmem:[#allocation3] sm:$0xff]  ;;  %v25476_v60 = vld [vmem:[#allocation52_spill] sm:$0xff] }
 0x37e   : > { %v23306_v20 = vpop.f32.mrf.mxu0  ;;  %v23310_v1 = vpop.f32.mrf.mxu1  ;;  %v8220_v7 = vadd.f32 %v25468_v35, %v8052_v11  ;;  %v25473_v41 = vld [vmem:[#allocation53_spill] sm:$0xff]  ;;  %v8058_v31 = vadd.f32 %v23170_v24, %v7897_v47  ;;  %v8060_v48 = vadd.f32 %v23178_v58, %v7899_v15  ;;  %v9290_v4 = vrot.slane %v23367_v40, 1  ;;  %v25480_v24 = vld [vmem:[#allocation42_spill] sm:$0xff]  ;;  %v25485_v19 = vld [vmem:[#allocation80_spill] sm:$0xff] }
 0x37f   : > { %v7895_v9 = vadd.f32 %v25467_v57, %v7731_v0  ;;  %v25474_v0 = vld [vmem:[#allocation47_spill] sm:$0xff]  ;;  %v7901_v37 = vadd.f32 %v25475_v23, %v7737_v52  ;;  %v8222_v39 = vadd.f32 %v25476_v60, %v8054_v62  ;;  %v25477_v57 = vld [vmem:[#allocation17_spill] sm:$0xff]  ;;  %v25479_v52 = vld [vmem:[#allocation48_spill] sm:$0xff] }
 0x380   : > { %v23316_v27 = vpop.f32.mrf.mxu0  ;;  %v23325_v32 = vpop.f32.mrf.mxu1  ;;  %v8223_v11 = vadd.f32 %v25474_v0, %v25473_v41  ;;  %v8384_v43 = vadd.f32 %v23208_v22, %v8220_v7  ;;  %v7903_v22 = vadd.f32 %v25477_v57, %v7739_v25  ;;  %v25481_v58 = vld [vmem:[#allocation45_spill] sm:$0xff]  ;;  %v25482_v62 = vld [vmem:[#allocation30_spill] sm:$0xff]  ;;  %v8226_v25 = vadd.f32 %v25485_v19, %v8058_v31  ;;  %v25488_v23 = vld [vmem:[#allocation63_spill] sm:$0xff] }
 0x381   : > { %v8056_v49 = vadd.f32 %v23162_v2, %v7895_v9  ;;  %v8548_v2 = vadd.f32 %v23202_v50, %v8385_v17  ;;  %v25478_v9 = vld [vmem:[#allocation43_spill] sm:$0xff]  ;;  %v8062_v14 = vadd.f32 %v25481_v58, %v7901_v37  ;;  %v25483_v47 = vld [vmem:[#allocation26_spill] sm:$0xff]  ;;  %v25484_v17 = vld [vmem:[#allocation60_spill] sm:$0xff]  ;;  %v8386_v61 = vadd.f32 %v23216_v5, %v8222_v39 }
 0x382   : > { %v23322_v16 = vpop.f32.mrf.mxu0  ;;  %v23341_v30 = vpop.f32.mrf.mxu1  ;;  %v8387_v44 = vadd.f32 %v23212_v29, %v8223_v11  ;;  %v8225_v35 = vadd.f32 %v25479_v52, %v25478_v9  ;;  %v8227_v50 = vadd.f32 %v25483_v47, %v25482_v62  ;;  %v8547_v29 = vadd.f32 %v25484_v17, %v8384_v43  ;;  %v25486_v41 = vld [vmem:[#allocation65_spill] sm:$0xff]  ;;  %v25487_v0 = vld [vmem:[#allocation62_spill] sm:$0xff]  ;;  %v25490_v9 = vld [vmem:[#allocation39_spill] sm:$0xff] }
 0x383   : > { %v8224_v7 = vadd.f32 %v25480_v24, %v8056_v49  ;;  %v8706_v15 = vadd.f32 %v23290_v54, %v8548_v2  ;;  %v8229_v11 = vadd.f32 %v25487_v0, %v25486_v41  ;;  %v8228_v49 = vadd.f32 %v25488_v23, %v8060_v48  ;;  %v25489_v60 = vld [vmem:[#allocation46_spill] sm:$0xff]  ;;  %v25492_v58 = vld [vmem:[#allocation40_spill] sm:$0xff]  ;;  %v25493_v62 = vld [vmem:[#allocation81_spill] sm:$0xff] }
 0x384   : > { %v23330_v10 = vpop.f32.mrf.mxu0  ;;  %v23359_v56 = vpop.f32.mrf.mxu1  ;;  %v8389_v37 = vadd.f32 %v25489_v60, %v8225_v35  ;;  %v25491_v52 = vld [vmem:[#allocation66_spill] sm:$0xff]  ;;  %v8064_v43 = vadd.f32 %v25492_v58, %v7903_v22  ;;  %v8550_v5 = vadd.f32 %v25493_v62, %v8387_v44  ;;  %v8705_v54 = vadd.f32 %v23298_v18, %v8547_v29  ;;  %v25495_v47 = vld [vmem:[#allocation57_spill] sm:$0xff]  ;;  %v25497_v19 = vld [vmem:[#allocation68_spill] sm:$0xff] }
 0x385   : > { %v8231_v24 = vadd.f32 %v25491_v52, %v25490_v9  ;;  %v25494_v31 = vld [vmem:[#allocation38_spill] sm:$0xff]  ;;  %v25496_v17 = vld [vmem:[#allocation49_spill] sm:$0xff]  ;;  %v8388_v35 = vadd.f32 %v25497_v19, %v8224_v7  ;;  %v25498_v41 = vld [vmem:[#allocation71_spill] sm:$0xff]  ;;  %v8870_v44 = vadd.f32 %v23282_v38, %v8706_v15  ;;  %v8392_v62 = vadd.f32 %v23243_v36, %v8228_v49 }
 0x386   : > { %v23338_v51 = vpop.f32.mrf.mxu0  ;;  %v23380_v34 = vpop.f32.mrf.mxu1  ;;  %v8230_v2 = vadd.f32 %v25494_v31, %v8062_v14  ;;  %v8233_v48 = vadd.f32 %v25496_v17, %v25495_v47  ;;  %v8391_v0 = vadd.f32 %v25498_v41, %v8227_v50  ;;  %v25499_v60 = vld [vmem:[#allocation64_spill] sm:$0xff]  ;;  %v25500_v22 = vld [vmem:[#allocation58_spill] sm:$0xff]  ;;  %v8708_v18 = vadd.f32 %v23306_v20, %v8550_v5  ;;  %v25501_v29 = vld [vmem:[#allocation87_spill] sm:$0xff] }
 0x387   : > { %v8549_v9 = vadd.f32 %v25499_v60, %v8386_v61  ;;  %v8390_v52 = vadd.f32 %v25500_v22, %v8226_v25  ;;  %v8552_v58 = vadd.f32 %v25501_v29, %v8389_v37  ;;  %v8393_v14 = vadd.f32 %v23238_v21, %v8229_v11  ;;  %v23427_v50 = vld [vmem:[%s25502_s23] ss:$0 sm:$0xff]  ;;  %v25504_v5 = vld [vmem:[#allocation67_spill] sm:$0xff] }
 0x388   : > { %v23346_v13 = vpop.f32.mrf.mxu0  ;;  %v23407_v39 = vpop.f32.mrf.mxu1  ;;  %v8395_v7 = vadd.f32 %v23251_v53, %v8231_v24  ;;  %v25503_v61 = vld [vmem:[#allocation44_spill] sm:$0xff]  ;;  %v8869_v38 = vadd.f32 %v23292_v33, %v8705_v54  ;;  %v8551_v21 = vadd.f32 %v25504_v5, %v8388_v35  ;;  %v25505_v11 = vld [vmem:[#allocation59_spill] sm:$0xff]  ;;  %v8394_v53 = vadd.f32 %v23262_v63, %v8230_v2  ;;  %v25507_v54 = vld [vmem:[#allocation34_spill] sm:$0xff] }
 0x389   : > { %v8232_v25 = vadd.f32 %v25503_v61, %v8064_v43  ;;  %v8707_v20 = vadd.f32 %v23316_v27, %v8549_v9  ;;  %v8554_v36 = vadd.f32 %v25505_v11, %v8391_v0  ;;  %v8710_v49 = vadd.f32 %v23322_v16, %v8552_v58  ;;  %v25506_v47 = vld [vmem:[#allocation72_spill] sm:$0xff]  ;;  %v25508_v60 = vld [vmem:[#allocation35_spill] sm:$0xff] }
 0x38a   : > { %v23354_v46 = vpop.f32.mrf.mxu0  ;;  %v8840_v15 = vpop.f32.mrf.mxu1  ;;  %v8553_v17 = vadd.f32 %v25506_v47, %v8390_v52  ;;  %v8872_v19 = vadd.f32 %v23300_v42, %v8708_v18  ;;  %v8556_v27 = vadd.f32 %v25507_v54, %v8393_v14  ;;  %v8555_v41 = vadd.f32 %v23240_v55, %v8392_v62 }
 0x38b   : > { %v8558_v35 = vadd.f32 %v25508_v60, %v8395_v7  ;;  %v8709_v0 = vadd.f32 %v23330_v10, %v8551_v21  ;;  %v8397_v63 = vadd.f32 %v23271_v28, %v8233_v48  ;;  %v8871_v16 = vadd.f32 %v23310_v1, %v8707_v20 }
 0x38c   : > { %v23365_v12 = vpop.f32.mrf.mxu0  ;;  %v18626_v2 = vpop.f32.mrf.mxu1  ;;  %v8557_v52 = vadd.f32 %v23253_v8, %v8394_v53  ;;  %v8874_v55 = vadd.f32 %v23325_v32, %v8710_v49  ;;  %v8712_v18 = vadd.f32 %v23338_v51, %v8554_v36  ;;  %v8711_v14 = vadd.f32 %v23346_v13, %v8553_v17 }
 0x38d   : > { %v8873_v48 = vadd.f32 %v23341_v30, %v8709_v0  ;;  %v8714_v62 = vadd.f32 %v23354_v46, %v8556_v27  ;;  %v8713_v8 = vadd.f32 %v23365_v12, %v8555_v41 }
 0x38e   : > { %v23375_v59 = vpop.f32.mrf.mxu0  ;;  %v8850_v7 = vpop.f32.mrf.mxu1  ;;  %v8876_v5 = vadd.f32 %v23359_v56, %v8712_v18  ;;  %v8875_v21 = vadd.f32 %v23380_v34, %v8711_v14 }
 0x38f   : > { %v8716_v32 = vadd.f32 %v23375_v59, %v8558_v35  ;;  %v8878_v11 = vadd.f32 %v23407_v39, %v8714_v62  ;;  %v8877_v36 = vadd.f32 %v8840_v15, %v8713_v8 }
 0x390   : > { %v23388_v45 = vpop.f32.mrf.mxu0 }
 0x391   : > { %v8715_v30 = vadd.f32 %v23388_v45, %v8557_v52  ;;  %v8880_v53 = vadd.f32 %v18626_v2, %v8716_v32 }
 0x392   : > { %v23400_v57 = vpop.f32.mrf.mxu0 }
 0x393   : > { %v23473_v34 = vadd.f32 %v8850_v7, %v8715_v30 }
 0x394   : > { %v23414_v23 = vpop.f32.mrf.mxu0 }
 0x396   : > { %v18634_v31 = vpop.f32.mrf.mxu0 }
 0x397   : > { %v9034_v37 = vadd.f32 %v18634_v31, %v8870_v44  ;;  %v8396_v44 = vadd.f32 %v23280_v3, %v8232_v25  ;;  %v8560_v25 = vadd.f32 %v23264_v6, %v8397_v63 }
 0x398   : > { %v8964_v24 = vpop.f32.mrf.mxu0 }
 0x399   : > { %v9055_v43 = vadd.f32 %v23427_v50, %v9034_v37  ;;  %v9033_v33 = vadd.f32 %v8964_v24, %v8869_v38  ;;  %v8559_v38 = vadd.f32 %v23273_v26, %v8396_v44  ;;  %v18629_v26 = vpop.f32.mrf.mxu1  ;;  %v8718_v47 = vadd.f32 %v23400_v57, %v8560_v25 }
 0x39a   : > { %v18637_v9 = vpop.f32.mrf.mxu0 }
 0x39b   : > { %v23446_v22 = vadd.f32 %v23427_v50, %v9033_v33  ;;  %v9036_v42 = vadd.f32 %v18637_v9, %v8872_v19  ;;  %v9081_v10 = vrot.slane %v9055_v43, 1  ;;  %v8717_v27 = vadd.f32 %v23414_v23, %v8559_v38  ;;  %v8860_v9 = vpop.f32.mrf.mxu1 }
 0x39c   : > { %v8974_v29 = vpop.f32.mrf.mxu0  ;;  %v23482_v2 = vadd.f32 %v18629_v26, %v8718_v47 }
 0x39d   : > { %v9080_v58 = vrot.slane %v23446_v22, 1  ;;  %v9057_v28 = vadd.f32 %v23427_v50, %v9036_v42  ;;  %v9035_v1 = vadd.f32 %v8974_v29, %v8871_v16 }
 0x39e   : > { %v18640_v3 = vpop.f32.mrf.mxu0 }
 0x39f   : > { %v9082_v51 = vsel %vm736_vm2, %v9080_v58, %v9081_v10  ;;  %v9056_v31 = vadd.f32 %v23427_v50, %v9035_v1  ;;  %v9038_v61 = vadd.f32 %v18640_v3, %v8874_v55  ;;  %v9085_v20 = vrot.slane %v9057_v28, 1 }
 0x3a0   : > { %v9115_v13 = vmax.f32 %v23446_v22, %v9082_v51  ;;  %v8984_v46 = vpop.f32.mrf.mxu0 }
 0x3a1   : > { %v9083_v12 = vrot.slane %v9056_v31, 1  ;;  %v9059_v37 = vadd.f32 %v23427_v50, %v9038_v61  ;;  %v9037_v59 = vadd.f32 %v8984_v46, %v8873_v48 }
 0x3a2   : > { %v18643_v6 = vpop.f32.mrf.mxu0 }
 0x3a3   : > { %v9084_v45 = vsel %vm736_vm2, %v9081_v10, %v9083_v12  ;;  %v9086_v49 = vsel %vm736_vm2, %v9083_v12, %v9085_v20  ;;  %v9058_v24 = vadd.f32 %v23427_v50, %v9037_v59  ;;  %v9040_v56 = vadd.f32 %v18643_v6, %v8876_v5 }
 0x3a4   : > { %v9116_v17 = vmax.f32 %v9055_v43, %v9084_v45  ;;  %v9117_v19 = vmax.f32 %v9056_v31, %v9086_v49  ;;  %v8994_v33 = vpop.f32.mrf.mxu0  ;;  %v9089_v39 = vrot.slane %v9059_v37, 1  ;;  %v8881_v10 = vadd.f32 %v8860_v9, %v8717_v27 }
 0x3a5   : > { %v9087_v15 = vrot.slane %v9058_v24, 1  ;;  %v9039_v54 = vadd.f32 %v8994_v33, %v8875_v21  ;;  %v23477_v35 = vadd.f32 %v23427_v50, %v9040_v56 }
 0x3a6   : > { %v9152_v41 = vrot.slane %v9116_v17, 6  ;;  %v9153_v60 = vrot.slane %v9117_v19, 6  ;;  %v18646_v0 = vpop.f32.mrf.mxu0 }
 0x3a7   : > { %v9088_v57 = vsel %vm736_vm2, %v9085_v20, %v9087_v15  ;;  %v9090_v43 = vsel %vm736_vm2, %v9087_v15, %v9089_v39  ;;  %v9060_v63 = vadd.f32 %v23427_v50, %v9039_v54  ;;  %v9042_v16 = vadd.f32 %v18646_v0, %v8878_v11 }
 0x3a8   : > { %v9154_v23 = vsel %vm25012_vm5, %v9152_v41, %v9153_v60  ;;  %v9118_v22 = vmax.f32 %v9057_v28, %v9088_v57  ;;  %v9119_v42 = vmax.f32 %v9058_v24, %v9090_v43  ;;  %v9004_v52 = vpop.f32.mrf.mxu0  ;;  %v9093_v55 = vrot.slane %v23477_v35, 1 }
 0x3a9   : > { %v9189_v44 = vmax.f32 %v9115_v13, %v9154_v23  ;;  %v9091_v18 = vrot.slane %v9060_v63, 1  ;;  %v23487_v29 = vadd.f32 %v23427_v50, %v9042_v16  ;;  %v9041_v48 = vadd.f32 %v9004_v52, %v8877_v36 }
 0x3aa   : > { %v9155_v58 = vrot.slane %v9118_v22, 6  ;;  %v9157_v1 = vrot.slane %v9119_v42, 6  ;;  %v18649_v14 = vpop.f32.mrf.mxu0  ;;  %v9549_v41 = vrot.slane %v23367_v40, 2 }
 0x3ab   : > { %vm9201_vm14 = vcmp.gt.f32.partialorder %v9189_v44, 0.0  ;;  %v9213_v62 = vmul.f32 0.01, %v9189_v44  ;;  %v9092_v8 = vsel %vm736_vm2, %v9089_v39, %v9091_v18  ;;  %v9094_v28 = vsel %vm736_vm2, %v9091_v18, %v9093_v55 }
 0x3ac   : > { %v9156_v3 = vsel %vm25012_vm5, %v9153_v60, %v9155_v58  ;;  %v9158_v32 = vsel %vm25012_vm5, %v9155_v58, %v9157_v1  ;;  %v9120_v7 = vmax.f32 %v9059_v37, %v9092_v8  ;;  %v9121_v51 = vmax.f32 %v9060_v63, %v9094_v28  ;;  %v9014_v31 = vpop.f32.mrf.mxu0 }
 0x3ad   : > { %v9225_v61 = vsel %vm9201_vm14, %v9189_v44, %v9213_v62  ;;  %v9190_v25 = vmax.f32 %v9116_v17, %v9156_v3  ;;  %v9191_v38 = vmax.f32 %v9117_v19, %v9158_v32  ;;  %v9097_v30 = vrot.slane %v23487_v29, 1 }
 0x3ae   : > { %9251 = vst.msk [vmem:[#allocation3 + $0xa] sm:$0x7f] %vm9250_vm11, %v9225_v61  ;;  %v9159_v13 = vrot.slane %v9120_v7, 6  ;;  %v9161_v46 = vrot.slane %v9121_v51, 6  ;;  %v9062_v20 = vadd.f32 %v23427_v50, %v9041_v48  ;;  %v9044_v12 = vadd.f32 %v18649_v14, %v8880_v53  ;;  %v18652_v59 = vpop.f32.mrf.mxu0 }
 0x3af   : > { %vm9202_vm8 = vcmp.gt.f32.partialorder %v9190_v25, 0.0  ;;  %vm9203_vm6 = vcmp.gt.f32.partialorder %v9191_v38, 0.0  ;;  %v9214_v5 = vmul.f32 0.01, %v9190_v25  ;;  %v9215_v21 = vmul.f32 0.01, %v9191_v38 }
 0x3b0   : > { %v9160_v37 = vsel %vm25012_vm5, %v9157_v1, %v9159_v13  ;;  %v9162_v11 = vsel %vm25012_vm5, %v9159_v13, %v9161_v46  ;;  %v9095_v36 = vrot.slane %v9062_v20, 1  ;;  %v23499_v6 = vadd.f32 %v23427_v50, %v9044_v12  ;;  %v9024_v56 = vpop.f32.mrf.mxu0 }
 0x3b1   : > { %v9226_v26 = vsel %vm9202_vm8, %v9190_v25, %v9214_v5  ;;  %v9227_v45 = vsel %vm9203_vm6, %v9191_v38, %v9215_v21  ;;  %v9192_v49 = vmax.f32 %v9118_v22, %v9160_v37  ;;  %v9193_v24 = vmax.f32 %v9119_v42, %v9162_v11 }
 0x3b2   : > { %9253 = vst.msk [vmem:[#allocation3 + $0xd] sm:$0xc0] %vm25011_vm12, %v9226_v26  ;;  %v9096_v53 = vsel %vm736_vm2, %v9093_v55, %v9095_v36  ;;  %v9098_v47 = vsel %vm736_vm2, %v9095_v36, %v9097_v30  ;;  %v23506_v17 = vrot.slane %v23499_v6, 1  ;;  %v9043_v19 = vadd.f32 %v9014_v31, %v23473_v34 }
 0x3b3   : > { %9255 = vst.msk [vmem:[#allocation3 + $0x15] sm:$0x1f] %vm9254_vm13, %v9227_v45  ;;  %vm9204_vm14 = vcmp.gt.f32.partialorder %v9192_v49, 0.0  ;;  %vm9205_vm7 = vcmp.gt.f32.partialorder %v9193_v24, 0.0  ;;  %v9216_v33 = vmul.f32 0.01, %v9192_v49  ;;  %v9122_v15 = vmax.f32 %v23477_v35, %v9096_v53 }
 0x3b4   : > { %v9217_v39 = vmul.f32 0.01, %v9193_v24  ;;  %vm9260_vm6 = vcmask 64514   ;;  %v9123_v54 = vmax.f32 %v9062_v20, %v9098_v47  ;;  %v9064_v27 = vadd.f32 %v23427_v50, %v9043_v19 }
 0x3b5   : > { %v9228_v60 = vsel %vm9204_vm14, %v9192_v49, %v9216_v33  ;;  %v9046_v9 = vadd.f32 %v18652_v59, %v23482_v2  ;;  %v9045_v57 = vadd.f32 %v9024_v56, %v8881_v10  ;;  %v23513_v43 = vld [vmem:[#allocation3 + $0x8] sm:$0xff]  ;;  %v9163_v34 = vrot.slane %v9122_v15, 6 }
 0x3b6   : > { %v9229_v0 = vsel %vm9205_vm7, %v9193_v24, %v9217_v39  ;;  %v9165_v63 = vrot.slane %v9123_v54, 6  ;;  %v9099_v16 = vrot.slane %v9064_v27, 1  ;;  %9257 = vst.msk [vmem:[#allocation3 + $0x18] sm:$0xf0] %vm9256_vm1, %v9228_v60  ;;  %v9291_v35 = vrot.slane %v23513_v43, 1 }
 0x3b7   : > { %9259 = vst.msk [vmem:[#allocation3 + $0x20] sm:$0x7] %vm9258_vm15, %v9229_v0  ;;  %v9126_v23 = vmax.f32 %v23499_v6, %v23506_v17  ;;  %v9067_v22 = vadd.f32 %v23427_v50, %v9046_v9  ;;  %v9066_v42 = vadd.f32 %v23427_v50, %v9045_v57  ;;  %v9550_v2 = vrot.slane %v23513_v43, 2  ;;  %v25509_v0 = vld [vmem:[#allocation85_spill] sm:$0xff]  ;;  %v16241_v9 = vld [vmem:[%s25405_s25 + $0x30] sm:$0xff] }
 0x3b8   : > { %v9164_v52 = vsel %vm25012_vm5, %v9161_v46, %v9163_v34  ;;  %v9166_v44 = vsel %vm25012_vm5, %v9163_v34, %v9165_v63  ;;  %v9100_v55 = vsel %vm736_vm2, %v9097_v30, %v9099_v16  ;;  %v9102_v18 = vsel %vm736_vm2, %v9099_v16, %v23506_v17 }
 0x3b9   : > { %v9194_v10 = vmax.f32 %v9120_v7, %v9164_v52  ;;  %v9195_v58 = vmax.f32 %v9121_v51, %v9166_v44  ;;  %v9124_v1 = vmax.f32 %v23487_v29, %v9100_v55  ;;  %v9125_v48 = vmax.f32 %v9064_v27, %v9102_v18 }
 0x3ba   : > { %v9131_v14 = vrot.slane %v9067_v22, 1  ;;  %v9129_v62 = vrot.slane %v9066_v42, 1  ;;  %v9292_v50 = vsel %vm736_vm2, %v9290_v4, %v9291_v35  ;;  %v9551_v8 = vsel %vm1099_vm4, %v9549_v41, %v9550_v2  ;;  %v23537_v31 = vld [vmem:[#allocation3 + $0x10] sm:$0xff] }
 0x3bb   : > { %vm9206_vm7 = vcmp.gt.f32.partialorder %v9194_v10, 0.0  ;;  %vm9207_vm8 = vcmp.gt.f32.partialorder %v9195_v58, 0.0  ;;  %v9218_v28 = vmul.f32 0.01, %v9194_v10  ;;  %v9219_v3 = vmul.f32 0.01, %v9195_v58  ;;  %18655 = vmatprep.mubr.msk.f32.mxu1 %vm9237_vm9, %v9292_v50  ;;  %18683 = vmatprep.mubr.msk.f32.mxu0 %vm9237_vm9, %v9551_v8 }
 0x3bc   : > { %v9167_v32 = vrot.slane %v9124_v1, 6  ;;  %v9169_v7 = vrot.slane %v9125_v48, 6  ;;  %v9138_v29 = vmax.f32 %v9067_v22, %v9131_v14  ;;  %v9130_v51 = vsel %vm736_vm2, %v23506_v17, %v9129_v62 }
 0x3bd   : > { %v9230_v61 = vsel %vm9206_vm7, %v9194_v10, %v9218_v28  ;;  %v9231_v4 = vsel %vm9207_vm8, %v9195_v58, %v9219_v3  ;;  %v9132_v25 = vsel %vm736_vm2, %v9129_v62, %v9131_v14  ;;  %v9136_v38 = vmax.f32 %v23499_v6, %v9130_v51  ;;  %v23541_v30 = vld [vmem:[#allocation3 + $0x18] sm:$0xff] }
 0x3be   : > { %9261 = vst.msk [vmem:[#allocation3 + $0x23] sm:$0xfc] %vm9260_vm6, %v9230_v61  ;;  %v9168_v13 = vsel %vm25012_vm5, %v9165_v63, %v9167_v32  ;;  %v9170_v46 = vsel %vm25012_vm5, %v9167_v32, %v9169_v7  ;;  %v9175_v20 = vrot.slane %v9138_v29, 6  ;;  %v9137_v12 = vmax.f32 %v9066_v42, %v9132_v25  ;;  %v16232_v61 = vld [vmem:[%s25405_s25 + $0x28] sm:$0xff] }
 0x3bf   : > { %9262 = vst.msk [vmem:[#allocation3 + $0x2b] sm:$0x1] %vm9248_vm10, %v9231_v4  ;;  %v9196_v59 = vmax.f32 %v9122_v15, %v9168_v13  ;;  %v9197_v5 = vmax.f32 %v9123_v54, %v9170_v46  ;;  %v9171_v21 = vrot.slane %v9136_v38, 6  ;;  %v9293_v37 = vrot.slane %v23537_v31, 1  ;;  %v16214_v15 = vld [vmem:[%s25405_s25 + $0x18] sm:$0xff]  ;;  %v23664_v46 = vld [vmem:[#allocation3 + $0x48] sm:$0xff] }
 0x3c0   : > { %v9173_v11 = vrot.slane %v9137_v12, 6  ;;  %v9552_v36 = vrot.slane %v23537_v31, 2  ;;  %v9295_v6 = vrot.slane %v23541_v30, 1  ;;  %v9554_v26 = vrot.slane %v23541_v30, 2  ;;  %v16250_v13 = vld [vmem:[%s25405_s25 + $0x38] sm:$0xff] }
 0x3c1   : > { %vm9208_vm14 = vcmp.gt.f32.partialorder %v9196_v59, 0.0  ;;  %vm9209_vm7 = vcmp.gt.f32.partialorder %v9197_v5, 0.0  ;;  %v9220_v45 = vmul.f32 0.01, %v9196_v59  ;;  %v9221_v49 = vmul.f32 0.01, %v9197_v5 }
 0x3c2   : > { %v9172_v24 = vsel %vm25012_vm5, %v9169_v7, %v9171_v21  ;;  %v9174_v53 = vsel %vm25012_vm5, %v9171_v21, %v9173_v11  ;;  %v9176_v47 = vsel %vm25012_vm5, %v9173_v11, %v9175_v20  ;;  %v23555_v17 = vsel %vm736_vm2, %v9291_v35, %v9293_v37 }
 0x3c3   : > { %v9232_v19 = vsel %vm9208_vm14, %v9196_v59, %v9220_v45  ;;  %v9233_v56 = vsel %vm9209_vm7, %v9197_v5, %v9221_v49  ;;  %v9198_v33 = vmax.f32 %v9124_v1, %v9172_v24  ;;  %v9199_v39 = vmax.f32 %v9125_v48, %v9174_v53  ;;  %18656 = vmatmul.mubr.msk.f32.vlgmr.msra.gmra.mxu1 %vm9237_vm9, %v23555_v17 }
 0x3c4   : > { %9263 = vst.msk [vmem:[#allocation3 + $0x2e] sm:$0x7f] %vm9250_vm11, %v9232_v19  ;;  %v9200_v54 = vmax.f32 %v9126_v23, %v9176_v47  ;;  %v9553_v27 = vsel %vm1099_vm4, %v9550_v2, %v9552_v36  ;;  %v23566_v41 = vsel %vm736_vm2, %v9293_v37, %v9295_v6  ;;  %v23569_v60 = vsel %vm1099_vm4, %v9552_v36, %v9554_v26  ;;  %v25510_v2 = vld [vmem:[#allocation56_spill] sm:$0xff] }
 0x3c5   : > { %9264 = vst.msk [vmem:[#allocation3 + $0x31] sm:$0xc0] %vm25011_vm12, %v9233_v56  ;;  %18668 = vmatpush3.msra.mxu1 %v25509_v0  ;;  %vm9210_vm8 = vcmp.gt.f32.partialorder %v9198_v33, 0.0  ;;  %vm9211_vm14 = vcmp.gt.f32.partialorder %v9199_v39, 0.0  ;;  %v9222_v57 = vmul.f32 0.01, %v9198_v33  ;;  %18684 = vmatmul.mubr.msk.f32.vlgmr.msra.gmra.mxu0 %vm9237_vm9, %v9553_v27 }
 0x3c6   : > { %v9223_v34 = vmul.f32 0.01, %v9199_v39  ;;  %18658 = vmatprep.mubr.msk.f32.mxu1 %vm9237_vm9, %v23566_v41  ;;  %vm9212_vm11 = vcmp.gt.f32.partialorder %v9200_v54, 0.0  ;;  %v9224_v63 = vmul.f32 0.01, %v9200_v54  ;;  %18686 = vmatprep.mubr.msk.f32.mxu0 %vm9237_vm9, %v23569_v60  ;;  %v23580_v16 = vld [vmem:[#allocation3 + $0x20] sm:$0xff] }
 0x3c7   : > { %18695 = vmatprep.subr.mxu1 %v16214_v15  ;;  %v9234_v35 = vsel %vm9210_vm8, %v9198_v33, %v9222_v57  ;;  %v9297_v22 = vrot.slane %v23580_v16, 1  ;;  %v9556_v42 = vrot.slane %v23580_v16, 2  ;;  %18710 = vmatpush3.msra.mxu0 %v25510_v2  ;;  %v10085_v12 = vrot.slane %v23664_v46, 2 }
 0x3c8   : > { %v9235_v23 = vsel %vm9211_vm14, %v9199_v39, %v9223_v34  ;;  %v9236_v52 = vsel %vm9212_vm11, %v9200_v54, %v9224_v63  ;;  %9265 = vst.msk [vmem:[#allocation3 + $0x39] sm:$0x1f] %vm9254_vm13, %v9234_v35  ;;  %18737 = vmatprep.subr.mxu0 %v16241_v9  ;;  %v9939_v21 = vrot.slane %v23537_v31, 3  ;;  %v10329_v37 = vrot.slane %v23541_v30, 4  ;;  %v9278_v39 = vld [vmem:[#allocation3 + $0x50] sm:$0x1] }
 0x3c9   : > { %9266 = vst.msk [vmem:[#allocation3 + $0x3c] sm:$0xf0] %vm9256_vm1, %v9235_v23  ;;  %v9298_v44 = vsel %vm736_vm2, %v9295_v6, %v9297_v22  ;;  %v9557_v55 = vsel %vm1099_vm4, %v9554_v26, %v9556_v42  ;;  %v9938_v11 = vrot.slane %v23513_v43, 3  ;;  %v10328_v36 = vrot.slane %v23537_v31, 4 }
 0x3ca   : > { %9267 = vst.msk [vmem:[#allocation3 + $0x44] sm:$0x7] %vm9258_vm15, %v9236_v52  ;;  %18659 = vmatmul.mubr.msk.f32.gmra.mxu1 %vm9237_vm9, %v9298_v44  ;;  %18687 = vmatmul.mubr.msk.f32.gmra.mxu0 %vm9237_vm9, %v9557_v55  ;;  %v9941_v6 = vrot.slane %v23541_v30, 3  ;;  %v10331_v26 = vrot.slane %v23580_v16, 4  ;;  %v9943_v24 = vrot.slane %v23580_v16, 3  ;;  %v10341_v57 = vrot.slane %v23664_v46, 4 }
 0x3cb   : > { %v23592_v18 = vld [vmem:[#allocation3 + $0x28] sm:$0xff]  ;;  %v9940_v45 = vsel %vm25009_vm3, %v9938_v11, %v9939_v21  ;;  %v10330_v49 = vsel %vm25010_vm0, %v10328_v36, %v10329_v37  ;;  %v10343_v34 = vrot.slane %v9278_v39, 4  ;;  %v16269_v52 = vld [vmem:[%s25511_s6 + $0x8] sm:$0xff]  ;;  %vm10593_vm7 = vcmask 62464  }
 0x3cc   : > { %v23594_v10 = vld [vmem:[#allocation3 + $0x30] sm:$0xff]  ;;  %v9299_v58 = vrot.slane %v23592_v18, 1  ;;  %v9558_v1 = vrot.slane %v23592_v18, 2  ;;  %v9945_v53 = vrot.slane %v23592_v18, 3  ;;  %vm10595_vm14 = vcmask 63489  }
 0x3cd   : > { %v9301_v48 = vrot.slane %v23594_v10, 1  ;;  %v9560_v14 = vrot.slane %v23594_v10, 2  ;;  %v10335_v47 = vrot.slane %v23594_v10, 4  ;;  %v9947_v19 = vrot.slane %v23594_v10, 3 }
 0x3ce   : > { %v9300_v62 = vsel %vm736_vm2, %v9297_v22, %v9299_v58  ;;  %v9559_v50 = vsel %vm1099_vm4, %v9556_v42, %v9558_v1  ;;  %v10344_v22 = vsel %vm25010_vm0, %v10341_v57, %v10343_v34  ;;  %v10206_v42 = vrot.slane %v23664_v46, 3 }
 0x3cf   : > { %v9302_v8 = vsel %vm736_vm2, %v9299_v58, %v9301_v48  ;;  %v9561_v28 = vsel %vm1099_vm4, %v9558_v1, %v9560_v14  ;;  %18661 = vmatprep.mubr.msk.f32.mxu1 %vm9237_vm9, %v9300_v62  ;;  %18689 = vmatprep.mubr.msk.f32.mxu0 %vm9237_vm9, %v9559_v50  ;;  %v23606_v3 = vld [vmem:[#allocation3 + $0x38] sm:$0xff]  ;;  %vm10602_vm12 = vcmask 58368   ;;  %vm10604_vm5 = vcmask 64517  }
 0x3d0   : > { %18662 = vmatmul.mubr.msk.f32.gmra.mxu1 %vm9237_vm9, %v9302_v8  ;;  %18690 = vmatmul.mubr.msk.f32.gmra.mxu0 %vm9237_vm9, %v9561_v28  ;;  %v9303_v32 = vrot.slane %v23606_v3, 1  ;;  %v9562_v7 = vrot.slane %v23606_v3, 2  ;;  %v10337_v56 = vrot.slane %v23606_v3, 4 }
 0x3d1   : > { %v23630_v4 = vld [vmem:[#allocation3 + $0x40] sm:$0xff] }
 0x3d2   : > { %v9304_v29 = vsel %vm736_vm2, %v9301_v48, %v9303_v32  ;;  %v9563_v51 = vsel %vm1099_vm4, %v9560_v14, %v9562_v7  ;;  %v9817_v25 = vrot.slane %v23630_v4, 2  ;;  %v9696_v20 = vrot.slane %v23630_v4, 1 }
 0x3d3   : > { %18664 = vmatprep.mubr.msk.f32.mxu1 %vm9237_vm9, %v9304_v29  ;;  %18692 = vmatprep.mubr.msk.f32.mxu0 %vm9237_vm9, %v9563_v51  ;;  %v10338_v0 = vsel %vm25010_vm0, %v10335_v47, %v10337_v56 }
 0x3d4   : > { %18665 = vmatmul.mubr.msk.f32.gmra.mxu1 %vm9237_vm9, %v9303_v32  ;;  %18693 = vmatmul.mubr.msk.f32.gmra.mxu0 %vm9237_vm9, %v9562_v7  ;;  %v9818_v38 = vsel %vm1099_vm4, %v9562_v7, %v9817_v25  ;;  %v9697_v59 = vsel %vm736_vm2, %v9303_v32, %v9696_v20  ;;  %v10086_v5 = vsel %vm1099_vm4, %v9817_v25, %v10085_v12 }
 0x3d5   : > { %18711 = vmatprep.mubr.msk.f32.mxu0 %vm9237_vm9, %v9553_v27  ;;  %18669 = vmatprep.mubr.msk.f32.mxu1 %vm9237_vm9, %v23367_v40  ;;  %v16259_v40 = vld [vmem:[%s25405_s25 + $0x40] sm:$0xff]  ;;  %v9949_v27 = vrot.slane %v23606_v3, 3 }
 0x3d7   : > { %v9950_v63 = vsel %vm25009_vm3, %v9947_v19, %v9949_v27 }
 0x3d8   : > { %18670 = vmatmul.mubr.msk.f32.vlgmr.msra.gmra.mxu1 %vm9237_vm9, %v23513_v43  ;;  %18712 = vmatmul.mubr.msk.f32.vlgmr.msra.gmra.mxu0 %vm9237_vm9, %v23569_v60  ;;  %v10333_v43 = vrot.slane %v23592_v18, 4 }
 0x3d9   : > { %18696 = vmatpush3.msra.mxu1 %v16214_v15  ;;  %18672 = vmatprep.mubr.msk.f32.mxu1 %vm9237_vm9, %v23537_v31  ;;  %v9942_v31 = vsel %vm25009_vm3, %v9939_v21, %v9941_v6  ;;  %v9946_v15 = vsel %vm25009_vm3, %v9943_v24, %v9945_v53 }
 0x3da   : > { %18714 = vmatprep.mubr.msk.f32.mxu0 %vm9237_vm9, %v9557_v55  ;;  %18723 = vmatprep.subr.mxu1 %v16232_v61  ;;  %v10334_v33 = vsel %vm25010_vm0, %v10331_v26, %v10333_v43  ;;  %v10336_v54 = vsel %vm25010_vm0, %v10333_v43, %v10335_v47 }
 0x3db   : > { %18738 = vmatpush3.msra.mxu0 %v16241_v9  ;;  %v9951_v9 = vrot.slane %v23630_v4, 3 }
 0x3dc   : > { %18673 = vmatmul.mubr.msk.f32.gmra.mxu1 %vm9237_vm9, %v23541_v30  ;;  %18715 = vmatmul.mubr.msk.f32.gmra.mxu0 %vm9237_vm9, %v9559_v50  ;;  %v10332_v30 = vsel %vm25010_vm0, %v10329_v37, %v10331_v26 }
 0x3dd   : > { %18675 = vmatprep.mubr.msk.f32.mxu1 %vm9237_vm9, %v23580_v16  ;;  %18717 = vmatprep.mubr.msk.f32.mxu0 %vm9237_vm9, %v9561_v28  ;;  %v9952_v35 = vsel %vm25009_vm3, %v9949_v27, %v9951_v9  ;;  %v10207_v2 = vsel %vm25009_vm3, %v9951_v9, %v10206_v42 }
 0x3de   : > { %18765 = vmatprep.subr.mxu0 %v16259_v40 }
 0x3e0   : > { %18676 = vmatmul.mubr.msk.f32.gmra.mxu1 %vm9237_vm9, %v23592_v18  ;;  %18718 = vmatmul.mubr.msk.f32.gmra.mxu0 %vm9237_vm9, %v9563_v51  ;;  %v23751_v18 = vld [vmem:[%s25511_s6 + $0x10] sm:$0xff] }
 0x3e1   : > { %18678 = vmatprep.mubr.msk.f32.mxu1 %vm9237_vm9, %v23594_v10  ;;  %18720 = vmatprep.mubr.msk.f32.mxu0 %vm9237_vm9, %v9818_v38  ;;  %25513 = vst [vmem:[#allocation79_spill] sm:$0xff] %v23751_v18  ;;  %v23757_v10 = vld [vmem:[%s25511_s6 + $0x18] sm:$0xff] }
 0x3e2   : > { %25514 = vst [vmem:[#allocation77_spill] sm:$0xff] %v23757_v10 }
 0x3e4   : > { %18679 = vmatmul.mubr.msk.f32.gmra.mxu1 %vm9237_vm9, %v23606_v3  ;;  %18721 = vmatmul.mubr.msk.f32.gmra.mxu0 %vm9237_vm9, %v9817_v25 }
 0x3e5   : > { %18697 = vmatprep.mubr.msk.f32.mxu1 %vm9237_vm9, %v23555_v17  ;;  %18739 = vmatprep.mubr.msk.f32.mxu0 %vm9237_vm9, %v23569_v60  ;;  %v9944_v17 = vsel %vm25009_vm3, %v9941_v6, %v9943_v24  ;;  %v9948_v60 = vsel %vm25009_vm3, %v9945_v53, %v9947_v19 }
 0x3e8   : > { %18698 = vmatmul.mubr.msk.f32.vlgmr.msra.gmra.mxu1 %vm9237_vm9, %v23566_v41  ;;  %18740 = vmatmul.mubr.msk.f32.vlgmr.msra.gmra.mxu0 %vm9237_vm9, %v9557_v55  ;;  %v10339_v41 = vrot.slane %v23630_v4, 4  ;;  %v23744_v55 = vld [vmem:[#allocation4] sm:$0xff] }
 0x3e9   : > { %18724 = vmatpush3.msra.mxu1 %v16232_v61  ;;  %18700 = vmatprep.mubr.msk.f32.mxu1 %vm9237_vm9, %v9298_v44  ;;  %v10615_v44 = vld [vmem:[%s25511_s6] sm:$0xff]  ;;  %25512 = vst [vmem:[#allocation78_spill] sm:$0xff] %v23744_v55 }
 0x3ea   : > { %18742 = vmatprep.mubr.msk.f32.mxu0 %vm9237_vm9, %v9559_v50  ;;  %18751 = vmatprep.subr.mxu1 %v16250_v13  ;;  %v10340_v16 = vsel %vm25010_vm0, %v10337_v56, %v10339_v41  ;;  %v10342_v23 = vsel %vm25010_vm0, %v10339_v41, %v10341_v57  ;;  %vm10598_vm0 = vcmask 64515  }
 0x3eb   : > { %18766 = vmatpush3.msra.mxu0 %v16259_v40 }
 0x3ec   : > { %18701 = vmatmul.mubr.msk.f32.gmra.mxu1 %vm9237_vm9, %v9300_v62  ;;  %18743 = vmatmul.mubr.msk.f32.gmra.mxu0 %vm9237_vm9, %v9561_v28 }
 0x3ed   : > { %18703 = vmatprep.mubr.msk.f32.mxu1 %vm9237_vm9, %v9302_v8  ;;  %18745 = vmatprep.mubr.msk.f32.mxu0 %vm9237_vm9, %v9563_v51 }
 0x3ee   : > { %18790 = vmatprep.subr.mxu0 %v10615_v44 }
 0x3f0   : > { %18704 = vmatmul.mubr.msk.f32.gmra.mxu1 %vm9237_vm9, %v9304_v29  ;;  %18746 = vmatmul.mubr.msk.f32.gmra.mxu0 %vm9237_vm9, %v9818_v38 }
 0x3f1   : > { %18706 = vmatprep.mubr.msk.f32.mxu1 %vm9237_vm9, %v9697_v59  ;;  %18748 = vmatprep.mubr.msk.f32.mxu0 %vm9237_vm9, %v10086_v5 }
 0x3f4   : > { %18707 = vmatmul.mubr.msk.f32.gmra.mxu1 %vm9237_vm9, %v9696_v20  ;;  %18749 = vmatmul.mubr.msk.f32.gmra.mxu0 %vm9237_vm9, %v10085_v12 }
 0x3f5   : > { %18725 = vmatprep.mubr.msk.f32.mxu1 %vm9237_vm9, %v9940_v45  ;;  %18767 = vmatprep.mubr.msk.f32.mxu0 %vm9237_vm9, %v10330_v49 }
 0x3f8   : > { %18726 = vmatmul.mubr.msk.f32.vlgmr.msra.gmra.mxu1 %vm9237_vm9, %v9942_v31  ;;  %18768 = vmatmul.mubr.msk.f32.vlgmr.msra.gmra.mxu0 %vm9237_vm9, %v10332_v30 }
 0x3f9   : > { %18752 = vmatpush3.msra.mxu1 %v16250_v13  ;;  %18728 = vmatprep.mubr.msk.f32.mxu1 %vm9237_vm9, %v9944_v17 }
 0x3fa   : > { %18770 = vmatprep.mubr.msk.f32.mxu0 %vm9237_vm9, %v10334_v33  ;;  %18779 = vmatprep.subr.mxu1 %v16269_v52 }
 0x3fb   : > { %18791 = vmatpush3.msra.mxu0 %v10615_v44 }
 0x3fc   : > { %18729 = vmatmul.mubr.msk.f32.gmra.mxu1 %vm9237_vm9, %v9946_v15  ;;  %18771 = vmatmul.mubr.msk.f32.gmra.mxu0 %vm9237_vm9, %v10336_v54 }
 0x3fd   : > { %18731 = vmatprep.mubr.msk.f32.mxu1 %vm9237_vm9, %v9948_v60  ;;  %18773 = vmatprep.mubr.msk.f32.mxu0 %vm9237_vm9, %v10338_v0 }
 0x3fe   : > { %18812 = vmatprep.subr.mxu0 %v23757_v10 }
 0x400   : > { %18732 = vmatmul.mubr.msk.f32.gmra.mxu1 %vm9237_vm9, %v9950_v63  ;;  %18774 = vmatmul.mubr.msk.f32.gmra.mxu0 %vm9237_vm9, %v10340_v16 }
 0x401   : > { %18734 = vmatprep.mubr.msk.f32.mxu1 %vm9237_vm9, %v9952_v35  ;;  %18776 = vmatprep.mubr.msk.f32.mxu0 %vm9237_vm9, %v10342_v23 }
 0x404   : > { %18735 = vmatmul.mubr.msk.f32.gmra.mxu1 %vm9237_vm9, %v9951_v9  ;;  %18777 = vmatmul.mubr.msk.f32.gmra.mxu0 %vm9237_vm9, %v10344_v22 }
 0x405   : > { %18753 = vmatprep.mubr.msk.f32.mxu1 %vm9237_vm9, %v9942_v31  ;;  %18792 = vmatprep.mubr.msk.f32.mxu0 %vm9237_vm9, %v23744_v55 }
 0x408   : > { %18754 = vmatmul.mubr.msk.f32.vlgmr.msra.gmra.mxu1 %vm9237_vm9, %v9944_v17 }
 0x409   : > { %18756 = vmatprep.mubr.msk.f32.mxu1 %vm9237_vm9, %v9946_v15  ;;  %18780 = vmatpush3.msra.mxu1 %v16269_v52 }
 0x40a   : > { %18801 = vmatprep.subr.mxu1 %v23751_v18 }
 0x40c   : > { %18757 = vmatmul.mubr.msk.f32.gmra.mxu1 %vm9237_vm9, %v9948_v60 }
 0x40d   : > { %18759 = vmatprep.mubr.msk.f32.mxu1 %vm9237_vm9, %v9950_v63 }
 0x410   : > { %18760 = vmatmul.mubr.msk.f32.gmra.mxu1 %vm9237_vm9, %v9952_v35 }
 0x411   : > { %18762 = vmatprep.mubr.msk.f32.mxu1 %vm9237_vm9, %v10207_v2 }
 0x414   : > { %18763 = vmatmul.mubr.msk.f32.gmra.mxu1 %vm9237_vm9, %v10206_v42 }
 0x483   : > { %v18657_v58 = vpop.f32.mrf.mxu1 }
 0x485   : > { %v18685_v1 = vpop.f32.mrf.mxu0  ;;  %v9387_v48 = vpop.f32.mrf.mxu1 }
 0x487   : > { %v9646_v14 = vpop.f32.mrf.mxu0 }
 0x48a   : > { %v18660_v62 = vpop.f32.mrf.mxu1  ;;  %v18688_v50 = vpop.f32.mrf.mxu0 }
 0x48c   : > { %v9397_v8 = vpop.f32.mrf.mxu1  ;;  %v9656_v28 = vpop.f32.mrf.mxu0 }
 0x490   : > { %v18663_v3 = vpop.f32.mrf.mxu1  ;;  %v18691_v32 = vpop.f32.mrf.mxu0 }
 0x492   : > { %v9407_v7 = vpop.f32.mrf.mxu1  ;;  %v23760_v29 = vpop.f32.mrf.mxu0 }
 0x494   : > { %v18666_v51 = vpop.f32.mrf.mxu1  ;;  %v23762_v61 = vpop.f32.mrf.mxu0 }
 0x496   : > { %v23764_v4 = vpop.f32.mrf.mxu1  ;;  %v23766_v40 = vpop.f32.mrf.mxu0 }
 0x498   : > { %v18671_v25 = vpop.f32.mrf.mxu1  ;;  %v18713_v38 = vpop.f32.mrf.mxu0 }
 0x499   : > { %v9514_v41 = vadd.f32 %v18671_v25, %v18657_v58 }
 0x49a   : > { %v9508_v13 = vpop.f32.mrf.mxu1  ;;  %v9889_v46 = vpop.f32.mrf.mxu0 }
 0x49b   : > { %v9509_v9 = vadd.f32 %v9508_v13, %v9387_v48  ;;  %v9686_v63 = vadd.f32 %v18685_v1, %v9514_v41 }
 0x49c   : > { %v18674_v20 = vpop.f32.mrf.mxu1  ;;  %v18716_v12 = vpop.f32.mrf.mxu0 }
 0x49d   : > { %v9524_v34 = vadd.f32 %v18674_v20, %v18660_v62  ;;  %v9685_v42 = vadd.f32 %v9646_v14, %v9509_v9 }
 0x49e   : > { %v9518_v59 = vpop.f32.mrf.mxu1  ;;  %v9899_v5 = vpop.f32.mrf.mxu0 }
 0x49f   : > { %v9519_v23 = vadd.f32 %v9518_v59, %v9397_v8  ;;  %v9688_v18 = vadd.f32 %v18688_v50, %v9524_v34 }
 0x4a0   : > { %v18677_v21 = vpop.f32.mrf.mxu1  ;;  %v23768_v37 = vpop.f32.mrf.mxu0 }
 0x4a1   : > { %v9534_v2 = vadd.f32 %v18677_v21, %v18663_v3  ;;  %v9687_v25 = vadd.f32 %v9656_v28, %v9519_v23 }
 0x4a2   : > { %v9528_v11 = vpop.f32.mrf.mxu1  ;;  %v23770_v36 = vpop.f32.mrf.mxu0 }
 0x4a3   : > { %v9690_v48 = vadd.f32 %v18691_v32, %v9534_v2 }
 0x4a4   : > { %v18680_v6 = vpop.f32.mrf.mxu1  ;;  %v23772_v26 = vpop.f32.mrf.mxu0 }
 0x4a5   : > { %v9544_v62 = vadd.f32 %v18680_v6, %v18666_v51 }
 0x4a6   : > { %v9538_v45 = vpop.f32.mrf.mxu1  ;;  %v23774_v49 = vpop.f32.mrf.mxu0 }
 0x4a7   : > { %v9539_v21 = vadd.f32 %v9538_v45, %v23764_v4 }
 0x4a8   : > { %v18699_v24 = vpop.f32.mrf.mxu1  ;;  %v18741_v43 = vpop.f32.mrf.mxu0 }
 0x4a9   : > { %v9808_v22 = vadd.f32 %v18699_v24, %v9686_v63 }
 0x4aa   : > { %v9768_v31 = vpop.f32.mrf.mxu1  ;;  %v10157_v30 = vpop.f32.mrf.mxu0 }
 0x4ab   : > { %v9807_v44 = vadd.f32 %v9768_v31, %v9685_v42 }
 0x4ac   : > { %v18702_v53 = vpop.f32.mrf.mxu1  ;;  %v18744_v47 = vpop.f32.mrf.mxu0 }
 0x4ad   : > { %v9810_v58 = vadd.f32 %v18702_v53, %v9688_v18  ;;  %v9928_v41 = vadd.f32 %v9889_v46, %v9807_v44  ;;  %v9692_v18 = vadd.f32 %v23762_v61, %v9544_v62 }
 0x4ae   : > { %v9778_v17 = vpop.f32.mrf.mxu1  ;;  %v23776_v19 = vpop.f32.mrf.mxu0 }
 0x4af   : > { %v9809_v1 = vadd.f32 %v9778_v17, %v9687_v25  ;;  %v9931_v3 = vadd.f32 %v18716_v12, %v9810_v58  ;;  %v9691_v12 = vadd.f32 %v23766_v40, %v9539_v21 }
 0x4b0   : > { %v18705_v56 = vpop.f32.mrf.mxu1  ;;  %v23778_v33 = vpop.f32.mrf.mxu0 }
 0x4b1   : > { %v9812_v8 = vadd.f32 %v18705_v56, %v9690_v48  ;;  %v9930_v32 = vadd.f32 %v9899_v5, %v9809_v1 }
 0x4b2   : > { %v9788_v39 = vpop.f32.mrf.mxu1  ;;  %v23780_v15 = vpop.f32.mrf.mxu0 }
 0x4b3   : > { %25515 = vst [vmem:[#allocation89_spill] sm:$0xff] %v23780_v15  ;;  %v9529_v15 = vadd.f32 %v9528_v11, %v9407_v7  ;;  %v9933_v11 = vadd.f32 %v23768_v37, %v9812_v8  ;;  %v16268_v37 = vld [vmem:[%s25518_s5] ss:$0 sm:$0xff] }
 0x4b4   : > { %v18708_v54 = vpop.f32.mrf.mxu1  ;;  %v23782_v60 = vpop.f32.mrf.mxu0 }
 0x4b5   : > { %25516 = vst [vmem:[#allocation90_spill] sm:$0xff] %v23782_v60  ;;  %v9929_v60 = vadd.f32 %v18713_v38, %v9808_v22  ;;  %v9689_v50 = vadd.f32 %v23760_v29, %v9529_v15  ;;  %v9814_v6 = vadd.f32 %v18708_v54, %v9692_v18 }
 0x4b6   : > { %v9798_v27 = vpop.f32.mrf.mxu1  ;;  %v23784_v16 = vpop.f32.mrf.mxu0 }
 0x4b7   : > { %25517 = vst [vmem:[#allocation19_spill] sm:$0xff] %v23784_v16  ;;  %v9811_v51 = vadd.f32 %v9788_v39, %v9689_v50  ;;  %v9813_v61 = vadd.f32 %v9798_v27, %v9691_v12  ;;  %v9935_v39 = vadd.f32 %v23772_v26, %v9814_v6 }
 0x4b8   : > { %v18727_v0 = vpop.f32.mrf.mxu1  ;;  %v18769_v10 = vpop.f32.mrf.mxu0 }
 0x4b9   : > { %v10075_v20 = vadd.f32 %v18727_v0, %v9929_v60  ;;  %v9932_v60 = vadd.f32 %v23770_v36, %v9811_v51  ;;  %v9934_v34 = vadd.f32 %v23774_v49, %v9813_v61 }
 0x4ba   : > { %v10035_v57 = vpop.f32.mrf.mxu1  ;;  %v10427_v16 = vpop.f32.mrf.mxu0  ;;  %v25519_v42 = vld [vmem:[#allocation89_spill] sm:$0xff] }
 0x4bb   : > { %v10074_v14 = vadd.f32 %v10035_v57, %v9928_v41  ;;  %v10197_v38 = vadd.f32 %v18741_v43, %v10075_v20 }
 0x4bc   : > { %v18730_v35 = vpop.f32.mrf.mxu1  ;;  %v18772_v7 = vpop.f32.mrf.mxu0  ;;  %v25520_v25 = vld [vmem:[#allocation90_spill] sm:$0xff] }
 0x4bd   : > { %v10077_v28 = vadd.f32 %v18730_v35, %v9931_v3  ;;  %v10196_v17 = vadd.f32 %v10157_v30, %v10074_v14 }
 0x4be   : > { %v10045_v52 = vpop.f32.mrf.mxu1  ;;  %v10437_v29 = vpop.f32.mrf.mxu0  ;;  %v25521_v3 = vld [vmem:[#allocation19_spill] sm:$0xff] }
 0x4bf   : > { %v10076_v31 = vadd.f32 %v10045_v52, %v9930_v32  ;;  %v10199_v15 = vadd.f32 %v18744_v47, %v10077_v28 }
 0x4c0   : > { %v18733_v55 = vpop.f32.mrf.mxu1  ;;  %v18775_v47 = vpop.f32.mrf.mxu0 }
 0x4c1   : > { %v10079_v4 = vadd.f32 %v18733_v55, %v9933_v11  ;;  %v10198_v40 = vadd.f32 %v23776_v19, %v10076_v31 }
 0x4c2   : > { %v10055_v13 = vpop.f32.mrf.mxu1  ;;  %v10447_v52 = vpop.f32.mrf.mxu0 }
 0x4c3   : > { %v10078_v55 = vadd.f32 %v10055_v13, %v9932_v60  ;;  %v10201_v9 = vadd.f32 %v23778_v33, %v10079_v4 }
 0x4c4   : > { %v18736_v59 = vpop.f32.mrf.mxu1 }
 0x4c5   : > { %v10081_v27 = vadd.f32 %v18736_v59, %v9935_v39  ;;  %v10200_v2 = vadd.f32 %v25519_v42, %v10078_v55  ;;  %v18778_v59 = vpop.f32.mrf.mxu0 }
 0x4c6   : > { %v10065_v24 = vpop.f32.mrf.mxu1 }
 0x4c7   : > { %v10203_v48 = vadd.f32 %v25520_v25, %v10081_v27  ;;  %v10457_v31 = vpop.f32.mrf.mxu0 }
 0x4c8   : > { %v18755_v46 = vpop.f32.mrf.mxu1 }
 0x4c9   : > { %v10318_v53 = vadd.f32 %v18755_v46, %v10197_v38 }
 0x4ca   : > { %v10278_v45 = vpop.f32.mrf.mxu1 }
 0x4cb   : > { %v10317_v56 = vadd.f32 %v10278_v45, %v10196_v17  ;;  %v10467_v5 = vadd.f32 %v18769_v10, %v10318_v53 }
 0x4cc   : > { %v18758_v43 = vpop.f32.mrf.mxu1 }
 0x4cd   : > { %v10466_v54 = vadd.f32 %v10427_v16, %v10317_v56  ;;  %v10320_v30 = vadd.f32 %v18758_v43, %v10199_v15  ;;  %v10482_v26 = vadd.f32 %v16268_v37, %v10467_v5  ;;  %v10080_v16 = vadd.f32 %v10065_v24, %v9934_v34 }
 0x4ce   : > { %v10288_v0 = vpop.f32.mrf.mxu1 }
 0x4cf   : > { %v10481_v57 = vadd.f32 %v16268_v37, %v10466_v54  ;;  %v10469_v36 = vadd.f32 %v18772_v7, %v10320_v30  ;;  %v10319_v10 = vadd.f32 %v10288_v0, %v10198_v40  ;;  %v10497_v13 = vrot.slane %v10482_v26, 1 }
 0x4d0   : > { %v18761_v63 = vpop.f32.mrf.mxu1  ;;  %v10202_v21 = vadd.f32 %v25521_v3, %v10080_v16 }
 0x4d1   : > { %v10484_v35 = vadd.f32 %v16268_v37, %v10469_v36  ;;  %v10468_v23 = vadd.f32 %v10437_v29, %v10319_v10  ;;  %v10322_v22 = vadd.f32 %v18761_v63, %v10201_v9  ;;  %v10496_v44 = vrot.slane %v10481_v57, 1 }
 0x4d2   : > { %v10298_v19 = vpop.f32.mrf.mxu1 }
 0x4d3   : > { %v10483_v58 = vadd.f32 %v16268_v37, %v10468_v23  ;;  %v10471_v33 = vadd.f32 %v18775_v47, %v10322_v22  ;;  %v10321_v62 = vadd.f32 %v10298_v19, %v10200_v2  ;;  %v10501_v20 = vrot.slane %v10484_v35, 1 }
 0x4d4   : > { %v18764_v1 = vpop.f32.mrf.mxu1  ;;  %v10498_v24 = vsel %vm736_vm2, %v10496_v44, %v10497_v13 }
 0x4d5   : > { %v10499_v49 = vrot.slane %v10483_v58, 1  ;;  %v10486_v41 = vadd.f32 %v16268_v37, %v10471_v33  ;;  %v10324_v8 = vadd.f32 %v18764_v1, %v10203_v48  ;;  %v10470_v14 = vadd.f32 %v10447_v52, %v10321_v62 }
 0x4d6   : > { %v10308_v50 = vpop.f32.mrf.mxu1  ;;  %v10516_v45 = vmax.f32 %v10481_v57, %v10498_v24  ;;  %v25523_v24 = vld [vmem:[#allocation77_spill] sm:$0xff] }
 0x4d7   : > { %v10500_v18 = vsel %vm736_vm2, %v10497_v13, %v10499_v49  ;;  %v10502_v28 = vsel %vm736_vm2, %v10499_v49, %v10501_v20  ;;  %v10473_v7 = vadd.f32 %v18778_v59, %v10324_v8  ;;  %v10485_v51 = vadd.f32 %v16268_v37, %v10470_v14  ;;  %v25522_v49 = vld [vmem:[#allocation78_spill] sm:$0xff] }
 0x4d8   : > { %v10517_v32 = vmax.f32 %v10482_v26, %v10500_v18  ;;  %v10518_v38 = vmax.f32 %v10483_v58, %v10502_v28  ;;  %v10323_v11 = vadd.f32 %v10308_v50, %v10202_v21  ;;  %v10505_v46 = vrot.slane %v10486_v41, 1  ;;  %v16303_v59 = vld [vmem:[%s25511_s6 + $0x28] sm:$0xff] }
 0x4d9   : > { %v10488_v6 = vadd.f32 %v16268_v37, %v10473_v7  ;;  %v10503_v12 = vrot.slane %v10485_v51, 1 }
 0x4da   : > { %v10537_v53 = vrot.slane %v10517_v32, 1  ;;  %v10538_v17 = vrot.slane %v10518_v38, 1  ;;  %v10472_v4 = vadd.f32 %v10457_v31, %v10323_v11  ;;  %v16296_v31 = vld [vmem:[%s25511_s6 + $0x20] sm:$0xff] }
 0x4db   : > { %v10524_v29 = vrot.slane %v10488_v6, 1  ;;  %v10504_v15 = vsel %vm736_vm2, %v10501_v20, %v10503_v12  ;;  %v10506_v61 = vsel %vm736_vm2, %v10503_v12, %v10505_v46 }
 0x4dc   : > { %v10539_v56 = vsel %vm736_vm2, %v10537_v53, %v10538_v17  ;;  %v10487_v60 = vadd.f32 %v16268_v37, %v10472_v4  ;;  %v10519_v43 = vmax.f32 %v10484_v35, %v10504_v15  ;;  %v10520_v39 = vmax.f32 %v10485_v51, %v10506_v61  ;;  %v25524_v53 = vld [vmem:[#allocation79_spill] sm:$0xff] }
 0x4dd   : > { %v10557_v5 = vmax.f32 %v10516_v45, %v10539_v56  ;;  %v10529_v54 = vmax.f32 %v10488_v6, %v10524_v29  ;;  %v10851_v15 = vrot.slane %v25522_v49, 2 }
 0x4de   : > { %v10507_v30 = vrot.slane %v10487_v60, 1  ;;  %v10540_v55 = vrot.slane %v10519_v43, 1  ;;  %v10542_v0 = vrot.slane %v10520_v39, 1 }
 0x4df   : > { %vm10564_vm8 = vcmp.gt.f32.partialorder %v10557_v5, 0.0  ;;  %v10571_v40 = vmul.f32 0.01, %v10557_v5  ;;  %v10548_v9 = vrot.slane %v10529_v54, 1 }
 0x4e0   : > { %v10508_v47 = vsel %vm736_vm2, %v10505_v46, %v10507_v30  ;;  %v10522_v27 = vmax.f32 %v10487_v60, %v10507_v30  ;;  %v10525_v57 = vsel %vm736_vm2, %v10507_v30, %v10524_v29  ;;  %v10541_v10 = vsel %vm736_vm2, %v10538_v17, %v10540_v55 }
 0x4e1   : > { %v10578_v36 = vsel %vm10564_vm8, %v10557_v5, %v10571_v40  ;;  %v10543_v37 = vsel %vm736_vm2, %v10540_v55, %v10542_v0  ;;  %v10521_v34 = vmax.f32 %v10486_v41, %v10508_v47  ;;  %v10558_v26 = vmax.f32 %v10517_v32, %v10541_v10  ;;  %v16310_v40 = vld [vmem:[%s25511_s6 + $0x30] sm:$0xff] }
 0x4e2   : > { %10594 = vst.msk [vmem:[#allocation4 + $0x9] sm:$0x3f] %vm10593_vm7, %v10578_v36  ;;  %v10559_v63 = vmax.f32 %v10518_v38, %v10543_v37  ;;  %v10528_v35 = vmax.f32 %v10487_v60, %v10525_v57  ;;  %v10563_v23 = vmax.f32 %v10522_v27, %v10548_v9  ;;  %v10624_v41 = vrot.slane %v25522_v49, 1  ;;  %v16317_v60 = vld [vmem:[%s25511_s6 + $0x38] sm:$0xff]  ;;  %v16324_v37 = vld [vmem:[%s25511_s6 + $0x40] sm:$0xff]  ;;  %s19446_s6 = smov [#allocation10]  }
 0x4e3   : > { %v10544_v22 = vrot.slane %v10521_v34, 1  ;;  %vm10565_vm11 = vcmp.gt.f32.partialorder %v10558_v26, 0.0  ;;  %v10572_v16 = vmul.f32 0.01, %v10558_v26  ;;  %v25525_v36 = vmov 0.0   ;;  %s19356_s27 = sshll.u32 %s19446_s6, 4  ;;  %s19357_s27 = int_to_ptr.vmem [resolvable:$false] %s19356_s27 }
 0x4e4   : > { %vm10566_vm3 = vcmp.gt.f32.partialorder %v10559_v63, 0.0  ;;  %v10573_v42 = vmul.f32 0.01, %v10559_v63  ;;  %v10546_v19 = vrot.slane %v10528_v35, 1  ;;  %vm10570_vm8 = vcmp.gt.f32.partialorder %v10563_v23, 0.0  ;;  %s19358_s23 = scalar_lea.vmem %s19357_s27, 32 }
 0x4e5   : > { %v10545_v2 = vsel %vm736_vm2, %v10542_v0, %v10544_v22  ;;  %v10577_v52 = vmul.f32 0.01, %v10563_v23  ;;  %v10579_v44 = vsel %vm10565_vm11, %v10558_v26, %v10572_v16  ;;  %v10614_v26 = vld [vmem:[#allocation4 + $0x38] sm:$0xff] }
 0x4e6   : > { %v10580_v58 = vsel %vm10566_vm3, %v10559_v63, %v10573_v42  ;;  %v10560_v33 = vmax.f32 %v10519_v43, %v10545_v2  ;;  %10596 = vst.msk [vmem:[#allocation4 + $0x10] sm:$0x7e] %vm10595_vm14, %v10579_v44  ;;  %v10547_v25 = vsel %vm736_vm2, %v10544_v22, %v10546_v19  ;;  %v10549_v48 = vsel %vm736_vm2, %v10546_v19, %v10548_v9  ;;  %v16332_v42 = vld [vmem:[%s25526_s8 + $0x8] sm:$0xff]  ;;  %v11706_v2 = vld [vmem:[%s25526_s8] sm:$0xff] }
 0x4e7   : > { %10597 = vst.msk [vmem:[#allocation4 + $0x17] sm:$0xfc] %vm9260_vm6, %v10580_v58  ;;  %v10584_v13 = vsel %vm10570_vm8, %v10563_v23, %v10577_v52  ;;  %v10561_v62 = vmax.f32 %v10520_v39, %v10547_v25  ;;  %v10562_v1 = vmax.f32 %v10521_v34, %v10549_v48  ;;  %v11407_v35 = vrot.slane %v10614_v26, 1  ;;  %v23949_v19 = vld [vmem:[#allocation5] sm:$0xff]  ;;  %v16349_v52 = vld [vmem:[%s25526_s8 + $0x18] sm:$0xff] }
 0x4e8   : > { %vm10567_vm7 = vcmp.gt.f32.partialorder %v10560_v33, 0.0  ;;  %v10574_v20 = vmul.f32 0.01, %v10560_v33  ;;  %10606 = vst.msk [vmem:[#allocation4 + $0x34] sm:$0x7] %vm9258_vm15, %v10584_v13  ;;  %v11516_v22 = vrot.slane %v10614_v26, 2 }
 0x4e9   : > { %v10608_v8 = vld [vmem:[#allocation4 + $0x8] sm:$0xff]  ;;  %vm10568_vm3 = vcmp.gt.f32.partialorder %v10561_v62, 0.0  ;;  %vm10569_vm6 = vcmp.gt.f32.partialorder %v10562_v1, 0.0  ;;  %v10575_v14 = vmul.f32 0.01, %v10561_v62 }
 0x4ea   : > { %v10576_v3 = vmul.f32 0.01, %v10562_v1  ;;  %18793 = vmatmul.mubr.msk.f32.vlgmr.msra.gmra.mxu0 %vm9237_vm9, %v10608_v8  ;;  %v10581_v21 = vsel %vm10567_vm7, %v10560_v33, %v10574_v20  ;;  %v10625_v50 = vrot.slane %v10608_v8, 1  ;;  %v10852_v61 = vrot.slane %v10608_v8, 2 }
 0x4eb   : > { %18813 = vmatpush3.msra.mxu0 %v25523_v24  ;;  %v10582_v18 = vsel %vm10568_vm3, %v10561_v62, %v10575_v14  ;;  %10599 = vst.msk [vmem:[#allocation4 + $0x1e] sm:$0xf8] %vm10598_vm0, %v10581_v21  ;;  %vm19445_vm0 = vmmov 0  }
 0x4ec   : > { %v10583_v28 = vsel %vm10569_vm6, %v10562_v1, %v10576_v3  ;;  %18834 = vmatprep.subr.mxu0 %v16303_v59  ;;  %10600 = vst.msk [vmem:[#allocation4 + $0x26] sm:$0x1] %vm9248_vm10, %v10582_v18  ;;  %v10626_v7 = vsel %vm736_vm2, %v10624_v41, %v10625_v50  ;;  %v10853_v43 = vsel %vm1099_vm4, %v10851_v15, %v10852_v61 }
 0x4ed   : > { %10601 = vst.msk [vmem:[#allocation4 + $0x25] sm:$0xf0] %vm9256_vm1, %v10582_v18  ;;  %18781 = vmatprep.mubr.msk.f32.mxu1 %vm9237_vm9, %v10626_v7  ;;  %v23830_v32 = vld [vmem:[#allocation4 + $0x10] sm:$0xff] }
 0x4ee   : > { %10603 = vst.msk [vmem:[#allocation4 + $0x2d] sm:$0x3] %vm10602_vm12, %v10583_v28  ;;  %v23832_v38 = vld [vmem:[#allocation4 + $0x18] sm:$0xff]  ;;  %v10627_v51 = vrot.slane %v23830_v32, 1  ;;  %18795 = vmatprep.mubr.msk.f32.mxu0 %vm9237_vm9, %v23830_v32  ;;  %v10854_v5 = vrot.slane %v23830_v32, 2 }
 0x4ef   : > { %10605 = vst.msk [vmem:[#allocation4 + $0x2c] sm:$0xe0] %vm10604_vm5, %v10583_v28  ;;  %v10629_v11 = vrot.slane %v23832_v38, 1  ;;  %18796 = vmatmul.mubr.msk.f32.gmra.mxu0 %vm9237_vm9, %v23832_v38  ;;  %v10856_v39 = vrot.slane %v23832_v38, 2 }
 0x4f0   : > { %v10628_v46 = vsel %vm736_vm2, %v10625_v50, %v10627_v51  ;;  %v10855_v54 = vsel %vm1099_vm4, %v10852_v61, %v10854_v5 }
 0x4f1   : > { %v23842_v6 = vsel %vm736_vm2, %v10627_v51, %v10629_v11  ;;  %18782 = vmatmul.mubr.msk.f32.vlgmr.msra.gmra.mxu1 %vm9237_vm9, %v10628_v46  ;;  %v10857_v55 = vsel %vm1099_vm4, %v10854_v5, %v10856_v39 }
 0x4f2   : > { %18802 = vmatpush3.msra.mxu1 %v25524_v53  ;;  %18784 = vmatprep.mubr.msk.f32.mxu1 %vm9237_vm9, %v23842_v6 }
 0x4f3   : > { %v23851_v17 = vld [vmem:[#allocation4 + $0x20] sm:$0xff]  ;;  %18823 = vmatprep.subr.mxu1 %v16296_v31 }
 0x4f4   : > { %18798 = vmatprep.mubr.msk.f32.mxu0 %vm9237_vm9, %v23851_v17  ;;  %v10631_v4 = vrot.slane %v23851_v17, 1  ;;  %v10858_v30 = vrot.slane %v23851_v17, 2 }
 0x4f5   : > { %v23853_v12 = vld [vmem:[#allocation4 + $0x28] sm:$0xff] }
 0x4f6   : > { %v10633_v45 = vrot.slane %v23853_v12, 1  ;;  %18799 = vmatmul.mubr.msk.f32.gmra.mxu0 %vm9237_vm9, %v23853_v12  ;;  %v10632_v29 = vsel %vm736_vm2, %v10629_v11, %v10631_v4  ;;  %v10860_v0 = vrot.slane %v23853_v12, 2  ;;  %v10613_v9 = vld [vmem:[#allocation4 + $0x30] sm:$0xff]  ;;  %v10859_v47 = vsel %vm1099_vm4, %v10856_v39, %v10858_v30 }
 0x4f7   : > { %18814 = vmatprep.mubr.msk.f32.mxu0 %vm9237_vm9, %v10608_v8  ;;  %18785 = vmatmul.mubr.msk.f32.gmra.mxu1 %vm9237_vm9, %v10632_v29  ;;  %v11192_v57 = vrot.slane %v10613_v9, 2  ;;  %v11083_v34 = vrot.slane %v10613_v9, 1 }
 0x4f8   : > { %v10634_v56 = vsel %vm736_vm2, %v10631_v4, %v10633_v45  ;;  %v10861_v27 = vsel %vm1099_vm4, %v10858_v30, %v10860_v0 }
 0x4f9   : > { %18787 = vmatprep.mubr.msk.f32.mxu1 %vm9237_vm9, %v10634_v56  ;;  %v11193_v10 = vsel %vm1099_vm4, %v10860_v0, %v11192_v57  ;;  %v11084_v63 = vsel %vm736_vm2, %v10633_v45, %v11083_v34  ;;  %v11408_v23 = vsel %vm736_vm2, %v11083_v34, %v11407_v35  ;;  %v11517_v16 = vsel %vm1099_vm4, %v11192_v57, %v11516_v22 }
 0x4fa   : > { %18815 = vmatmul.mubr.msk.f32.vlgmr.msra.gmra.mxu0 %vm9237_vm9, %v23830_v32 }
 0x4fb   : > { %18817 = vmatprep.mubr.msk.f32.mxu0 %vm9237_vm9, %v23832_v38  ;;  %18835 = vmatpush3.msra.mxu0 %v16303_v59 }
 0x4fc   : > { %18788 = vmatmul.mubr.msk.f32.gmra.mxu1 %vm9237_vm9, %v10633_v45  ;;  %18856 = vmatprep.subr.mxu0 %v16317_v60 }
 0x4fd   : > { %18803 = vmatprep.mubr.msk.f32.mxu1 %vm9237_vm9, %v10853_v43 }
 0x4fe   : > { %18818 = vmatmul.mubr.msk.f32.gmra.mxu0 %vm9237_vm9, %v23851_v17 }
 0x4ff   : > { %18820 = vmatprep.mubr.msk.f32.mxu0 %vm9237_vm9, %v23853_v12 }
 0x500   : > { %18804 = vmatmul.mubr.msk.f32.vlgmr.msra.gmra.mxu1 %vm9237_vm9, %v10855_v54 }
 0x501   : > { %18824 = vmatpush3.msra.mxu1 %v16296_v31  ;;  %18806 = vmatprep.mubr.msk.f32.mxu1 %vm9237_vm9, %v10857_v55 }
 0x502   : > { %18821 = vmatmul.mubr.msk.f32.gmra.mxu0 %vm9237_vm9, %v10613_v9  ;;  %18845 = vmatprep.subr.mxu1 %v16310_v40 }
 0x503   : > { %18836 = vmatprep.mubr.msk.f32.mxu0 %vm9237_vm9, %v10855_v54 }
 0x504   : > { %18807 = vmatmul.mubr.msk.f32.gmra.mxu1 %vm9237_vm9, %v10859_v47 }
 0x505   : > { %18809 = vmatprep.mubr.msk.f32.mxu1 %vm9237_vm9, %v10861_v27 }
 0x506   : > { %18837 = vmatmul.mubr.msk.f32.vlgmr.msra.gmra.mxu0 %vm9237_vm9, %v10857_v55 }
 0x507   : > { %18839 = vmatprep.mubr.msk.f32.mxu0 %vm9237_vm9, %v10859_v47  ;;  %18857 = vmatpush3.msra.mxu0 %v16317_v60 }
 0x508   : > { %18810 = vmatmul.mubr.msk.f32.gmra.mxu1 %vm9237_vm9, %v10860_v0  ;;  %18878 = vmatprep.subr.mxu0 %v25525_v36 }
 0x509   : > { %18825 = vmatprep.mubr.msk.f32.mxu1 %vm9237_vm9, %v10628_v46 }
 0x50a   : > { %18840 = vmatmul.mubr.msk.f32.gmra.mxu0 %vm9237_vm9, %v10861_v27 }
 0x50b   : > { %18842 = vmatprep.mubr.msk.f32.mxu0 %vm9237_vm9, %v11193_v10 }
 0x50c   : > { %18826 = vmatmul.mubr.msk.f32.vlgmr.msra.gmra.mxu1 %vm9237_vm9, %v23842_v6 }
 0x50d   : > { %18846 = vmatpush3.msra.mxu1 %v16310_v40  ;;  %18828 = vmatprep.mubr.msk.f32.mxu1 %vm9237_vm9, %v10632_v29 }
 0x50e   : > { %18843 = vmatmul.mubr.msk.f32.gmra.mxu0 %vm9237_vm9, %v11192_v57  ;;  %18867 = vmatprep.subr.mxu1 %v16324_v37 }
 0x50f   : > { %18858 = vmatprep.mubr.msk.f32.mxu0 %vm9237_vm9, %v23842_v6 }
 0x510   : > { %18829 = vmatmul.mubr.msk.f32.gmra.mxu1 %vm9237_vm9, %v10634_v56 }
 0x511   : > { %18831 = vmatprep.mubr.msk.f32.mxu1 %vm9237_vm9, %v11084_v63 }
 0x512   : > { %18859 = vmatmul.mubr.msk.f32.vlgmr.msra.gmra.mxu0 %vm9237_vm9, %v10632_v29 }
 0x513   : > { %18861 = vmatprep.mubr.msk.f32.mxu0 %vm9237_vm9, %v10634_v56  ;;  %18879 = vmatpush3.msra.mxu0 %v16332_v42 }
 0x514   : > { %18832 = vmatmul.mubr.msk.f32.gmra.mxu1 %vm9237_vm9, %v11083_v34  ;;  %18912 = vmatprep.subr.mxu0 %v25525_v36 }
 0x515   : > { %18847 = vmatprep.mubr.msk.f32.mxu1 %vm9237_vm9, %v23830_v32 }
 0x516   : > { %18862 = vmatmul.mubr.msk.f32.gmra.mxu0 %vm9237_vm9, %v11084_v63 }
 0x517   : > { %18864 = vmatprep.mubr.msk.f32.mxu0 %vm9237_vm9, %v11408_v23 }
 0x518   : > { %18848 = vmatmul.mubr.msk.f32.vlgmr.msra.gmra.mxu1 %vm9237_vm9, %v23832_v38 }
 0x519   : > { %18868 = vmatpush3.msra.mxu1 %v16324_v37  ;;  %18850 = vmatprep.mubr.msk.f32.mxu1 %vm9237_vm9, %v23851_v17 }
 0x51a   : > { %18865 = vmatmul.mubr.msk.f32.gmra.mxu0 %vm9237_vm9, %v11407_v35  ;;  %18895 = vmatprep.subr.mxu1 %v25525_v36 }
 0x51b   : > { %18880 = vmatprep.mubr.msk.f32.mxu0 %vm19445_vm0, %v25525_v36 }
 0x51c   : > { %18851 = vmatmul.mubr.msk.f32.gmra.mxu1 %vm9237_vm9, %v23853_v12 }
 0x51d   : > { %18853 = vmatprep.mubr.msk.f32.mxu1 %vm9237_vm9, %v10613_v9 }
 0x520   : > { %18854 = vmatmul.mubr.msk.f32.gmra.mxu1 %vm9237_vm9, %v10614_v26 }
 0x521   : > { %18869 = vmatprep.mubr.msk.f32.mxu1 %vm9237_vm9, %v10857_v55 }
 0x524   : > { %18870 = vmatmul.mubr.msk.f32.vlgmr.msra.gmra.mxu1 %vm9237_vm9, %v10859_v47 }
 0x525   : > { %18872 = vmatprep.mubr.msk.f32.mxu1 %vm9237_vm9, %v10861_v27  ;;  %18896 = vmatpush3.msra.mxu1 %v11706_v2 }
 0x526   : > { %18929 = vmatprep.subr.mxu1 %v25525_v36 }
 0x528   : > { %18873 = vmatmul.mubr.msk.f32.gmra.mxu1 %vm9237_vm9, %v11193_v10 }
 0x529   : > { %18875 = vmatprep.mubr.msk.f32.mxu1 %vm9237_vm9, %v11517_v16 }
 0x52c   : > { %18876 = vmatmul.mubr.msk.f32.gmra.mxu1 %vm9237_vm9, %v11516_v22 }
 0x52d   : > { %18897 = vmatprep.mubr.msk.f32.mxu1 %vm19445_vm0, %v25525_v36 }
 0x530   : > { %18898 = vmatmul.mubr.msk.f32.vlgmr.msra.gmra.mxu1 %vm9237_vm9, %v23949_v19 }
 0x531   : > { %18900 = vmatprep.mubr.msk.f32.mxu1 %vm19445_vm0, %v25525_v36  ;;  %18930 = vmatpush3.msra.mxu1 %v16349_v52 }
 0x532   : > { %18963 = vmatprep.subr.mxu1 %v25525_v36 }
 0x5aa   : > { %v18794_v44 = vpop.f32.mrf.mxu0 }
 0x5ac   : > { %v10820_v58 = vpop.f32.mrf.mxu0 }
 0x5af   : > { %v18797_v33 = vpop.f32.mrf.mxu0 }
 0x5b1   : > { %v18783_v25 = vpop.f32.mrf.mxu1  ;;  %v10830_v48 = vpop.f32.mrf.mxu0 }
 0x5b2   : > { %v10826_v45 = vadd.f32 %v18794_v44, %v18783_v25 }
 0x5b3   : > { %v10713_v13 = vpop.f32.mrf.mxu1 }
 0x5b4   : > { %v10821_v56 = vadd.f32 %v10820_v58, %v10713_v13 }
 0x5b6   : > { %v18800_v62 = vpop.f32.mrf.mxu0 }
 0x5b7   : > { %v18786_v1 = vpop.f32.mrf.mxu1 }
 0x5b8   : > { %v10840_v20 = vpop.f32.mrf.mxu0  ;;  %v10836_v5 = vadd.f32 %v18797_v33, %v18786_v1 }
 0x5b9   : > { %v10723_v49 = vpop.f32.mrf.mxu1 }
 0x5ba   : > { %v18816_v41 = vpop.f32.mrf.mxu0  ;;  %v10831_v54 = vadd.f32 %v10830_v48, %v10723_v49 }
 0x5bc   : > { %v18789_v8 = vpop.f32.mrf.mxu1  ;;  %v11046_v59 = vpop.f32.mrf.mxu0 }
 0x5bd   : > { %v10846_v9 = vadd.f32 %v18800_v62, %v18789_v8 }
 0x5be   : > { %v10733_v14 = vpop.f32.mrf.mxu1  ;;  %v18819_v3 = vpop.f32.mrf.mxu0 }
 0x5bf   : > { %v10841_v37 = vadd.f32 %v10840_v20, %v10733_v14 }
 0x5c0   : > { %v18805_v21 = vpop.f32.mrf.mxu1  ;;  %v11056_v50 = vpop.f32.mrf.mxu0 }
 0x5c1   : > { %v10970_v15 = vadd.f32 %v18805_v21, %v10826_v45 }
 0x5c2   : > { %v10940_v24 = vpop.f32.mrf.mxu1  ;;  %v18822_v18 = vpop.f32.mrf.mxu0 }
 0x5c3   : > { %v10969_v43 = vadd.f32 %v10940_v24, %v10821_v56  ;;  %v11076_v40 = vadd.f32 %v18816_v41, %v10970_v15 }
 0x5c4   : > { %v18808_v28 = vpop.f32.mrf.mxu1  ;;  %v11066_v7 = vpop.f32.mrf.mxu0 }
 0x5c5   : > { %v10972_v30 = vadd.f32 %v18808_v28, %v10836_v5  ;;  %v11075_v57 = vadd.f32 %v11046_v59, %v10969_v43 }
 0x5c6   : > { %v10950_v32 = vpop.f32.mrf.mxu1  ;;  %v18838_v38 = vpop.f32.mrf.mxu0 }
 0x5c7   : > { %v10971_v47 = vadd.f32 %v10950_v32, %v10831_v54  ;;  %v11078_v63 = vadd.f32 %v18819_v3, %v10972_v30 }
 0x5c8   : > { %v18811_v51 = vpop.f32.mrf.mxu1  ;;  %v11264_v11 = vpop.f32.mrf.mxu0 }
 0x5c9   : > { %v10974_v34 = vadd.f32 %v18811_v51, %v10846_v9  ;;  %v11077_v42 = vadd.f32 %v11056_v50, %v10971_v47 }
 0x5ca   : > { %v10960_v46 = vpop.f32.mrf.mxu1  ;;  %v18841_v6 = vpop.f32.mrf.mxu0 }
 0x5cb   : > { %v10973_v22 = vadd.f32 %v10960_v46, %v10841_v37  ;;  %v11080_v58 = vadd.f32 %v18822_v18, %v10974_v34  ;;  %v16331_v18 = vld [vmem:[%s25527_s7] ss:$0 sm:$0xff]  ;;  %s25570_s7 = sld [smem:[#allocation92_spill]] }
 0x5cc   : > { %v18827_v31 = vpop.f32.mrf.mxu1  ;;  %v11274_v53 = vpop.f32.mrf.mxu0 }
 0x5cd   : > { %v11185_v27 = vadd.f32 %v18827_v31, %v11076_v40  ;;  %v11079_v1 = vadd.f32 %v11066_v7, %v10973_v22 }
 0x5ce   : > { %v11155_v17 = vpop.f32.mrf.mxu1  ;;  %v18844_v12 = vpop.f32.mrf.mxu0 }
 0x5cf   : > { %v11184_v26 = vadd.f32 %v11155_v17, %v11075_v57  ;;  %v11294_v2 = vadd.f32 %v18838_v38, %v11185_v27 }
 0x5d0   : > { %v18830_v4 = vpop.f32.mrf.mxu1  ;;  %v11284_v61 = vpop.f32.mrf.mxu0 }
 0x5d1   : > { %v11187_v16 = vadd.f32 %v18830_v4, %v11078_v63  ;;  %v11293_v25 = vadd.f32 %v11264_v11, %v11184_v26 }
 0x5d2   : > { %v11165_v29 = vpop.f32.mrf.mxu1  ;;  %v18860_v55 = vpop.f32.mrf.mxu0 }
 0x5d3   : > { %v11186_v44 = vadd.f32 %v11165_v29, %v11077_v42  ;;  %v11296_v20 = vadd.f32 %v18841_v6, %v11187_v16 }
 0x5d4   : > { %v18833_v60 = vpop.f32.mrf.mxu1  ;;  %v11479_v35 = vpop.f32.mrf.mxu0 }
 0x5d5   : > { %v11189_v62 = vadd.f32 %v18833_v60, %v11080_v58  ;;  %v11295_v14 = vadd.f32 %v11274_v53, %v11186_v44 }
 0x5d6   : > { %v11175_v39 = vpop.f32.mrf.mxu1  ;;  %v18863_v48 = vpop.f32.mrf.mxu0 }
 0x5d7   : > { %v11188_v8 = vadd.f32 %v11175_v39, %v11079_v1  ;;  %v11298_v28 = vadd.f32 %v18844_v12, %v11189_v62 }
 0x5d8   : > { %v18849_v0 = vpop.f32.mrf.mxu1  ;;  %v11489_v21 = vpop.f32.mrf.mxu0 }
 0x5d9   : > { %v11400_v33 = vadd.f32 %v18849_v0, %v11294_v2  ;;  %v11297_v46 = vadd.f32 %v11284_v61, %v11188_v8 }
 0x5da   : > { %v11370_v10 = vpop.f32.mrf.mxu1  ;;  %v18866_v51 = vpop.f32.mrf.mxu0 }
 0x5db   : > { %v11399_v49 = vadd.f32 %v11370_v10, %v11293_v25  ;;  %v11509_v3 = vadd.f32 %v18860_v55, %v11400_v33 }
 0x5dc   : > { %v18852_v23 = vpop.f32.mrf.mxu1  ;;  %v11499_v15 = vpop.f32.mrf.mxu0 }
 0x5dd   : > { %v11402_v59 = vadd.f32 %v18852_v23, %v11296_v20  ;;  %v11508_v38 = vadd.f32 %v11479_v35, %v11399_v49 }
 0x5de   : > { %v11380_v52 = vpop.f32.mrf.mxu1 }
 0x5df   : > { %v11401_v50 = vadd.f32 %v11380_v52, %v11295_v14  ;;  %v11511_v31 = vadd.f32 %v18863_v48, %v11402_v59 }
 0x5e0   : > { %v18855_v13 = vpop.f32.mrf.mxu1 }
 0x5e1   : > { %v11404_v7 = vadd.f32 %v18855_v13, %v11298_v28  ;;  %v11510_v56 = vadd.f32 %v11489_v21, %v11401_v50  ;;  %v11714_v28 = vrot.slane %v23949_v19, 1 }
 0x5e2   : > { %v11390_v41 = vpop.f32.mrf.mxu1 }
 0x5e3   : > { %v11403_v53 = vadd.f32 %v11390_v41, %v11297_v46  ;;  %v11513_v60 = vadd.f32 %v18866_v51, %v11404_v7 }
 0x5e4   : > { %v18871_v24 = vpop.f32.mrf.mxu1 }
 0x5e5   : > { %v11618_v32 = vadd.f32 %v18871_v24, %v11509_v3  ;;  %v11512_v40 = vadd.f32 %v11499_v15, %v11403_v53  ;;  %v16361_v15 = vld [vmem:[%s25526_s8 + $0x28] sm:$0xff] }
 0x5e6   : > { %v11588_v11 = vpop.f32.mrf.mxu1 }
 0x5e7   : > { %v11617_v6 = vadd.f32 %v11588_v11, %v11508_v38  ;;  %v11631_v17 = vadd.f32 %v16331_v18, %v11618_v32  ;;  %v16343_v38 = vld [vmem:[%s25526_s8 + $0x10] sm:$0xff] }
 0x5e8   : > { %v18874_v4 = vpop.f32.mrf.mxu1 }
 0x5e9   : > { %v11630_v45 = vadd.f32 %v16331_v18, %v11617_v6  ;;  %v11620_v29 = vadd.f32 %v18874_v4, %v11511_v31  ;;  %v11642_v54 = vrot.slane %v11631_v17, 1 }
 0x5ea   : > { %v11598_v12 = vpop.f32.mrf.mxu1 }
 0x5eb   : > { %v11641_v5 = vrot.slane %v11630_v45, 1  ;;  %v11633_v43 = vadd.f32 %v16331_v18, %v11620_v29  ;;  %v11619_v39 = vadd.f32 %v11598_v12, %v11510_v56 }
 0x5ec   : > { %v18877_v30 = vpop.f32.mrf.mxu1 }
 0x5ed   : > { %v11632_v55 = vadd.f32 %v16331_v18, %v11619_v39  ;;  %v11622_v0 = vadd.f32 %v18877_v30, %v11513_v60  ;;  %v11643_v61 = vsel %vm736_vm2, %v11641_v5, %v11642_v54  ;;  %v11646_v47 = vrot.slane %v11633_v43, 1 }
 0x5ee   : > { %v11608_v9 = vpop.f32.mrf.mxu1  ;;  %v11655_v35 = vmax.f32 %v11630_v45, %v11643_v61  ;;  %v12041_v45 = vrot.slane %v23949_v19, 7  ;;  %v11925_v5 = vrot.slane %v23949_v19, 2  ;;  %v16355_v19 = vld [vmem:[%s25526_s8 + $0x20] sm:$0xff] }
 0x5ef   : > { %v11644_v27 = vrot.slane %v11632_v55, 1  ;;  %v11635_v57 = vadd.f32 %v16331_v18, %v11622_v0  ;;  %v11621_v10 = vadd.f32 %v11608_v9, %v11512_v40 }
 0x5f1   : > { %v11645_v37 = vsel %vm736_vm2, %v11642_v54, %v11644_v27  ;;  %v11647_v34 = vsel %vm736_vm2, %v11644_v27, %v11646_v47  ;;  %v11661_v26 = vrot.slane %v11635_v57, 1  ;;  %v11634_v63 = vadd.f32 %v16331_v18, %v11621_v10 }
 0x5f2   : > { %v11656_v23 = vmax.f32 %v11631_v17, %v11645_v37  ;;  %v11657_v22 = vmax.f32 %v11632_v55, %v11647_v34  ;;  %v16373_v37 = vld [vmem:[%s25526_s8 + $0x38] sm:$0xff] }
 0x5f3   : > { %v11648_v16 = vrot.slane %v11634_v63, 1  ;;  %v11666_v52 = vmax.f32 %v11635_v57, %v11661_v26 }
 0x5f4   : > { %v11667_v42 = vmax.f32 %v11655_v35, %v11656_v23  ;;  %v11668_v2 = vmax.f32 %v11656_v23, %v11657_v22 }
 0x5f5   : > { %v11649_v44 = vsel %vm736_vm2, %v11646_v47, %v11648_v16  ;;  %v11659_v58 = vmax.f32 %v11634_v63, %v11648_v16  ;;  %v11662_v33 = vsel %vm736_vm2, %v11648_v16, %v11661_v26  ;;  %v16367_v26 = vld [vmem:[%s25526_s8 + $0x30] sm:$0xff]  ;;  %v16379_v16 = vld [vmem:[%s25526_s8 + $0x40] sm:$0xff]  ;;  %s650_s8 = scalar_lea.vmem %s25570_s7, %s19673_s0  ;;  %s642_s7 = scalar_lea.vmem [#allocation10], %s24678_s3 }
 0x5f6   : > { %vm11672_vm1 = vcmp.gt.f32.partialorder %v11667_v42, 0.0  ;;  %vm11673_vm14 = vcmp.gt.f32.partialorder %v11668_v2, 0.0  ;;  %v11677_v25 = vmul.f32 0.01, %v11667_v42  ;;  %v11678_v48 = vmul.f32 0.01, %v11668_v2 }
 0x5f7   : > { %v11658_v13 = vmax.f32 %v11633_v43, %v11649_v44  ;;  %v11665_v62 = vmax.f32 %v11634_v63, %v11662_v33  ;;  %v11671_v1 = vmax.f32 %v11659_v58, %v11666_v52  ;;  %v24157_v44 = vpop.f32.mrf.mxu1  ;;  %s25013_s0 = sshll.u32 %s19574_s2, 4  ;;  %s15306_s30 = sshll.u32 %s642_s7, 4  ;;  %s15307_s30 = int_to_ptr.vmem [resolvable:$true] %s15306_s30 }
 0x5f8   : > { %v11682_v49 = vsel %vm11672_vm1, %v11667_v42, %v11677_v25  ;;  %v11683_v20 = vsel %vm11673_vm14, %v11668_v2, %v11678_v48  ;;  %vm25532_vm14 = vcmask 1041408   ;;  %s19352_s5 = scalar_lea.vmem %s15307_s30, 16  ;;  %p19359_p0 = scmp.lt.s32.totalorder %s15307_s30, %s19357_s27 }
 0x5f9   : > { %11694 = vst.msk [vmem:[#allocation5 + $0x8] sm:$0x1f] %vm9254_vm13, %v11682_v49  ;;  %11695 = vst.msk [vmem:[#allocation5 + $0xf] sm:$0x1f] %vm9254_vm13, %v11683_v20  ;;  %v11669_v41 = vmax.f32 %v11657_v22, %v11658_v13  ;;  %v11670_v8 = vmax.f32 %v11658_v13, %v11665_v62  ;;  %vm11676_vm11 = vcmp.gt.f32.partialorder %v11671_v1, 0.0  ;;  %v18899_v58 = vpop.f32.mrf.mxu1  ;;  %v16386_v20 = vld [vmem:[%s25537_s10 + $0x8] sm:$0xff]  ;;  %p19353_p11 = scmp.ne.s32.totalorder %s15307_s30, %s19352_s5  ;;  %p19360_p1 = scmp.lt.s32.totalorder %s19358_s23, %s19352_s5 }
 0x5fa   : > { %v11681_v59 = vmul.f32 0.01, %v11671_v1  ;;  %v11705_v49 = vld [vmem:[#allocation5 + $0x30] sm:$0x1] }
 0x5fb   : > { %vm11674_vm8 = vcmp.gt.f32.partialorder %v11669_v41, 0.0  ;;  %vm11675_vm7 = vcmp.gt.f32.partialorder %v11670_v8, 0.0  ;;  %v11679_v14 = vmul.f32 0.01, %v11669_v41  ;;  %v11680_v3 = vmul.f32 0.01, %v11670_v8  ;;  %p19354_p12 = pnand %p19353_p11, %p19591_p5  ;;  %p19361_p2 = por %p19360_p1, %p19359_p0 }
 0x5fc   : > { %v11686_v21 = vsel %vm11676_vm11, %v11671_v1, %v11681_v59  ;;  %vm25533_vm11 = vmmov %vm25532_vm14 }
 0x5fd   : > { %v11684_v24 = vsel %vm11674_vm8, %v11669_v41, %v11679_v14  ;;  %v11685_v50 = vsel %vm11675_vm7, %v11670_v8, %v11680_v3  ;;  %11698 = vst.msk [vmem:[#allocation5 + $0x24] sm:$0x1f] %vm9254_vm13, %v11686_v21  ;;  %vm25535_vm7 = vmmov %vm25533_vm11  ;;  %v16393_v41 = vld [vmem:[%s25537_s10 + $0x10] sm:$0xff]  ;;  %p19355_p13 = pneg %p19354_p12 }
 0x5fe   : > { %11696 = vst.msk [vmem:[#allocation5 + $0x16] sm:$0x1f] %vm9254_vm13, %v11684_v24  ;;  %11697 = vst.msk [vmem:[#allocation5 + $0x1d] sm:$0x1f] %vm9254_vm13, %v11685_v50  ;;  %vm25528_vm13 = vcmask 1040384  }
 0x5ff   : > { %vm25529_vm3 = vmmov %vm25528_vm13  ;;  %p19362_p3 = pnand %p19361_p2, %p19355_p13 }
 0x600   : > { %v23979_v32 = vld [vmem:[#allocation5 + $0x8] sm:$0xff]  ;;  %vm25530_vm6 = vmmov %vm25529_vm3 }
 0x601   : > { %18901 = vmatmul.mubr.msk.f32.gmra.mxu1 %vm9237_vm9, %v23979_v32  ;;  %v11715_v18 = vrot.slane %v23979_v32, 1  ;;  %v12042_v29 = vrot.slane %v23979_v32, 7  ;;  %v11926_v43 = vrot.slane %v23979_v32, 2  ;;  %vm25531_vm1 = vmmov %vm25529_vm3  ;;  %v12360_v22 = vrot.slane %v23979_v32, 6 }
 0x602   : > { %18903 = vmatprep.mubr.msk.f32.mxu1 %vm19445_vm0, %v25525_v36  ;;  %vm25534_vm8 = vmmov %vm25531_vm1 }
 0x603   : > { %v11716_v51 = vsel %vm736_vm2, %v11714_v28, %v11715_v18  ;;  %v12043_v12 = vsel %vm25528_vm13, %v12041_v45, %v12042_v29  ;;  %v11927_v30 = vsel %vm1099_vm4, %v11925_v5, %v11926_v43  ;;  %vm25536_vm13 = vmmov %vm25535_vm7 }
 0x604   : > { %18881 = vmatmul.mubr.msk.f32.vlgmr.msra.gmra.mxu0 %vm9237_vm9, %v11716_v51  ;;  %v24102_v34 = vld [vmem:[#allocation5 + $0x28] sm:$0xff] }
 0x605   : > { %18913 = vmatpush3.msra.mxu0 %v16343_v38  ;;  %v23991_v11 = vld [vmem:[#allocation5 + $0x10] sm:$0xff]  ;;  %18883 = vmatprep.mubr.msk.f32.mxu0 %vm19445_vm0, %v25525_v36  ;;  %v23995_v7 = vld [vmem:[#allocation5 + $0x18] sm:$0xff]  ;;  %v24006_v17 = vld [vmem:[#allocation5 + $0x20] sm:$0xff]  ;;  %v12257_v63 = vrot.slane %v24102_v34, 1  ;;  %v12476_v52 = vrot.slane %v24102_v34, 7  ;;  %v12367_v62 = vrot.slane %v24102_v34, 6 }
 0x606   : > { %18904 = vmatmul.mubr.msk.f32.gmra.mxu1 %vm9237_vm9, %v23991_v11  ;;  %v11717_v46 = vrot.slane %v23991_v11, 1  ;;  %18946 = vmatprep.subr.mxu0 %v25525_v36  ;;  %v11719_v31 = vrot.slane %v23995_v7, 1  ;;  %v24016_v53 = vrot.slane %v24006_v17, 1  ;;  %v12044_v60 = vrot.slane %v23991_v11, 7 }
 0x607   : > { %18906 = vmatprep.mubr.msk.f32.mxu1 %vm19445_vm0, %v25525_v36  ;;  %v12046_v54 = vrot.slane %v23995_v7, 7  ;;  %v11928_v40 = vrot.slane %v23991_v11, 2  ;;  %v24060_v0 = vrot.slane %v24006_v17, 7  ;;  %v11930_v9 = vrot.slane %v23995_v7, 2 }
 0x608   : > { %v11718_v6 = vsel %vm736_vm2, %v11715_v18, %v11717_v46  ;;  %v11720_v4 = vsel %vm736_vm2, %v11717_v46, %v11719_v31  ;;  %v11722_v56 = vsel %vm736_vm2, %v11719_v31, %v24016_v53  ;;  %v12045_v39 = vsel %vm25529_vm3, %v12042_v29, %v12044_v60 }
 0x609   : > { %18884 = vmatmul.mubr.msk.f32.gmra.mxu0 %vm9237_vm9, %v11718_v6  ;;  %v12047_v55 = vsel %vm25530_vm6, %v12044_v60, %v12046_v54  ;;  %v11929_v61 = vsel %vm1099_vm4, %v11926_v43, %v11928_v40  ;;  %v12049_v47 = vsel %vm25531_vm1, %v12046_v54, %v24060_v0  ;;  %v11931_v27 = vsel %vm1099_vm4, %v11928_v40, %v11930_v9  ;;  %vm25539_vm6 = vmmov %vm25531_vm1 }
 0x60a   : > { %18907 = vmatmul.mubr.msk.f32.gmra.mxu1 %vm9237_vm9, %v23995_v7  ;;  %18886 = vmatprep.mubr.msk.f32.mxu0 %vm19445_vm0, %v25525_v36  ;;  %v11932_v57 = vrot.slane %v24006_v17, 2  ;;  %v12258_v35 = vsel %vm736_vm2, %v24016_v53, %v12257_v63  ;;  %v12361_v23 = vrot.slane %v23991_v11, 6  ;;  %v12363_v2 = vrot.slane %v23995_v7, 6 }
 0x60b   : > { %18909 = vmatprep.mubr.msk.f32.mxu1 %vm19445_vm0, %v25525_v36  ;;  %v12365_v25 = vrot.slane %v24006_v17, 6  ;;  %v12477_v48 = vsel %vm25534_vm8, %v24060_v0, %v12476_v52  ;;  %vm12750_vm3 = vcmask 60416  }
 0x60c   : > { %v11933_v10 = vsel %vm1099_vm4, %v11930_v9, %v11932_v57  ;;  %v12362_v42 = vsel %vm25532_vm14, %v12360_v22, %v12361_v23  ;;  %v12364_v33 = vsel %vm25533_vm11, %v12361_v23, %v12363_v2  ;;  %12751 = vst.msk [vmem:[#allocation6 + $0x20] sm:$0xf] %vm12750_vm3, %v25525_v36  ;;  %vm12753_vm14 = vcmask 64519   ;;  %vm25540_vm11 = vmmov %vm25539_vm6 }
 0x60d   : > { %18887 = vmatmul.mubr.msk.f32.gmra.mxu0 %vm9237_vm9, %v11720_v4  ;;  %v12366_v13 = vsel %vm25535_vm7, %v12363_v2, %v12365_v25  ;;  %v12368_v1 = vsel %vm25536_vm13, %v12365_v25, %v12367_v62  ;;  %vm25541_vm7 = vmmov %vm25539_vm6  ;;  %vm25542_vm13 = vcmask 64518  }
 0x60e   : > { %18910 = vmatmul.mubr.msk.f32.gmra.mxu1 %vm9237_vm9, %v24006_v17  ;;  %18889 = vmatprep.mubr.msk.f32.mxu0 %vm19445_vm0, %v25525_v36 }
 0x60f   : > { %18931 = vmatprep.mubr.msk.f32.mxu1 %vm19445_vm0, %v25525_v36 }
 0x611   : > { %18890 = vmatmul.mubr.msk.f32.gmra.mxu0 %vm9237_vm9, %v11722_v56 }
 0x612   : > { %18932 = vmatmul.mubr.msk.f32.vlgmr.msra.gmra.mxu1 %vm9237_vm9, %v12043_v12  ;;  %18892 = vmatprep.mubr.msk.f32.mxu0 %vm19445_vm0, %v25525_v36 }
 0x613   : > { %18934 = vmatprep.mubr.msk.f32.mxu1 %vm19445_vm0, %v25525_v36  ;;  %18964 = vmatpush3.msra.mxu1 %v16361_v15 }
 0x614   : > { %18997 = vmatprep.subr.mxu1 %v25525_v36 }
 0x615   : > { %18893 = vmatmul.mubr.msk.f32.gmra.mxu0 %vm9237_vm9, %v24016_v53 }
 0x616   : > { %18935 = vmatmul.mubr.msk.f32.gmra.mxu1 %vm9237_vm9, %v12045_v39  ;;  %18914 = vmatprep.mubr.msk.f32.mxu0 %vm19445_vm0, %v25525_v36 }
 0x617   : > { %18937 = vmatprep.mubr.msk.f32.mxu1 %vm19445_vm0, %v25525_v36 }
 0x619   : > { %18915 = vmatmul.mubr.msk.f32.vlgmr.msra.gmra.mxu0 %vm9237_vm9, %v11927_v30 }
 0x61a   : > { %18947 = vmatpush3.msra.mxu0 %v16355_v19  ;;  %18938 = vmatmul.mubr.msk.f32.gmra.mxu1 %vm9237_vm9, %v12047_v55 }
 0x61b   : > { %18917 = vmatprep.mubr.msk.f32.mxu0 %vm19445_vm0, %v25525_v36  ;;  %18940 = vmatprep.mubr.msk.f32.mxu1 %vm19445_vm0, %v25525_v36 }
 0x61c   : > { %18980 = vmatprep.subr.mxu0 %v25525_v36 }
 0x61d   : > { %18918 = vmatmul.mubr.msk.f32.gmra.mxu0 %vm9237_vm9, %v11929_v61 }
 0x61e   : > { %18941 = vmatmul.mubr.msk.f32.gmra.mxu1 %vm9237_vm9, %v12049_v47  ;;  %18920 = vmatprep.mubr.msk.f32.mxu0 %vm19445_vm0, %v25525_v36 }
 0x61f   : > { %18943 = vmatprep.mubr.msk.f32.mxu1 %vm19445_vm0, %v25525_v36 }
 0x621   : > { %18921 = vmatmul.mubr.msk.f32.gmra.mxu0 %vm9237_vm9, %v11931_v27 }
 0x622   : > { %18944 = vmatmul.mubr.msk.f32.gmra.mxu1 %vm9237_vm9, %v24060_v0  ;;  %18923 = vmatprep.mubr.msk.f32.mxu0 %vm19445_vm0, %v25525_v36 }
 0x623   : > { %18965 = vmatprep.mubr.msk.f32.mxu1 %vm19445_vm0, %v25525_v36 }
 0x625   : > { %18924 = vmatmul.mubr.msk.f32.gmra.mxu0 %vm9237_vm9, %v11933_v10 }
 0x626   : > { %18966 = vmatmul.mubr.msk.f32.vlgmr.msra.gmra.mxu1 %vm9237_vm9, %v11718_v6  ;;  %18926 = vmatprep.mubr.msk.f32.mxu0 %vm19445_vm0, %v25525_v36 }
 0x627   : > { %18968 = vmatprep.mubr.msk.f32.mxu1 %vm19445_vm0, %v25525_v36  ;;  %18998 = vmatpush3.msra.mxu1 %v16373_v37 }
 0x628   : > { %19031 = vmatprep.subr.mxu1 %v25525_v36 }
 0x629   : > { %18927 = vmatmul.mubr.msk.f32.gmra.mxu0 %vm9237_vm9, %v11932_v57 }
 0x62a   : > { %18969 = vmatmul.mubr.msk.f32.gmra.mxu1 %vm9237_vm9, %v11720_v4  ;;  %18948 = vmatprep.mubr.msk.f32.mxu0 %vm19445_vm0, %v25525_v36 }
 0x62b   : > { %18971 = vmatprep.mubr.msk.f32.mxu1 %vm19445_vm0, %v25525_v36 }
 0x62d   : > { %18949 = vmatmul.mubr.msk.f32.vlgmr.msra.gmra.mxu0 %vm9237_vm9, %v23979_v32 }
 0x62e   : > { %18981 = vmatpush3.msra.mxu0 %v16367_v26  ;;  %18972 = vmatmul.mubr.msk.f32.gmra.mxu1 %vm9237_vm9, %v11722_v56 }
 0x62f   : > { %18951 = vmatprep.mubr.msk.f32.mxu0 %vm19445_vm0, %v25525_v36  ;;  %18974 = vmatprep.mubr.msk.f32.mxu1 %vm19445_vm0, %v25525_v36 }
 0x630   : > { %19014 = vmatprep.subr.mxu0 %v25525_v36 }
 0x631   : > { %18952 = vmatmul.mubr.msk.f32.gmra.mxu0 %vm9237_vm9, %v23991_v11 }
 0x632   : > { %18975 = vmatmul.mubr.msk.f32.gmra.mxu1 %vm9237_vm9, %v12258_v35  ;;  %18954 = vmatprep.mubr.msk.f32.mxu0 %vm19445_vm0, %v25525_v36 }
 0x633   : > { %18977 = vmatprep.mubr.msk.f32.mxu1 %vm19445_vm0, %v25525_v36 }
 0x635   : > { %18955 = vmatmul.mubr.msk.f32.gmra.mxu0 %vm9237_vm9, %v23995_v7 }
 0x636   : > { %18978 = vmatmul.mubr.msk.f32.gmra.mxu1 %vm9237_vm9, %v12257_v63  ;;  %18957 = vmatprep.mubr.msk.f32.mxu0 %vm19445_vm0, %v25525_v36 }
 0x637   : > { %18999 = vmatprep.mubr.msk.f32.mxu1 %vm19445_vm0, %v25525_v36 }
 0x639   : > { %18958 = vmatmul.mubr.msk.f32.gmra.mxu0 %vm9237_vm9, %v24006_v17 }
 0x63a   : > { %19000 = vmatmul.mubr.msk.f32.vlgmr.msra.gmra.mxu1 %vm9237_vm9, %v12045_v39  ;;  %18960 = vmatprep.mubr.msk.f32.mxu0 %vm19445_vm0, %v25525_v36 }
 0x63b   : > { %19002 = vmatprep.mubr.msk.f32.mxu1 %vm19445_vm0, %v25525_v36  ;;  %19032 = vmatpush3.msra.mxu1 %v16386_v20 }
 0x63c   : > { %19042 = vmatprep.subr.mxu1 %v25525_v36 }
 0x63d   : > { %18961 = vmatmul.mubr.msk.f32.gmra.mxu0 %vm9237_vm9, %v24102_v34 }
 0x63e   : > { %19003 = vmatmul.mubr.msk.f32.gmra.mxu1 %vm9237_vm9, %v12047_v55  ;;  %18982 = vmatprep.mubr.msk.f32.mxu0 %vm19445_vm0, %v25525_v36 }
 0x63f   : > { %19005 = vmatprep.mubr.msk.f32.mxu1 %vm19445_vm0, %v25525_v36 }
 0x641   : > { %18983 = vmatmul.mubr.msk.f32.vlgmr.msra.gmra.mxu0 %vm9237_vm9, %v12362_v42 }
 0x642   : > { %19015 = vmatpush3.msra.mxu0 %v16379_v16  ;;  %19006 = vmatmul.mubr.msk.f32.gmra.mxu1 %vm9237_vm9, %v12049_v47 }
 0x643   : > { %18985 = vmatprep.mubr.msk.f32.mxu0 %vm19445_vm0, %v25525_v36  ;;  %19008 = vmatprep.mubr.msk.f32.mxu1 %vm19445_vm0, %v25525_v36 }
 0x644   : > { %19053 = vmatprep.subr.mxu0 %v25525_v36 }
 0x645   : > { %18986 = vmatmul.mubr.msk.f32.gmra.mxu0 %vm9237_vm9, %v12364_v33 }
 0x646   : > { %19009 = vmatmul.mubr.msk.f32.gmra.mxu1 %vm9237_vm9, %v12477_v48  ;;  %18988 = vmatprep.mubr.msk.f32.mxu0 %vm19445_vm0, %v25525_v36 }
 0x647   : > { %19011 = vmatprep.mubr.msk.f32.mxu1 %vm19445_vm0, %v25525_v36 }
 0x649   : > { %18989 = vmatmul.mubr.msk.f32.gmra.mxu0 %vm9237_vm9, %v12366_v13 }
 0x64a   : > { %19012 = vmatmul.mubr.msk.f32.gmra.mxu1 %vm9237_vm9, %v12476_v52  ;;  %18991 = vmatprep.mubr.msk.f32.mxu0 %vm19445_vm0, %v25525_v36 }
 0x64b   : > { %19033 = vmatprep.mubr.msk.f32.mxu1 %vm19445_vm0, %v25525_v36 }
 0x64d   : > { %18992 = vmatmul.mubr.msk.f32.gmra.mxu0 %vm9237_vm9, %v12368_v1 }
 0x64e   : > { %18994 = vmatprep.mubr.msk.f32.mxu0 %vm19445_vm0, %v25525_v36 }
 0x651   : > { %18995 = vmatmul.mubr.msk.f32.gmra.mxu0 %vm9237_vm9, %v12367_v62 }
 0x652   : > { %19016 = vmatprep.mubr.msk.f32.mxu0 %vm19445_vm0, %v25525_v36 }
 0x655   : > { %19017 = vmatmul.mubr.msk.f32.vlgmr.msra.gmra.mxu0 %vm9237_vm9, %v23991_v11 }
 0x656   : > { %19019 = vmatprep.mubr.msk.f32.mxu0 %vm19445_vm0, %v25525_v36  ;;  %19054 = vmatpush3.msra.mxu0 %v16393_v41 }
 0x657   : > { %19075 = vmatprep.subr.mxu0 %v25525_v36 }
 0x659   : > { %19020 = vmatmul.mubr.msk.f32.gmra.mxu0 %vm9237_vm9, %v23995_v7 }
 0x65a   : > { %19022 = vmatprep.mubr.msk.f32.mxu0 %vm19445_vm0, %v25525_v36 }
 0x65d   : > { %19023 = vmatmul.mubr.msk.f32.gmra.mxu0 %vm9237_vm9, %v24006_v17 }
 0x65e   : > { %19025 = vmatprep.mubr.msk.f32.mxu0 %vm19445_vm0, %v25525_v36 }
 0x661   : > { %19026 = vmatmul.mubr.msk.f32.gmra.mxu0 %vm9237_vm9, %v24102_v34 }
 0x662   : > { %19028 = vmatprep.mubr.msk.f32.mxu0 %vm19445_vm0, %v25525_v36 }
 0x665   : > { %19029 = vmatmul.mubr.msk.f32.gmra.mxu0 %vm9237_vm9, %v11705_v49 }
 0x666   : > { %19055 = vmatprep.mubr.msk.f32.mxu0 %vm19445_vm0, %v25525_v36 }
 0x6c1   : > { %v11904_v8 = vpop.f32.mrf.mxu1 }
 0x6c3   : > { %v18902_v59 = vpop.f32.mrf.mxu1 }
 0x6c4   : > { %v11799_v14 = vpop.f32.mrf.mxu0 }
 0x6c5   : > { %v11900_v60 = vadd.f32 %v24157_v44, %v11799_v14 }
 0x6c6   : > { %v11909_v3 = vpop.f32.mrf.mxu1  ;;  %v18882_v21 = vpop.f32.mrf.mxu0 }
 0x6c8   : > { %v18905_v24 = vpop.f32.mrf.mxu1 }
 0x6c9   : > { %v11804_v50 = vpop.f32.mrf.mxu0 }
 0x6ca   : > { %v24219_v28 = vadd.f32 %v11904_v8, %v11804_v50  ;;  %v11914_v32 = vpop.f32.mrf.mxu1 }
 0x6cb   : > { %v18885_v18 = vpop.f32.mrf.mxu0 }
 0x6cc   : > { %v18908_v38 = vpop.f32.mrf.mxu1 }
 0x6cd   : > { %v11809_v51 = vpop.f32.mrf.mxu0 }
 0x6ce   : > { %v24221_v11 = vadd.f32 %v11909_v3, %v11809_v51  ;;  %v11919_v7 = vpop.f32.mrf.mxu1 }
 0x6cf   : > { %v18888_v46 = vpop.f32.mrf.mxu0 }
 0x6d0   : > { %v18911_v6 = vpop.f32.mrf.mxu1 }
 0x6d1   : > { %v11814_v31 = vpop.f32.mrf.mxu0 }
 0x6d2   : > { %v24223_v17 = vadd.f32 %v11914_v32, %v11814_v31  ;;  %v12126_v4 = vpop.f32.mrf.mxu1 }
 0x6d3   : > { %v18891_v53 = vpop.f32.mrf.mxu0 }
 0x6d4   : > { %v18933_v45 = vpop.f32.mrf.mxu1 }
 0x6d5   : > { %v11819_v29 = vpop.f32.mrf.mxu0 }
 0x6d6   : > { %v24225_v56 = vadd.f32 %v11919_v7, %v11819_v29  ;;  %v12131_v15 = vpop.f32.mrf.mxu1 }
 0x6d7   : > { %v18894_v12 = vpop.f32.mrf.mxu0 }
 0x6d8   : > { %v18936_v5 = vpop.f32.mrf.mxu1 }
 0x6d9   : > { %v12010_v43 = vpop.f32.mrf.mxu0 }
 0x6da   : > { %v12034_v39 = vadd.f32 %v12010_v43, %v11900_v60  ;;  %v12136_v54 = vpop.f32.mrf.mxu1 }
 0x6db   : > { %v18916_v19 = vpop.f32.mrf.mxu0 }
 0x6dc   : > { %v18939_v30 = vpop.f32.mrf.mxu1  ;;  %v12150_v40 = vadd.f32 %v12126_v4, %v12034_v39 }
 0x6dd   : > { %v12015_v55 = vpop.f32.mrf.mxu0 }
 0x6de   : > { %v12141_v0 = vpop.f32.mrf.mxu1  ;;  %v12035_v6 = vadd.f32 %v12015_v55, %v24219_v28 }
 0x6df   : > { %v18919_v61 = vpop.f32.mrf.mxu0 }
 0x6e0   : > { %v18942_v9 = vpop.f32.mrf.mxu1  ;;  %v12151_v60 = vadd.f32 %v12131_v15, %v12035_v6 }
 0x6e1   : > { %v12020_v47 = vpop.f32.mrf.mxu0 }
 0x6e2   : > { %v24228_v27 = vpop.f32.mrf.mxu1  ;;  %v12036_v12 = vadd.f32 %v12020_v47, %v24221_v11 }
 0x6e3   : > { %v18922_v57 = vpop.f32.mrf.mxu0 }
 0x6e4   : > { %v18945_v10 = vpop.f32.mrf.mxu1  ;;  %v12152_v9 = vadd.f32 %v12136_v54, %v12036_v12 }
 0x6e5   : > { %v12025_v37 = vpop.f32.mrf.mxu0 }
 0x6e6   : > { %v12329_v34 = vpop.f32.mrf.mxu1  ;;  %v12037_v30 = vadd.f32 %v12025_v37, %v24223_v17  ;;  %v16385_v17 = vld [vmem:[%s25538_s9] ss:$0 sm:$0xff] }
 0x6e7   : > { %v18925_v26 = vpop.f32.mrf.mxu0 }
 0x6e8   : > { %v18967_v63 = vpop.f32.mrf.mxu1  ;;  %v12153_v55 = vadd.f32 %v12141_v0, %v12037_v30 }
 0x6e9   : > { %v12030_v35 = vpop.f32.mrf.mxu0 }
 0x6ea   : > { %v12334_v23 = vpop.f32.mrf.mxu1 }
 0x6eb   : > { %v18928_v22 = vpop.f32.mrf.mxu0 }
 0x6ec   : > { %v18970_v16 = vpop.f32.mrf.mxu1 }
 0x6ed   : > { %v12226_v42 = vpop.f32.mrf.mxu0 }
 0x6ee   : > { %v12339_v2 = vpop.f32.mrf.mxu1  ;;  %v12250_v53 = vadd.f32 %v12226_v42, %v12150_v40  ;;  %v12038_v40 = vadd.f32 %v12030_v35, %v24225_v56 }
 0x6ef   : > { %v18950_v52 = vpop.f32.mrf.mxu0 }
 0x6f0   : > { %v18973_v44 = vpop.f32.mrf.mxu1  ;;  %v12353_v19 = vadd.f32 %v12329_v34, %v12250_v53  ;;  %v12154_v54 = vadd.f32 %v24228_v27, %v12038_v40 }
 0x6f1   : > { %v12231_v58 = vpop.f32.mrf.mxu0 }
 0x6f2   : > { %v12344_v33 = vpop.f32.mrf.mxu1  ;;  %v12251_v39 = vadd.f32 %v12231_v58, %v12151_v60 }
 0x6f3   : > { %v18953_v25 = vpop.f32.mrf.mxu0 }
 0x6f4   : > { %v18976_v48 = vpop.f32.mrf.mxu1  ;;  %v12354_v28 = vadd.f32 %v12334_v23, %v12251_v39 }
 0x6f5   : > { %v12236_v13 = vpop.f32.mrf.mxu0 }
 0x6f6   : > { %v12349_v62 = vpop.f32.mrf.mxu1  ;;  %v12252_v26 = vadd.f32 %v12236_v13, %v12152_v9 }
 0x6f7   : > { %v18956_v1 = vpop.f32.mrf.mxu0 }
 0x6f8   : > { %v18979_v49 = vpop.f32.mrf.mxu1  ;;  %v12355_v47 = vadd.f32 %v12339_v2, %v12252_v26 }
 0x6f9   : > { %v12241_v20 = vpop.f32.mrf.mxu0 }
 0x6fa   : > { %v12548_v41 = vpop.f32.mrf.mxu1  ;;  %v12253_v11 = vadd.f32 %v12241_v20, %v12153_v55 }
 0x6fb   : > { %v18959_v8 = vpop.f32.mrf.mxu0 }
 0x6fc   : > { %v19001_v59 = vpop.f32.mrf.mxu1  ;;  %v12356_v23 = vadd.f32 %v12344_v33, %v12253_v11 }
 0x6fd   : > { %v12246_v14 = vpop.f32.mrf.mxu0 }
 0x6fe   : > { %v12553_v3 = vpop.f32.mrf.mxu1  ;;  %v12254_v44 = vadd.f32 %v12246_v14, %v12154_v54 }
 0x6ff   : > { %v18962_v21 = vpop.f32.mrf.mxu0 }
 0x700   : > { %v19004_v24 = vpop.f32.mrf.mxu1  ;;  %v12357_v1 = vadd.f32 %v12349_v62, %v12254_v44  ;;  %v12765_v44 = vld [vmem:[%s25537_s10] sm:$0xff] }
 0x701   : > { %v12445_v50 = vpop.f32.mrf.mxu0 }
 0x702   : > { %v12558_v32 = vpop.f32.mrf.mxu1  ;;  %v12469_v57 = vadd.f32 %v12445_v50, %v12353_v19 }
 0x703   : > { %v18984_v18 = vpop.f32.mrf.mxu0 }
 0x704   : > { %v19007_v38 = vpop.f32.mrf.mxu1  ;;  %v12572_v16 = vadd.f32 %v12548_v41, %v12469_v57 }
 0x705   : > { %v12450_v51 = vpop.f32.mrf.mxu0 }
 0x706   : > { %v12563_v7 = vpop.f32.mrf.mxu1  ;;  %v12470_v22 = vadd.f32 %v12450_v51, %v12354_v28 }
 0x707   : > { %v18987_v46 = vpop.f32.mrf.mxu0 }
 0x708   : > { %v19010_v31 = vpop.f32.mrf.mxu1  ;;  %v12573_v52 = vadd.f32 %v12553_v3, %v12470_v22 }
 0x709   : > { %v12455_v4 = vpop.f32.mrf.mxu0 }
 0x70a   : > { %v12568_v45 = vpop.f32.mrf.mxu1  ;;  %v12471_v34 = vadd.f32 %v12455_v4, %v12355_v47 }
 0x70b   : > { %v18990_v29 = vpop.f32.mrf.mxu0 }
 0x70c   : > { %v19013_v5 = vpop.f32.mrf.mxu1  ;;  %v12574_v13 = vadd.f32 %v12558_v32, %v12471_v34 }
 0x70d   : > { %v12460_v43 = vpop.f32.mrf.mxu0 }
 0x70e   : > { %v12472_v35 = vadd.f32 %v12460_v43, %v12356_v23 }
 0x70f   : > { %v18993_v61 = vpop.f32.mrf.mxu0 }
 0x710   : > { %v12575_v59 = vadd.f32 %v12563_v7, %v12472_v35 }
 0x711   : > { %v12465_v10 = vpop.f32.mrf.mxu0 }
 0x712   : > { %v12473_v21 = vadd.f32 %v12465_v10, %v12357_v1 }
 0x713   : > { %v18996_v63 = vpop.f32.mrf.mxu0 }
 0x714   : > { %v12576_v46 = vadd.f32 %v12568_v45, %v12473_v21 }
 0x715   : > { %v12648_v15 = vpop.f32.mrf.mxu0 }
 0x716   : > { %v12672_v42 = vadd.f32 %v12648_v15, %v12572_v16 }
 0x717   : > { %v19018_v37 = vpop.f32.mrf.mxu0 }
 0x718   : > { %v12684_v58 = vadd.f32 %v16385_v17, %v12672_v42 }
 0x719   : > { %v12653_v0 = vpop.f32.mrf.mxu0 }
 0x71a   : > { %v12673_v56 = vadd.f32 %v12653_v0, %v12573_v52  ;;  %v12693_v49 = vrot.slane %v12684_v58, 1 }
 0x71b   : > { %v19021_v25 = vpop.f32.mrf.mxu0 }
 0x71c   : > { %v12685_v48 = vadd.f32 %v16385_v17, %v12673_v56  ;;  %v16401_v25 = vld [vmem:[%s25537_s10 + $0x20] sm:$0xff] }
 0x71d   : > { %v12658_v2 = vpop.f32.mrf.mxu0 }
 0x71e   : > { %v12694_v20 = vrot.slane %v12685_v48, 1  ;;  %v12674_v41 = vadd.f32 %v12658_v2, %v12574_v13 }
 0x71f   : > { %v19024_v8 = vpop.f32.mrf.mxu0 }
 0x720   : > { %v12695_v27 = vsel %vm736_vm2, %v12693_v49, %v12694_v20  ;;  %v12713_v3 = vmax.f32 %v12684_v58, %v12694_v20  ;;  %v12686_v33 = vadd.f32 %v16385_v17, %v12674_v41  ;;  %v16397_v41 = vld [vmem:[%s25537_s10 + $0x18] sm:$0xff] }
 0x721   : > { %v12704_v24 = vmax.f32 %v12684_v58, %v12695_v27  ;;  %v12663_v14 = vpop.f32.mrf.mxu0  ;;  %v16409_v27 = vld [vmem:[%s25537_s10 + $0x30] sm:$0xff] }
 0x722   : > { %v12696_v50 = vrot.slane %v12686_v33, 1  ;;  %v12675_v18 = vadd.f32 %v12663_v14, %v12575_v59  ;;  %v12719_v53 = vrot.slane %v12713_v3, 7 }
 0x723   : > { %v19027_v38 = vpop.f32.mrf.mxu0 }
 0x724   : > { %v12697_v51 = vsel %vm736_vm2, %v12694_v20, %v12696_v50  ;;  %v12687_v32 = vadd.f32 %v16385_v17, %v12675_v18 }
 0x725   : > { %v12705_v62 = vmax.f32 %v12685_v48, %v12697_v51  ;;  %v12668_v6 = vpop.f32.mrf.mxu0  ;;  %v16405_v51 = vld [vmem:[%s25537_s10 + $0x28] sm:$0xff] }
 0x726   : > { %v12698_v31 = vrot.slane %v12687_v32, 1  ;;  %v12676_v4 = vadd.f32 %v12668_v6, %v12576_v46 }
 0x727   : > { %v12720_v7 = vrot.slane %v12705_v62, 7  ;;  %v19030_v29 = vpop.f32.mrf.mxu0 }
 0x728   : > { %v12699_v12 = vsel %vm736_vm2, %v12696_v50, %v12698_v31  ;;  %v12688_v60 = vadd.f32 %v16385_v17, %v12676_v4  ;;  %v12707_v28 = vmax.f32 %v12687_v32, %v12698_v31  ;;  %v16417_v4 = vld [vmem:[%s25537_s10 + $0x40] sm:$0xff] }
 0x729   : > { %v12721_v5 = vsel %vm25539_vm6, %v12719_v53, %v12720_v7  ;;  %v12706_v43 = vmax.f32 %v12686_v33, %v12699_v12 }
 0x72a   : > { %v12730_v39 = vmax.f32 %v12704_v24, %v12721_v5  ;;  %v12709_v19 = vrot.slane %v12688_v60, 1 }
 0x72b   : > { %v12722_v30 = vrot.slane %v12706_v43, 7 }
 0x72c   : > { %vm12734_vm1 = vcmp.gt.f32.partialorder %v12730_v39, 0.0  ;;  %v12738_v61 = vmul.f32 0.01, %v12730_v39  ;;  %v12710_v45 = vsel %vm736_vm2, %v12698_v31, %v12709_v19  ;;  %v12764_v31 = vld [vmem:[#allocation6 + $0x20] sm:$0xf] }
 0x72d   : > { %v12723_v9 = vsel %vm25540_vm11, %v12720_v7, %v12722_v30  ;;  %v12714_v57 = vmax.f32 %v12687_v32, %v12710_v45  ;;  %vm25547_vm11 = vcmask 1043456   ;;  %v13336_v12 = vrot.slane %v12764_v31, 4 }
 0x72e   : > { %v12742_v10 = vsel %vm12734_vm1, %v12730_v39, %v12738_v61  ;;  %v12731_v26 = vmax.f32 %v12705_v62, %v12723_v9  ;;  %v13527_v39 = vrot.slane %v12764_v31, 6 }
 0x72f   : > { %12752 = vst.msk [vmem:[#allocation6 + $0x7] sm:$0xf] %vm12750_vm3, %v12742_v10  ;;  %v12724_v55 = vrot.slane %v12714_v57, 7 }
 0x730   : > { %12754 = vst.msk [vmem:[#allocation6 + $0x6] sm:$0x80] %vm12753_vm14, %v12742_v10  ;;  %vm12735_vm8 = vcmp.gt.f32.partialorder %v12731_v26, 0.0  ;;  %v12739_v63 = vmul.f32 0.01, %v12731_v26  ;;  %vm25546_vm14 = vcmask 1041408  }
 0x731   : > { %v12725_v40 = vsel %vm25541_vm7, %v12722_v30, %v12724_v55  ;;  %v12733_v22 = vmax.f32 %v12707_v28, %v12724_v55  ;;  %v13434_v10 = vrot.slane %v12764_v31, 5  ;;  %v16422_v28 = vld [vmem:[%s24756_s12 + $0x8] sm:$0xff]  ;;  %v16427_v55 = vld [vmem:[%s24756_s12 + $0x10] sm:$0xff] }
 0x732   : > { %v12743_v16 = vsel %vm12735_vm8, %v12731_v26, %v12739_v63  ;;  %v12732_v11 = vmax.f32 %v12706_v43, %v12725_v40  ;;  %vm25548_vm8 = vmmov %vm25546_vm14  ;;  %v16413_v43 = vld [vmem:[%s25537_s10 + $0x38] sm:$0xff]  ;;  %v24414_v63 = vld [vmem:[%s24756_s12] sm:$0xff]  ;;  %s15304_s10 = scalar_lea.hbm %s24764_s20, %s25013_s0 }
 0x733   : > { %12755 = vst.msk [vmem:[#allocation6 + $0xe] sm:$0x7] %vm9258_vm15, %v12743_v16  ;;  %vm12737_vm6 = vcmp.gt.f32.partialorder %v12733_v22, 0.0  ;;  %v12741_v15 = vmul.f32 0.01, %v12733_v22  ;;  %v24420_v40 = vld [vmem:[%s24756_s12 + $0x20] sm:$0xff] }
 0x734   : > { %12756 = vst.msk [vmem:[#allocation6 + $0xd] sm:$0xc0] %vm25542_vm13, %v12743_v16  ;;  %vm12736_vm1 = vcmp.gt.f32.partialorder %v12732_v11, 0.0  ;;  %v12740_v47 = vmul.f32 0.01, %v12732_v11  ;;  %vm25550_vm13 = vmmov %vm25548_vm8 }
 0x735   : > { %v12745_v42 = vsel %vm12737_vm6, %v12733_v22, %v12741_v15 }
 0x736   : > { %v12744_v17 = vsel %vm12736_vm1, %v12732_v11, %v12740_v47  ;;  %12759 = vst.msk [vmem:[#allocation6 + $0x1c] sm:$0x1] %vm9248_vm10, %v12745_v42  ;;  %v24251_v37 = vld [vmem:[#allocation6] sm:$0xff]  ;;  %vm25552_vm1 = vmmov %vm25548_vm8 }
 0x737   : > { %12757 = vst.msk [vmem:[#allocation6 + $0x15] sm:$0x3] %vm10602_vm12, %v12744_v17  ;;  %v12771_v34 = vrot.slane %v24251_v37, 1  ;;  %v12950_v23 = vrot.slane %v24251_v37, 2  ;;  %v13145_v20 = vrot.slane %v24251_v37, 7  ;;  %v13047_v18 = vrot.slane %v24251_v37, 6 }
 0x738   : > { %12758 = vst.msk [vmem:[#allocation6 + $0x14] sm:$0xe0] %vm10604_vm5, %v12744_v17  ;;  %vm25543_vm5 = vmmov %vm25541_vm7 }
 0x739   : > { %vm25544_vm12 = vmmov %vm25543_vm5 }
 0x73a   : > { %v24253_v54 = vld [vmem:[#allocation6 + $0x8] sm:$0xff]  ;;  %vm25545_vm3 = vmmov %vm25543_vm5 }
 0x73b   : > { %v12772_v52 = vrot.slane %v24253_v54, 1  ;;  %v12951_v0 = vrot.slane %v24253_v54, 2  ;;  %v13146_v49 = vrot.slane %v24253_v54, 7  ;;  %v13048_v14 = vrot.slane %v24253_v54, 6  ;;  %vm25549_vm7 = vmmov %vm25547_vm11 }
 0x73c   : > { %v13331_v38 = vrot.slane %v24253_v54, 4  ;;  %vm25551_vm6 = vmmov %vm25549_vm7  ;;  %v13429_v61 = vrot.slane %v24253_v54, 5 }
 0x73d   : > { %v12773_v58 = vsel %vm736_vm2, %v12771_v34, %v12772_v52  ;;  %v12952_v56 = vsel %vm1099_vm4, %v12950_v23, %v12951_v0  ;;  %v13147_v8 = vsel %vm25543_vm5, %v13145_v20, %v13146_v49  ;;  %v13049_v32 = vsel %vm25546_vm14, %v13047_v18, %v13048_v14  ;;  %vm25557_vm14 = vmmov %vm25552_vm1 }
 0x73e   : > { %19034 = vmatmul.mubr.msk.f32.vlgmr.msra.gmra.mxu1 %vm9237_vm9, %v12773_v58  ;;  %19056 = vmatmul.mubr.msk.f32.vlgmr.msra.gmra.mxu0 %vm9237_vm9, %v12952_v56  ;;  %v24266_v35 = vld [vmem:[#allocation6 + $0x10] sm:$0xff]  ;;  %vm25553_vm5 = vcmask 1042432  }
 0x73f   : > { %19043 = vmatpush3.msra.mxu1 %v12765_v44  ;;  %19036 = vmatprep.mubr.msk.f32.mxu1 %vm19445_vm0, %v25525_v36  ;;  %v12774_v48 = vrot.slane %v24266_v35, 1  ;;  %v12953_v13 = vrot.slane %v24266_v35, 2  ;;  %v13148_v59 = vrot.slane %v24266_v35, 7  ;;  %v24303_v21 = vld [vmem:[#allocation6 + $0x18] sm:$0xff]  ;;  %v13332_v50 = vrot.slane %v24266_v35, 4 }
 0x740   : > { %19058 = vmatprep.mubr.msk.f32.mxu0 %vm19445_vm0, %v25525_v36  ;;  %19064 = vmatprep.subr.mxu1 %v25525_v36  ;;  %v13150_v33 = vrot.slane %v24303_v21, 7  ;;  %v13050_v62 = vrot.slane %v24266_v35, 6  ;;  %v13334_v6 = vrot.slane %v24303_v21, 4  ;;  %v13052_v29 = vrot.slane %v24303_v21, 6 }
 0x741   : > { %v12775_v2 = vsel %vm736_vm2, %v12772_v52, %v12774_v48  ;;  %v12954_v1 = vsel %vm1099_vm4, %v12951_v0, %v12953_v13  ;;  %19076 = vmatpush3.msra.mxu0 %v16401_v25  ;;  %v13149_v3 = vsel %vm25544_vm12, %v13146_v49, %v13148_v59  ;;  %v13333_v46 = vsel %vm25547_vm11, %v13331_v38, %v13332_v50  ;;  %vm25554_vm12 = vmmov %vm25553_vm5 }
 0x742   : > { %19037 = vmatmul.mubr.msk.f32.gmra.mxu1 %vm9237_vm9, %v12775_v2  ;;  %19059 = vmatmul.mubr.msk.f32.gmra.mxu0 %vm9237_vm9, %v12954_v1  ;;  %v13151_v24 = vsel %vm25545_vm3, %v13148_v59, %v13150_v33  ;;  %v13051_v53 = vsel %vm25548_vm8, %v13048_v14, %v13050_v62  ;;  %v13335_v7 = vsel %vm25549_vm7, %v13332_v50, %v13334_v6  ;;  %v13430_v30 = vrot.slane %v24266_v35, 5  ;;  %vm25555_vm3 = vmmov %vm25553_vm5 }
 0x743   : > { %19039 = vmatprep.mubr.msk.f32.mxu1 %vm19445_vm0, %v25525_v36  ;;  %19061 = vmatprep.mubr.msk.f32.mxu0 %vm19445_vm0, %v25525_v36  ;;  %v13053_v60 = vsel %vm25550_vm13, %v13050_v62, %v13052_v29  ;;  %v13337_v5 = vsel %vm25551_vm6, %v13334_v6, %v13336_v12  ;;  %v13528_v19 = vsel %vm25552_vm1, %v13052_v29, %v13527_v39  ;;  %v13432_v9 = vrot.slane %v24303_v21, 5  ;;  %vm25558_vm11 = vmmov %vm25552_vm1 }
 0x744   : > { %19097 = vmatprep.subr.mxu0 %v25525_v36  ;;  %v13431_v45 = vsel %vm25553_vm5, %v13429_v61, %v13430_v30  ;;  %vm13665_vm8 = vcmask 63492   ;;  %vm25559_vm6 = vcmask 64518  }
 0x745   : > { %v13433_v57 = vsel %vm25554_vm12, %v13430_v30, %v13432_v9  ;;  %v13435_v26 = vsel %vm25555_vm3, %v13432_v9, %v13434_v10  ;;  %vm25565_vm12 = vcmask 1043456  }
 0x746   : > { %19040 = vmatmul.mubr.msk.f32.gmra.mxu1 %vm9237_vm9, %v12774_v48  ;;  %19062 = vmatmul.mubr.msk.f32.gmra.mxu0 %vm9237_vm9, %v12953_v13 }
 0x747   : > { %19044 = vmatprep.mubr.msk.f32.mxu1 %vm19445_vm0, %v25525_v36  ;;  %19077 = vmatprep.mubr.msk.f32.mxu0 %vm19445_vm0, %v25525_v36 }
 0x74a   : > { %19045 = vmatmul.mubr.msk.f32.vlgmr.msra.gmra.mxu1 %vm9237_vm9, %v24251_v37  ;;  %19078 = vmatmul.mubr.msk.f32.vlgmr.msra.gmra.mxu0 %vm9237_vm9, %v13147_v8 }
 0x74b   : > { %19065 = vmatpush3.msra.mxu1 %v16397_v41  ;;  %19047 = vmatprep.mubr.msk.f32.mxu1 %vm19445_vm0, %v25525_v36 }
 0x74c   : > { %19080 = vmatprep.mubr.msk.f32.mxu0 %vm19445_vm0, %v25525_v36  ;;  %19086 = vmatprep.subr.mxu1 %v25525_v36 }
 0x74d   : > { %19098 = vmatpush3.msra.mxu0 %v16409_v27 }
 0x74e   : > { %19048 = vmatmul.mubr.msk.f32.gmra.mxu1 %vm9237_vm9, %v24253_v54  ;;  %19081 = vmatmul.mubr.msk.f32.gmra.mxu0 %vm9237_vm9, %v13149_v3 }
 0x74f   : > { %19050 = vmatprep.mubr.msk.f32.mxu1 %vm19445_vm0, %v25525_v36  ;;  %19083 = vmatprep.mubr.msk.f32.mxu0 %vm19445_vm0, %v25525_v36 }
 0x750   : > { %19119 = vmatprep.subr.mxu0 %v25525_v36 }
 0x752   : > { %19051 = vmatmul.mubr.msk.f32.gmra.mxu1 %vm9237_vm9, %v24266_v35  ;;  %19084 = vmatmul.mubr.msk.f32.gmra.mxu0 %vm9237_vm9, %v13151_v24 }
 0x753   : > { %19066 = vmatprep.mubr.msk.f32.mxu1 %vm19445_vm0, %v25525_v36  ;;  %19099 = vmatprep.mubr.msk.f32.mxu0 %vm19445_vm0, %v25525_v36 }
 0x756   : > { %19067 = vmatmul.mubr.msk.f32.vlgmr.msra.gmra.mxu1 %vm9237_vm9, %v13049_v32  ;;  %19100 = vmatmul.mubr.msk.f32.vlgmr.msra.gmra.mxu0 %vm9237_vm9, %v13333_v46 }
 0x757   : > { %19087 = vmatpush3.msra.mxu1 %v16405_v51  ;;  %19069 = vmatprep.mubr.msk.f32.mxu1 %vm19445_vm0, %v25525_v36 }
 0x758   : > { %19102 = vmatprep.mubr.msk.f32.mxu0 %vm19445_vm0, %v25525_v36  ;;  %19108 = vmatprep.subr.mxu1 %v25525_v36 }
 0x759   : > { %19120 = vmatpush3.msra.mxu0 %v16417_v4 }
 0x75a   : > { %19070 = vmatmul.mubr.msk.f32.gmra.mxu1 %vm9237_vm9, %v13051_v53  ;;  %19103 = vmatmul.mubr.msk.f32.gmra.mxu0 %vm9237_vm9, %v13335_v7 }
 0x75b   : > { %19072 = vmatprep.mubr.msk.f32.mxu1 %vm19445_vm0, %v25525_v36  ;;  %19105 = vmatprep.mubr.msk.f32.mxu0 %vm19445_vm0, %v25525_v36 }
 0x75c   : > { %19140 = vmatprep.subr.mxu0 %v16427_v55 }
 0x75e   : > { %19073 = vmatmul.mubr.msk.f32.gmra.mxu1 %vm9237_vm9, %v13053_v60  ;;  %19106 = vmatmul.mubr.msk.f32.gmra.mxu0 %vm9237_vm9, %v13337_v5 }
 0x75f   : > { %19088 = vmatprep.mubr.msk.f32.mxu1 %vm19445_vm0, %v25525_v36  ;;  %19121 = vmatprep.mubr.msk.f32.mxu0 %vm19445_vm0, %v25525_v36 }
 0x762   : > { %19089 = vmatmul.mubr.msk.f32.vlgmr.msra.gmra.mxu1 %vm9237_vm9, %v24253_v54  ;;  %19122 = vmatmul.mubr.msk.f32.vlgmr.msra.gmra.mxu0 %vm9237_vm9, %v13051_v53 }
 0x763   : > { %19109 = vmatpush3.msra.mxu1 %v16413_v43  ;;  %19091 = vmatprep.mubr.msk.f32.mxu1 %vm19445_vm0, %v25525_v36 }
 0x764   : > { %19124 = vmatprep.mubr.msk.f32.mxu0 %vm19445_vm0, %v25525_v36  ;;  %19130 = vmatprep.subr.mxu1 %v16422_v28 }
 0x765   : > { %19141 = vmatpush3.msra.mxu0 %v16427_v55 }
 0x766   : > { %19092 = vmatmul.mubr.msk.f32.gmra.mxu1 %vm9237_vm9, %v24266_v35  ;;  %19125 = vmatmul.mubr.msk.f32.gmra.mxu0 %vm9237_vm9, %v13053_v60 }
 0x767   : > { %19094 = vmatprep.mubr.msk.f32.mxu1 %vm19445_vm0, %v25525_v36  ;;  %19127 = vmatprep.mubr.msk.f32.mxu0 %vm19445_vm0, %v25525_v36 }
 0x768   : > { %19150 = vmatprep.subr.mxu0 %v24420_v40 }
 0x76a   : > { %19095 = vmatmul.mubr.msk.f32.gmra.mxu1 %vm9237_vm9, %v24303_v21  ;;  %19128 = vmatmul.mubr.msk.f32.gmra.mxu0 %vm9237_vm9, %v13528_v19 }
 0x76b   : > { %19110 = vmatprep.mubr.msk.f32.mxu1 %vm19445_vm0, %v25525_v36 }
 0x76e   : > { %19111 = vmatmul.mubr.msk.f32.vlgmr.msra.gmra.mxu1 %vm9237_vm9, %v13431_v45 }
 0x76f   : > { %19113 = vmatprep.mubr.msk.f32.mxu1 %vm19445_vm0, %v25525_v36  ;;  %19131 = vmatpush3.msra.mxu1 %v16422_v28 }
 0x770   : > { %19135 = vmatprep.subr.mxu1 %v24414_v63 }
 0x772   : > { %19114 = vmatmul.mubr.msk.f32.gmra.mxu1 %vm9237_vm9, %v13433_v57 }
 0x773   : > { %19116 = vmatprep.mubr.msk.f32.mxu1 %vm19445_vm0, %v25525_v36 }
 0x776   : > { %19117 = vmatmul.mubr.msk.f32.gmra.mxu1 %vm9237_vm9, %v13435_v26 }
 0x7fe   : > { %v12848_v22 = vpop.f32.mrf.mxu1  ;;  %v13027_v16 = vpop.f32.mrf.mxu0 }
 0x800   : > { %v19035_v11 = vpop.f32.mrf.mxu1  ;;  %v19057_v15 = vpop.f32.mrf.mxu0 }
 0x802   : > { %v12853_v47 = vpop.f32.mrf.mxu1  ;;  %v13032_v42 = vpop.f32.mrf.mxu0 }
 0x804   : > { %v19038_v17 = vpop.f32.mrf.mxu1  ;;  %v19060_v37 = vpop.f32.mrf.mxu0 }
 0x806   : > { %v12858_v54 = vpop.f32.mrf.mxu1  ;;  %v13037_v34 = vpop.f32.mrf.mxu0 }
 0x808   : > { %v19041_v52 = vpop.f32.mrf.mxu1  ;;  %v19063_v23 = vpop.f32.mrf.mxu0 }
 0x80a   : > { %v12934_v0 = vpop.f32.mrf.mxu1  ;;  %v13224_v44 = vpop.f32.mrf.mxu0 }
 0x80b   : > { %v12935_v14 = vadd.f32 %v12934_v0, %v12848_v22 }
 0x80c   : > { %v19046_v58 = vpop.f32.mrf.mxu1  ;;  %v19079_v56 = vpop.f32.mrf.mxu0 }
 0x80d   : > { %v13041_v46 = vadd.f32 %v13027_v16, %v12935_v14 }
 0x80e   : > { %v12939_v35 = vpop.f32.mrf.mxu1  ;;  %v13229_v25 = vpop.f32.mrf.mxu0 }
 0x80f   : > { %v12940_v32 = vadd.f32 %v12939_v35, %v12853_v47 }
 0x810   : > { %v19049_v48 = vpop.f32.mrf.mxu1  ;;  %v19082_v13 = vpop.f32.mrf.mxu0 }
 0x811   : > { %v13042_v29 = vadd.f32 %v13032_v42, %v12940_v32 }
 0x812   : > { %v12944_v2 = vpop.f32.mrf.mxu1  ;;  %v13234_v1 = vpop.f32.mrf.mxu0 }
 0x813   : > { %v12945_v7 = vadd.f32 %v12944_v2, %v12858_v54  ;;  %v16421_v54 = vld [vmem:[%s25556_s11] ss:$0 sm:$0xff] }
 0x814   : > { %v19052_v49 = vpop.f32.mrf.mxu1  ;;  %v19085_v20 = vpop.f32.mrf.mxu0 }
 0x815   : > { %v13043_v30 = vadd.f32 %v13037_v34, %v12945_v7 }
 0x816   : > { %v13126_v41 = vpop.f32.mrf.mxu1  ;;  %v13410_v8 = vpop.f32.mrf.mxu0 }
 0x817   : > { %v13140_v31 = vadd.f32 %v13126_v41, %v13041_v46 }
 0x818   : > { %v19068_v59 = vpop.f32.mrf.mxu1  ;;  %v19101_v21 = vpop.f32.mrf.mxu0 }
 0x819   : > { %v13238_v43 = vadd.f32 %v13224_v44, %v13140_v31 }
 0x81a   : > { %v13131_v27 = vpop.f32.mrf.mxu1  ;;  %v13415_v3 = vpop.f32.mrf.mxu0 }
 0x81b   : > { %v13141_v5 = vadd.f32 %v13131_v27, %v13042_v29 }
 0x81c   : > { %v19071_v33 = vpop.f32.mrf.mxu1  ;;  %v19104_v24 = vpop.f32.mrf.mxu0 }
 0x81d   : > { %v13239_v10 = vadd.f32 %v13229_v25, %v13141_v5 }
 0x81e   : > { %v13136_v50 = vpop.f32.mrf.mxu1  ;;  %v13420_v18 = vpop.f32.mrf.mxu0 }
 0x81f   : > { %v13142_v57 = vadd.f32 %v13136_v50, %v13043_v30  ;;  %v16430_v30 = vld [vmem:[%s24756_s12 + $0x18] sm:$0xff] }
 0x820   : > { %v19074_v38 = vpop.f32.mrf.mxu1  ;;  %v19107_v51 = vpop.f32.mrf.mxu0 }
 0x821   : > { %v13240_v11 = vadd.f32 %v13234_v1, %v13142_v57 }
 0x822   : > { %v13311_v62 = vpop.f32.mrf.mxu1  ;;  %v13597_v6 = vpop.f32.mrf.mxu0 }
 0x823   : > { %v13325_v61 = vadd.f32 %v13311_v62, %v13238_v43 }
 0x824   : > { %v19090_v4 = vpop.f32.mrf.mxu1  ;;  %v19123_v53 = vpop.f32.mrf.mxu0 }
 0x825   : > { %v13424_v22 = vadd.f32 %v13410_v8, %v13325_v61 }
 0x826   : > { %v13316_v12 = vpop.f32.mrf.mxu1  ;;  %v13602_v60 = vpop.f32.mrf.mxu0 }
 0x827   : > { %v13326_v55 = vadd.f32 %v13316_v12, %v13239_v10 }
 0x828   : > { %v19093_v39 = vpop.f32.mrf.mxu1  ;;  %v19126_v19 = vpop.f32.mrf.mxu0 }
 0x829   : > { %v13425_v37 = vadd.f32 %v13415_v3, %v13326_v55 }
 0x82a   : > { %v13321_v45 = vpop.f32.mrf.mxu1  ;;  %v13607_v9 = vpop.f32.mrf.mxu0 }
 0x82b   : > { %v13327_v42 = vadd.f32 %v13321_v45, %v13240_v11  ;;  %v13670_v11 = vld [vmem:[#allocation7 + $0x18] sm:$0x1] }
 0x82c   : > { %v19096_v26 = vpop.f32.mrf.mxu1  ;;  %v19129_v28 = vpop.f32.mrf.mxu0 }
 0x82d   : > { %v13426_v58 = vadd.f32 %v13420_v18, %v13327_v42  ;;  %v16439_v28 = vld [vmem:[%s24756_s12 + $0x30] sm:$0xff] }
 0x82e   : > { %v13508_v16 = vpop.f32.mrf.mxu1 }
 0x82f   : > { %v13522_v15 = vadd.f32 %v13508_v16, %v13424_v22  ;;  %v16436_v22 = vld [vmem:[%s24756_s12 + $0x28] sm:$0xff] }
 0x830   : > { %v19112_v47 = vpop.f32.mrf.mxu1 }
 0x831   : > { %v13611_v17 = vadd.f32 %v13597_v6, %v13522_v15 }
 0x832   : > { %v13513_v34 = vpop.f32.mrf.mxu1 }
 0x833   : > { %v13523_v52 = vadd.f32 %v13513_v34, %v13425_v37  ;;  %v13621_v0 = vadd.f32 %v16421_v54, %v13611_v17  ;;  %v16445_v37 = vld [vmem:[%s24756_s12 + $0x40] sm:$0xff]  ;;  %v14365_v34 = vrot.slane %v13670_v11, 4 }
 0x834   : > { %v19115_v23 = vpop.f32.mrf.mxu1 }
 0x835   : > { %v13612_v44 = vadd.f32 %v13602_v60, %v13523_v52  ;;  %v13626_v13 = vrot.slane %v13621_v0, 1  ;;  %v16442_v23 = vld [vmem:[%s24756_s12 + $0x38] sm:$0xff] }
 0x836   : > { %v13518_v56 = vpop.f32.mrf.mxu1 }
 0x837   : > { %v13622_v35 = vadd.f32 %v16421_v54, %v13612_v44  ;;  %v13524_v25 = vadd.f32 %v13518_v56, %v13426_v58 }
 0x838   : > { %v19118_v48 = vpop.f32.mrf.mxu1 }
 0x839   : > { %v13627_v2 = vrot.slane %v13622_v35, 1  ;;  %v13613_v1 = vadd.f32 %v13607_v9, %v13524_v25  ;;  %v14480_v48 = vld [vmem:[%s24758_s14 + $0x8] sm:$0xff] }
 0x83b   : > { %v13628_v49 = vsel %vm736_vm2, %v13626_v13, %v13627_v2  ;;  %v13623_v20 = vadd.f32 %v16421_v54, %v13613_v1  ;;  %v13632_v14 = vmax.f32 %v13622_v35, %v13627_v2  ;;  %v14479_v13 = vld [vmem:[%s24758_s14] sm:$0xff]  ;;  %v16450_v1 = vld [vmem:[%s24758_s14 + $0x10] sm:$0xff] }
 0x83c   : > { %v13631_v8 = vmax.f32 %v13621_v0, %v13628_v49 }
 0x83d   : > { %v13634_v41 = vrot.slane %v13623_v20, 1 }
 0x83e   : > { %v13643_v33 = vrot.slane %v13631_v8, 6 }
 0x83f   : > { %v13635_v59 = vsel %vm736_vm2, %v13627_v2, %v13634_v41  ;;  %v13639_v21 = vmax.f32 %v13623_v20, %v13634_v41  ;;  %v16451_v2 = vld [vmem:[%s24758_s14 + $0x18] sm:$0xff] }
 0x840   : > { %v13638_v27 = vmax.f32 %v13622_v35, %v13635_v59 }
 0x841   : > { %v13646_v3 = vrot.slane %v13639_v21, 6 }
 0x842   : > { %v13644_v24 = vrot.slane %v13638_v27, 6 }
 0x844   : > { %v13645_v50 = vsel %vm25557_vm14, %v13643_v33, %v13644_v24  ;;  %v13647_v18 = vsel %vm25558_vm11, %v13644_v24, %v13646_v3  ;;  %vm25567_vm14 = vmmov %vm25565_vm12  ;;  %vm25568_vm11 = vcmask 1044480  }
 0x845   : > { %v13650_v38 = vmax.f32 %v13631_v8, %v13645_v50  ;;  %v13651_v51 = vmax.f32 %v13632_v14, %v13647_v18 }
 0x847   : > { %vm13652_vm7 = vcmp.gt.f32.partialorder %v13650_v38, 0.0  ;;  %vm13653_vm13 = vcmp.gt.f32.partialorder %v13651_v51, 0.0  ;;  %v13654_v32 = vmul.f32 0.01, %v13650_v38  ;;  %v13655_v46 = vmul.f32 0.01, %v13651_v51 }
 0x849   : > { %v13656_v62 = vsel %vm13652_vm7, %v13650_v38, %v13654_v32  ;;  %v13657_v6 = vsel %vm13653_vm13, %v13651_v51, %v13655_v46  ;;  %vm14481_vm7 = vcmask 130048  }
 0x84a   : > { %13662 = vst.msk [vmem:[#allocation7 + $0x6] sm:$0x7] %vm9258_vm15, %v13656_v62  ;;  %vm25561_vm15 = vmmov %vm25552_vm1 }
 0x84b   : > { %13663 = vst.msk [vmem:[#allocation7 + $0x5] sm:$0xc0] %vm25559_vm6, %v13656_v62 }
 0x84c   : > { %13664 = vst.msk [vmem:[#allocation7 + $0xd] sm:$0x1] %vm9248_vm10, %v13657_v6  ;;  %vm25560_vm10 = vmmov %vm25552_vm1 }
 0x84d   : > { %13666 = vst.msk [vmem:[#allocation7 + $0xc] sm:$0x70] %vm13665_vm8, %v13657_v6  ;;  %vm25562_vm1 = vmmov %vm25555_vm3 }
 0x84e   : > { %vm25563_vm5 = vmmov %vm25562_vm1 }
 0x851   : > { %v13667_v31 = vld [vmem:[#allocation7] sm:$0xff] }
 0x852   : > { %v13676_v53 = vrot.slane %v13667_v31, 1  ;;  %v13839_v29 = vrot.slane %v13667_v31, 2  ;;  %v14014_v5 = vrot.slane %v13667_v31, 6  ;;  %v13926_v45 = vrot.slane %v13667_v31, 5 }
 0x853   : > { %v24433_v4 = vld [vmem:[#allocation7 + $0x8] sm:$0xff] }
 0x854   : > { %v13677_v7 = vrot.slane %v24433_v4, 1  ;;  %v13840_v12 = vrot.slane %v24433_v4, 2  ;;  %v24437_v60 = vld [vmem:[#allocation7 + $0x10] sm:$0xff]  ;;  %v14015_v43 = vrot.slane %v24433_v4, 6  ;;  %v13927_v9 = vrot.slane %v24433_v4, 5 }
 0x855   : > { %v14017_v61 = vrot.slane %v24437_v60, 6  ;;  %v14190_v10 = vrot.slane %v24437_v60, 2  ;;  %v13929_v55 = vrot.slane %v24437_v60, 5  ;;  %v14103_v16 = vrot.slane %v24433_v4, 7 }
 0x856   : > { %v13678_v39 = vsel %vm736_vm2, %v13676_v53, %v13677_v7  ;;  %v13841_v19 = vsel %vm1099_vm4, %v13839_v29, %v13840_v12  ;;  %v14016_v57 = vsel %vm25560_vm10, %v14014_v5, %v14015_v43  ;;  %v14362_v47 = vrot.slane %v24433_v4, 4 }
 0x857   : > { %19132 = vmatprep.mubr.msk.f32.mxu1 %vm9237_vm9, %v13678_v39  ;;  %19142 = vmatprep.mubr.msk.f32.mxu0 %vm9237_vm9, %v13841_v19  ;;  %v14018_v26 = vsel %vm25561_vm15, %v14015_v43, %v14017_v61  ;;  %v14191_v15 = vsel %vm1099_vm4, %v13840_v12, %v14190_v10  ;;  %v14363_v42 = vrot.slane %v24437_v60, 4  ;;  %v13930_v17 = vsel %vm25563_vm5, %v13927_v9, %v13929_v55  ;;  %v16448_v19 = vld [vmem:[%s24757_s13] ss:$0 sm:$0xff] }
 0x858   : > { %19133 = vmatmul.mubr.msk.f32.vlgmr.msra.gmra.mxu1 %vm9237_vm9, %v13677_v7  ;;  %19143 = vmatmul.mubr.msk.f32.vlgmr.msra.gmra.mxu0 %vm9237_vm9, %v13840_v12  ;;  %v14105_v54 = vrot.slane %v24437_v60, 7  ;;  %vm25564_vm4 = vcmask 1040384   ;;  %v14275_v0 = vrot.slane %v24433_v4, 3  ;;  %v14276_v44 = vrot.slane %v24437_v60, 3 }
 0x859   : > { %19136 = vmatpush3.msra.mxu1 %v24414_v63  ;;  %19137 = vmatprep.mubr.msk.f32.mxu1 %vm9237_vm9, %v13667_v31  ;;  %v13928_v63 = vsel %vm25562_vm1, %v13926_v45, %v13927_v9  ;;  %v14364_v58 = vsel %vm25565_vm12, %v14362_v47, %v14363_v42  ;;  %vm25566_vm3 = vmmov %vm25564_vm4  ;;  %v14366_v35 = vsel %vm25567_vm14, %v14363_v42, %v14365_v34 }
 0x85a   : > { %19152 = vmatprep.mubr.msk.f32.mxu0 %vm9237_vm9, %v14016_v57  ;;  %19145 = vmatprep.subr.mxu1 %v16430_v30  ;;  %v14106_v56 = vsel %vm25566_vm3, %v14103_v16, %v14105_v54  ;;  %v14277_v25 = vsel %vm25568_vm11, %v14275_v0, %v14276_v44 }
 0x85b   : > { %19151 = vmatpush3.msra.mxu0 %v24420_v40  ;;  %v14102_v40 = vrot.slane %v13667_v31, 7 }
 0x85c   : > { %19138 = vmatmul.mubr.msk.f32.vlgmr.msra.gmra.mxu1 %vm9237_vm9, %v24433_v4  ;;  %19153 = vmatmul.mubr.msk.f32.vlgmr.msra.gmra.mxu0 %vm9237_vm9, %v14018_v26 }
 0x85d   : > { %19146 = vmatpush3.msra.mxu1 %v16430_v30  ;;  %19147 = vmatprep.mubr.msk.f32.mxu1 %vm9237_vm9, %v13928_v63  ;;  %v14104_v52 = vsel %vm25564_vm4, %v14102_v40, %v14103_v16 }
 0x85e   : > { %19162 = vmatprep.mubr.msk.f32.mxu0 %vm9237_vm9, %v14191_v15  ;;  %19160 = vmatprep.subr.mxu0 %v16439_v28 }
 0x85f   : > { %19155 = vmatprep.subr.mxu1 %v16436_v22  ;;  %19161 = vmatpush3.msra.mxu0 %v16439_v28 }
 0x860   : > { %19148 = vmatmul.mubr.msk.f32.vlgmr.msra.gmra.mxu1 %vm9237_vm9, %v13930_v17  ;;  %19163 = vmatmul.mubr.msk.f32.vlgmr.msra.gmra.mxu0 %vm9237_vm9, %v14190_v10 }
 0x861   : > { %19156 = vmatpush3.msra.mxu1 %v16436_v22  ;;  %19157 = vmatprep.mubr.msk.f32.mxu1 %vm9237_vm9, %v14104_v52  ;;  %v16453_v52 = vld [vmem:[%s24758_s14 + $0x20] sm:$0xff] }
 0x862   : > { %19172 = vmatprep.mubr.msk.f32.mxu0 %vm9237_vm9, %v14364_v58  ;;  %19170 = vmatprep.subr.mxu0 %v16445_v37 }
 0x863   : > { %19165 = vmatprep.subr.mxu1 %v16442_v23  ;;  %19171 = vmatpush3.msra.mxu0 %v16445_v37  ;;  %v16454_v37 = vld [vmem:[%s24758_s14 + $0x28] sm:$0xff] }
 0x864   : > { %19158 = vmatmul.mubr.msk.f32.vlgmr.msra.gmra.mxu1 %vm9237_vm9, %v14106_v56  ;;  %19173 = vmatmul.mubr.msk.f32.vlgmr.msra.gmra.mxu0 %vm9237_vm9, %v14366_v35  ;;  %v14798_v56 = vld [vmem:[%s24761_s17 + $0x18] sm:$0xff]  ;;  %v14797_v35 = vld [vmem:[%s24761_s17 + $0x10] sm:$0xff] }
 0x865   : > { %19166 = vmatpush3.msra.mxu1 %v16442_v23  ;;  %19167 = vmatprep.mubr.msk.f32.mxu1 %vm9237_vm9, %v14277_v25  ;;  %v16457_v23 = vld [vmem:[%s24758_s14 + $0x38] sm:$0xff] }
 0x866   : > { %19175 = vmatprep.subr.mxu1 %v25525_v36  ;;  %19182 = vmatprep.subr.mxu0 %v25525_v36  ;;  %v14794_v25 = vld [vmem:[%s24760_s16 + $0x18] sm:$0xff] }
 0x867   : > { %19186 = vmatprep.mubr.msk.f32.mxu0 %vm19445_vm0, %v25525_v36  ;;  %19183 = vmatpush3.msra.mxu0 %v16451_v2  ;;  %v14795_v2 = vld [vmem:[%s24761_s17] sm:$0xff] }
 0x868   : > { %19168 = vmatmul.mubr.msk.f32.vlgmr.msra.gmra.mxu1 %vm9237_vm9, %v14276_v44  ;;  %19184 = vmatprep.subr.mxu0 %v25525_v36  ;;  %vm25569_vm9 = vmmov %vm25562_vm1  ;;  %v16456_v44 = vld [vmem:[%s24758_s14 + $0x30] sm:$0xff] }
 0x869   : > { %19179 = vmatprep.mubr.msk.f32.mxu1 %vm19445_vm0, %v25525_v36  ;;  %19176 = vmatpush3.msra.mxu1 %v14480_v48  ;;  %v14796_v48 = vld [vmem:[%s24761_s17 + $0x8] sm:$0xff] }
 0x86a   : > { %19177 = vmatprep.subr.mxu1 %v25525_v36  ;;  %19185 = vmatpush3.msra.mxu0 %v16450_v1  ;;  %v14792_v1 = vld [vmem:[%s24760_s16 + $0x8] sm:$0xff] }
 0x86b   : > { %19178 = vmatpush3.msra.mxu1 %v14479_v13  ;;  %19196 = vmatprep.subr.mxu0 %v25525_v36  ;;  %v14793_v13 = vld [vmem:[%s24760_s16 + $0x10] sm:$0xff] }
 0x86c   : > { %19189 = vmatprep.subr.mxu1 %v25525_v36 }
 0x918   : > { %v19134_v49 = vpop.f32.mrf.mxu1  ;;  %v19144_v20 = vpop.f32.mrf.mxu0 }
 0x91a   : > { %v13749_v41 = vpop.f32.mrf.mxu1  ;;  %v13912_v8 = vpop.f32.mrf.mxu0 }
 0x91c   : > { %v19139_v59 = vpop.f32.mrf.mxu1  ;;  %v19154_v21 = vpop.f32.mrf.mxu0 }
 0x91d   : > { %v13834_v27 = vadd.f32 %v19139_v59, %v19134_v49  ;;  %v24583_v49 = vld [vmem:[%s650_s8] sm:$0x1]  ;;  %v16466_v59 = vld [vmem:[%s24761_s17 + $0x28] sm:$0xff] }
 0x91e   : > { %v13828_v3 = vpop.f32.mrf.mxu1  ;;  %v14089_v33 = vpop.f32.mrf.mxu0 }
 0x91f   : > { %v13829_v24 = vadd.f32 %v13828_v3, %v13749_v41  ;;  %v13922_v14 = vadd.f32 %v19144_v20, %v13834_v27  ;;  %v14791_v20 = vld [vmem:[%s24760_s16] sm:$0xff]  ;;  %v16468_v41 = vld [vmem:[%s24761_s17 + $0x38] sm:$0xff] }
 0x920   : > { %v19149_v50 = vpop.f32.mrf.mxu1  ;;  %v19164_v18 = vpop.f32.mrf.mxu0  ;;  %v14478_v27 = vld [vmem:[%s24759_s15] sm:$0x1] }
 0x921   : > { %v14011_v38 = vadd.f32 %v19149_v50, %v13922_v14  ;;  %v13921_v51 = vadd.f32 %v13912_v8, %v13829_v24  ;;  %v16467_v8 = vld [vmem:[%s24761_s17 + $0x30] sm:$0xff] }
 0x922   : > { %v14001_v32 = vpop.f32.mrf.mxu1  ;;  %v14262_v6 = vpop.f32.mrf.mxu0 }
 0x923   : > { %v14010_v46 = vadd.f32 %v14001_v32, %v13921_v51  ;;  %v14099_v62 = vadd.f32 %v19154_v21, %v14011_v38  ;;  %v16465_v21 = vld [vmem:[%s24761_s17 + $0x20] sm:$0xff] }
 0x924   : > { %v19159_v31 = vpop.f32.mrf.mxu1  ;;  %v19174_v60 = vpop.f32.mrf.mxu0 }
 0x925   : > { %v14187_v4 = vadd.f32 %v19159_v31, %v14099_v62  ;;  %v14098_v53 = vadd.f32 %v14089_v33, %v14010_v46 }
 0x926   : > { %v14177_v7 = vpop.f32.mrf.mxu1  ;;  %v14437_v9 = vpop.f32.mrf.mxu0 }
 0x927   : > { %v14186_v29 = vadd.f32 %v14177_v7, %v14098_v53  ;;  %v14272_v12 = vadd.f32 %v19164_v18, %v14187_v4  ;;  %v16464_v4 = vld [vmem:[%s24760_s16 + $0x38] sm:$0xff]  ;;  %v16463_v7 = vld [vmem:[%s24760_s16 + $0x30] sm:$0xff] }
 0x928   : > { %v19169_v5 = vpop.f32.mrf.mxu1 }
 0x929   : > { %v14358_v43 = vadd.f32 %v19169_v5, %v14272_v12  ;;  %v14271_v39 = vadd.f32 %v14262_v6, %v14186_v29  ;;  %v16462_v29 = vld [vmem:[%s24760_s16 + $0x28] sm:$0xff]  ;;  %v16461_v12 = vld [vmem:[%s24760_s16 + $0x20] sm:$0xff]  ;;  %v16474_v5 = vld [vmem:[%s24760_s16 + $0x50] sm:$0xff] }
 0x92a   : > { %v14348_v30 = vpop.f32.mrf.mxu1 }
 0x92b   : > { %v14447_v61 = vadd.f32 %v19174_v60, %v14358_v43  ;;  %v14357_v45 = vadd.f32 %v14348_v30, %v14271_v39  ;;  %v16475_v60 = vld [vmem:[%s24760_s16 + $0x58] sm:$0xff]  ;;  %v16473_v43 = vld [vmem:[%s24760_s16 + $0x48] sm:$0xff]  ;;  %v16472_v39 = vld [vmem:[%s24760_s16 + $0x40] sm:$0xff] }
 0x92d   : > { %v14456_v57 = vadd.f32 %v16448_v19, %v14447_v61  ;;  %v14446_v10 = vadd.f32 %v14437_v9, %v14357_v45  ;;  %v16479_v9 = vld [vmem:[%s24761_s17 + $0x58] sm:$0xff] }
 0x92f   : > { %v14462_v26 = vrot.slane %v14456_v57, 1  ;;  %v14455_v28 = vadd.f32 %v16448_v19, %v14446_v10  ;;  %v16477_v10 = vld [vmem:[%s24761_s17 + $0x48] sm:$0xff] }
 0x931   : > { %v14458_v55 = vrot.slane %v14455_v28, 1  ;;  %v14467_v63 = vmax.f32 %v14456_v57, %v14462_v26  ;;  %v16478_v57 = vld [vmem:[%s24761_s17 + $0x50] sm:$0xff] }
 0x933   : > { %v14463_v22 = vsel %vm736_vm2, %v14458_v55, %v14462_v26  ;;  %v14471_v16 = vrot.slane %v14467_v63, 5  ;;  %v14460_v15 = vmax.f32 %v14455_v28, %v14458_v55  ;;  %vm14799_vm2 = vcmask 261120   ;;  %v16476_v26 = vld [vmem:[%s24761_s17 + $0x40] sm:$0xff] }
 0x934   : > { %v14466_v40 = vmax.f32 %v14455_v28, %v14463_v22  ;;  %v14946_v55 = vld [vmem:[%s24762_s18] sm:$0x1] }
 0x936   : > { %v14470_v11 = vrot.slane %v14466_v40, 5 }
 0x938   : > { %v14472_v47 = vsel %vm25569_vm9, %v14470_v11, %v14471_v16 }
 0x939   : > { %v14474_v42 = vmax.f32 %v14460_v15, %v14472_v47  ;;  %v16471_v47 = vld [vmem:[%s24762_s18 + $0x1] sm:$0x1] }
 0x93b   : > { %vm14475_vm8 = vcmp.gt.f32.partialorder %v14474_v42, 0.0  ;;  %v14476_v17 = vmul.f32 0.01, %v14474_v42 }
 0x93d   : > { %v14477_v54 = vsel %vm14475_vm8, %v14474_v42, %v14476_v17 }
 0x93e   : > { %19180 = vmatmul.mubr.msk.f32.vlgmr.msra.gmra.mxu1 %vm14481_vm7, %v14477_v54  ;;  %v14559_v34 = vrot.slane %v14477_v54, 1  ;;  %v14636_v0 = vrot.slane %v14477_v54, 5  ;;  %v14713_v58 = vrot.slane %v14477_v54, 6 }
 0x93f   : > { %19190 = vmatpush3.msra.mxu1 %v16454_v37  ;;  %19193 = vmatprep.mubr.msk.f32.mxu1 %vm19445_vm0, %v25525_v36 }
 0x940   : > { %19191 = vmatprep.subr.mxu1 %v25525_v36  ;;  %19187 = vmatmul.mubr.msk.f32.vlgmr.msra.gmra.mxu0 %vm14481_vm7, %v14559_v34 }
 0x941   : > { %19192 = vmatpush3.msra.mxu1 %v16453_v52  ;;  %19197 = vmatpush3.msra.mxu0 %v16457_v23 }
 0x942   : > { %19198 = vmatprep.subr.mxu0 %v25525_v36  ;;  %19194 = vmatmul.mubr.msk.f32.vlgmr.msra.gmra.mxu1 %vm14481_vm7, %v14636_v0 }
 0x943   : > { %19199 = vmatpush3.msra.mxu0 %v16456_v44  ;;  %19200 = vmatprep.mubr.msk.f32.mxu0 %vm19445_vm0, %v25525_v36 }
 0x944   : > { %19201 = vmatmul.mubr.msk.f32.vlgmr.msra.gmra.mxu0 %vm14481_vm7, %v14713_v58  ;;  %19203 = vmatprep.subr.mxu1 %v25525_v36 }
 0x945   : > { %19214 = vmatprep.subr.mxu0 %v25525_v36  ;;  %19211 = vmatprep.mubr.msk.f32.mxu1 %vm19445_vm0, %v25525_v36 }
 0x946   : > { %19222 = vmatprep.mubr.msk.f32.mxu0 %vm19445_vm0, %v25525_v36  ;;  %19204 = vmatpush3.msra.mxu1 %v14798_v56 }
 0x947   : > { %19205 = vmatprep.subr.mxu1 %v25525_v36  ;;  %19215 = vmatpush3.msra.mxu0 %v14794_v25 }
 0x948   : > { %19206 = vmatpush3.msra.mxu1 %v14797_v35  ;;  %19216 = vmatprep.subr.mxu0 %v25525_v36 }
 0x949   : > { %19207 = vmatprep.subr.mxu1 %v25525_v36  ;;  %19217 = vmatpush3.msra.mxu0 %v14793_v13 }
 0x94a   : > { %19208 = vmatpush3.msra.mxu1 %v14796_v48  ;;  %19218 = vmatprep.subr.mxu0 %v25525_v36 }
 0x94b   : > { %19209 = vmatprep.subr.mxu1 %v25525_v36  ;;  %19219 = vmatpush3.msra.mxu0 %v14792_v1 }
 0x94c   : > { %19210 = vmatpush3.msra.mxu1 %v14795_v2  ;;  %19220 = vmatprep.subr.mxu0 %v25525_v36 }
 0x94d   : > { %19225 = vmatprep.subr.mxu1 %v25525_v36  ;;  %19212 = vmatmul.mubr.msk.f32.vlgmr.msra.gmra.mxu1 %vm14799_vm2, %v24583_v49 }
 0x94e   : > { %19221 = vmatpush3.msra.mxu0 %v14791_v20  ;;  %19226 = vmatpush3.msra.mxu1 %v16468_v41 }
 0x94f   : > { %19236 = vmatprep.subr.mxu0 %v25525_v36  ;;  %19227 = vmatprep.subr.mxu1 %v25525_v36 }
 0x950   : > { %19233 = vmatprep.mubr.msk.f32.mxu1 %vm19445_vm0, %v25525_v36  ;;  %19228 = vmatpush3.msra.mxu1 %v16467_v8 }
 0x951   : > { %19229 = vmatprep.subr.mxu1 %v25525_v36 }
 0x952   : > { %19230 = vmatpush3.msra.mxu1 %v16466_v59 }
 0x953   : > { %19231 = vmatprep.subr.mxu1 %v25525_v36 }
 0x954   : > { %19232 = vmatpush3.msra.mxu1 %v16465_v21 }
 0x955   : > { %19234 = vmatmul.mubr.msk.f32.vlgmr.msra.gmra.mxu1 %vm14799_vm2, %v24583_v49  ;;  %19247 = vmatprep.subr.mxu1 %v25525_v36 }
 0x956   : > { %19255 = vmatprep.mubr.msk.f32.mxu1 %vm19445_vm0, %v25525_v36  ;;  %19248 = vmatpush3.msra.mxu1 %v16479_v9 }
 0x957   : > { %19249 = vmatprep.subr.mxu1 %v25525_v36 }
 0x958   : > { %19250 = vmatpush3.msra.mxu1 %v16478_v57 }
 0x959   : > { %19251 = vmatprep.subr.mxu1 %v25525_v36 }
 0x95a   : > { %19252 = vmatpush3.msra.mxu1 %v16477_v10 }
 0x95b   : > { %19253 = vmatprep.subr.mxu1 %v25525_v36 }
 0x95c   : > { %19254 = vmatpush3.msra.mxu1 %v16476_v26 }
 0x9fe   : > { %v14551_v3 = vpop.f32.mrf.mxu1 }
 0x9ff   : > { %v14555_v33 = vadd.f32 %v14551_v3, %v14478_v27 }
 0xa00   : > { %v19181_v24 = vpop.f32.mrf.mxu1  ;;  %v14628_v14 = vpop.f32.mrf.mxu0 }
 0xa01   : > { %v14632_v50 = vadd.f32 %v14628_v14, %v14555_v33 }
 0xa02   : > { %v19188_v18 = vpop.f32.mrf.mxu0  ;;  %v14705_v38 = vpop.f32.mrf.mxu1 }
 0xa03   : > { %v14709_v51 = vadd.f32 %v14705_v38, %v14632_v50 }
 0xa04   : > { %v19195_v32 = vpop.f32.mrf.mxu1  ;;  %v14782_v46 = vpop.f32.mrf.mxu0 }
 0xa05   : > { %v14786_v62 = vadd.f32 %v14782_v46, %v14709_v51 }
 0xa06   : > { %v19202_v6 = vpop.f32.mrf.mxu0 }
 0xa07   : > { %vm14787_vm13 = vcmp.gt.f32.partialorder %v14786_v62, 0.0  ;;  %v14788_v31 = vmul.f32 0.01, %v14786_v62 }
 0xa09   : > { %v14789_v53 = vsel %vm14787_vm13, %v14786_v62, %v14788_v31 }
 0xa0a   : > { %19223 = vmatmul.mubr.msk.f32.vlgmr.msra.gmra.mxu0 %vm14799_vm2, %v14789_v53 }
 0xa0b   : > { %19237 = vmatpush3.msra.mxu0 %v16464_v4  ;;  %19244 = vmatprep.mubr.msk.f32.mxu0 %vm19445_vm0, %v25525_v36 }
 0xa0c   : > { %19238 = vmatprep.subr.mxu0 %v25525_v36 }
 0xa0d   : > { %19239 = vmatpush3.msra.mxu0 %v16463_v7  ;;  %v14869_v19 = vpop.f32.mrf.mxu1 }
 0xa0e   : > { %19240 = vmatprep.subr.mxu0 %v25525_v36 }
 0xa0f   : > { %19241 = vmatpush3.msra.mxu0 %v16462_v29  ;;  %v19213_v30 = vpop.f32.mrf.mxu1 }
 0xa10   : > { %19242 = vmatprep.subr.mxu0 %v25525_v36 }
 0xa11   : > { %19243 = vmatpush3.msra.mxu0 %v16461_v12 }
 0xa12   : > { %19245 = vmatmul.mubr.msk.f32.vlgmr.msra.gmra.mxu0 %vm14799_vm2, %v14789_v53  ;;  %19258 = vmatprep.subr.mxu0 %v25525_v36 }
 0xa13   : > { %19259 = vmatpush3.msra.mxu0 %v16475_v60  ;;  %19266 = vmatprep.mubr.msk.f32.mxu0 %vm19445_vm0, %v25525_v36  ;;  %vm15273_vm0 = vcmask 253952  }
 0xa14   : > { %19260 = vmatprep.subr.mxu0 %v25525_v36 }
 0xa15   : > { %19261 = vmatpush3.msra.mxu0 %v16474_v5  ;;  %v15029_v61 = vpop.f32.mrf.mxu1 }
 0xa16   : > { %19262 = vmatprep.subr.mxu0 %v25525_v36 }
 0xa17   : > { %19263 = vmatpush3.msra.mxu0 %v16473_v43  ;;  %v19235_v45 = vpop.f32.mrf.mxu1 }
 0xa18   : > { %19264 = vmatprep.subr.mxu0 %v25525_v36 }
 0xa19   : > { %19265 = vmatpush3.msra.mxu0 %v16472_v39 }
 0xa1a   : > { %19267 = vmatmul.mubr.msk.f32.vlgmr.msra.gmra.mxu0 %vm14799_vm2, %v14789_v53 }
 0xaca   : > { %v14942_v28 = vpop.f32.mrf.mxu0 }
 0xacb   : > { %v14943_v63 = vadd.f32 %v14942_v28, %v14869_v19 }
 0xacc   : > { %v19224_v22 = vpop.f32.mrf.mxu0 }
 0xacd   : > { %v14947_v40 = vadd.f32 %v14946_v55, %v14943_v63 }
 0xacf   : > { %v14948_v16 = vsub.f32 0.0, %v14947_v40 }
 0xad1   : > { %v14949_v11 = vmul.f32 1.442695, %v14948_v16 }
 0xad2   : > { %v15099_v15 = vpop.f32.mrf.mxu0 }
 0xad3   : > { %19315 = vpow2.f32 %v14949_v11  ;;  %v15100_v42 = vadd.f32 %v15099_v15, %v15029_v61 }
 0xad4   : > { %v19246_v36 = vpop.f32.mrf.mxu0 }
 0xad5   : > { %v15105_v17 = vadd.f32 %v16471_v47, %v15100_v42 }
 0xad7   : > { %v15106_v37 = vsub.f32 0.0, %v15105_v17 }
 0xad9   : > { %v15107_v54 = vmul.f32 1.442695, %v15106_v37 }
 0xada   : > { %v15261_v34 = vpop.f32.mrf.mxu0 }
 0xadb   : > { %19317 = vpow2.f32 %v15107_v54 }
 0xadc   : > { %v19268_v52 = vpop.f32.mrf.mxu0 }
 0xae0   : > { %v19316_v23 = vpop.eup %19315 }
 0xae1   : > { %v14951_v0 = vadd.f32 1.0, %v19316_v23 }
 0xae3   : > { %19319 = vrcp.f32 %v14951_v0 }
 0xae8   : > { %v19318_v44 = vpop.eup %19317 }
 0xae9   : > { %v15109_v58 = vadd.f32 1.0, %v19318_v44 }
 0xaeb   : > { %19321 = vrcp.f32 %v15109_v58 }
 0xaf0   : > { %v19320_v56 = vpop.eup %19319 }
 0xaf1   : > { %15275 = vst.msk [vmem:[%s642_s7] sm:$0x1] %vm15273_vm0, %v19320_v56 }
 0xaf8   : > { %v19322_v35 = vpop.eup %19321 }
 0xaf9   : > { %v15116_v25 = vmul.f32 %v19322_v35, %v24583_v49 }
 0xafb   : > { %19256 = vmatmul.mubr.msk.f32.vlgmr.msra.gmra.mxu1 %vm14799_vm2, %v15116_v25 }
 0xafc   : > { %19365 = shalt.err (!%p19362_p3)
}
 0xafd   : > { %s19366_s28 = scalar_lea.hbm %s15304_s10, 16  ;;  %s19370_s9 = scalar_lea.hbm %s24764_s20, 32 }
 0xafe   : > { %p19367_p4 = scmp.ne.s32.totalorder %s15304_s10, %s19366_s28  ;;  %p19371_p9 = scmp.lt.s32.totalorder %s15304_s10, %s24764_s20 }
 0xaff   : > { %p19372_p10 = scmp.lt.s32.totalorder %s19370_s9, %s19366_s28 }
 0xb00   : > { %p19368_p7 = pnand %p19367_p4, %p19591_p5 }
 0xb01   : > { %p19373_p11 = por %p19372_p10, %p19371_p9 }
 0xb02   : > { %p19369_p8 = pneg %p19368_p7 }
 0xb04   : > { %p19374_p12 = pnand %p19373_p11, %p19369_p8 }
 0xb06   : > { %19377 = shalt.err (!%p19374_p12)
}
 0xb07   : > { %19270 = dma.vmem_to_hbm [thread:$0]  (%p19591_p5), %s15307_s30, 16, %s15304_s10, %s15281_s26   ;;  %v16482_v13 = vld [vmem:[%s24762_s18 + $0x2] sm:$0x1]  ;;  %v15270_v41 = vsub.f32 1.0, %v19320_v56  ;;  %v15269_v59 = vmul.f32 %v19320_v56, %v24583_v49 }
 0xb08   : > { %s636_s11 = scalar_lea.vmem [#allocation8], %s24678_s3  ;;  %s25571_s10 = sshll.u32 %s19574_s2, 4 }
 0xb09   : > { %s15293_s0 = sshll.u32 %s636_s11, 4  ;;  %s15291_s27 = scalar_lea.hbm %s24763_s19, %s25571_s10  ;;  %s15294_s0 = int_to_ptr.vmem [resolvable:$true] %s15293_s0 }
 0xb0a   : > { %s15277_s23 = scalar_lea.sflag [#allocation9], %s24678_s3  ;;  %s19378_s28 = scalar_lea.vmem %s15294_s0, 16 }
 0xb0b   : > { %p19379_p13 = scmp.ne.s32.totalorder %s15294_s0, %s19378_s28  ;;  %s19447_s7 = smov [#allocation8]  }
 0xb0c   : > { %s19382_s8 = sshll.u32 %s19447_s7, 4  ;;  %s19383_s8 = int_to_ptr.vmem [resolvable:$false] %s19382_s8 }
 0xb0d   : > { %p19380_p0 = pnand %p19379_p13, %p19591_p5  ;;  %s19384_s9 = scalar_lea.vmem %s19383_s8, 32 }
 0xb0e   : > { %p19385_p2 = scmp.lt.s32.totalorder %s15294_s0, %s19383_s8  ;;  %p19386_p3 = scmp.lt.s32.totalorder %s19384_s9, %s19378_s28 }
 0xb0f   : > { %p19381_p1 = pneg %p19380_p0 }
 0xb10   : > { %p19387_p4 = por %p19386_p3, %p19385_p2 }
 0xb12   : > { %p19388_p7 = pnand %p19387_p4, %p19381_p1 }
 0xbbb   : > { %v15191_v48 = vpop.f32.mrf.mxu1 }
 0xbbc   : > { %v15262_v2 = vadd.f32 %v15261_v34, %v15191_v48 }
 0xbbd   : > { %v19257_v1 = vpop.f32.mrf.mxu1 }
 0xbbe   : > { %v15267_v20 = vadd.f32 %v16482_v13, %v15262_v2 }
 0xbc0   : > { %19323 = vtanh.f32 %v15267_v20 }
 0xbcd   : > { %v19324_v8 = vpop.eup %19323 }
 0xbce   : > { %v15271_v21 = vmul.f32 %v19324_v8, %v15270_v41 }
 0xbd0   : > { %v15272_v27 = vadd.f32 %v15271_v21, %v15269_v59 }
 0xbd2   : > { %15274 = vst.msk [vmem:[%s636_s11] sm:$0x1] %vm15273_vm0, %v15272_v27 }
 0xbd3   : > { %19391 = shalt.err (!%p19388_p7)
}
 0xbd4   : > { %s19392_s2 = scalar_lea.hbm %s15291_s27, 16  ;;  %s19396_s6 = scalar_lea.hbm %s24763_s19, 32 }
 0xbd5   : > { %p19393_p8 = scmp.ne.s32.totalorder %s15291_s27, %s19392_s2  ;;  %p19397_p11 = scmp.lt.s32.totalorder %s15291_s27, %s24763_s19 }
 0xbd6   : > { %p19398_p12 = scmp.lt.s32.totalorder %s19396_s6, %s19392_s2 }
 0xbd7   : > { %p19394_p9 = pnand %p19393_p8, %p19591_p5 }
 0xbd8   : > { %p19399_p13 = por %p19398_p12, %p19397_p11 }
 0xbd9   : > { %p19395_p10 = pneg %p19394_p9 }
 0xbdb   : > { %p19400_p0 = pnand %p19399_p13, %p19395_p10 }
 0xbdd   : > { %19403 = shalt.err (!%p19400_p0)
}
 0xbde   : > { %19269 = dma.vmem_to_hbm [thread:$0]  (%p19591_p5), %s15294_s0, 16, %s15291_s27, %s15277_s23  }
 0xbdf PF: > { %p19280_p1 = scmp.ge.s32.totalorder %s19442_s24, 2  ;;  %s15318_s30 = sand.u32 1, %s19430_s1  }
 0xbe0   : > { %s15319_s26 = scalar_lea.sflag [#allocation9], %s15318_s30 }
 0xbe1   : > { %p19274_p2 = pnand %p19280_p1, %p19595_p6 }
 0xbe3   : > { %p19275_p3 = pneg %p19274_p2 }
 0xbe5   : > { %19421 = dma.done.wait (%p19275_p3), %s15319_s26, 16  }
 0xbe6   : > { %19423 = vsyncadd (%p19275_p3), %s15319_s26, 4294967280  ;;  %s15327_s28 = scalar_lea.sflag [#allocation11], %s15318_s30 }
 0xbe7   : > { %19425 = dma.done.wait (%p19275_p3), %s15327_s28, 16  }
 0xbe8   : > { %19427 = vsyncadd (%p19275_p3), %s15327_s28, 4294967280  ;;  %s25572_s24 = sld [smem:[#allocation15_spill]]  ;;  %s25575_s1 = smov %s19434_s22 }
 0xbe9   : > { %s25573_s7 = sld [smem:[#allocation14_spill]] }
 0xbea   : > { %s25574_s23 = sld [smem:[#allocation16_spill]] }
 0xbee   : > { %p34_p5 = scmp.ge.s32.totalorder %s25572_s24, 4  }
 0xbef   : > { %s25576_s22 = smov %s25573_s7 }
 0xbf0   :  { %36 = sbr.rel (!%p34_p5) target bundleno = 18 (0x12), region = 248 }
 0xbf5   :  { %15331 = vsyncpa [#allocation9], 1 }
 0xbf6   :  { %15333 = vsyncpa [#allocation9 + $0x1], 1 }
 0xbf7   :  { %15334 = vsyncpa [#allocation11], 1 }
 0xbf8   :  { %15336 = vsyncpa [#allocation11 + $0x1], 1 }

</bundles_post_ra>
